<compile_context>
chip_gen: v7x
topology: tpu7x:2x2x1
jax: 0.10.0
libtpu: 0.0.40
codegen_flags: <defaults>
</compile_context>

<pallas_src>
import functools

import jax
import jax.numpy as jnp
from jax import lax
from jax.experimental import pallas as pl
from jax.experimental.pallas import tpu as pltpu


def _leaky_relu(x, slope=0.01):
    return jnp.where(x > 0, x, slope * x)


def dec_kernel(H, V, T,
               # scalar prefetch (SMEM)
               tokens_ref, tf_ref,
               # inputs (VMEM, full resident blocks)
               embeds_ref,          # (V, 1, E)  raw embedding table (row lookup)
               embnT_ref,           # (E, V)     row-normalized embeddings, transposed
               h0_ref,              # (1, 4H)    [l0_fwd | l0_bwd | l1_fwd | l1_bwd]
               wih0_ref, bih0_ref,  # (E, 6H), (1, 6H)   fused layer-0 input weights
               wih1_ref, bih1_ref,  # (2H, 6H), (1, 6H)  fused layer-1 input weights
               whh_ref, bhh_ref,    # (4H, 12H) block-diagonal, (1, 12H)
               wq_ref, bq_ref, v_ref,    # attention: (2H,H), (1,H), (1,H)
               pkeys_ref, enc_ref,       # (S, H), (S, 2H)
               wpre_ref, bpre_ref,       # (2H, H), (1, H)
               wout_ref, bout_ref,       # (2H, E), (1, E)
               # outputs
               out_ref,     # (T, 1, E)
               pre_ref,     # (T, 1, H)
               alpha_ref,   # (T, 1, S)
               hid_ref,     # (1, 4H)
               # scratch
               tok_scr):    # SMEM (1,), carried current token id
    H3 = 3 * H

    def gates(gi, gh, hp):
        # PyTorch GRUCell semantics, gate order (r, z, n).
        r = jax.nn.sigmoid(gi[:, :H] + gh[:, :H])
        z = jax.nn.sigmoid(gi[:, H:2 * H] + gh[:, H:2 * H])
        n = jnp.tanh(gi[:, 2 * H:] + r * gh[:, 2 * H:])
        return (1.0 - z) * n + z * hp

    tok_scr[0] = tokens_ref[0]
    h = h0_ref[...]                                     # (1, 4H), carried in vregs

    # Fully unrolled decode loop (single kernel invocation, static indices).
    for i in range(T):
        tok = tok_scr[0]

        # --- embedding lookup (dropout = identity) ---------------------------
        embedded = embeds_ref[tok]                      # (1, E)

        # --- fused 2-layer bidirectional GRU, one timestep --------------------
        gh = jnp.dot(h, whh_ref[...],
                     preferred_element_type=jnp.float32) + bhh_ref[...]     # (1, 12H)
        gi0 = jnp.dot(embedded, wih0_ref[...],
                      preferred_element_type=jnp.float32) + bih0_ref[...]   # (1, 6H)
        nf0 = gates(gi0[:, :H3], gh[:, :H3], h[:, :H])
        nb0 = gates(gi0[:, H3:], gh[:, H3:2 * H3], h[:, H:2 * H])
        l0_out = jnp.concatenate([nf0, nb0], axis=1)                        # (1, 2H)
        gi1 = jnp.dot(l0_out, wih1_ref[...],
                      preferred_element_type=jnp.float32) + bih1_ref[...]   # (1, 6H)
        nf1 = gates(gi1[:, :H3], gh[:, 2 * H3:3 * H3], h[:, 2 * H:3 * H])
        nb1 = gates(gi1[:, H3:], gh[:, 3 * H3:], h[:, 3 * H:])
        gru_out = jnp.concatenate([nf1, nb1], axis=1)                       # (1, 2H)
        h = jnp.concatenate([nf0, nb0, nf1, nb1], axis=1)                   # (1, 4H)

        # --- additive attention (row-form, lane-dense) ------------------------
        query = jnp.dot(gru_out, wq_ref[...],
                        preferred_element_type=jnp.float32) + bq_ref[...]   # (1, H)
        energy = jnp.tanh(pkeys_ref[...] + query)                           # (S, H)
        scores = jnp.dot(v_ref[...], energy.T,
                         preferred_element_type=jnp.float32)                # (1, S)
        m = jnp.max(scores, axis=-1, keepdims=True)
        e = jnp.exp(scores - m)
        denom = jnp.sum(e, axis=-1, keepdims=True)                          # (1, 1)
        alphas = e * pl.reciprocal(denom, approx=True)                      # (1, S)
        context = jnp.dot(alphas, enc_ref[...],
                          preferred_element_type=jnp.float32)               # (1, 2H)

        # --- output path (dropout = identity; double leaky-relu is in spec) ---
        out_a = _leaky_relu(_leaky_relu(context))
        pre_output = _leaky_relu(
            jnp.dot(out_a, wpre_ref[...],
                    preferred_element_type=jnp.float32) + bpre_ref[...])    # (1, H)
        out_final = jnp.dot(out_a, wout_ref[...],
                            preferred_element_type=jnp.float32) + bout_ref[...]  # (1, E)

        out_ref[i] = out_final
        pre_ref[i] = pre_output
        alpha_ref[i] = alphas

        # --- next token: teacher forcing vs cosine-similarity argmax ----------
        use_gt = tf_ref[i]

        @pl.when(use_gt == 1)
        def _():
            tok_scr[0] = tokens_ref[i + 1]

        @pl.when(use_gt == 0)
        def _():
            # argmax_j cos(out_final, embeds[j]): ||out_final|| is a positive
            # scalar so it drops out of the argmax; embedding-row norms were
            # folded into embnT in the wrapper.
            sc = jnp.dot(out_final, embnT_ref[...],
                         preferred_element_type=jnp.float32)                # (1, V)
            smax = jnp.max(sc, axis=-1, keepdims=True)
            lane = lax.broadcasted_iota(jnp.int32, sc.shape, 1)
            best = jnp.min(jnp.where(sc >= smax, lane, V)).astype(jnp.int32)
            tok_scr[0] = best

    hid_ref[...] = h


def _full_spec(shape):
    zeros = (0,) * len(shape)
    return pl.BlockSpec(shape, lambda i, toks, tfm: zeros)


def dec_forward(tokens, tf_mask, embeds, h0, projected_keys, encoder_outputs, params):
    V, E = embeds.shape
    n4, H = h0.shape
    assert n4 == 4
    S = projected_keys.shape[0]
    T = int(tokens.shape[0]) - 1

    (gru_ws, wq, bq, v, wpre, bpre, wout, bout) = params
    (wih_f0, whh_f0, bih_f0, bhh_f0,
     wih_b0, whh_b0, bih_b0, bhh_b0,
     wih_f1, whh_f1, bih_f1, bhh_f1,
     wih_b1, whh_b1, bih_b1, bhh_b1) = gru_ws

    # ---- one-time GRU weight fusion (outside the kernel) ---------------------
    wih0 = jnp.concatenate([wih_f0, wih_b0], axis=1)                 # (E, 6H)
    bih0 = jnp.concatenate([bih_f0, bih_b0], axis=1)                 # (1, 6H)
    wih1 = jnp.concatenate([wih_f1, wih_b1], axis=1)                 # (2H, 6H)
    bih1 = jnp.concatenate([bih_f1, bih_b1], axis=1)                 # (1, 6H)
    whh_bd = jnp.zeros((4 * H, 12 * H), jnp.float32)                 # block-diagonal
    for d, w in enumerate((whh_f0, whh_b0, whh_f1, whh_b1)):
        whh_bd = whh_bd.at[d * H:(d + 1) * H, d * 3 * H:(d + 1) * 3 * H].set(w)
    bhh_all = jnp.concatenate([bhh_f0, bhh_b0, bhh_f1, bhh_b1], axis=1)   # (1, 12H)

    # ---- embedding tables -----------------------------------------------------
    embeds3 = embeds.reshape(V, 1, E)                                # dynamic row lookup
    e_norm = jnp.sqrt(jnp.sum(embeds * embeds, axis=1, keepdims=True))
    embnT = (embeds / jnp.maximum(e_norm, 1e-8)).T                   # (E, V), norms folded

    h0_row = h0.reshape(1, 4 * H)                                    # [f0 | b0 | f1 | b1]

    in_arrays = [embeds3, embnT, h0_row,
                 wih0, bih0, wih1, bih1, whh_bd, bhh_all,
                 wq, bq, v, projected_keys, encoder_outputs,
                 wpre, bpre, wout, bout]
    in_specs = [_full_spec(a.shape) for a in in_arrays]

    out_shape = (
        jax.ShapeDtypeStruct((T, 1, E), jnp.float32),    # per-step outlayer outputs
        jax.ShapeDtypeStruct((T, 1, H), jnp.float32),    # pre_outputs
        jax.ShapeDtypeStruct((T, 1, S), jnp.float32),    # alphas (lane-dense rows)
        jax.ShapeDtypeStruct((1, 4 * H), jnp.float32),   # final hidden
    )
    out_specs = (
        pl.BlockSpec((T, 1, E), lambda i, toks, tfm: (0, 0, 0)),
        pl.BlockSpec((T, 1, H), lambda i, toks, tfm: (0, 0, 0)),
        pl.BlockSpec((T, 1, S), lambda i, toks, tfm: (0, 0, 0)),
        pl.BlockSpec((1, 4 * H), lambda i, toks, tfm: (0, 0)),
    )

    grid_spec = pltpu.PrefetchScalarGridSpec(
        num_scalar_prefetch=2,
        grid=(1,),                       # single invocation; full decode loop in-kernel
        in_specs=in_specs,
        out_specs=out_specs,
        scratch_shapes=[pltpu.SMEM((1,), jnp.int32)],    # carried current token id
    )

    kernel = functools.partial(dec_kernel, H, V, T)
    outs, pre_outs, alphas, hidden = pl.pallas_call(
        kernel,
        grid_spec=grid_spec,
        out_shape=out_shape,
        compiler_params=pltpu.CompilerParams(
            dimension_semantics=("arbitrary",)),
    )(tokens, tf_mask, *in_arrays)

    # Match torch conventions: outputs cat along dim=1 -> (1, T, E), etc.
    outputs = outs.reshape(1, T, E)
    pre_outputs = pre_outs.reshape(1, T, H)
    alphas_out = alphas.reshape(T, S)
    hidden_out = hidden.reshape(4, 1, H)
    return outputs, pre_outputs, alphas_out, hidden_out


def init_params(key, H, E):
    """Deterministic synthetic parameter init (shapes from the module's __init__)."""
    scale = 0.1
    keys = iter(jax.random.split(key, 64))

    def rnd(shape):
        return (scale * jax.random.normal(next(keys), shape)).astype(jnp.float32)

    gru_ws = []
    for layer in range(2):                     # n_layers = 2
        in_size = E if layer == 0 else 2 * H   # bidirectional -> layer 1 input 2H
        for _direction in range(2):            # fwd, bwd
            gru_ws += [
                rnd((in_size, 3 * H)),   # w_ih (pre-transposed)
                rnd((H, 3 * H)),         # w_hh (pre-transposed)
                rnd((1, 3 * H)),         # b_ih
                rnd((1, 3 * H)),         # b_hh
            ]

    wq = rnd((2 * H, H))        # attention query projection (2H -> H)
    bq = rnd((1, H))
    v = rnd((1, H))             # attention energy vector
    wpre = rnd((2 * H, H))      # pre_output_layer: Linear(context_size=2H, H)
    bpre = rnd((1, H))
    wout = rnd((2 * H, E))      # outputlayer: Linear(2H, embed_size)
    bout = rnd((1, E))
    return (gru_ws, wq, bq, v, wpre, bpre, wout, bout)


if __name__ == "__main__":
    H = 32      # hidden_size
    E = 16      # embed_size
    V = 12      # vocabulary size (len(embeddings))
    S = 16      # encoder sequence length
    L = 8       # decoder input token sequence length -> T = 7 steps
    teacher_forcing = 0.4

    key = jax.random.PRNGKey(0)
    k_emb, k_tok, k_tf, k_h0, k_pk, k_eo, k_par = jax.random.split(key, 7)

    embeds = jax.random.normal(k_emb, (V, E), dtype=jnp.float32)
    tokens = jax.random.randint(k_tok, (L,), 0, V, dtype=jnp.int32)
    # 1 -> use ground-truth token (rand < teacher_forcing), 0 -> use cos-sim argmax
    tf_mask = (jax.random.uniform(k_tf, (L - 1,)) < teacher_forcing).astype(jnp.int32)
    h0 = jax.random.normal(k_h0, (4, H), dtype=jnp.float32)                  # (n_layers*2, H)
    projected_keys = jax.random.normal(k_pk, (S, H), dtype=jnp.float32)
    encoder_outputs = jax.random.normal(k_eo, (S, 2 * H), dtype=jnp.float32)

    params = init_params(k_par, H, E)

    outputs, pre_outputs, alphas, hidden = dec_forward(
        tokens, tf_mask, embeds, h0, projected_keys, encoder_outputs, params)
    jax.block_until_ready((outputs, pre_outputs, alphas, hidden))

    assert outputs.shape == (1, L - 1, E)
    assert pre_outputs.shape == (1, L - 1, H)
    assert alphas.shape == (L - 1, S)
    assert hidden.shape == (4, 1, H)
    print("KERNEL_OK")
</pallas_src>

<mosaic_0001>
module attributes {stable_mosaic.version = 11 : i64} {
  func.func @dec_kernel(%arg0: i32, %arg1: memref<8xi32, #tpu.memory_space<smem>>, %arg2: memref<7xi32, #tpu.memory_space<smem>>, %arg3: memref<12x1x16xf32, #tpu.memory_space<vmem>>, %arg4: memref<16x12xf32, #tpu.memory_space<vmem>>, %arg5: memref<1x128xf32, #tpu.memory_space<vmem>>, %arg6: memref<16x192xf32, #tpu.memory_space<vmem>>, %arg7: memref<1x192xf32, #tpu.memory_space<vmem>>, %arg8: memref<64x192xf32, #tpu.memory_space<vmem>>, %arg9: memref<1x192xf32, #tpu.memory_space<vmem>>, %arg10: memref<128x384xf32, #tpu.memory_space<vmem>>, %arg11: memref<1x384xf32, #tpu.memory_space<vmem>>, %arg12: memref<64x32xf32, #tpu.memory_space<vmem>>, %arg13: memref<1x32xf32, #tpu.memory_space<vmem>>, %arg14: memref<1x32xf32, #tpu.memory_space<vmem>>, %arg15: memref<16x32xf32, #tpu.memory_space<vmem>>, %arg16: memref<16x64xf32, #tpu.memory_space<vmem>>, %arg17: memref<64x32xf32, #tpu.memory_space<vmem>>, %arg18: memref<1x32xf32, #tpu.memory_space<vmem>>, %arg19: memref<64x16xf32, #tpu.memory_space<vmem>>, %arg20: memref<1x16xf32, #tpu.memory_space<vmem>>, %arg21: memref<7x1x16xf32, #tpu.memory_space<vmem>>, %arg22: memref<7x1x32xf32, #tpu.memory_space<vmem>>, %arg23: memref<7x1x16xf32, #tpu.memory_space<vmem>>, %arg24: memref<1x128xf32, #tpu.memory_space<vmem>>, %arg25: memref<1xi32, #tpu.memory_space<smem>>) attributes {dimension_semantics = [#tpu.dimension_semantics<arbitrary>], iteration_bounds = array<i64: 1>, scalar_prefetch = 2 : i64, scratch_operands = 1 : i64, tpu.core_type = #tpu.core_type<tc>, window_params = [{pipeline_mode = #tpu.pipeline_mode<synchronous>, transform_indices = @transform_0, window_bounds = array<i64: 12, 1, 16>}, {pipeline_mode = #tpu.pipeline_mode<synchronous>, transform_indices = @transform_1, window_bounds = array<i64: 16, 12>}, {pipeline_mode = #tpu.pipeline_mode<synchronous>, transform_indices = @transform_2, window_bounds = array<i64: 1, 128>}, {pipeline_mode = #tpu.pipeline_mode<synchronous>, transform_indices = @transform_3, window_bounds = array<i64: 16, 192>}, {pipeline_mode = #tpu.pipeline_mode<synchronous>, transform_indices = @transform_4, window_bounds = array<i64: 1, 192>}, {pipeline_mode = #tpu.pipeline_mode<synchronous>, transform_indices = @transform_5, window_bounds = array<i64: 64, 192>}, {pipeline_mode = #tpu.pipeline_mode<synchronous>, transform_indices = @transform_6, window_bounds = array<i64: 1, 192>}, {pipeline_mode = #tpu.pipeline_mode<synchronous>, transform_indices = @transform_7, window_bounds = array<i64: 128, 384>}, {pipeline_mode = #tpu.pipeline_mode<synchronous>, transform_indices = @transform_8, window_bounds = array<i64: 1, 384>}, {pipeline_mode = #tpu.pipeline_mode<synchronous>, transform_indices = @transform_9, window_bounds = array<i64: 64, 32>}, {pipeline_mode = #tpu.pipeline_mode<synchronous>, transform_indices = @transform_10, window_bounds = array<i64: 1, 32>}, {pipeline_mode = #tpu.pipeline_mode<synchronous>, transform_indices = @transform_11, window_bounds = array<i64: 1, 32>}, {pipeline_mode = #tpu.pipeline_mode<synchronous>, transform_indices = @transform_12, window_bounds = array<i64: 16, 32>}, {pipeline_mode = #tpu.pipeline_mode<synchronous>, transform_indices = @transform_13, window_bounds = array<i64: 16, 64>}, {pipeline_mode = #tpu.pipeline_mode<synchronous>, transform_indices = @transform_14, window_bounds = array<i64: 64, 32>}, {pipeline_mode = #tpu.pipeline_mode<synchronous>, transform_indices = @transform_15, window_bounds = array<i64: 1, 32>}, {pipeline_mode = #tpu.pipeline_mode<synchronous>, transform_indices = @transform_16, window_bounds = array<i64: 64, 16>}, {pipeline_mode = #tpu.pipeline_mode<synchronous>, transform_indices = @transform_17, window_bounds = array<i64: 1, 16>}, {pipeline_mode = #tpu.pipeline_mode<synchronous>, transform_indices = @transform_18, window_bounds = array<i64: 7, 1, 16>}, {pipeline_mode = #tpu.pipeline_mode<synchronous>, transform_indices = @transform_19, window_bounds = array<i64: 7, 1, 32>}, {pipeline_mode = #tpu.pipeline_mode<synchronous>, transform_indices = @transform_20, window_bounds = array<i64: 7, 1, 16>}, {pipeline_mode = #tpu.pipeline_mode<synchronous>, transform_indices = @transform_21, window_bounds = array<i64: 1, 128>}]} {
    %c0 = arith.constant 0 : index
    %0 = memref.load %arg1[%c0] : memref<8xi32, #tpu.memory_space<smem>>
    %c0_0 = arith.constant 0 : index
    %1 = memref.load %arg25[%c0_0] : memref<1xi32, #tpu.memory_space<smem>>
    memref.store %0, %arg25[%c0_0] : memref<1xi32, #tpu.memory_space<smem>>
    %c0_1 = arith.constant 0 : index
    %c0_2 = arith.constant 0 : index
    %2 = vector.load %arg5[%c0_1, %c0_2] : memref<1x128xf32, #tpu.memory_space<vmem>>, vector<1x128xf32>
    %c0_3 = arith.constant 0 : index
    %3 = memref.load %arg25[%c0_3] : memref<1xi32, #tpu.memory_space<smem>>
    %4 = arith.index_cast %3 : i32 to index
    %c0_4 = arith.constant 0 : index
    %c0_5 = arith.constant 0 : index
    %5 = vector.load %arg3[%4, %c0_4, %c0_5] : memref<12x1x16xf32, #tpu.memory_space<vmem>>, vector<1x1x16xf32>
    %6 = vector.shape_cast %5 : vector<1x1x16xf32> to vector<1x16xf32>
    %c0_6 = arith.constant 0 : index
    %c0_7 = arith.constant 0 : index
    %7 = vector.load %arg10[%c0_6, %c0_7] : memref<128x384xf32, #tpu.memory_space<vmem>>, vector<128x384xf32>
    %cst = arith.constant dense<0.000000e+00> : vector<1x384xf32>
    %8 = tpu.matmul %2, %7, %cst {dimension_numbers = #tpu.dot_dimension_numbers<[1], [0], [0], [1], [0, 0, 1, 1], [], []>} : vector<1x128xf32>, vector<128x384xf32>, vector<1x384xf32> -> vector<1x384xf32>
    %c0_8 = arith.constant 0 : index
    %c0_9 = arith.constant 0 : index
    %9 = vector.load %arg11[%c0_8, %c0_9] : memref<1x384xf32, #tpu.memory_space<vmem>>, vector<1x384xf32>
    %10 = arith.addf %8, %9 : vector<1x384xf32>
    %c0_10 = arith.constant 0 : index
    %c0_11 = arith.constant 0 : index
    %11 = vector.load %arg6[%c0_10, %c0_11] : memref<16x192xf32, #tpu.memory_space<vmem>>, vector<16x192xf32>
    %cst_12 = arith.constant dense<0.000000e+00> : vector<1x192xf32>
    %12 = tpu.matmul %6, %11, %cst_12 {dimension_numbers = #tpu.dot_dimension_numbers<[1], [0], [0], [1], [0, 0, 1, 1], [], []>} : vector<1x16xf32>, vector<16x192xf32>, vector<1x192xf32> -> vector<1x192xf32>
    %c0_13 = arith.constant 0 : index
    %c0_14 = arith.constant 0 : index
    %13 = vector.load %arg7[%c0_13, %c0_14] : memref<1x192xf32, #tpu.memory_space<vmem>>, vector<1x192xf32>
    %14 = arith.addf %12, %13 : vector<1x192xf32>
    %15 = vector.extract_strided_slice %14 {offsets = [0, 0], sizes = [1, 96], strides = [1, 1]} : vector<1x192xf32> to vector<1x96xf32>
    %16 = vector.extract_strided_slice %10 {offsets = [0, 0], sizes = [1, 96], strides = [1, 1]} : vector<1x384xf32> to vector<1x96xf32>
    %17 = vector.extract_strided_slice %2 {offsets = [0, 0], sizes = [1, 32], strides = [1, 1]} : vector<1x128xf32> to vector<1x32xf32>
    %18 = vector.extract_strided_slice %15 {offsets = [0, 0], sizes = [1, 32], strides = [1, 1]} : vector<1x96xf32> to vector<1x32xf32>
    %19 = vector.extract_strided_slice %16 {offsets = [0, 0], sizes = [1, 32], strides = [1, 1]} : vector<1x96xf32> to vector<1x32xf32>
    %20 = arith.addf %18, %19 : vector<1x32xf32>
    %21 = arith.negf %20 : vector<1x32xf32>
    %22 = math.exp %21 : vector<1x32xf32>
    %cst_15 = arith.constant 1.000000e+00 : f32
    %23 = vector.broadcast %cst_15 : f32 to vector<1x32xf32>
    %24 = arith.addf %23, %22 : vector<1x32xf32>
    %25 = arith.divf %23, %24 : vector<1x32xf32>
    %26 = vector.extract_strided_slice %15 {offsets = [0, 32], sizes = [1, 32], strides = [1, 1]} : vector<1x96xf32> to vector<1x32xf32>
    %27 = vector.extract_strided_slice %16 {offsets = [0, 32], sizes = [1, 32], strides = [1, 1]} : vector<1x96xf32> to vector<1x32xf32>
    %28 = arith.addf %26, %27 : vector<1x32xf32>
    %29 = arith.negf %28 : vector<1x32xf32>
    %30 = math.exp %29 : vector<1x32xf32>
    %cst_16 = arith.constant 1.000000e+00 : f32
    %31 = vector.broadcast %cst_16 : f32 to vector<1x32xf32>
    %32 = arith.addf %31, %30 : vector<1x32xf32>
    %33 = arith.divf %31, %32 : vector<1x32xf32>
    %34 = vector.extract_strided_slice %15 {offsets = [0, 64], sizes = [1, 32], strides = [1, 1]} : vector<1x96xf32> to vector<1x32xf32>
    %35 = vector.extract_strided_slice %16 {offsets = [0, 64], sizes = [1, 32], strides = [1, 1]} : vector<1x96xf32> to vector<1x32xf32>
    %36 = arith.mulf %25, %35 : vector<1x32xf32>
    %37 = arith.addf %34, %36 : vector<1x32xf32>
    %38 = math.tanh %37 : vector<1x32xf32>
    %cst_17 = arith.constant 1.000000e+00 : f32
    %39 = vector.broadcast %cst_17 : f32 to vector<1x32xf32>
    %40 = arith.subf %39, %33 : vector<1x32xf32>
    %41 = arith.mulf %40, %38 : vector<1x32xf32>
    %42 = arith.mulf %33, %17 : vector<1x32xf32>
    %43 = arith.addf %41, %42 : vector<1x32xf32>
    %44 = vector.extract_strided_slice %14 {offsets = [0, 96], sizes = [1, 96], strides = [1, 1]} : vector<1x192xf32> to vector<1x96xf32>
    %45 = vector.extract_strided_slice %10 {offsets = [0, 96], sizes = [1, 96], strides = [1, 1]} : vector<1x384xf32> to vector<1x96xf32>
    %46 = vector.extract_strided_slice %2 {offsets = [0, 32], sizes = [1, 32], strides = [1, 1]} : vector<1x128xf32> to vector<1x32xf32>
    %47 = vector.extract_strided_slice %44 {offsets = [0, 0], sizes = [1, 32], strides = [1, 1]} : vector<1x96xf32> to vector<1x32xf32>
    %48 = vector.extract_strided_slice %45 {offsets = [0, 0], sizes = [1, 32], strides = [1, 1]} : vector<1x96xf32> to vector<1x32xf32>
    %49 = arith.addf %47, %48 : vector<1x32xf32>
    %50 = arith.negf %49 : vector<1x32xf32>
    %51 = math.exp %50 : vector<1x32xf32>
    %cst_18 = arith.constant 1.000000e+00 : f32
    %52 = vector.broadcast %cst_18 : f32 to vector<1x32xf32>
    %53 = arith.addf %52, %51 : vector<1x32xf32>
    %54 = arith.divf %52, %53 : vector<1x32xf32>
    %55 = vector.extract_strided_slice %44 {offsets = [0, 32], sizes = [1, 32], strides = [1, 1]} : vector<1x96xf32> to vector<1x32xf32>
    %56 = vector.extract_strided_slice %45 {offsets = [0, 32], sizes = [1, 32], strides = [1, 1]} : vector<1x96xf32> to vector<1x32xf32>
    %57 = arith.addf %55, %56 : vector<1x32xf32>
    %58 = arith.negf %57 : vector<1x32xf32>
    %59 = math.exp %58 : vector<1x32xf32>
    %cst_19 = arith.constant 1.000000e+00 : f32
    %60 = vector.broadcast %cst_19 : f32 to vector<1x32xf32>
    %61 = arith.addf %60, %59 : vector<1x32xf32>
    %62 = arith.divf %60, %61 : vector<1x32xf32>
    %63 = vector.extract_strided_slice %44 {offsets = [0, 64], sizes = [1, 32], strides = [1, 1]} : vector<1x96xf32> to vector<1x32xf32>
    %64 = vector.extract_strided_slice %45 {offsets = [0, 64], sizes = [1, 32], strides = [1, 1]} : vector<1x96xf32> to vector<1x32xf32>
    %65 = arith.mulf %54, %64 : vector<1x32xf32>
    %66 = arith.addf %63, %65 : vector<1x32xf32>
    %67 = math.tanh %66 : vector<1x32xf32>
    %cst_20 = arith.constant 1.000000e+00 : f32
    %68 = vector.broadcast %cst_20 : f32 to vector<1x32xf32>
    %69 = arith.subf %68, %62 : vector<1x32xf32>
    %70 = arith.mulf %69, %67 : vector<1x32xf32>
    %71 = arith.mulf %62, %46 : vector<1x32xf32>
    %72 = arith.addf %70, %71 : vector<1x32xf32>
    %73 = tpu.concatenate %43, %72 in 1 : vector<1x32xf32>, vector<1x32xf32> -> vector<1x64xf32>
    %c0_21 = arith.constant 0 : index
    %c0_22 = arith.constant 0 : index
    %74 = vector.load %arg8[%c0_21, %c0_22] : memref<64x192xf32, #tpu.memory_space<vmem>>, vector<64x192xf32>
    %cst_23 = arith.constant dense<0.000000e+00> : vector<1x192xf32>
    %75 = tpu.matmul %73, %74, %cst_23 {dimension_numbers = #tpu.dot_dimension_numbers<[1], [0], [0], [1], [0, 0, 1, 1], [], []>} : vector<1x64xf32>, vector<64x192xf32>, vector<1x192xf32> -> vector<1x192xf32>
    %c0_24 = arith.constant 0 : index
    %c0_25 = arith.constant 0 : index
    %76 = vector.load %arg9[%c0_24, %c0_25] : memref<1x192xf32, #tpu.memory_space<vmem>>, vector<1x192xf32>
    %77 = arith.addf %75, %76 : vector<1x192xf32>
    %78 = vector.extract_strided_slice %77 {offsets = [0, 0], sizes = [1, 96], strides = [1, 1]} : vector<1x192xf32> to vector<1x96xf32>
    %79 = vector.extract_strided_slice %10 {offsets = [0, 192], sizes = [1, 96], strides = [1, 1]} : vector<1x384xf32> to vector<1x96xf32>
    %80 = vector.extract_strided_slice %2 {offsets = [0, 64], sizes = [1, 32], strides = [1, 1]} : vector<1x128xf32> to vector<1x32xf32>
    %81 = vector.extract_strided_slice %78 {offsets = [0, 0], sizes = [1, 32], strides = [1, 1]} : vector<1x96xf32> to vector<1x32xf32>
    %82 = vector.extract_strided_slice %79 {offsets = [0, 0], sizes = [1, 32], strides = [1, 1]} : vector<1x96xf32> to vector<1x32xf32>
    %83 = arith.addf %81, %82 : vector<1x32xf32>
    %84 = arith.negf %83 : vector<1x32xf32>
    %85 = math.exp %84 : vector<1x32xf32>
    %cst_26 = arith.constant 1.000000e+00 : f32
    %86 = vector.broadcast %cst_26 : f32 to vector<1x32xf32>
    %87 = arith.addf %86, %85 : vector<1x32xf32>
    %88 = arith.divf %86, %87 : vector<1x32xf32>
    %89 = vector.extract_strided_slice %78 {offsets = [0, 32], sizes = [1, 32], strides = [1, 1]} : vector<1x96xf32> to vector<1x32xf32>
    %90 = vector.extract_strided_slice %79 {offsets = [0, 32], sizes = [1, 32], strides = [1, 1]} : vector<1x96xf32> to vector<1x32xf32>
    %91 = arith.addf %89, %90 : vector<1x32xf32>
    %92 = arith.negf %91 : vector<1x32xf32>
    %93 = math.exp %92 : vector<1x32xf32>
    %cst_27 = arith.constant 1.000000e+00 : f32
    %94 = vector.broadcast %cst_27 : f32 to vector<1x32xf32>
    %95 = arith.addf %94, %93 : vector<1x32xf32>
    %96 = arith.divf %94, %95 : vector<1x32xf32>
    %97 = vector.extract_strided_slice %78 {offsets = [0, 64], sizes = [1, 32], strides = [1, 1]} : vector<1x96xf32> to vector<1x32xf32>
    %98 = vector.extract_strided_slice %79 {offsets = [0, 64], sizes = [1, 32], strides = [1, 1]} : vector<1x96xf32> to vector<1x32xf32>
    %99 = arith.mulf %88, %98 : vector<1x32xf32>
    %100 = arith.addf %97, %99 : vector<1x32xf32>
    %101 = math.tanh %100 : vector<1x32xf32>
    %cst_28 = arith.constant 1.000000e+00 : f32
    %102 = vector.broadcast %cst_28 : f32 to vector<1x32xf32>
    %103 = arith.subf %102, %96 : vector<1x32xf32>
    %104 = arith.mulf %103, %101 : vector<1x32xf32>
    %105 = arith.mulf %96, %80 : vector<1x32xf32>
    %106 = arith.addf %104, %105 : vector<1x32xf32>
    %107 = vector.extract_strided_slice %77 {offsets = [0, 96], sizes = [1, 96], strides = [1, 1]} : vector<1x192xf32> to vector<1x96xf32>
    %108 = vector.extract_strided_slice %10 {offsets = [0, 288], sizes = [1, 96], strides = [1, 1]} : vector<1x384xf32> to vector<1x96xf32>
    %109 = vector.extract_strided_slice %2 {offsets = [0, 96], sizes = [1, 32], strides = [1, 1]} : vector<1x128xf32> to vector<1x32xf32>
    %110 = vector.extract_strided_slice %107 {offsets = [0, 0], sizes = [1, 32], strides = [1, 1]} : vector<1x96xf32> to vector<1x32xf32>
    %111 = vector.extract_strided_slice %108 {offsets = [0, 0], sizes = [1, 32], strides = [1, 1]} : vector<1x96xf32> to vector<1x32xf32>
    %112 = arith.addf %110, %111 : vector<1x32xf32>
    %113 = arith.negf %112 : vector<1x32xf32>
    %114 = math.exp %113 : vector<1x32xf32>
    %cst_29 = arith.constant 1.000000e+00 : f32
    %115 = vector.broadcast %cst_29 : f32 to vector<1x32xf32>
    %116 = arith.addf %115, %114 : vector<1x32xf32>
    %117 = arith.divf %115, %116 : vector<1x32xf32>
    %118 = vector.extract_strided_slice %107 {offsets = [0, 32], sizes = [1, 32], strides = [1, 1]} : vector<1x96xf32> to vector<1x32xf32>
    %119 = vector.extract_strided_slice %108 {offsets = [0, 32], sizes = [1, 32], strides = [1, 1]} : vector<1x96xf32> to vector<1x32xf32>
    %120 = arith.addf %118, %119 : vector<1x32xf32>
    %121 = arith.negf %120 : vector<1x32xf32>
    %122 = math.exp %121 : vector<1x32xf32>
    %cst_30 = arith.constant 1.000000e+00 : f32
    %123 = vector.broadcast %cst_30 : f32 to vector<1x32xf32>
    %124 = arith.addf %123, %122 : vector<1x32xf32>
    %125 = arith.divf %123, %124 : vector<1x32xf32>
    %126 = vector.extract_strided_slice %107 {offsets = [0, 64], sizes = [1, 32], strides = [1, 1]} : vector<1x96xf32> to vector<1x32xf32>
    %127 = vector.extract_strided_slice %108 {offsets = [0, 64], sizes = [1, 32], strides = [1, 1]} : vector<1x96xf32> to vector<1x32xf32>
    %128 = arith.mulf %117, %127 : vector<1x32xf32>
    %129 = arith.addf %126, %128 : vector<1x32xf32>
    %130 = math.tanh %129 : vector<1x32xf32>
    %cst_31 = arith.constant 1.000000e+00 : f32
    %131 = vector.broadcast %cst_31 : f32 to vector<1x32xf32>
    %132 = arith.subf %131, %125 : vector<1x32xf32>
    %133 = arith.mulf %132, %130 : vector<1x32xf32>
    %134 = arith.mulf %125, %109 : vector<1x32xf32>
    %135 = arith.addf %133, %134 : vector<1x32xf32>
    %136 = tpu.concatenate %106, %135 in 1 : vector<1x32xf32>, vector<1x32xf32> -> vector<1x64xf32>
    %137 = tpu.concatenate %43, %72, %106, %135 in 1 : vector<1x32xf32>, vector<1x32xf32>, vector<1x32xf32>, vector<1x32xf32> -> vector<1x128xf32>
    %c0_32 = arith.constant 0 : index
    %c0_33 = arith.constant 0 : index
    %138 = vector.load %arg12[%c0_32, %c0_33] : memref<64x32xf32, #tpu.memory_space<vmem>>, vector<64x32xf32>
    %cst_34 = arith.constant dense<0.000000e+00> : vector<1x32xf32>
    %139 = tpu.matmul %136, %138, %cst_34 {dimension_numbers = #tpu.dot_dimension_numbers<[1], [0], [0], [1], [0, 0, 1, 1], [], []>} : vector<1x64xf32>, vector<64x32xf32>, vector<1x32xf32> -> vector<1x32xf32>
    %c0_35 = arith.constant 0 : index
    %c0_36 = arith.constant 0 : index
    %140 = vector.load %arg13[%c0_35, %c0_36] : memref<1x32xf32, #tpu.memory_space<vmem>>, vector<1x32xf32>
    %141 = arith.addf %139, %140 : vector<1x32xf32>
    %c0_37 = arith.constant 0 : index
    %c0_38 = arith.constant 0 : index
    %142 = vector.load %arg15[%c0_37, %c0_38] : memref<16x32xf32, #tpu.memory_space<vmem>>, vector<16x32xf32>
    %143 = vector.broadcast %141 : vector<1x32xf32> to vector<16x32xf32>
    %144 = arith.addf %142, %143 : vector<16x32xf32>
    %145 = math.tanh %144 : vector<16x32xf32>
    %c0_39 = arith.constant 0 : index
    %c0_40 = arith.constant 0 : index
    %146 = vector.load %arg14[%c0_39, %c0_40] : memref<1x32xf32, #tpu.memory_space<vmem>>, vector<1x32xf32>
    %147 = tpu.transpose %145, [1, 0] : vector<16x32xf32> -> vector<32x16xf32>
    %cst_41 = arith.constant dense<0.000000e+00> : vector<1x16xf32>
    %148 = tpu.matmul %146, %147, %cst_41 {dimension_numbers = #tpu.dot_dimension_numbers<[1], [0], [0], [1], [0, 0, 1, 1], [], []>} : vector<1x32xf32>, vector<32x16xf32>, vector<1x16xf32> -> vector<1x16xf32>
    %cst_42 = arith.constant dense<0xFF800000> : vector<1xf32>
    %149 = vector.multi_reduction <maximumf>, %148, %cst_42 [1] : vector<1x16xf32> to vector<1xf32>
    %150 = vector.shape_cast %149 : vector<1xf32> to vector<1x1xf32>
    %151 = vector.broadcast %150 : vector<1x1xf32> to vector<1x16xf32>
    %152 = arith.subf %148, %151 : vector<1x16xf32>
    %153 = math.exp %152 : vector<1x16xf32>
    %cst_43 = arith.constant dense<0.000000e+00> : vector<1xf32>
    %154 = vector.multi_reduction <add>, %153, %cst_43 [1] : vector<1x16xf32> to vector<1xf32>
    %155 = vector.shape_cast %154 : vector<1xf32> to vector<1x1xf32>
    %156 = tpu.reciprocal %155 {approx = true} : vector<1x1xf32> -> vector<1x1xf32>
    %157 = vector.broadcast %156 : vector<1x1xf32> to vector<1x16xf32>
    %158 = arith.mulf %153, %157 : vector<1x16xf32>
    %c0_44 = arith.constant 0 : index
    %c0_45 = arith.constant 0 : index
    %159 = vector.load %arg16[%c0_44, %c0_45] : memref<16x64xf32, #tpu.memory_space<vmem>>, vector<16x64xf32>
    %cst_46 = arith.constant dense<0.000000e+00> : vector<1x64xf32>
    %160 = tpu.matmul %158, %159, %cst_46 {dimension_numbers = #tpu.dot_dimension_numbers<[1], [0], [0], [1], [0, 0, 1, 1], [], []>} : vector<1x16xf32>, vector<16x64xf32>, vector<1x64xf32> -> vector<1x64xf32>
    %cst_47 = arith.constant 0.000000e+00 : f32
    %161 = vector.broadcast %cst_47 : f32 to vector<1x64xf32>
    %162 = arith.cmpf ogt, %160, %161 : vector<1x64xf32>
    %cst_48 = arith.constant 0.00999999977 : f32
    %163 = vector.broadcast %cst_48 : f32 to vector<1x64xf32>
    %164 = arith.mulf %163, %160 : vector<1x64xf32>
    %165 = arith.select %162, %160, %164 : vector<1x64xi1>, vector<1x64xf32>
    %cst_49 = arith.constant 0.000000e+00 : f32
    %166 = vector.broadcast %cst_49 : f32 to vector<1x64xf32>
    %167 = arith.cmpf ogt, %165, %166 : vector<1x64xf32>
    %cst_50 = arith.constant 0.00999999977 : f32
    %168 = vector.broadcast %cst_50 : f32 to vector<1x64xf32>
    %169 = arith.mulf %168, %165 : vector<1x64xf32>
    %170 = arith.select %167, %165, %169 : vector<1x64xi1>, vector<1x64xf32>
    %c0_51 = arith.constant 0 : index
    %c0_52 = arith.constant 0 : index
    %171 = vector.load %arg17[%c0_51, %c0_52] : memref<64x32xf32, #tpu.memory_space<vmem>>, vector<64x32xf32>
    %cst_53 = arith.constant dense<0.000000e+00> : vector<1x32xf32>
    %172 = tpu.matmul %170, %171, %cst_53 {dimension_numbers = #tpu.dot_dimension_numbers<[1], [0], [0], [1], [0, 0, 1, 1], [], []>} : vector<1x64xf32>, vector<64x32xf32>, vector<1x32xf32> -> vector<1x32xf32>
    %c0_54 = arith.constant 0 : index
    %c0_55 = arith.constant 0 : index
    %173 = vector.load %arg18[%c0_54, %c0_55] : memref<1x32xf32, #tpu.memory_space<vmem>>, vector<1x32xf32>
    %174 = arith.addf %172, %173 : vector<1x32xf32>
    %cst_56 = arith.constant 0.000000e+00 : f32
    %175 = vector.broadcast %cst_56 : f32 to vector<1x32xf32>
    %176 = arith.cmpf ogt, %174, %175 : vector<1x32xf32>
    %cst_57 = arith.constant 0.00999999977 : f32
    %177 = vector.broadcast %cst_57 : f32 to vector<1x32xf32>
    %178 = arith.mulf %177, %174 : vector<1x32xf32>
    %179 = arith.select %176, %174, %178 : vector<1x32xi1>, vector<1x32xf32>
    %c0_58 = arith.constant 0 : index
    %c0_59 = arith.constant 0 : index
    %180 = vector.load %arg19[%c0_58, %c0_59] : memref<64x16xf32, #tpu.memory_space<vmem>>, vector<64x16xf32>
    %cst_60 = arith.constant dense<0.000000e+00> : vector<1x16xf32>
    %181 = tpu.matmul %170, %180, %cst_60 {dimension_numbers = #tpu.dot_dimension_numbers<[1], [0], [0], [1], [0, 0, 1, 1], [], []>} : vector<1x64xf32>, vector<64x16xf32>, vector<1x16xf32> -> vector<1x16xf32>
    %c0_61 = arith.constant 0 : index
    %c0_62 = arith.constant 0 : index
    %182 = vector.load %arg20[%c0_61, %c0_62] : memref<1x16xf32, #tpu.memory_space<vmem>>, vector<1x16xf32>
    %183 = arith.addf %181, %182 : vector<1x16xf32>
    %c0_63 = arith.constant 0 : index
    %c0_64 = arith.constant 0 : index
    %c0_65 = arith.constant 0 : index
    %184 = vector.load %arg21[%c0_63, %c0_64, %c0_65] : memref<7x1x16xf32, #tpu.memory_space<vmem>>, vector<1x1x16xf32>
    %185 = vector.shape_cast %184 : vector<1x1x16xf32> to vector<1x16xf32>
    %186 = vector.shape_cast %183 : vector<1x16xf32> to vector<1x1x16xf32>
    tpu.vector_store %arg21[%c0_63, %c0_64, %c0_65], %186 {strides = array<i32>} : memref<7x1x16xf32, #tpu.memory_space<vmem>>, vector<1x1x16xf32>,
    %c0_66 = arith.constant 0 : index
    %c0_67 = arith.constant 0 : index
    %c0_68 = arith.constant 0 : index
    %187 = vector.load %arg22[%c0_66, %c0_67, %c0_68] : memref<7x1x32xf32, #tpu.memory_space<vmem>>, vector<1x1x32xf32>
    %188 = vector.shape_cast %187 : vector<1x1x32xf32> to vector<1x32xf32>
    %189 = vector.shape_cast %179 : vector<1x32xf32> to vector<1x1x32xf32>
    tpu.vector_store %arg22[%c0_66, %c0_67, %c0_68], %189 {strides = array<i32>} : memref<7x1x32xf32, #tpu.memory_space<vmem>>, vector<1x1x32xf32>,
    %c0_69 = arith.constant 0 : index
    %c0_70 = arith.constant 0 : index
    %c0_71 = arith.constant 0 : index
    %190 = vector.load %arg23[%c0_69, %c0_70, %c0_71] : memref<7x1x16xf32, #tpu.memory_space<vmem>>, vector<1x1x16xf32>
    %191 = vector.shape_cast %190 : vector<1x1x16xf32> to vector<1x16xf32>
    %192 = vector.shape_cast %158 : vector<1x16xf32> to vector<1x1x16xf32>
    tpu.vector_store %arg23[%c0_69, %c0_70, %c0_71], %192 {strides = array<i32>} : memref<7x1x16xf32, #tpu.memory_space<vmem>>, vector<1x1x16xf32>,
    %c0_72 = arith.constant 0 : index
    %193 = memref.load %arg2[%c0_72] : memref<7xi32, #tpu.memory_space<smem>>
    %c1_i32 = arith.constant 1 : i32
    %194 = arith.cmpi eq, %193, %c1_i32 : i32
    %195 = arith.extui %194 : i1 to i32
    %c0_i32 = arith.constant 0 : i32
    %196 = arith.cmpi ne, %195, %c0_i32 : i32
    scf.if %196 {
      %c1_521 = arith.constant 1 : index
      %1383 = memref.load %arg1[%c1_521] : memref<8xi32, #tpu.memory_space<smem>>
      %c0_522 = arith.constant 0 : index
      %1384 = memref.load %arg25[%c0_522] : memref<1xi32, #tpu.memory_space<smem>>
      memref.store %1383, %arg25[%c0_522] : memref<1xi32, #tpu.memory_space<smem>>
    } else {
    }
    %c0_i32_73 = arith.constant 0 : i32
    %197 = arith.cmpi eq, %193, %c0_i32_73 : i32
    %198 = arith.extui %197 : i1 to i32
    %c0_i32_74 = arith.constant 0 : i32
    %199 = arith.cmpi ne, %198, %c0_i32_74 : i32
    scf.if %199 {
      %c0_521 = arith.constant 0 : index
      %c0_522 = arith.constant 0 : index
      %1383 = vector.load %arg4[%c0_521, %c0_522] : memref<16x12xf32, #tpu.memory_space<vmem>>, vector<16x12xf32>
      %cst_523 = arith.constant dense<0.000000e+00> : vector<1x12xf32>
      %1384 = tpu.matmul %183, %1383, %cst_523 {dimension_numbers = #tpu.dot_dimension_numbers<[1], [0], [0], [1], [0, 0, 1, 1], [], []>} : vector<1x16xf32>, vector<16x12xf32>, vector<1x12xf32> -> vector<1x12xf32>
      %cst_524 = arith.constant dense<0xFF800000> : vector<1xf32>
      %1385 = vector.multi_reduction <maximumf>, %1384, %cst_524 [1] : vector<1x12xf32> to vector<1xf32>
      %1386 = vector.shape_cast %1385 : vector<1xf32> to vector<1x1xf32>
      %1387 = tpu.iota {dimensions = array<i32: 1>} : vector<1x12xi32>
      %1388 = vector.broadcast %1386 : vector<1x1xf32> to vector<1x12xf32>
      %1389 = arith.cmpf oge, %1384, %1388 : vector<1x12xf32>
      %c12_i32 = arith.constant 12 : i32
      %1390 = vector.broadcast %c12_i32 : i32 to vector<1x12xi32>
      %1391 = arith.select %1389, %1387, %1390 : vector<1x12xi1>, vector<1x12xi32>
      %1392 = vector.shape_cast %1391 : vector<1x12xi32> to vector<1x1x12xi32>
      %cst_525 = arith.constant dense<2147483647> : vector<1xi32>
      %1393 = vector.multi_reduction <minsi>, %1392, %cst_525 [1, 2] : vector<1x1x12xi32> to vector<1xi32>
      %1394 = vector.shape_cast %1393 : vector<1xi32> to vector<1x1x1xi32>
      %1395 = vector.extract %1394[0, 0, 0] : i32 from vector<1x1x1xi32>
      %c0_526 = arith.constant 0 : index
      %1396 = memref.load %arg25[%c0_526] : memref<1xi32, #tpu.memory_space<smem>>
      memref.store %1395, %arg25[%c0_526] : memref<1xi32, #tpu.memory_space<smem>>
    } else {
    }
    %c0_75 = arith.constant 0 : index
    %200 = memref.load %arg25[%c0_75] : memref<1xi32, #tpu.memory_space<smem>>
    %201 = arith.index_cast %200 : i32 to index
    %c0_76 = arith.constant 0 : index
    %c0_77 = arith.constant 0 : index
    %202 = vector.load %arg3[%201, %c0_76, %c0_77] : memref<12x1x16xf32, #tpu.memory_space<vmem>>, vector<1x1x16xf32>
    %203 = vector.shape_cast %202 : vector<1x1x16xf32> to vector<1x16xf32>
    %c0_78 = arith.constant 0 : index
    %c0_79 = arith.constant 0 : index
    %204 = vector.load %arg10[%c0_78, %c0_79] : memref<128x384xf32, #tpu.memory_space<vmem>>, vector<128x384xf32>
    %cst_80 = arith.constant dense<0.000000e+00> : vector<1x384xf32>
    %205 = tpu.matmul %137, %204, %cst_80 {dimension_numbers = #tpu.dot_dimension_numbers<[1], [0], [0], [1], [0, 0, 1, 1], [], []>} : vector<1x128xf32>, vector<128x384xf32>, vector<1x384xf32> -> vector<1x384xf32>
    %c0_81 = arith.constant 0 : index
    %c0_82 = arith.constant 0 : index
    %206 = vector.load %arg11[%c0_81, %c0_82] : memref<1x384xf32, #tpu.memory_space<vmem>>, vector<1x384xf32>
    %207 = arith.addf %205, %206 : vector<1x384xf32>
    %c0_83 = arith.constant 0 : index
    %c0_84 = arith.constant 0 : index
    %208 = vector.load %arg6[%c0_83, %c0_84] : memref<16x192xf32, #tpu.memory_space<vmem>>, vector<16x192xf32>
    %cst_85 = arith.constant dense<0.000000e+00> : vector<1x192xf32>
    %209 = tpu.matmul %203, %208, %cst_85 {dimension_numbers = #tpu.dot_dimension_numbers<[1], [0], [0], [1], [0, 0, 1, 1], [], []>} : vector<1x16xf32>, vector<16x192xf32>, vector<1x192xf32> -> vector<1x192xf32>
    %c0_86 = arith.constant 0 : index
    %c0_87 = arith.constant 0 : index
    %210 = vector.load %arg7[%c0_86, %c0_87] : memref<1x192xf32, #tpu.memory_space<vmem>>, vector<1x192xf32>
    %211 = arith.addf %209, %210 : vector<1x192xf32>
    %212 = vector.extract_strided_slice %211 {offsets = [0, 0], sizes = [1, 96], strides = [1, 1]} : vector<1x192xf32> to vector<1x96xf32>
    %213 = vector.extract_strided_slice %207 {offsets = [0, 0], sizes = [1, 96], strides = [1, 1]} : vector<1x384xf32> to vector<1x96xf32>
    %214 = vector.extract_strided_slice %137 {offsets = [0, 0], sizes = [1, 32], strides = [1, 1]} : vector<1x128xf32> to vector<1x32xf32>
    %215 = vector.extract_strided_slice %212 {offsets = [0, 0], sizes = [1, 32], strides = [1, 1]} : vector<1x96xf32> to vector<1x32xf32>
    %216 = vector.extract_strided_slice %213 {offsets = [0, 0], sizes = [1, 32], strides = [1, 1]} : vector<1x96xf32> to vector<1x32xf32>
    %217 = arith.addf %215, %216 : vector<1x32xf32>
    %218 = arith.negf %217 : vector<1x32xf32>
    %219 = math.exp %218 : vector<1x32xf32>
    %cst_88 = arith.constant 1.000000e+00 : f32
    %220 = vector.broadcast %cst_88 : f32 to vector<1x32xf32>
    %221 = arith.addf %220, %219 : vector<1x32xf32>
    %222 = arith.divf %220, %221 : vector<1x32xf32>
    %223 = vector.extract_strided_slice %212 {offsets = [0, 32], sizes = [1, 32], strides = [1, 1]} : vector<1x96xf32> to vector<1x32xf32>
    %224 = vector.extract_strided_slice %213 {offsets = [0, 32], sizes = [1, 32], strides = [1, 1]} : vector<1x96xf32> to vector<1x32xf32>
    %225 = arith.addf %223, %224 : vector<1x32xf32>
    %226 = arith.negf %225 : vector<1x32xf32>
    %227 = math.exp %226 : vector<1x32xf32>
    %cst_89 = arith.constant 1.000000e+00 : f32
    %228 = vector.broadcast %cst_89 : f32 to vector<1x32xf32>
    %229 = arith.addf %228, %227 : vector<1x32xf32>
    %230 = arith.divf %228, %229 : vector<1x32xf32>
    %231 = vector.extract_strided_slice %212 {offsets = [0, 64], sizes = [1, 32], strides = [1, 1]} : vector<1x96xf32> to vector<1x32xf32>
    %232 = vector.extract_strided_slice %213 {offsets = [0, 64], sizes = [1, 32], strides = [1, 1]} : vector<1x96xf32> to vector<1x32xf32>
    %233 = arith.mulf %222, %232 : vector<1x32xf32>
    %234 = arith.addf %231, %233 : vector<1x32xf32>
    %235 = math.tanh %234 : vector<1x32xf32>
    %cst_90 = arith.constant 1.000000e+00 : f32
    %236 = vector.broadcast %cst_90 : f32 to vector<1x32xf32>
    %237 = arith.subf %236, %230 : vector<1x32xf32>
    %238 = arith.mulf %237, %235 : vector<1x32xf32>
    %239 = arith.mulf %230, %214 : vector<1x32xf32>
    %240 = arith.addf %238, %239 : vector<1x32xf32>
    %241 = vector.extract_strided_slice %211 {offsets = [0, 96], sizes = [1, 96], strides = [1, 1]} : vector<1x192xf32> to vector<1x96xf32>
    %242 = vector.extract_strided_slice %207 {offsets = [0, 96], sizes = [1, 96], strides = [1, 1]} : vector<1x384xf32> to vector<1x96xf32>
    %243 = vector.extract_strided_slice %137 {offsets = [0, 32], sizes = [1, 32], strides = [1, 1]} : vector<1x128xf32> to vector<1x32xf32>
    %244 = vector.extract_strided_slice %241 {offsets = [0, 0], sizes = [1, 32], strides = [1, 1]} : vector<1x96xf32> to vector<1x32xf32>
    %245 = vector.extract_strided_slice %242 {offsets = [0, 0], sizes = [1, 32], strides = [1, 1]} : vector<1x96xf32> to vector<1x32xf32>
    %246 = arith.addf %244, %245 : vector<1x32xf32>
    %247 = arith.negf %246 : vector<1x32xf32>
    %248 = math.exp %247 : vector<1x32xf32>
    %cst_91 = arith.constant 1.000000e+00 : f32
    %249 = vector.broadcast %cst_91 : f32 to vector<1x32xf32>
    %250 = arith.addf %249, %248 : vector<1x32xf32>
    %251 = arith.divf %249, %250 : vector<1x32xf32>
    %252 = vector.extract_strided_slice %241 {offsets = [0, 32], sizes = [1, 32], strides = [1, 1]} : vector<1x96xf32> to vector<1x32xf32>
    %253 = vector.extract_strided_slice %242 {offsets = [0, 32], sizes = [1, 32], strides = [1, 1]} : vector<1x96xf32> to vector<1x32xf32>
    %254 = arith.addf %252, %253 : vector<1x32xf32>
    %255 = arith.negf %254 : vector<1x32xf32>
    %256 = math.exp %255 : vector<1x32xf32>
    %cst_92 = arith.constant 1.000000e+00 : f32
    %257 = vector.broadcast %cst_92 : f32 to vector<1x32xf32>
    %258 = arith.addf %257, %256 : vector<1x32xf32>
    %259 = arith.divf %257, %258 : vector<1x32xf32>
    %260 = vector.extract_strided_slice %241 {offsets = [0, 64], sizes = [1, 32], strides = [1, 1]} : vector<1x96xf32> to vector<1x32xf32>
    %261 = vector.extract_strided_slice %242 {offsets = [0, 64], sizes = [1, 32], strides = [1, 1]} : vector<1x96xf32> to vector<1x32xf32>
    %262 = arith.mulf %251, %261 : vector<1x32xf32>
    %263 = arith.addf %260, %262 : vector<1x32xf32>
    %264 = math.tanh %263 : vector<1x32xf32>
    %cst_93 = arith.constant 1.000000e+00 : f32
    %265 = vector.broadcast %cst_93 : f32 to vector<1x32xf32>
    %266 = arith.subf %265, %259 : vector<1x32xf32>
    %267 = arith.mulf %266, %264 : vector<1x32xf32>
    %268 = arith.mulf %259, %243 : vector<1x32xf32>
    %269 = arith.addf %267, %268 : vector<1x32xf32>
    %270 = tpu.concatenate %240, %269 in 1 : vector<1x32xf32>, vector<1x32xf32> -> vector<1x64xf32>
    %c0_94 = arith.constant 0 : index
    %c0_95 = arith.constant 0 : index
    %271 = vector.load %arg8[%c0_94, %c0_95] : memref<64x192xf32, #tpu.memory_space<vmem>>, vector<64x192xf32>
    %cst_96 = arith.constant dense<0.000000e+00> : vector<1x192xf32>
    %272 = tpu.matmul %270, %271, %cst_96 {dimension_numbers = #tpu.dot_dimension_numbers<[1], [0], [0], [1], [0, 0, 1, 1], [], []>} : vector<1x64xf32>, vector<64x192xf32>, vector<1x192xf32> -> vector<1x192xf32>
    %c0_97 = arith.constant 0 : index
    %c0_98 = arith.constant 0 : index
    %273 = vector.load %arg9[%c0_97, %c0_98] : memref<1x192xf32, #tpu.memory_space<vmem>>, vector<1x192xf32>
    %274 = arith.addf %272, %273 : vector<1x192xf32>
    %275 = vector.extract_strided_slice %274 {offsets = [0, 0], sizes = [1, 96], strides = [1, 1]} : vector<1x192xf32> to vector<1x96xf32>
    %276 = vector.extract_strided_slice %207 {offsets = [0, 192], sizes = [1, 96], strides = [1, 1]} : vector<1x384xf32> to vector<1x96xf32>
    %277 = vector.extract_strided_slice %137 {offsets = [0, 64], sizes = [1, 32], strides = [1, 1]} : vector<1x128xf32> to vector<1x32xf32>
    %278 = vector.extract_strided_slice %275 {offsets = [0, 0], sizes = [1, 32], strides = [1, 1]} : vector<1x96xf32> to vector<1x32xf32>
    %279 = vector.extract_strided_slice %276 {offsets = [0, 0], sizes = [1, 32], strides = [1, 1]} : vector<1x96xf32> to vector<1x32xf32>
    %280 = arith.addf %278, %279 : vector<1x32xf32>
    %281 = arith.negf %280 : vector<1x32xf32>
    %282 = math.exp %281 : vector<1x32xf32>
    %cst_99 = arith.constant 1.000000e+00 : f32
    %283 = vector.broadcast %cst_99 : f32 to vector<1x32xf32>
    %284 = arith.addf %283, %282 : vector<1x32xf32>
    %285 = arith.divf %283, %284 : vector<1x32xf32>
    %286 = vector.extract_strided_slice %275 {offsets = [0, 32], sizes = [1, 32], strides = [1, 1]} : vector<1x96xf32> to vector<1x32xf32>
    %287 = vector.extract_strided_slice %276 {offsets = [0, 32], sizes = [1, 32], strides = [1, 1]} : vector<1x96xf32> to vector<1x32xf32>
    %288 = arith.addf %286, %287 : vector<1x32xf32>
    %289 = arith.negf %288 : vector<1x32xf32>
    %290 = math.exp %289 : vector<1x32xf32>
    %cst_100 = arith.constant 1.000000e+00 : f32
    %291 = vector.broadcast %cst_100 : f32 to vector<1x32xf32>
    %292 = arith.addf %291, %290 : vector<1x32xf32>
    %293 = arith.divf %291, %292 : vector<1x32xf32>
    %294 = vector.extract_strided_slice %275 {offsets = [0, 64], sizes = [1, 32], strides = [1, 1]} : vector<1x96xf32> to vector<1x32xf32>
    %295 = vector.extract_strided_slice %276 {offsets = [0, 64], sizes = [1, 32], strides = [1, 1]} : vector<1x96xf32> to vector<1x32xf32>
    %296 = arith.mulf %285, %295 : vector<1x32xf32>
    %297 = arith.addf %294, %296 : vector<1x32xf32>
    %298 = math.tanh %297 : vector<1x32xf32>
    %cst_101 = arith.constant 1.000000e+00 : f32
    %299 = vector.broadcast %cst_101 : f32 to vector<1x32xf32>
    %300 = arith.subf %299, %293 : vector<1x32xf32>
    %301 = arith.mulf %300, %298 : vector<1x32xf32>
    %302 = arith.mulf %293, %277 : vector<1x32xf32>
    %303 = arith.addf %301, %302 : vector<1x32xf32>
    %304 = vector.extract_strided_slice %274 {offsets = [0, 96], sizes = [1, 96], strides = [1, 1]} : vector<1x192xf32> to vector<1x96xf32>
    %305 = vector.extract_strided_slice %207 {offsets = [0, 288], sizes = [1, 96], strides = [1, 1]} : vector<1x384xf32> to vector<1x96xf32>
    %306 = vector.extract_strided_slice %137 {offsets = [0, 96], sizes = [1, 32], strides = [1, 1]} : vector<1x128xf32> to vector<1x32xf32>
    %307 = vector.extract_strided_slice %304 {offsets = [0, 0], sizes = [1, 32], strides = [1, 1]} : vector<1x96xf32> to vector<1x32xf32>
    %308 = vector.extract_strided_slice %305 {offsets = [0, 0], sizes = [1, 32], strides = [1, 1]} : vector<1x96xf32> to vector<1x32xf32>
    %309 = arith.addf %307, %308 : vector<1x32xf32>
    %310 = arith.negf %309 : vector<1x32xf32>
    %311 = math.exp %310 : vector<1x32xf32>
    %cst_102 = arith.constant 1.000000e+00 : f32
    %312 = vector.broadcast %cst_102 : f32 to vector<1x32xf32>
    %313 = arith.addf %312, %311 : vector<1x32xf32>
    %314 = arith.divf %312, %313 : vector<1x32xf32>
    %315 = vector.extract_strided_slice %304 {offsets = [0, 32], sizes = [1, 32], strides = [1, 1]} : vector<1x96xf32> to vector<1x32xf32>
    %316 = vector.extract_strided_slice %305 {offsets = [0, 32], sizes = [1, 32], strides = [1, 1]} : vector<1x96xf32> to vector<1x32xf32>
    %317 = arith.addf %315, %316 : vector<1x32xf32>
    %318 = arith.negf %317 : vector<1x32xf32>
    %319 = math.exp %318 : vector<1x32xf32>
    %cst_103 = arith.constant 1.000000e+00 : f32
    %320 = vector.broadcast %cst_103 : f32 to vector<1x32xf32>
    %321 = arith.addf %320, %319 : vector<1x32xf32>
    %322 = arith.divf %320, %321 : vector<1x32xf32>
    %323 = vector.extract_strided_slice %304 {offsets = [0, 64], sizes = [1, 32], strides = [1, 1]} : vector<1x96xf32> to vector<1x32xf32>
    %324 = vector.extract_strided_slice %305 {offsets = [0, 64], sizes = [1, 32], strides = [1, 1]} : vector<1x96xf32> to vector<1x32xf32>
    %325 = arith.mulf %314, %324 : vector<1x32xf32>
    %326 = arith.addf %323, %325 : vector<1x32xf32>
    %327 = math.tanh %326 : vector<1x32xf32>
    %cst_104 = arith.constant 1.000000e+00 : f32
    %328 = vector.broadcast %cst_104 : f32 to vector<1x32xf32>
    %329 = arith.subf %328, %322 : vector<1x32xf32>
    %330 = arith.mulf %329, %327 : vector<1x32xf32>
    %331 = arith.mulf %322, %306 : vector<1x32xf32>
    %332 = arith.addf %330, %331 : vector<1x32xf32>
    %333 = tpu.concatenate %303, %332 in 1 : vector<1x32xf32>, vector<1x32xf32> -> vector<1x64xf32>
    %334 = tpu.concatenate %240, %269, %303, %332 in 1 : vector<1x32xf32>, vector<1x32xf32>, vector<1x32xf32>, vector<1x32xf32> -> vector<1x128xf32>
    %c0_105 = arith.constant 0 : index
    %c0_106 = arith.constant 0 : index
    %335 = vector.load %arg12[%c0_105, %c0_106] : memref<64x32xf32, #tpu.memory_space<vmem>>, vector<64x32xf32>
    %cst_107 = arith.constant dense<0.000000e+00> : vector<1x32xf32>
    %336 = tpu.matmul %333, %335, %cst_107 {dimension_numbers = #tpu.dot_dimension_numbers<[1], [0], [0], [1], [0, 0, 1, 1], [], []>} : vector<1x64xf32>, vector<64x32xf32>, vector<1x32xf32> -> vector<1x32xf32>
    %c0_108 = arith.constant 0 : index
    %c0_109 = arith.constant 0 : index
    %337 = vector.load %arg13[%c0_108, %c0_109] : memref<1x32xf32, #tpu.memory_space<vmem>>, vector<1x32xf32>
    %338 = arith.addf %336, %337 : vector<1x32xf32>
    %c0_110 = arith.constant 0 : index
    %c0_111 = arith.constant 0 : index
    %339 = vector.load %arg15[%c0_110, %c0_111] : memref<16x32xf32, #tpu.memory_space<vmem>>, vector<16x32xf32>
    %340 = vector.broadcast %338 : vector<1x32xf32> to vector<16x32xf32>
    %341 = arith.addf %339, %340 : vector<16x32xf32>
    %342 = math.tanh %341 : vector<16x32xf32>
    %c0_112 = arith.constant 0 : index
    %c0_113 = arith.constant 0 : index
    %343 = vector.load %arg14[%c0_112, %c0_113] : memref<1x32xf32, #tpu.memory_space<vmem>>, vector<1x32xf32>
    %344 = tpu.transpose %342, [1, 0] : vector<16x32xf32> -> vector<32x16xf32>
    %cst_114 = arith.constant dense<0.000000e+00> : vector<1x16xf32>
    %345 = tpu.matmul %343, %344, %cst_114 {dimension_numbers = #tpu.dot_dimension_numbers<[1], [0], [0], [1], [0, 0, 1, 1], [], []>} : vector<1x32xf32>, vector<32x16xf32>, vector<1x16xf32> -> vector<1x16xf32>
    %cst_115 = arith.constant dense<0xFF800000> : vector<1xf32>
    %346 = vector.multi_reduction <maximumf>, %345, %cst_115 [1] : vector<1x16xf32> to vector<1xf32>
    %347 = vector.shape_cast %346 : vector<1xf32> to vector<1x1xf32>
    %348 = vector.broadcast %347 : vector<1x1xf32> to vector<1x16xf32>
    %349 = arith.subf %345, %348 : vector<1x16xf32>
    %350 = math.exp %349 : vector<1x16xf32>
    %cst_116 = arith.constant dense<0.000000e+00> : vector<1xf32>
    %351 = vector.multi_reduction <add>, %350, %cst_116 [1] : vector<1x16xf32> to vector<1xf32>
    %352 = vector.shape_cast %351 : vector<1xf32> to vector<1x1xf32>
    %353 = tpu.reciprocal %352 {approx = true} : vector<1x1xf32> -> vector<1x1xf32>
    %354 = vector.broadcast %353 : vector<1x1xf32> to vector<1x16xf32>
    %355 = arith.mulf %350, %354 : vector<1x16xf32>
    %c0_117 = arith.constant 0 : index
    %c0_118 = arith.constant 0 : index
    %356 = vector.load %arg16[%c0_117, %c0_118] : memref<16x64xf32, #tpu.memory_space<vmem>>, vector<16x64xf32>
    %cst_119 = arith.constant dense<0.000000e+00> : vector<1x64xf32>
    %357 = tpu.matmul %355, %356, %cst_119 {dimension_numbers = #tpu.dot_dimension_numbers<[1], [0], [0], [1], [0, 0, 1, 1], [], []>} : vector<1x16xf32>, vector<16x64xf32>, vector<1x64xf32> -> vector<1x64xf32>
    %cst_120 = arith.constant 0.000000e+00 : f32
    %358 = vector.broadcast %cst_120 : f32 to vector<1x64xf32>
    %359 = arith.cmpf ogt, %357, %358 : vector<1x64xf32>
    %cst_121 = arith.constant 0.00999999977 : f32
    %360 = vector.broadcast %cst_121 : f32 to vector<1x64xf32>
    %361 = arith.mulf %360, %357 : vector<1x64xf32>
    %362 = arith.select %359, %357, %361 : vector<1x64xi1>, vector<1x64xf32>
    %cst_122 = arith.constant 0.000000e+00 : f32
    %363 = vector.broadcast %cst_122 : f32 to vector<1x64xf32>
    %364 = arith.cmpf ogt, %362, %363 : vector<1x64xf32>
    %cst_123 = arith.constant 0.00999999977 : f32
    %365 = vector.broadcast %cst_123 : f32 to vector<1x64xf32>
    %366 = arith.mulf %365, %362 : vector<1x64xf32>
    %367 = arith.select %364, %362, %366 : vector<1x64xi1>, vector<1x64xf32>
    %c0_124 = arith.constant 0 : index
    %c0_125 = arith.constant 0 : index
    %368 = vector.load %arg17[%c0_124, %c0_125] : memref<64x32xf32, #tpu.memory_space<vmem>>, vector<64x32xf32>
    %cst_126 = arith.constant dense<0.000000e+00> : vector<1x32xf32>
    %369 = tpu.matmul %367, %368, %cst_126 {dimension_numbers = #tpu.dot_dimension_numbers<[1], [0], [0], [1], [0, 0, 1, 1], [], []>} : vector<1x64xf32>, vector<64x32xf32>, vector<1x32xf32> -> vector<1x32xf32>
    %c0_127 = arith.constant 0 : index
    %c0_128 = arith.constant 0 : index
    %370 = vector.load %arg18[%c0_127, %c0_128] : memref<1x32xf32, #tpu.memory_space<vmem>>, vector<1x32xf32>
    %371 = arith.addf %369, %370 : vector<1x32xf32>
    %cst_129 = arith.constant 0.000000e+00 : f32
    %372 = vector.broadcast %cst_129 : f32 to vector<1x32xf32>
    %373 = arith.cmpf ogt, %371, %372 : vector<1x32xf32>
    %cst_130 = arith.constant 0.00999999977 : f32
    %374 = vector.broadcast %cst_130 : f32 to vector<1x32xf32>
    %375 = arith.mulf %374, %371 : vector<1x32xf32>
    %376 = arith.select %373, %371, %375 : vector<1x32xi1>, vector<1x32xf32>
    %c0_131 = arith.constant 0 : index
    %c0_132 = arith.constant 0 : index
    %377 = vector.load %arg19[%c0_131, %c0_132] : memref<64x16xf32, #tpu.memory_space<vmem>>, vector<64x16xf32>
    %cst_133 = arith.constant dense<0.000000e+00> : vector<1x16xf32>
    %378 = tpu.matmul %367, %377, %cst_133 {dimension_numbers = #tpu.dot_dimension_numbers<[1], [0], [0], [1], [0, 0, 1, 1], [], []>} : vector<1x64xf32>, vector<64x16xf32>, vector<1x16xf32> -> vector<1x16xf32>
    %c0_134 = arith.constant 0 : index
    %c0_135 = arith.constant 0 : index
    %379 = vector.load %arg20[%c0_134, %c0_135] : memref<1x16xf32, #tpu.memory_space<vmem>>, vector<1x16xf32>
    %380 = arith.addf %378, %379 : vector<1x16xf32>
    %c1 = arith.constant 1 : index
    %c0_136 = arith.constant 0 : index
    %c0_137 = arith.constant 0 : index
    %381 = vector.load %arg21[%c1, %c0_136, %c0_137] : memref<7x1x16xf32, #tpu.memory_space<vmem>>, vector<1x1x16xf32>
    %382 = vector.shape_cast %381 : vector<1x1x16xf32> to vector<1x16xf32>
    %383 = vector.shape_cast %380 : vector<1x16xf32> to vector<1x1x16xf32>
    tpu.vector_store %arg21[%c1, %c0_136, %c0_137], %383 {strides = array<i32>} : memref<7x1x16xf32, #tpu.memory_space<vmem>>, vector<1x1x16xf32>,
    %c1_138 = arith.constant 1 : index
    %c0_139 = arith.constant 0 : index
    %c0_140 = arith.constant 0 : index
    %384 = vector.load %arg22[%c1_138, %c0_139, %c0_140] : memref<7x1x32xf32, #tpu.memory_space<vmem>>, vector<1x1x32xf32>
    %385 = vector.shape_cast %384 : vector<1x1x32xf32> to vector<1x32xf32>
    %386 = vector.shape_cast %376 : vector<1x32xf32> to vector<1x1x32xf32>
    tpu.vector_store %arg22[%c1_138, %c0_139, %c0_140], %386 {strides = array<i32>} : memref<7x1x32xf32, #tpu.memory_space<vmem>>, vector<1x1x32xf32>,
    %c1_141 = arith.constant 1 : index
    %c0_142 = arith.constant 0 : index
    %c0_143 = arith.constant 0 : index
    %387 = vector.load %arg23[%c1_141, %c0_142, %c0_143] : memref<7x1x16xf32, #tpu.memory_space<vmem>>, vector<1x1x16xf32>
    %388 = vector.shape_cast %387 : vector<1x1x16xf32> to vector<1x16xf32>
    %389 = vector.shape_cast %355 : vector<1x16xf32> to vector<1x1x16xf32>
    tpu.vector_store %arg23[%c1_141, %c0_142, %c0_143], %389 {strides = array<i32>} : memref<7x1x16xf32, #tpu.memory_space<vmem>>, vector<1x1x16xf32>,
    %c1_144 = arith.constant 1 : index
    %390 = memref.load %arg2[%c1_144] : memref<7xi32, #tpu.memory_space<smem>>
    %c1_i32_145 = arith.constant 1 : i32
    %391 = arith.cmpi eq, %390, %c1_i32_145 : i32
    %392 = arith.extui %391 : i1 to i32
    %c0_i32_146 = arith.constant 0 : i32
    %393 = arith.cmpi ne, %392, %c0_i32_146 : i32
    scf.if %393 {
      %c2_521 = arith.constant 2 : index
      %1383 = memref.load %arg1[%c2_521] : memref<8xi32, #tpu.memory_space<smem>>
      %c0_522 = arith.constant 0 : index
      %1384 = memref.load %arg25[%c0_522] : memref<1xi32, #tpu.memory_space<smem>>
      memref.store %1383, %arg25[%c0_522] : memref<1xi32, #tpu.memory_space<smem>>
    } else {
    }
    %c0_i32_147 = arith.constant 0 : i32
    %394 = arith.cmpi eq, %390, %c0_i32_147 : i32
    %395 = arith.extui %394 : i1 to i32
    %c0_i32_148 = arith.constant 0 : i32
    %396 = arith.cmpi ne, %395, %c0_i32_148 : i32
    scf.if %396 {
      %c0_521 = arith.constant 0 : index
      %c0_522 = arith.constant 0 : index
      %1383 = vector.load %arg4[%c0_521, %c0_522] : memref<16x12xf32, #tpu.memory_space<vmem>>, vector<16x12xf32>
      %cst_523 = arith.constant dense<0.000000e+00> : vector<1x12xf32>
      %1384 = tpu.matmul %380, %1383, %cst_523 {dimension_numbers = #tpu.dot_dimension_numbers<[1], [0], [0], [1], [0, 0, 1, 1], [], []>} : vector<1x16xf32>, vector<16x12xf32>, vector<1x12xf32> -> vector<1x12xf32>
      %cst_524 = arith.constant dense<0xFF800000> : vector<1xf32>
      %1385 = vector.multi_reduction <maximumf>, %1384, %cst_524 [1] : vector<1x12xf32> to vector<1xf32>
      %1386 = vector.shape_cast %1385 : vector<1xf32> to vector<1x1xf32>
      %1387 = tpu.iota {dimensions = array<i32: 1>} : vector<1x12xi32>
      %1388 = vector.broadcast %1386 : vector<1x1xf32> to vector<1x12xf32>
      %1389 = arith.cmpf oge, %1384, %1388 : vector<1x12xf32>
      %c12_i32 = arith.constant 12 : i32
      %1390 = vector.broadcast %c12_i32 : i32 to vector<1x12xi32>
      %1391 = arith.select %1389, %1387, %1390 : vector<1x12xi1>, vector<1x12xi32>
      %1392 = vector.shape_cast %1391 : vector<1x12xi32> to vector<1x1x12xi32>
      %cst_525 = arith.constant dense<2147483647> : vector<1xi32>
      %1393 = vector.multi_reduction <minsi>, %1392, %cst_525 [1, 2] : vector<1x1x12xi32> to vector<1xi32>
      %1394 = vector.shape_cast %1393 : vector<1xi32> to vector<1x1x1xi32>
      %1395 = vector.extract %1394[0, 0, 0] : i32 from vector<1x1x1xi32>
      %c0_526 = arith.constant 0 : index
      %1396 = memref.load %arg25[%c0_526] : memref<1xi32, #tpu.memory_space<smem>>
      memref.store %1395, %arg25[%c0_526] : memref<1xi32, #tpu.memory_space<smem>>
    } else {
    }
    %c0_149 = arith.constant 0 : index
    %397 = memref.load %arg25[%c0_149] : memref<1xi32, #tpu.memory_space<smem>>
    %398 = arith.index_cast %397 : i32 to index
    %c0_150 = arith.constant 0 : index
    %c0_151 = arith.constant 0 : index
    %399 = vector.load %arg3[%398, %c0_150, %c0_151] : memref<12x1x16xf32, #tpu.memory_space<vmem>>, vector<1x1x16xf32>
    %400 = vector.shape_cast %399 : vector<1x1x16xf32> to vector<1x16xf32>
    %c0_152 = arith.constant 0 : index
    %c0_153 = arith.constant 0 : index
    %401 = vector.load %arg10[%c0_152, %c0_153] : memref<128x384xf32, #tpu.memory_space<vmem>>, vector<128x384xf32>
    %cst_154 = arith.constant dense<0.000000e+00> : vector<1x384xf32>
    %402 = tpu.matmul %334, %401, %cst_154 {dimension_numbers = #tpu.dot_dimension_numbers<[1], [0], [0], [1], [0, 0, 1, 1], [], []>} : vector<1x128xf32>, vector<128x384xf32>, vector<1x384xf32> -> vector<1x384xf32>
    %c0_155 = arith.constant 0 : index
    %c0_156 = arith.constant 0 : index
    %403 = vector.load %arg11[%c0_155, %c0_156] : memref<1x384xf32, #tpu.memory_space<vmem>>, vector<1x384xf32>
    %404 = arith.addf %402, %403 : vector<1x384xf32>
    %c0_157 = arith.constant 0 : index
    %c0_158 = arith.constant 0 : index
    %405 = vector.load %arg6[%c0_157, %c0_158] : memref<16x192xf32, #tpu.memory_space<vmem>>, vector<16x192xf32>
    %cst_159 = arith.constant dense<0.000000e+00> : vector<1x192xf32>
    %406 = tpu.matmul %400, %405, %cst_159 {dimension_numbers = #tpu.dot_dimension_numbers<[1], [0], [0], [1], [0, 0, 1, 1], [], []>} : vector<1x16xf32>, vector<16x192xf32>, vector<1x192xf32> -> vector<1x192xf32>
    %c0_160 = arith.constant 0 : index
    %c0_161 = arith.constant 0 : index
    %407 = vector.load %arg7[%c0_160, %c0_161] : memref<1x192xf32, #tpu.memory_space<vmem>>, vector<1x192xf32>
    %408 = arith.addf %406, %407 : vector<1x192xf32>
    %409 = vector.extract_strided_slice %408 {offsets = [0, 0], sizes = [1, 96], strides = [1, 1]} : vector<1x192xf32> to vector<1x96xf32>
    %410 = vector.extract_strided_slice %404 {offsets = [0, 0], sizes = [1, 96], strides = [1, 1]} : vector<1x384xf32> to vector<1x96xf32>
    %411 = vector.extract_strided_slice %334 {offsets = [0, 0], sizes = [1, 32], strides = [1, 1]} : vector<1x128xf32> to vector<1x32xf32>
    %412 = vector.extract_strided_slice %409 {offsets = [0, 0], sizes = [1, 32], strides = [1, 1]} : vector<1x96xf32> to vector<1x32xf32>
    %413 = vector.extract_strided_slice %410 {offsets = [0, 0], sizes = [1, 32], strides = [1, 1]} : vector<1x96xf32> to vector<1x32xf32>
    %414 = arith.addf %412, %413 : vector<1x32xf32>
    %415 = arith.negf %414 : vector<1x32xf32>
    %416 = math.exp %415 : vector<1x32xf32>
    %cst_162 = arith.constant 1.000000e+00 : f32
    %417 = vector.broadcast %cst_162 : f32 to vector<1x32xf32>
    %418 = arith.addf %417, %416 : vector<1x32xf32>
    %419 = arith.divf %417, %418 : vector<1x32xf32>
    %420 = vector.extract_strided_slice %409 {offsets = [0, 32], sizes = [1, 32], strides = [1, 1]} : vector<1x96xf32> to vector<1x32xf32>
    %421 = vector.extract_strided_slice %410 {offsets = [0, 32], sizes = [1, 32], strides = [1, 1]} : vector<1x96xf32> to vector<1x32xf32>
    %422 = arith.addf %420, %421 : vector<1x32xf32>
    %423 = arith.negf %422 : vector<1x32xf32>
    %424 = math.exp %423 : vector<1x32xf32>
    %cst_163 = arith.constant 1.000000e+00 : f32
    %425 = vector.broadcast %cst_163 : f32 to vector<1x32xf32>
    %426 = arith.addf %425, %424 : vector<1x32xf32>
    %427 = arith.divf %425, %426 : vector<1x32xf32>
    %428 = vector.extract_strided_slice %409 {offsets = [0, 64], sizes = [1, 32], strides = [1, 1]} : vector<1x96xf32> to vector<1x32xf32>
    %429 = vector.extract_strided_slice %410 {offsets = [0, 64], sizes = [1, 32], strides = [1, 1]} : vector<1x96xf32> to vector<1x32xf32>
    %430 = arith.mulf %419, %429 : vector<1x32xf32>
    %431 = arith.addf %428, %430 : vector<1x32xf32>
    %432 = math.tanh %431 : vector<1x32xf32>
    %cst_164 = arith.constant 1.000000e+00 : f32
    %433 = vector.broadcast %cst_164 : f32 to vector<1x32xf32>
    %434 = arith.subf %433, %427 : vector<1x32xf32>
    %435 = arith.mulf %434, %432 : vector<1x32xf32>
    %436 = arith.mulf %427, %411 : vector<1x32xf32>
    %437 = arith.addf %435, %436 : vector<1x32xf32>
    %438 = vector.extract_strided_slice %408 {offsets = [0, 96], sizes = [1, 96], strides = [1, 1]} : vector<1x192xf32> to vector<1x96xf32>
    %439 = vector.extract_strided_slice %404 {offsets = [0, 96], sizes = [1, 96], strides = [1, 1]} : vector<1x384xf32> to vector<1x96xf32>
    %440 = vector.extract_strided_slice %334 {offsets = [0, 32], sizes = [1, 32], strides = [1, 1]} : vector<1x128xf32> to vector<1x32xf32>
    %441 = vector.extract_strided_slice %438 {offsets = [0, 0], sizes = [1, 32], strides = [1, 1]} : vector<1x96xf32> to vector<1x32xf32>
    %442 = vector.extract_strided_slice %439 {offsets = [0, 0], sizes = [1, 32], strides = [1, 1]} : vector<1x96xf32> to vector<1x32xf32>
    %443 = arith.addf %441, %442 : vector<1x32xf32>
    %444 = arith.negf %443 : vector<1x32xf32>
    %445 = math.exp %444 : vector<1x32xf32>
    %cst_165 = arith.constant 1.000000e+00 : f32
    %446 = vector.broadcast %cst_165 : f32 to vector<1x32xf32>
    %447 = arith.addf %446, %445 : vector<1x32xf32>
    %448 = arith.divf %446, %447 : vector<1x32xf32>
    %449 = vector.extract_strided_slice %438 {offsets = [0, 32], sizes = [1, 32], strides = [1, 1]} : vector<1x96xf32> to vector<1x32xf32>
    %450 = vector.extract_strided_slice %439 {offsets = [0, 32], sizes = [1, 32], strides = [1, 1]} : vector<1x96xf32> to vector<1x32xf32>
    %451 = arith.addf %449, %450 : vector<1x32xf32>
    %452 = arith.negf %451 : vector<1x32xf32>
    %453 = math.exp %452 : vector<1x32xf32>
    %cst_166 = arith.constant 1.000000e+00 : f32
    %454 = vector.broadcast %cst_166 : f32 to vector<1x32xf32>
    %455 = arith.addf %454, %453 : vector<1x32xf32>
    %456 = arith.divf %454, %455 : vector<1x32xf32>
    %457 = vector.extract_strided_slice %438 {offsets = [0, 64], sizes = [1, 32], strides = [1, 1]} : vector<1x96xf32> to vector<1x32xf32>
    %458 = vector.extract_strided_slice %439 {offsets = [0, 64], sizes = [1, 32], strides = [1, 1]} : vector<1x96xf32> to vector<1x32xf32>
    %459 = arith.mulf %448, %458 : vector<1x32xf32>
    %460 = arith.addf %457, %459 : vector<1x32xf32>
    %461 = math.tanh %460 : vector<1x32xf32>
    %cst_167 = arith.constant 1.000000e+00 : f32
    %462 = vector.broadcast %cst_167 : f32 to vector<1x32xf32>
    %463 = arith.subf %462, %456 : vector<1x32xf32>
    %464 = arith.mulf %463, %461 : vector<1x32xf32>
    %465 = arith.mulf %456, %440 : vector<1x32xf32>
    %466 = arith.addf %464, %465 : vector<1x32xf32>
    %467 = tpu.concatenate %437, %466 in 1 : vector<1x32xf32>, vector<1x32xf32> -> vector<1x64xf32>
    %c0_168 = arith.constant 0 : index
    %c0_169 = arith.constant 0 : index
    %468 = vector.load %arg8[%c0_168, %c0_169] : memref<64x192xf32, #tpu.memory_space<vmem>>, vector<64x192xf32>
    %cst_170 = arith.constant dense<0.000000e+00> : vector<1x192xf32>
    %469 = tpu.matmul %467, %468, %cst_170 {dimension_numbers = #tpu.dot_dimension_numbers<[1], [0], [0], [1], [0, 0, 1, 1], [], []>} : vector<1x64xf32>, vector<64x192xf32>, vector<1x192xf32> -> vector<1x192xf32>
    %c0_171 = arith.constant 0 : index
    %c0_172 = arith.constant 0 : index
    %470 = vector.load %arg9[%c0_171, %c0_172] : memref<1x192xf32, #tpu.memory_space<vmem>>, vector<1x192xf32>
    %471 = arith.addf %469, %470 : vector<1x192xf32>
    %472 = vector.extract_strided_slice %471 {offsets = [0, 0], sizes = [1, 96], strides = [1, 1]} : vector<1x192xf32> to vector<1x96xf32>
    %473 = vector.extract_strided_slice %404 {offsets = [0, 192], sizes = [1, 96], strides = [1, 1]} : vector<1x384xf32> to vector<1x96xf32>
    %474 = vector.extract_strided_slice %334 {offsets = [0, 64], sizes = [1, 32], strides = [1, 1]} : vector<1x128xf32> to vector<1x32xf32>
    %475 = vector.extract_strided_slice %472 {offsets = [0, 0], sizes = [1, 32], strides = [1, 1]} : vector<1x96xf32> to vector<1x32xf32>
    %476 = vector.extract_strided_slice %473 {offsets = [0, 0], sizes = [1, 32], strides = [1, 1]} : vector<1x96xf32> to vector<1x32xf32>
    %477 = arith.addf %475, %476 : vector<1x32xf32>
    %478 = arith.negf %477 : vector<1x32xf32>
    %479 = math.exp %478 : vector<1x32xf32>
    %cst_173 = arith.constant 1.000000e+00 : f32
    %480 = vector.broadcast %cst_173 : f32 to vector<1x32xf32>
    %481 = arith.addf %480, %479 : vector<1x32xf32>
    %482 = arith.divf %480, %481 : vector<1x32xf32>
    %483 = vector.extract_strided_slice %472 {offsets = [0, 32], sizes = [1, 32], strides = [1, 1]} : vector<1x96xf32> to vector<1x32xf32>
    %484 = vector.extract_strided_slice %473 {offsets = [0, 32], sizes = [1, 32], strides = [1, 1]} : vector<1x96xf32> to vector<1x32xf32>
    %485 = arith.addf %483, %484 : vector<1x32xf32>
    %486 = arith.negf %485 : vector<1x32xf32>
    %487 = math.exp %486 : vector<1x32xf32>
    %cst_174 = arith.constant 1.000000e+00 : f32
    %488 = vector.broadcast %cst_174 : f32 to vector<1x32xf32>
    %489 = arith.addf %488, %487 : vector<1x32xf32>
    %490 = arith.divf %488, %489 : vector<1x32xf32>
    %491 = vector.extract_strided_slice %472 {offsets = [0, 64], sizes = [1, 32], strides = [1, 1]} : vector<1x96xf32> to vector<1x32xf32>
    %492 = vector.extract_strided_slice %473 {offsets = [0, 64], sizes = [1, 32], strides = [1, 1]} : vector<1x96xf32> to vector<1x32xf32>
    %493 = arith.mulf %482, %492 : vector<1x32xf32>
    %494 = arith.addf %491, %493 : vector<1x32xf32>
    %495 = math.tanh %494 : vector<1x32xf32>
    %cst_175 = arith.constant 1.000000e+00 : f32
    %496 = vector.broadcast %cst_175 : f32 to vector<1x32xf32>
    %497 = arith.subf %496, %490 : vector<1x32xf32>
    %498 = arith.mulf %497, %495 : vector<1x32xf32>
    %499 = arith.mulf %490, %474 : vector<1x32xf32>
    %500 = arith.addf %498, %499 : vector<1x32xf32>
    %501 = vector.extract_strided_slice %471 {offsets = [0, 96], sizes = [1, 96], strides = [1, 1]} : vector<1x192xf32> to vector<1x96xf32>
    %502 = vector.extract_strided_slice %404 {offsets = [0, 288], sizes = [1, 96], strides = [1, 1]} : vector<1x384xf32> to vector<1x96xf32>
    %503 = vector.extract_strided_slice %334 {offsets = [0, 96], sizes = [1, 32], strides = [1, 1]} : vector<1x128xf32> to vector<1x32xf32>
    %504 = vector.extract_strided_slice %501 {offsets = [0, 0], sizes = [1, 32], strides = [1, 1]} : vector<1x96xf32> to vector<1x32xf32>
    %505 = vector.extract_strided_slice %502 {offsets = [0, 0], sizes = [1, 32], strides = [1, 1]} : vector<1x96xf32> to vector<1x32xf32>
    %506 = arith.addf %504, %505 : vector<1x32xf32>
    %507 = arith.negf %506 : vector<1x32xf32>
    %508 = math.exp %507 : vector<1x32xf32>
    %cst_176 = arith.constant 1.000000e+00 : f32
    %509 = vector.broadcast %cst_176 : f32 to vector<1x32xf32>
    %510 = arith.addf %509, %508 : vector<1x32xf32>
    %511 = arith.divf %509, %510 : vector<1x32xf32>
    %512 = vector.extract_strided_slice %501 {offsets = [0, 32], sizes = [1, 32], strides = [1, 1]} : vector<1x96xf32> to vector<1x32xf32>
    %513 = vector.extract_strided_slice %502 {offsets = [0, 32], sizes = [1, 32], strides = [1, 1]} : vector<1x96xf32> to vector<1x32xf32>
    %514 = arith.addf %512, %513 : vector<1x32xf32>
    %515 = arith.negf %514 : vector<1x32xf32>
    %516 = math.exp %515 : vector<1x32xf32>
    %cst_177 = arith.constant 1.000000e+00 : f32
    %517 = vector.broadcast %cst_177 : f32 to vector<1x32xf32>
    %518 = arith.addf %517, %516 : vector<1x32xf32>
    %519 = arith.divf %517, %518 : vector<1x32xf32>
    %520 = vector.extract_strided_slice %501 {offsets = [0, 64], sizes = [1, 32], strides = [1, 1]} : vector<1x96xf32> to vector<1x32xf32>
    %521 = vector.extract_strided_slice %502 {offsets = [0, 64], sizes = [1, 32], strides = [1, 1]} : vector<1x96xf32> to vector<1x32xf32>
    %522 = arith.mulf %511, %521 : vector<1x32xf32>
    %523 = arith.addf %520, %522 : vector<1x32xf32>
    %524 = math.tanh %523 : vector<1x32xf32>
    %cst_178 = arith.constant 1.000000e+00 : f32
    %525 = vector.broadcast %cst_178 : f32 to vector<1x32xf32>
    %526 = arith.subf %525, %519 : vector<1x32xf32>
    %527 = arith.mulf %526, %524 : vector<1x32xf32>
    %528 = arith.mulf %519, %503 : vector<1x32xf32>
    %529 = arith.addf %527, %528 : vector<1x32xf32>
    %530 = tpu.concatenate %500, %529 in 1 : vector<1x32xf32>, vector<1x32xf32> -> vector<1x64xf32>
    %531 = tpu.concatenate %437, %466, %500, %529 in 1 : vector<1x32xf32>, vector<1x32xf32>, vector<1x32xf32>, vector<1x32xf32> -> vector<1x128xf32>
    %c0_179 = arith.constant 0 : index
    %c0_180 = arith.constant 0 : index
    %532 = vector.load %arg12[%c0_179, %c0_180] : memref<64x32xf32, #tpu.memory_space<vmem>>, vector<64x32xf32>
    %cst_181 = arith.constant dense<0.000000e+00> : vector<1x32xf32>
    %533 = tpu.matmul %530, %532, %cst_181 {dimension_numbers = #tpu.dot_dimension_numbers<[1], [0], [0], [1], [0, 0, 1, 1], [], []>} : vector<1x64xf32>, vector<64x32xf32>, vector<1x32xf32> -> vector<1x32xf32>
    %c0_182 = arith.constant 0 : index
    %c0_183 = arith.constant 0 : index
    %534 = vector.load %arg13[%c0_182, %c0_183] : memref<1x32xf32, #tpu.memory_space<vmem>>, vector<1x32xf32>
    %535 = arith.addf %533, %534 : vector<1x32xf32>
    %c0_184 = arith.constant 0 : index
    %c0_185 = arith.constant 0 : index
    %536 = vector.load %arg15[%c0_184, %c0_185] : memref<16x32xf32, #tpu.memory_space<vmem>>, vector<16x32xf32>
    %537 = vector.broadcast %535 : vector<1x32xf32> to vector<16x32xf32>
    %538 = arith.addf %536, %537 : vector<16x32xf32>
    %539 = math.tanh %538 : vector<16x32xf32>
    %c0_186 = arith.constant 0 : index
    %c0_187 = arith.constant 0 : index
    %540 = vector.load %arg14[%c0_186, %c0_187] : memref<1x32xf32, #tpu.memory_space<vmem>>, vector<1x32xf32>
    %541 = tpu.transpose %539, [1, 0] : vector<16x32xf32> -> vector<32x16xf32>
    %cst_188 = arith.constant dense<0.000000e+00> : vector<1x16xf32>
    %542 = tpu.matmul %540, %541, %cst_188 {dimension_numbers = #tpu.dot_dimension_numbers<[1], [0], [0], [1], [0, 0, 1, 1], [], []>} : vector<1x32xf32>, vector<32x16xf32>, vector<1x16xf32> -> vector<1x16xf32>
    %cst_189 = arith.constant dense<0xFF800000> : vector<1xf32>
    %543 = vector.multi_reduction <maximumf>, %542, %cst_189 [1] : vector<1x16xf32> to vector<1xf32>
    %544 = vector.shape_cast %543 : vector<1xf32> to vector<1x1xf32>
    %545 = vector.broadcast %544 : vector<1x1xf32> to vector<1x16xf32>
    %546 = arith.subf %542, %545 : vector<1x16xf32>
    %547 = math.exp %546 : vector<1x16xf32>
    %cst_190 = arith.constant dense<0.000000e+00> : vector<1xf32>
    %548 = vector.multi_reduction <add>, %547, %cst_190 [1] : vector<1x16xf32> to vector<1xf32>
    %549 = vector.shape_cast %548 : vector<1xf32> to vector<1x1xf32>
    %550 = tpu.reciprocal %549 {approx = true} : vector<1x1xf32> -> vector<1x1xf32>
    %551 = vector.broadcast %550 : vector<1x1xf32> to vector<1x16xf32>
    %552 = arith.mulf %547, %551 : vector<1x16xf32>
    %c0_191 = arith.constant 0 : index
    %c0_192 = arith.constant 0 : index
    %553 = vector.load %arg16[%c0_191, %c0_192] : memref<16x64xf32, #tpu.memory_space<vmem>>, vector<16x64xf32>
    %cst_193 = arith.constant dense<0.000000e+00> : vector<1x64xf32>
    %554 = tpu.matmul %552, %553, %cst_193 {dimension_numbers = #tpu.dot_dimension_numbers<[1], [0], [0], [1], [0, 0, 1, 1], [], []>} : vector<1x16xf32>, vector<16x64xf32>, vector<1x64xf32> -> vector<1x64xf32>
    %cst_194 = arith.constant 0.000000e+00 : f32
    %555 = vector.broadcast %cst_194 : f32 to vector<1x64xf32>
    %556 = arith.cmpf ogt, %554, %555 : vector<1x64xf32>
    %cst_195 = arith.constant 0.00999999977 : f32
    %557 = vector.broadcast %cst_195 : f32 to vector<1x64xf32>
    %558 = arith.mulf %557, %554 : vector<1x64xf32>
    %559 = arith.select %556, %554, %558 : vector<1x64xi1>, vector<1x64xf32>
    %cst_196 = arith.constant 0.000000e+00 : f32
    %560 = vector.broadcast %cst_196 : f32 to vector<1x64xf32>
    %561 = arith.cmpf ogt, %559, %560 : vector<1x64xf32>
    %cst_197 = arith.constant 0.00999999977 : f32
    %562 = vector.broadcast %cst_197 : f32 to vector<1x64xf32>
    %563 = arith.mulf %562, %559 : vector<1x64xf32>
    %564 = arith.select %561, %559, %563 : vector<1x64xi1>, vector<1x64xf32>
    %c0_198 = arith.constant 0 : index
    %c0_199 = arith.constant 0 : index
    %565 = vector.load %arg17[%c0_198, %c0_199] : memref<64x32xf32, #tpu.memory_space<vmem>>, vector<64x32xf32>
    %cst_200 = arith.constant dense<0.000000e+00> : vector<1x32xf32>
    %566 = tpu.matmul %564, %565, %cst_200 {dimension_numbers = #tpu.dot_dimension_numbers<[1], [0], [0], [1], [0, 0, 1, 1], [], []>} : vector<1x64xf32>, vector<64x32xf32>, vector<1x32xf32> -> vector<1x32xf32>
    %c0_201 = arith.constant 0 : index
    %c0_202 = arith.constant 0 : index
    %567 = vector.load %arg18[%c0_201, %c0_202] : memref<1x32xf32, #tpu.memory_space<vmem>>, vector<1x32xf32>
    %568 = arith.addf %566, %567 : vector<1x32xf32>
    %cst_203 = arith.constant 0.000000e+00 : f32
    %569 = vector.broadcast %cst_203 : f32 to vector<1x32xf32>
    %570 = arith.cmpf ogt, %568, %569 : vector<1x32xf32>
    %cst_204 = arith.constant 0.00999999977 : f32
    %571 = vector.broadcast %cst_204 : f32 to vector<1x32xf32>
    %572 = arith.mulf %571, %568 : vector<1x32xf32>
    %573 = arith.select %570, %568, %572 : vector<1x32xi1>, vector<1x32xf32>
    %c0_205 = arith.constant 0 : index
    %c0_206 = arith.constant 0 : index
    %574 = vector.load %arg19[%c0_205, %c0_206] : memref<64x16xf32, #tpu.memory_space<vmem>>, vector<64x16xf32>
    %cst_207 = arith.constant dense<0.000000e+00> : vector<1x16xf32>
    %575 = tpu.matmul %564, %574, %cst_207 {dimension_numbers = #tpu.dot_dimension_numbers<[1], [0], [0], [1], [0, 0, 1, 1], [], []>} : vector<1x64xf32>, vector<64x16xf32>, vector<1x16xf32> -> vector<1x16xf32>
    %c0_208 = arith.constant 0 : index
    %c0_209 = arith.constant 0 : index
    %576 = vector.load %arg20[%c0_208, %c0_209] : memref<1x16xf32, #tpu.memory_space<vmem>>, vector<1x16xf32>
    %577 = arith.addf %575, %576 : vector<1x16xf32>
    %c2 = arith.constant 2 : index
    %c0_210 = arith.constant 0 : index
    %c0_211 = arith.constant 0 : index
    %578 = vector.load %arg21[%c2, %c0_210, %c0_211] : memref<7x1x16xf32, #tpu.memory_space<vmem>>, vector<1x1x16xf32>
    %579 = vector.shape_cast %578 : vector<1x1x16xf32> to vector<1x16xf32>
    %580 = vector.shape_cast %577 : vector<1x16xf32> to vector<1x1x16xf32>
    tpu.vector_store %arg21[%c2, %c0_210, %c0_211], %580 {strides = array<i32>} : memref<7x1x16xf32, #tpu.memory_space<vmem>>, vector<1x1x16xf32>,
    %c2_212 = arith.constant 2 : index
    %c0_213 = arith.constant 0 : index
    %c0_214 = arith.constant 0 : index
    %581 = vector.load %arg22[%c2_212, %c0_213, %c0_214] : memref<7x1x32xf32, #tpu.memory_space<vmem>>, vector<1x1x32xf32>
    %582 = vector.shape_cast %581 : vector<1x1x32xf32> to vector<1x32xf32>
    %583 = vector.shape_cast %573 : vector<1x32xf32> to vector<1x1x32xf32>
    tpu.vector_store %arg22[%c2_212, %c0_213, %c0_214], %583 {strides = array<i32>} : memref<7x1x32xf32, #tpu.memory_space<vmem>>, vector<1x1x32xf32>,
    %c2_215 = arith.constant 2 : index
    %c0_216 = arith.constant 0 : index
    %c0_217 = arith.constant 0 : index
    %584 = vector.load %arg23[%c2_215, %c0_216, %c0_217] : memref<7x1x16xf32, #tpu.memory_space<vmem>>, vector<1x1x16xf32>
    %585 = vector.shape_cast %584 : vector<1x1x16xf32> to vector<1x16xf32>
    %586 = vector.shape_cast %552 : vector<1x16xf32> to vector<1x1x16xf32>
    tpu.vector_store %arg23[%c2_215, %c0_216, %c0_217], %586 {strides = array<i32>} : memref<7x1x16xf32, #tpu.memory_space<vmem>>, vector<1x1x16xf32>,
    %c2_218 = arith.constant 2 : index
    %587 = memref.load %arg2[%c2_218] : memref<7xi32, #tpu.memory_space<smem>>
    %c1_i32_219 = arith.constant 1 : i32
    %588 = arith.cmpi eq, %587, %c1_i32_219 : i32
    %589 = arith.extui %588 : i1 to i32
    %c0_i32_220 = arith.constant 0 : i32
    %590 = arith.cmpi ne, %589, %c0_i32_220 : i32
    scf.if %590 {
      %c3_521 = arith.constant 3 : index
      %1383 = memref.load %arg1[%c3_521] : memref<8xi32, #tpu.memory_space<smem>>
      %c0_522 = arith.constant 0 : index
      %1384 = memref.load %arg25[%c0_522] : memref<1xi32, #tpu.memory_space<smem>>
      memref.store %1383, %arg25[%c0_522] : memref<1xi32, #tpu.memory_space<smem>>
    } else {
    }
    %c0_i32_221 = arith.constant 0 : i32
    %591 = arith.cmpi eq, %587, %c0_i32_221 : i32
    %592 = arith.extui %591 : i1 to i32
    %c0_i32_222 = arith.constant 0 : i32
    %593 = arith.cmpi ne, %592, %c0_i32_222 : i32
    scf.if %593 {
      %c0_521 = arith.constant 0 : index
      %c0_522 = arith.constant 0 : index
      %1383 = vector.load %arg4[%c0_521, %c0_522] : memref<16x12xf32, #tpu.memory_space<vmem>>, vector<16x12xf32>
      %cst_523 = arith.constant dense<0.000000e+00> : vector<1x12xf32>
      %1384 = tpu.matmul %577, %1383, %cst_523 {dimension_numbers = #tpu.dot_dimension_numbers<[1], [0], [0], [1], [0, 0, 1, 1], [], []>} : vector<1x16xf32>, vector<16x12xf32>, vector<1x12xf32> -> vector<1x12xf32>
      %cst_524 = arith.constant dense<0xFF800000> : vector<1xf32>
      %1385 = vector.multi_reduction <maximumf>, %1384, %cst_524 [1] : vector<1x12xf32> to vector<1xf32>
      %1386 = vector.shape_cast %1385 : vector<1xf32> to vector<1x1xf32>
      %1387 = tpu.iota {dimensions = array<i32: 1>} : vector<1x12xi32>
      %1388 = vector.broadcast %1386 : vector<1x1xf32> to vector<1x12xf32>
      %1389 = arith.cmpf oge, %1384, %1388 : vector<1x12xf32>
      %c12_i32 = arith.constant 12 : i32
      %1390 = vector.broadcast %c12_i32 : i32 to vector<1x12xi32>
      %1391 = arith.select %1389, %1387, %1390 : vector<1x12xi1>, vector<1x12xi32>
      %1392 = vector.shape_cast %1391 : vector<1x12xi32> to vector<1x1x12xi32>
      %cst_525 = arith.constant dense<2147483647> : vector<1xi32>
      %1393 = vector.multi_reduction <minsi>, %1392, %cst_525 [1, 2] : vector<1x1x12xi32> to vector<1xi32>
      %1394 = vector.shape_cast %1393 : vector<1xi32> to vector<1x1x1xi32>
      %1395 = vector.extract %1394[0, 0, 0] : i32 from vector<1x1x1xi32>
      %c0_526 = arith.constant 0 : index
      %1396 = memref.load %arg25[%c0_526] : memref<1xi32, #tpu.memory_space<smem>>
      memref.store %1395, %arg25[%c0_526] : memref<1xi32, #tpu.memory_space<smem>>
    } else {
    }
    %c0_223 = arith.constant 0 : index
    %594 = memref.load %arg25[%c0_223] : memref<1xi32, #tpu.memory_space<smem>>
    %595 = arith.index_cast %594 : i32 to index
    %c0_224 = arith.constant 0 : index
    %c0_225 = arith.constant 0 : index
    %596 = vector.load %arg3[%595, %c0_224, %c0_225] : memref<12x1x16xf32, #tpu.memory_space<vmem>>, vector<1x1x16xf32>
    %597 = vector.shape_cast %596 : vector<1x1x16xf32> to vector<1x16xf32>
    %c0_226 = arith.constant 0 : index
    %c0_227 = arith.constant 0 : index
    %598 = vector.load %arg10[%c0_226, %c0_227] : memref<128x384xf32, #tpu.memory_space<vmem>>, vector<128x384xf32>
    %cst_228 = arith.constant dense<0.000000e+00> : vector<1x384xf32>
    %599 = tpu.matmul %531, %598, %cst_228 {dimension_numbers = #tpu.dot_dimension_numbers<[1], [0], [0], [1], [0, 0, 1, 1], [], []>} : vector<1x128xf32>, vector<128x384xf32>, vector<1x384xf32> -> vector<1x384xf32>
    %c0_229 = arith.constant 0 : index
    %c0_230 = arith.constant 0 : index
    %600 = vector.load %arg11[%c0_229, %c0_230] : memref<1x384xf32, #tpu.memory_space<vmem>>, vector<1x384xf32>
    %601 = arith.addf %599, %600 : vector<1x384xf32>
    %c0_231 = arith.constant 0 : index
    %c0_232 = arith.constant 0 : index
    %602 = vector.load %arg6[%c0_231, %c0_232] : memref<16x192xf32, #tpu.memory_space<vmem>>, vector<16x192xf32>
    %cst_233 = arith.constant dense<0.000000e+00> : vector<1x192xf32>
    %603 = tpu.matmul %597, %602, %cst_233 {dimension_numbers = #tpu.dot_dimension_numbers<[1], [0], [0], [1], [0, 0, 1, 1], [], []>} : vector<1x16xf32>, vector<16x192xf32>, vector<1x192xf32> -> vector<1x192xf32>
    %c0_234 = arith.constant 0 : index
    %c0_235 = arith.constant 0 : index
    %604 = vector.load %arg7[%c0_234, %c0_235] : memref<1x192xf32, #tpu.memory_space<vmem>>, vector<1x192xf32>
    %605 = arith.addf %603, %604 : vector<1x192xf32>
    %606 = vector.extract_strided_slice %605 {offsets = [0, 0], sizes = [1, 96], strides = [1, 1]} : vector<1x192xf32> to vector<1x96xf32>
    %607 = vector.extract_strided_slice %601 {offsets = [0, 0], sizes = [1, 96], strides = [1, 1]} : vector<1x384xf32> to vector<1x96xf32>
    %608 = vector.extract_strided_slice %531 {offsets = [0, 0], sizes = [1, 32], strides = [1, 1]} : vector<1x128xf32> to vector<1x32xf32>
    %609 = vector.extract_strided_slice %606 {offsets = [0, 0], sizes = [1, 32], strides = [1, 1]} : vector<1x96xf32> to vector<1x32xf32>
    %610 = vector.extract_strided_slice %607 {offsets = [0, 0], sizes = [1, 32], strides = [1, 1]} : vector<1x96xf32> to vector<1x32xf32>
    %611 = arith.addf %609, %610 : vector<1x32xf32>
    %612 = arith.negf %611 : vector<1x32xf32>
    %613 = math.exp %612 : vector<1x32xf32>
    %cst_236 = arith.constant 1.000000e+00 : f32
    %614 = vector.broadcast %cst_236 : f32 to vector<1x32xf32>
    %615 = arith.addf %614, %613 : vector<1x32xf32>
    %616 = arith.divf %614, %615 : vector<1x32xf32>
    %617 = vector.extract_strided_slice %606 {offsets = [0, 32], sizes = [1, 32], strides = [1, 1]} : vector<1x96xf32> to vector<1x32xf32>
    %618 = vector.extract_strided_slice %607 {offsets = [0, 32], sizes = [1, 32], strides = [1, 1]} : vector<1x96xf32> to vector<1x32xf32>
    %619 = arith.addf %617, %618 : vector<1x32xf32>
    %620 = arith.negf %619 : vector<1x32xf32>
    %621 = math.exp %620 : vector<1x32xf32>
    %cst_237 = arith.constant 1.000000e+00 : f32
    %622 = vector.broadcast %cst_237 : f32 to vector<1x32xf32>
    %623 = arith.addf %622, %621 : vector<1x32xf32>
    %624 = arith.divf %622, %623 : vector<1x32xf32>
    %625 = vector.extract_strided_slice %606 {offsets = [0, 64], sizes = [1, 32], strides = [1, 1]} : vector<1x96xf32> to vector<1x32xf32>
    %626 = vector.extract_strided_slice %607 {offsets = [0, 64], sizes = [1, 32], strides = [1, 1]} : vector<1x96xf32> to vector<1x32xf32>
    %627 = arith.mulf %616, %626 : vector<1x32xf32>
    %628 = arith.addf %625, %627 : vector<1x32xf32>
    %629 = math.tanh %628 : vector<1x32xf32>
    %cst_238 = arith.constant 1.000000e+00 : f32
    %630 = vector.broadcast %cst_238 : f32 to vector<1x32xf32>
    %631 = arith.subf %630, %624 : vector<1x32xf32>
    %632 = arith.mulf %631, %629 : vector<1x32xf32>
    %633 = arith.mulf %624, %608 : vector<1x32xf32>
    %634 = arith.addf %632, %633 : vector<1x32xf32>
    %635 = vector.extract_strided_slice %605 {offsets = [0, 96], sizes = [1, 96], strides = [1, 1]} : vector<1x192xf32> to vector<1x96xf32>
    %636 = vector.extract_strided_slice %601 {offsets = [0, 96], sizes = [1, 96], strides = [1, 1]} : vector<1x384xf32> to vector<1x96xf32>
    %637 = vector.extract_strided_slice %531 {offsets = [0, 32], sizes = [1, 32], strides = [1, 1]} : vector<1x128xf32> to vector<1x32xf32>
    %638 = vector.extract_strided_slice %635 {offsets = [0, 0], sizes = [1, 32], strides = [1, 1]} : vector<1x96xf32> to vector<1x32xf32>
    %639 = vector.extract_strided_slice %636 {offsets = [0, 0], sizes = [1, 32], strides = [1, 1]} : vector<1x96xf32> to vector<1x32xf32>
    %640 = arith.addf %638, %639 : vector<1x32xf32>
    %641 = arith.negf %640 : vector<1x32xf32>
    %642 = math.exp %641 : vector<1x32xf32>
    %cst_239 = arith.constant 1.000000e+00 : f32
    %643 = vector.broadcast %cst_239 : f32 to vector<1x32xf32>
    %644 = arith.addf %643, %642 : vector<1x32xf32>
    %645 = arith.divf %643, %644 : vector<1x32xf32>
    %646 = vector.extract_strided_slice %635 {offsets = [0, 32], sizes = [1, 32], strides = [1, 1]} : vector<1x96xf32> to vector<1x32xf32>
    %647 = vector.extract_strided_slice %636 {offsets = [0, 32], sizes = [1, 32], strides = [1, 1]} : vector<1x96xf32> to vector<1x32xf32>
    %648 = arith.addf %646, %647 : vector<1x32xf32>
    %649 = arith.negf %648 : vector<1x32xf32>
    %650 = math.exp %649 : vector<1x32xf32>
    %cst_240 = arith.constant 1.000000e+00 : f32
    %651 = vector.broadcast %cst_240 : f32 to vector<1x32xf32>
    %652 = arith.addf %651, %650 : vector<1x32xf32>
    %653 = arith.divf %651, %652 : vector<1x32xf32>
    %654 = vector.extract_strided_slice %635 {offsets = [0, 64], sizes = [1, 32], strides = [1, 1]} : vector<1x96xf32> to vector<1x32xf32>
    %655 = vector.extract_strided_slice %636 {offsets = [0, 64], sizes = [1, 32], strides = [1, 1]} : vector<1x96xf32> to vector<1x32xf32>
    %656 = arith.mulf %645, %655 : vector<1x32xf32>
    %657 = arith.addf %654, %656 : vector<1x32xf32>
    %658 = math.tanh %657 : vector<1x32xf32>
    %cst_241 = arith.constant 1.000000e+00 : f32
    %659 = vector.broadcast %cst_241 : f32 to vector<1x32xf32>
    %660 = arith.subf %659, %653 : vector<1x32xf32>
    %661 = arith.mulf %660, %658 : vector<1x32xf32>
    %662 = arith.mulf %653, %637 : vector<1x32xf32>
    %663 = arith.addf %661, %662 : vector<1x32xf32>
    %664 = tpu.concatenate %634, %663 in 1 : vector<1x32xf32>, vector<1x32xf32> -> vector<1x64xf32>
    %c0_242 = arith.constant 0 : index
    %c0_243 = arith.constant 0 : index
    %665 = vector.load %arg8[%c0_242, %c0_243] : memref<64x192xf32, #tpu.memory_space<vmem>>, vector<64x192xf32>
    %cst_244 = arith.constant dense<0.000000e+00> : vector<1x192xf32>
    %666 = tpu.matmul %664, %665, %cst_244 {dimension_numbers = #tpu.dot_dimension_numbers<[1], [0], [0], [1], [0, 0, 1, 1], [], []>} : vector<1x64xf32>, vector<64x192xf32>, vector<1x192xf32> -> vector<1x192xf32>
    %c0_245 = arith.constant 0 : index
    %c0_246 = arith.constant 0 : index
    %667 = vector.load %arg9[%c0_245, %c0_246] : memref<1x192xf32, #tpu.memory_space<vmem>>, vector<1x192xf32>
    %668 = arith.addf %666, %667 : vector<1x192xf32>
    %669 = vector.extract_strided_slice %668 {offsets = [0, 0], sizes = [1, 96], strides = [1, 1]} : vector<1x192xf32> to vector<1x96xf32>
    %670 = vector.extract_strided_slice %601 {offsets = [0, 192], sizes = [1, 96], strides = [1, 1]} : vector<1x384xf32> to vector<1x96xf32>
    %671 = vector.extract_strided_slice %531 {offsets = [0, 64], sizes = [1, 32], strides = [1, 1]} : vector<1x128xf32> to vector<1x32xf32>
    %672 = vector.extract_strided_slice %669 {offsets = [0, 0], sizes = [1, 32], strides = [1, 1]} : vector<1x96xf32> to vector<1x32xf32>
    %673 = vector.extract_strided_slice %670 {offsets = [0, 0], sizes = [1, 32], strides = [1, 1]} : vector<1x96xf32> to vector<1x32xf32>
    %674 = arith.addf %672, %673 : vector<1x32xf32>
    %675 = arith.negf %674 : vector<1x32xf32>
    %676 = math.exp %675 : vector<1x32xf32>
    %cst_247 = arith.constant 1.000000e+00 : f32
    %677 = vector.broadcast %cst_247 : f32 to vector<1x32xf32>
    %678 = arith.addf %677, %676 : vector<1x32xf32>
    %679 = arith.divf %677, %678 : vector<1x32xf32>
    %680 = vector.extract_strided_slice %669 {offsets = [0, 32], sizes = [1, 32], strides = [1, 1]} : vector<1x96xf32> to vector<1x32xf32>
    %681 = vector.extract_strided_slice %670 {offsets = [0, 32], sizes = [1, 32], strides = [1, 1]} : vector<1x96xf32> to vector<1x32xf32>
    %682 = arith.addf %680, %681 : vector<1x32xf32>
    %683 = arith.negf %682 : vector<1x32xf32>
    %684 = math.exp %683 : vector<1x32xf32>
    %cst_248 = arith.constant 1.000000e+00 : f32
    %685 = vector.broadcast %cst_248 : f32 to vector<1x32xf32>
    %686 = arith.addf %685, %684 : vector<1x32xf32>
    %687 = arith.divf %685, %686 : vector<1x32xf32>
    %688 = vector.extract_strided_slice %669 {offsets = [0, 64], sizes = [1, 32], strides = [1, 1]} : vector<1x96xf32> to vector<1x32xf32>
    %689 = vector.extract_strided_slice %670 {offsets = [0, 64], sizes = [1, 32], strides = [1, 1]} : vector<1x96xf32> to vector<1x32xf32>
    %690 = arith.mulf %679, %689 : vector<1x32xf32>
    %691 = arith.addf %688, %690 : vector<1x32xf32>
    %692 = math.tanh %691 : vector<1x32xf32>
    %cst_249 = arith.constant 1.000000e+00 : f32
    %693 = vector.broadcast %cst_249 : f32 to vector<1x32xf32>
    %694 = arith.subf %693, %687 : vector<1x32xf32>
    %695 = arith.mulf %694, %692 : vector<1x32xf32>
    %696 = arith.mulf %687, %671 : vector<1x32xf32>
    %697 = arith.addf %695, %696 : vector<1x32xf32>
    %698 = vector.extract_strided_slice %668 {offsets = [0, 96], sizes = [1, 96], strides = [1, 1]} : vector<1x192xf32> to vector<1x96xf32>
    %699 = vector.extract_strided_slice %601 {offsets = [0, 288], sizes = [1, 96], strides = [1, 1]} : vector<1x384xf32> to vector<1x96xf32>
    %700 = vector.extract_strided_slice %531 {offsets = [0, 96], sizes = [1, 32], strides = [1, 1]} : vector<1x128xf32> to vector<1x32xf32>
    %701 = vector.extract_strided_slice %698 {offsets = [0, 0], sizes = [1, 32], strides = [1, 1]} : vector<1x96xf32> to vector<1x32xf32>
    %702 = vector.extract_strided_slice %699 {offsets = [0, 0], sizes = [1, 32], strides = [1, 1]} : vector<1x96xf32> to vector<1x32xf32>
    %703 = arith.addf %701, %702 : vector<1x32xf32>
    %704 = arith.negf %703 : vector<1x32xf32>
    %705 = math.exp %704 : vector<1x32xf32>
    %cst_250 = arith.constant 1.000000e+00 : f32
    %706 = vector.broadcast %cst_250 : f32 to vector<1x32xf32>
    %707 = arith.addf %706, %705 : vector<1x32xf32>
    %708 = arith.divf %706, %707 : vector<1x32xf32>
    %709 = vector.extract_strided_slice %698 {offsets = [0, 32], sizes = [1, 32], strides = [1, 1]} : vector<1x96xf32> to vector<1x32xf32>
    %710 = vector.extract_strided_slice %699 {offsets = [0, 32], sizes = [1, 32], strides = [1, 1]} : vector<1x96xf32> to vector<1x32xf32>
    %711 = arith.addf %709, %710 : vector<1x32xf32>
    %712 = arith.negf %711 : vector<1x32xf32>
    %713 = math.exp %712 : vector<1x32xf32>
    %cst_251 = arith.constant 1.000000e+00 : f32
    %714 = vector.broadcast %cst_251 : f32 to vector<1x32xf32>
    %715 = arith.addf %714, %713 : vector<1x32xf32>
    %716 = arith.divf %714, %715 : vector<1x32xf32>
    %717 = vector.extract_strided_slice %698 {offsets = [0, 64], sizes = [1, 32], strides = [1, 1]} : vector<1x96xf32> to vector<1x32xf32>
    %718 = vector.extract_strided_slice %699 {offsets = [0, 64], sizes = [1, 32], strides = [1, 1]} : vector<1x96xf32> to vector<1x32xf32>
    %719 = arith.mulf %708, %718 : vector<1x32xf32>
    %720 = arith.addf %717, %719 : vector<1x32xf32>
    %721 = math.tanh %720 : vector<1x32xf32>
    %cst_252 = arith.constant 1.000000e+00 : f32
    %722 = vector.broadcast %cst_252 : f32 to vector<1x32xf32>
    %723 = arith.subf %722, %716 : vector<1x32xf32>
    %724 = arith.mulf %723, %721 : vector<1x32xf32>
    %725 = arith.mulf %716, %700 : vector<1x32xf32>
    %726 = arith.addf %724, %725 : vector<1x32xf32>
    %727 = tpu.concatenate %697, %726 in 1 : vector<1x32xf32>, vector<1x32xf32> -> vector<1x64xf32>
    %728 = tpu.concatenate %634, %663, %697, %726 in 1 : vector<1x32xf32>, vector<1x32xf32>, vector<1x32xf32>, vector<1x32xf32> -> vector<1x128xf32>
    %c0_253 = arith.constant 0 : index
    %c0_254 = arith.constant 0 : index
    %729 = vector.load %arg12[%c0_253, %c0_254] : memref<64x32xf32, #tpu.memory_space<vmem>>, vector<64x32xf32>
    %cst_255 = arith.constant dense<0.000000e+00> : vector<1x32xf32>
    %730 = tpu.matmul %727, %729, %cst_255 {dimension_numbers = #tpu.dot_dimension_numbers<[1], [0], [0], [1], [0, 0, 1, 1], [], []>} : vector<1x64xf32>, vector<64x32xf32>, vector<1x32xf32> -> vector<1x32xf32>
    %c0_256 = arith.constant 0 : index
    %c0_257 = arith.constant 0 : index
    %731 = vector.load %arg13[%c0_256, %c0_257] : memref<1x32xf32, #tpu.memory_space<vmem>>, vector<1x32xf32>
    %732 = arith.addf %730, %731 : vector<1x32xf32>
    %c0_258 = arith.constant 0 : index
    %c0_259 = arith.constant 0 : index
    %733 = vector.load %arg15[%c0_258, %c0_259] : memref<16x32xf32, #tpu.memory_space<vmem>>, vector<16x32xf32>
    %734 = vector.broadcast %732 : vector<1x32xf32> to vector<16x32xf32>
    %735 = arith.addf %733, %734 : vector<16x32xf32>
    %736 = math.tanh %735 : vector<16x32xf32>
    %c0_260 = arith.constant 0 : index
    %c0_261 = arith.constant 0 : index
    %737 = vector.load %arg14[%c0_260, %c0_261] : memref<1x32xf32, #tpu.memory_space<vmem>>, vector<1x32xf32>
    %738 = tpu.transpose %736, [1, 0] : vector<16x32xf32> -> vector<32x16xf32>
    %cst_262 = arith.constant dense<0.000000e+00> : vector<1x16xf32>
    %739 = tpu.matmul %737, %738, %cst_262 {dimension_numbers = #tpu.dot_dimension_numbers<[1], [0], [0], [1], [0, 0, 1, 1], [], []>} : vector<1x32xf32>, vector<32x16xf32>, vector<1x16xf32> -> vector<1x16xf32>
    %cst_263 = arith.constant dense<0xFF800000> : vector<1xf32>
    %740 = vector.multi_reduction <maximumf>, %739, %cst_263 [1] : vector<1x16xf32> to vector<1xf32>
    %741 = vector.shape_cast %740 : vector<1xf32> to vector<1x1xf32>
    %742 = vector.broadcast %741 : vector<1x1xf32> to vector<1x16xf32>
    %743 = arith.subf %739, %742 : vector<1x16xf32>
    %744 = math.exp %743 : vector<1x16xf32>
    %cst_264 = arith.constant dense<0.000000e+00> : vector<1xf32>
    %745 = vector.multi_reduction <add>, %744, %cst_264 [1] : vector<1x16xf32> to vector<1xf32>
    %746 = vector.shape_cast %745 : vector<1xf32> to vector<1x1xf32>
    %747 = tpu.reciprocal %746 {approx = true} : vector<1x1xf32> -> vector<1x1xf32>
    %748 = vector.broadcast %747 : vector<1x1xf32> to vector<1x16xf32>
    %749 = arith.mulf %744, %748 : vector<1x16xf32>
    %c0_265 = arith.constant 0 : index
    %c0_266 = arith.constant 0 : index
    %750 = vector.load %arg16[%c0_265, %c0_266] : memref<16x64xf32, #tpu.memory_space<vmem>>, vector<16x64xf32>
    %cst_267 = arith.constant dense<0.000000e+00> : vector<1x64xf32>
    %751 = tpu.matmul %749, %750, %cst_267 {dimension_numbers = #tpu.dot_dimension_numbers<[1], [0], [0], [1], [0, 0, 1, 1], [], []>} : vector<1x16xf32>, vector<16x64xf32>, vector<1x64xf32> -> vector<1x64xf32>
    %cst_268 = arith.constant 0.000000e+00 : f32
    %752 = vector.broadcast %cst_268 : f32 to vector<1x64xf32>
    %753 = arith.cmpf ogt, %751, %752 : vector<1x64xf32>
    %cst_269 = arith.constant 0.00999999977 : f32
    %754 = vector.broadcast %cst_269 : f32 to vector<1x64xf32>
    %755 = arith.mulf %754, %751 : vector<1x64xf32>
    %756 = arith.select %753, %751, %755 : vector<1x64xi1>, vector<1x64xf32>
    %cst_270 = arith.constant 0.000000e+00 : f32
    %757 = vector.broadcast %cst_270 : f32 to vector<1x64xf32>
    %758 = arith.cmpf ogt, %756, %757 : vector<1x64xf32>
    %cst_271 = arith.constant 0.00999999977 : f32
    %759 = vector.broadcast %cst_271 : f32 to vector<1x64xf32>
    %760 = arith.mulf %759, %756 : vector<1x64xf32>
    %761 = arith.select %758, %756, %760 : vector<1x64xi1>, vector<1x64xf32>
    %c0_272 = arith.constant 0 : index
    %c0_273 = arith.constant 0 : index
    %762 = vector.load %arg17[%c0_272, %c0_273] : memref<64x32xf32, #tpu.memory_space<vmem>>, vector<64x32xf32>
    %cst_274 = arith.constant dense<0.000000e+00> : vector<1x32xf32>
    %763 = tpu.matmul %761, %762, %cst_274 {dimension_numbers = #tpu.dot_dimension_numbers<[1], [0], [0], [1], [0, 0, 1, 1], [], []>} : vector<1x64xf32>, vector<64x32xf32>, vector<1x32xf32> -> vector<1x32xf32>
    %c0_275 = arith.constant 0 : index
    %c0_276 = arith.constant 0 : index
    %764 = vector.load %arg18[%c0_275, %c0_276] : memref<1x32xf32, #tpu.memory_space<vmem>>, vector<1x32xf32>
    %765 = arith.addf %763, %764 : vector<1x32xf32>
    %cst_277 = arith.constant 0.000000e+00 : f32
    %766 = vector.broadcast %cst_277 : f32 to vector<1x32xf32>
    %767 = arith.cmpf ogt, %765, %766 : vector<1x32xf32>
    %cst_278 = arith.constant 0.00999999977 : f32
    %768 = vector.broadcast %cst_278 : f32 to vector<1x32xf32>
    %769 = arith.mulf %768, %765 : vector<1x32xf32>
    %770 = arith.select %767, %765, %769 : vector<1x32xi1>, vector<1x32xf32>
    %c0_279 = arith.constant 0 : index
    %c0_280 = arith.constant 0 : index
    %771 = vector.load %arg19[%c0_279, %c0_280] : memref<64x16xf32, #tpu.memory_space<vmem>>, vector<64x16xf32>
    %cst_281 = arith.constant dense<0.000000e+00> : vector<1x16xf32>
    %772 = tpu.matmul %761, %771, %cst_281 {dimension_numbers = #tpu.dot_dimension_numbers<[1], [0], [0], [1], [0, 0, 1, 1], [], []>} : vector<1x64xf32>, vector<64x16xf32>, vector<1x16xf32> -> vector<1x16xf32>
    %c0_282 = arith.constant 0 : index
    %c0_283 = arith.constant 0 : index
    %773 = vector.load %arg20[%c0_282, %c0_283] : memref<1x16xf32, #tpu.memory_space<vmem>>, vector<1x16xf32>
    %774 = arith.addf %772, %773 : vector<1x16xf32>
    %c3 = arith.constant 3 : index
    %c0_284 = arith.constant 0 : index
    %c0_285 = arith.constant 0 : index
    %775 = vector.load %arg21[%c3, %c0_284, %c0_285] : memref<7x1x16xf32, #tpu.memory_space<vmem>>, vector<1x1x16xf32>
    %776 = vector.shape_cast %775 : vector<1x1x16xf32> to vector<1x16xf32>
    %777 = vector.shape_cast %774 : vector<1x16xf32> to vector<1x1x16xf32>
    tpu.vector_store %arg21[%c3, %c0_284, %c0_285], %777 {strides = array<i32>} : memref<7x1x16xf32, #tpu.memory_space<vmem>>, vector<1x1x16xf32>,
    %c3_286 = arith.constant 3 : index
    %c0_287 = arith.constant 0 : index
    %c0_288 = arith.constant 0 : index
    %778 = vector.load %arg22[%c3_286, %c0_287, %c0_288] : memref<7x1x32xf32, #tpu.memory_space<vmem>>, vector<1x1x32xf32>
    %779 = vector.shape_cast %778 : vector<1x1x32xf32> to vector<1x32xf32>
    %780 = vector.shape_cast %770 : vector<1x32xf32> to vector<1x1x32xf32>
    tpu.vector_store %arg22[%c3_286, %c0_287, %c0_288], %780 {strides = array<i32>} : memref<7x1x32xf32, #tpu.memory_space<vmem>>, vector<1x1x32xf32>,
    %c3_289 = arith.constant 3 : index
    %c0_290 = arith.constant 0 : index
    %c0_291 = arith.constant 0 : index
    %781 = vector.load %arg23[%c3_289, %c0_290, %c0_291] : memref<7x1x16xf32, #tpu.memory_space<vmem>>, vector<1x1x16xf32>
    %782 = vector.shape_cast %781 : vector<1x1x16xf32> to vector<1x16xf32>
    %783 = vector.shape_cast %749 : vector<1x16xf32> to vector<1x1x16xf32>
    tpu.vector_store %arg23[%c3_289, %c0_290, %c0_291], %783 {strides = array<i32>} : memref<7x1x16xf32, #tpu.memory_space<vmem>>, vector<1x1x16xf32>,
    %c3_292 = arith.constant 3 : index
    %784 = memref.load %arg2[%c3_292] : memref<7xi32, #tpu.memory_space<smem>>
    %c1_i32_293 = arith.constant 1 : i32
    %785 = arith.cmpi eq, %784, %c1_i32_293 : i32
    %786 = arith.extui %785 : i1 to i32
    %c0_i32_294 = arith.constant 0 : i32
    %787 = arith.cmpi ne, %786, %c0_i32_294 : i32
    scf.if %787 {
      %c4_521 = arith.constant 4 : index
      %1383 = memref.load %arg1[%c4_521] : memref<8xi32, #tpu.memory_space<smem>>
      %c0_522 = arith.constant 0 : index
      %1384 = memref.load %arg25[%c0_522] : memref<1xi32, #tpu.memory_space<smem>>
      memref.store %1383, %arg25[%c0_522] : memref<1xi32, #tpu.memory_space<smem>>
    } else {
    }
    %c0_i32_295 = arith.constant 0 : i32
    %788 = arith.cmpi eq, %784, %c0_i32_295 : i32
    %789 = arith.extui %788 : i1 to i32
    %c0_i32_296 = arith.constant 0 : i32
    %790 = arith.cmpi ne, %789, %c0_i32_296 : i32
    scf.if %790 {
      %c0_521 = arith.constant 0 : index
      %c0_522 = arith.constant 0 : index
      %1383 = vector.load %arg4[%c0_521, %c0_522] : memref<16x12xf32, #tpu.memory_space<vmem>>, vector<16x12xf32>
      %cst_523 = arith.constant dense<0.000000e+00> : vector<1x12xf32>
      %1384 = tpu.matmul %774, %1383, %cst_523 {dimension_numbers = #tpu.dot_dimension_numbers<[1], [0], [0], [1], [0, 0, 1, 1], [], []>} : vector<1x16xf32>, vector<16x12xf32>, vector<1x12xf32> -> vector<1x12xf32>
      %cst_524 = arith.constant dense<0xFF800000> : vector<1xf32>
      %1385 = vector.multi_reduction <maximumf>, %1384, %cst_524 [1] : vector<1x12xf32> to vector<1xf32>
      %1386 = vector.shape_cast %1385 : vector<1xf32> to vector<1x1xf32>
      %1387 = tpu.iota {dimensions = array<i32: 1>} : vector<1x12xi32>
      %1388 = vector.broadcast %1386 : vector<1x1xf32> to vector<1x12xf32>
      %1389 = arith.cmpf oge, %1384, %1388 : vector<1x12xf32>
      %c12_i32 = arith.constant 12 : i32
      %1390 = vector.broadcast %c12_i32 : i32 to vector<1x12xi32>
      %1391 = arith.select %1389, %1387, %1390 : vector<1x12xi1>, vector<1x12xi32>
      %1392 = vector.shape_cast %1391 : vector<1x12xi32> to vector<1x1x12xi32>
      %cst_525 = arith.constant dense<2147483647> : vector<1xi32>
      %1393 = vector.multi_reduction <minsi>, %1392, %cst_525 [1, 2] : vector<1x1x12xi32> to vector<1xi32>
      %1394 = vector.shape_cast %1393 : vector<1xi32> to vector<1x1x1xi32>
      %1395 = vector.extract %1394[0, 0, 0] : i32 from vector<1x1x1xi32>
      %c0_526 = arith.constant 0 : index
      %1396 = memref.load %arg25[%c0_526] : memref<1xi32, #tpu.memory_space<smem>>
      memref.store %1395, %arg25[%c0_526] : memref<1xi32, #tpu.memory_space<smem>>
    } else {
    }
    %c0_297 = arith.constant 0 : index
    %791 = memref.load %arg25[%c0_297] : memref<1xi32, #tpu.memory_space<smem>>
    %792 = arith.index_cast %791 : i32 to index
    %c0_298 = arith.constant 0 : index
    %c0_299 = arith.constant 0 : index
    %793 = vector.load %arg3[%792, %c0_298, %c0_299] : memref<12x1x16xf32, #tpu.memory_space<vmem>>, vector<1x1x16xf32>
    %794 = vector.shape_cast %793 : vector<1x1x16xf32> to vector<1x16xf32>
    %c0_300 = arith.constant 0 : index
    %c0_301 = arith.constant 0 : index
    %795 = vector.load %arg10[%c0_300, %c0_301] : memref<128x384xf32, #tpu.memory_space<vmem>>, vector<128x384xf32>
    %cst_302 = arith.constant dense<0.000000e+00> : vector<1x384xf32>
    %796 = tpu.matmul %728, %795, %cst_302 {dimension_numbers = #tpu.dot_dimension_numbers<[1], [0], [0], [1], [0, 0, 1, 1], [], []>} : vector<1x128xf32>, vector<128x384xf32>, vector<1x384xf32> -> vector<1x384xf32>
    %c0_303 = arith.constant 0 : index
    %c0_304 = arith.constant 0 : index
    %797 = vector.load %arg11[%c0_303, %c0_304] : memref<1x384xf32, #tpu.memory_space<vmem>>, vector<1x384xf32>
    %798 = arith.addf %796, %797 : vector<1x384xf32>
    %c0_305 = arith.constant 0 : index
    %c0_306 = arith.constant 0 : index
    %799 = vector.load %arg6[%c0_305, %c0_306] : memref<16x192xf32, #tpu.memory_space<vmem>>, vector<16x192xf32>
    %cst_307 = arith.constant dense<0.000000e+00> : vector<1x192xf32>
    %800 = tpu.matmul %794, %799, %cst_307 {dimension_numbers = #tpu.dot_dimension_numbers<[1], [0], [0], [1], [0, 0, 1, 1], [], []>} : vector<1x16xf32>, vector<16x192xf32>, vector<1x192xf32> -> vector<1x192xf32>
    %c0_308 = arith.constant 0 : index
    %c0_309 = arith.constant 0 : index
    %801 = vector.load %arg7[%c0_308, %c0_309] : memref<1x192xf32, #tpu.memory_space<vmem>>, vector<1x192xf32>
    %802 = arith.addf %800, %801 : vector<1x192xf32>
    %803 = vector.extract_strided_slice %802 {offsets = [0, 0], sizes = [1, 96], strides = [1, 1]} : vector<1x192xf32> to vector<1x96xf32>
    %804 = vector.extract_strided_slice %798 {offsets = [0, 0], sizes = [1, 96], strides = [1, 1]} : vector<1x384xf32> to vector<1x96xf32>
    %805 = vector.extract_strided_slice %728 {offsets = [0, 0], sizes = [1, 32], strides = [1, 1]} : vector<1x128xf32> to vector<1x32xf32>
    %806 = vector.extract_strided_slice %803 {offsets = [0, 0], sizes = [1, 32], strides = [1, 1]} : vector<1x96xf32> to vector<1x32xf32>
    %807 = vector.extract_strided_slice %804 {offsets = [0, 0], sizes = [1, 32], strides = [1, 1]} : vector<1x96xf32> to vector<1x32xf32>
    %808 = arith.addf %806, %807 : vector<1x32xf32>
    %809 = arith.negf %808 : vector<1x32xf32>
    %810 = math.exp %809 : vector<1x32xf32>
    %cst_310 = arith.constant 1.000000e+00 : f32
    %811 = vector.broadcast %cst_310 : f32 to vector<1x32xf32>
    %812 = arith.addf %811, %810 : vector<1x32xf32>
    %813 = arith.divf %811, %812 : vector<1x32xf32>
    %814 = vector.extract_strided_slice %803 {offsets = [0, 32], sizes = [1, 32], strides = [1, 1]} : vector<1x96xf32> to vector<1x32xf32>
    %815 = vector.extract_strided_slice %804 {offsets = [0, 32], sizes = [1, 32], strides = [1, 1]} : vector<1x96xf32> to vector<1x32xf32>
    %816 = arith.addf %814, %815 : vector<1x32xf32>
    %817 = arith.negf %816 : vector<1x32xf32>
    %818 = math.exp %817 : vector<1x32xf32>
    %cst_311 = arith.constant 1.000000e+00 : f32
    %819 = vector.broadcast %cst_311 : f32 to vector<1x32xf32>
    %820 = arith.addf %819, %818 : vector<1x32xf32>
    %821 = arith.divf %819, %820 : vector<1x32xf32>
    %822 = vector.extract_strided_slice %803 {offsets = [0, 64], sizes = [1, 32], strides = [1, 1]} : vector<1x96xf32> to vector<1x32xf32>
    %823 = vector.extract_strided_slice %804 {offsets = [0, 64], sizes = [1, 32], strides = [1, 1]} : vector<1x96xf32> to vector<1x32xf32>
    %824 = arith.mulf %813, %823 : vector<1x32xf32>
    %825 = arith.addf %822, %824 : vector<1x32xf32>
    %826 = math.tanh %825 : vector<1x32xf32>
    %cst_312 = arith.constant 1.000000e+00 : f32
    %827 = vector.broadcast %cst_312 : f32 to vector<1x32xf32>
    %828 = arith.subf %827, %821 : vector<1x32xf32>
    %829 = arith.mulf %828, %826 : vector<1x32xf32>
    %830 = arith.mulf %821, %805 : vector<1x32xf32>
    %831 = arith.addf %829, %830 : vector<1x32xf32>
    %832 = vector.extract_strided_slice %802 {offsets = [0, 96], sizes = [1, 96], strides = [1, 1]} : vector<1x192xf32> to vector<1x96xf32>
    %833 = vector.extract_strided_slice %798 {offsets = [0, 96], sizes = [1, 96], strides = [1, 1]} : vector<1x384xf32> to vector<1x96xf32>
    %834 = vector.extract_strided_slice %728 {offsets = [0, 32], sizes = [1, 32], strides = [1, 1]} : vector<1x128xf32> to vector<1x32xf32>
    %835 = vector.extract_strided_slice %832 {offsets = [0, 0], sizes = [1, 32], strides = [1, 1]} : vector<1x96xf32> to vector<1x32xf32>
    %836 = vector.extract_strided_slice %833 {offsets = [0, 0], sizes = [1, 32], strides = [1, 1]} : vector<1x96xf32> to vector<1x32xf32>
    %837 = arith.addf %835, %836 : vector<1x32xf32>
    %838 = arith.negf %837 : vector<1x32xf32>
    %839 = math.exp %838 : vector<1x32xf32>
    %cst_313 = arith.constant 1.000000e+00 : f32
    %840 = vector.broadcast %cst_313 : f32 to vector<1x32xf32>
    %841 = arith.addf %840, %839 : vector<1x32xf32>
    %842 = arith.divf %840, %841 : vector<1x32xf32>
    %843 = vector.extract_strided_slice %832 {offsets = [0, 32], sizes = [1, 32], strides = [1, 1]} : vector<1x96xf32> to vector<1x32xf32>
    %844 = vector.extract_strided_slice %833 {offsets = [0, 32], sizes = [1, 32], strides = [1, 1]} : vector<1x96xf32> to vector<1x32xf32>
    %845 = arith.addf %843, %844 : vector<1x32xf32>
    %846 = arith.negf %845 : vector<1x32xf32>
    %847 = math.exp %846 : vector<1x32xf32>
    %cst_314 = arith.constant 1.000000e+00 : f32
    %848 = vector.broadcast %cst_314 : f32 to vector<1x32xf32>
    %849 = arith.addf %848, %847 : vector<1x32xf32>
    %850 = arith.divf %848, %849 : vector<1x32xf32>
    %851 = vector.extract_strided_slice %832 {offsets = [0, 64], sizes = [1, 32], strides = [1, 1]} : vector<1x96xf32> to vector<1x32xf32>
    %852 = vector.extract_strided_slice %833 {offsets = [0, 64], sizes = [1, 32], strides = [1, 1]} : vector<1x96xf32> to vector<1x32xf32>
    %853 = arith.mulf %842, %852 : vector<1x32xf32>
    %854 = arith.addf %851, %853 : vector<1x32xf32>
    %855 = math.tanh %854 : vector<1x32xf32>
    %cst_315 = arith.constant 1.000000e+00 : f32
    %856 = vector.broadcast %cst_315 : f32 to vector<1x32xf32>
    %857 = arith.subf %856, %850 : vector<1x32xf32>
    %858 = arith.mulf %857, %855 : vector<1x32xf32>
    %859 = arith.mulf %850, %834 : vector<1x32xf32>
    %860 = arith.addf %858, %859 : vector<1x32xf32>
    %861 = tpu.concatenate %831, %860 in 1 : vector<1x32xf32>, vector<1x32xf32> -> vector<1x64xf32>
    %c0_316 = arith.constant 0 : index
    %c0_317 = arith.constant 0 : index
    %862 = vector.load %arg8[%c0_316, %c0_317] : memref<64x192xf32, #tpu.memory_space<vmem>>, vector<64x192xf32>
    %cst_318 = arith.constant dense<0.000000e+00> : vector<1x192xf32>
    %863 = tpu.matmul %861, %862, %cst_318 {dimension_numbers = #tpu.dot_dimension_numbers<[1], [0], [0], [1], [0, 0, 1, 1], [], []>} : vector<1x64xf32>, vector<64x192xf32>, vector<1x192xf32> -> vector<1x192xf32>
    %c0_319 = arith.constant 0 : index
    %c0_320 = arith.constant 0 : index
    %864 = vector.load %arg9[%c0_319, %c0_320] : memref<1x192xf32, #tpu.memory_space<vmem>>, vector<1x192xf32>
    %865 = arith.addf %863, %864 : vector<1x192xf32>
    %866 = vector.extract_strided_slice %865 {offsets = [0, 0], sizes = [1, 96], strides = [1, 1]} : vector<1x192xf32> to vector<1x96xf32>
    %867 = vector.extract_strided_slice %798 {offsets = [0, 192], sizes = [1, 96], strides = [1, 1]} : vector<1x384xf32> to vector<1x96xf32>
    %868 = vector.extract_strided_slice %728 {offsets = [0, 64], sizes = [1, 32], strides = [1, 1]} : vector<1x128xf32> to vector<1x32xf32>
    %869 = vector.extract_strided_slice %866 {offsets = [0, 0], sizes = [1, 32], strides = [1, 1]} : vector<1x96xf32> to vector<1x32xf32>
    %870 = vector.extract_strided_slice %867 {offsets = [0, 0], sizes = [1, 32], strides = [1, 1]} : vector<1x96xf32> to vector<1x32xf32>
    %871 = arith.addf %869, %870 : vector<1x32xf32>
    %872 = arith.negf %871 : vector<1x32xf32>
    %873 = math.exp %872 : vector<1x32xf32>
    %cst_321 = arith.constant 1.000000e+00 : f32
    %874 = vector.broadcast %cst_321 : f32 to vector<1x32xf32>
    %875 = arith.addf %874, %873 : vector<1x32xf32>
    %876 = arith.divf %874, %875 : vector<1x32xf32>
    %877 = vector.extract_strided_slice %866 {offsets = [0, 32], sizes = [1, 32], strides = [1, 1]} : vector<1x96xf32> to vector<1x32xf32>
    %878 = vector.extract_strided_slice %867 {offsets = [0, 32], sizes = [1, 32], strides = [1, 1]} : vector<1x96xf32> to vector<1x32xf32>
    %879 = arith.addf %877, %878 : vector<1x32xf32>
    %880 = arith.negf %879 : vector<1x32xf32>
    %881 = math.exp %880 : vector<1x32xf32>
    %cst_322 = arith.constant 1.000000e+00 : f32
    %882 = vector.broadcast %cst_322 : f32 to vector<1x32xf32>
    %883 = arith.addf %882, %881 : vector<1x32xf32>
    %884 = arith.divf %882, %883 : vector<1x32xf32>
    %885 = vector.extract_strided_slice %866 {offsets = [0, 64], sizes = [1, 32], strides = [1, 1]} : vector<1x96xf32> to vector<1x32xf32>
    %886 = vector.extract_strided_slice %867 {offsets = [0, 64], sizes = [1, 32], strides = [1, 1]} : vector<1x96xf32> to vector<1x32xf32>
    %887 = arith.mulf %876, %886 : vector<1x32xf32>
    %888 = arith.addf %885, %887 : vector<1x32xf32>
    %889 = math.tanh %888 : vector<1x32xf32>
    %cst_323 = arith.constant 1.000000e+00 : f32
    %890 = vector.broadcast %cst_323 : f32 to vector<1x32xf32>
    %891 = arith.subf %890, %884 : vector<1x32xf32>
    %892 = arith.mulf %891, %889 : vector<1x32xf32>
    %893 = arith.mulf %884, %868 : vector<1x32xf32>
    %894 = arith.addf %892, %893 : vector<1x32xf32>
    %895 = vector.extract_strided_slice %865 {offsets = [0, 96], sizes = [1, 96], strides = [1, 1]} : vector<1x192xf32> to vector<1x96xf32>
    %896 = vector.extract_strided_slice %798 {offsets = [0, 288], sizes = [1, 96], strides = [1, 1]} : vector<1x384xf32> to vector<1x96xf32>
    %897 = vector.extract_strided_slice %728 {offsets = [0, 96], sizes = [1, 32], strides = [1, 1]} : vector<1x128xf32> to vector<1x32xf32>
    %898 = vector.extract_strided_slice %895 {offsets = [0, 0], sizes = [1, 32], strides = [1, 1]} : vector<1x96xf32> to vector<1x32xf32>
    %899 = vector.extract_strided_slice %896 {offsets = [0, 0], sizes = [1, 32], strides = [1, 1]} : vector<1x96xf32> to vector<1x32xf32>
    %900 = arith.addf %898, %899 : vector<1x32xf32>
    %901 = arith.negf %900 : vector<1x32xf32>
    %902 = math.exp %901 : vector<1x32xf32>
    %cst_324 = arith.constant 1.000000e+00 : f32
    %903 = vector.broadcast %cst_324 : f32 to vector<1x32xf32>
    %904 = arith.addf %903, %902 : vector<1x32xf32>
    %905 = arith.divf %903, %904 : vector<1x32xf32>
    %906 = vector.extract_strided_slice %895 {offsets = [0, 32], sizes = [1, 32], strides = [1, 1]} : vector<1x96xf32> to vector<1x32xf32>
    %907 = vector.extract_strided_slice %896 {offsets = [0, 32], sizes = [1, 32], strides = [1, 1]} : vector<1x96xf32> to vector<1x32xf32>
    %908 = arith.addf %906, %907 : vector<1x32xf32>
    %909 = arith.negf %908 : vector<1x32xf32>
    %910 = math.exp %909 : vector<1x32xf32>
    %cst_325 = arith.constant 1.000000e+00 : f32
    %911 = vector.broadcast %cst_325 : f32 to vector<1x32xf32>
    %912 = arith.addf %911, %910 : vector<1x32xf32>
    %913 = arith.divf %911, %912 : vector<1x32xf32>
    %914 = vector.extract_strided_slice %895 {offsets = [0, 64], sizes = [1, 32], strides = [1, 1]} : vector<1x96xf32> to vector<1x32xf32>
    %915 = vector.extract_strided_slice %896 {offsets = [0, 64], sizes = [1, 32], strides = [1, 1]} : vector<1x96xf32> to vector<1x32xf32>
    %916 = arith.mulf %905, %915 : vector<1x32xf32>
    %917 = arith.addf %914, %916 : vector<1x32xf32>
    %918 = math.tanh %917 : vector<1x32xf32>
    %cst_326 = arith.constant 1.000000e+00 : f32
    %919 = vector.broadcast %cst_326 : f32 to vector<1x32xf32>
    %920 = arith.subf %919, %913 : vector<1x32xf32>
    %921 = arith.mulf %920, %918 : vector<1x32xf32>
    %922 = arith.mulf %913, %897 : vector<1x32xf32>
    %923 = arith.addf %921, %922 : vector<1x32xf32>
    %924 = tpu.concatenate %894, %923 in 1 : vector<1x32xf32>, vector<1x32xf32> -> vector<1x64xf32>
    %925 = tpu.concatenate %831, %860, %894, %923 in 1 : vector<1x32xf32>, vector<1x32xf32>, vector<1x32xf32>, vector<1x32xf32> -> vector<1x128xf32>
    %c0_327 = arith.constant 0 : index
    %c0_328 = arith.constant 0 : index
    %926 = vector.load %arg12[%c0_327, %c0_328] : memref<64x32xf32, #tpu.memory_space<vmem>>, vector<64x32xf32>
    %cst_329 = arith.constant dense<0.000000e+00> : vector<1x32xf32>
    %927 = tpu.matmul %924, %926, %cst_329 {dimension_numbers = #tpu.dot_dimension_numbers<[1], [0], [0], [1], [0, 0, 1, 1], [], []>} : vector<1x64xf32>, vector<64x32xf32>, vector<1x32xf32> -> vector<1x32xf32>
    %c0_330 = arith.constant 0 : index
    %c0_331 = arith.constant 0 : index
    %928 = vector.load %arg13[%c0_330, %c0_331] : memref<1x32xf32, #tpu.memory_space<vmem>>, vector<1x32xf32>
    %929 = arith.addf %927, %928 : vector<1x32xf32>
    %c0_332 = arith.constant 0 : index
    %c0_333 = arith.constant 0 : index
    %930 = vector.load %arg15[%c0_332, %c0_333] : memref<16x32xf32, #tpu.memory_space<vmem>>, vector<16x32xf32>
    %931 = vector.broadcast %929 : vector<1x32xf32> to vector<16x32xf32>
    %932 = arith.addf %930, %931 : vector<16x32xf32>
    %933 = math.tanh %932 : vector<16x32xf32>
    %c0_334 = arith.constant 0 : index
    %c0_335 = arith.constant 0 : index
    %934 = vector.load %arg14[%c0_334, %c0_335] : memref<1x32xf32, #tpu.memory_space<vmem>>, vector<1x32xf32>
    %935 = tpu.transpose %933, [1, 0] : vector<16x32xf32> -> vector<32x16xf32>
    %cst_336 = arith.constant dense<0.000000e+00> : vector<1x16xf32>
    %936 = tpu.matmul %934, %935, %cst_336 {dimension_numbers = #tpu.dot_dimension_numbers<[1], [0], [0], [1], [0, 0, 1, 1], [], []>} : vector<1x32xf32>, vector<32x16xf32>, vector<1x16xf32> -> vector<1x16xf32>
    %cst_337 = arith.constant dense<0xFF800000> : vector<1xf32>
    %937 = vector.multi_reduction <maximumf>, %936, %cst_337 [1] : vector<1x16xf32> to vector<1xf32>
    %938 = vector.shape_cast %937 : vector<1xf32> to vector<1x1xf32>
    %939 = vector.broadcast %938 : vector<1x1xf32> to vector<1x16xf32>
    %940 = arith.subf %936, %939 : vector<1x16xf32>
    %941 = math.exp %940 : vector<1x16xf32>
    %cst_338 = arith.constant dense<0.000000e+00> : vector<1xf32>
    %942 = vector.multi_reduction <add>, %941, %cst_338 [1] : vector<1x16xf32> to vector<1xf32>
    %943 = vector.shape_cast %942 : vector<1xf32> to vector<1x1xf32>
    %944 = tpu.reciprocal %943 {approx = true} : vector<1x1xf32> -> vector<1x1xf32>
    %945 = vector.broadcast %944 : vector<1x1xf32> to vector<1x16xf32>
    %946 = arith.mulf %941, %945 : vector<1x16xf32>
    %c0_339 = arith.constant 0 : index
    %c0_340 = arith.constant 0 : index
    %947 = vector.load %arg16[%c0_339, %c0_340] : memref<16x64xf32, #tpu.memory_space<vmem>>, vector<16x64xf32>
    %cst_341 = arith.constant dense<0.000000e+00> : vector<1x64xf32>
    %948 = tpu.matmul %946, %947, %cst_341 {dimension_numbers = #tpu.dot_dimension_numbers<[1], [0], [0], [1], [0, 0, 1, 1], [], []>} : vector<1x16xf32>, vector<16x64xf32>, vector<1x64xf32> -> vector<1x64xf32>
    %cst_342 = arith.constant 0.000000e+00 : f32
    %949 = vector.broadcast %cst_342 : f32 to vector<1x64xf32>
    %950 = arith.cmpf ogt, %948, %949 : vector<1x64xf32>
    %cst_343 = arith.constant 0.00999999977 : f32
    %951 = vector.broadcast %cst_343 : f32 to vector<1x64xf32>
    %952 = arith.mulf %951, %948 : vector<1x64xf32>
    %953 = arith.select %950, %948, %952 : vector<1x64xi1>, vector<1x64xf32>
    %cst_344 = arith.constant 0.000000e+00 : f32
    %954 = vector.broadcast %cst_344 : f32 to vector<1x64xf32>
    %955 = arith.cmpf ogt, %953, %954 : vector<1x64xf32>
    %cst_345 = arith.constant 0.00999999977 : f32
    %956 = vector.broadcast %cst_345 : f32 to vector<1x64xf32>
    %957 = arith.mulf %956, %953 : vector<1x64xf32>
    %958 = arith.select %955, %953, %957 : vector<1x64xi1>, vector<1x64xf32>
    %c0_346 = arith.constant 0 : index
    %c0_347 = arith.constant 0 : index
    %959 = vector.load %arg17[%c0_346, %c0_347] : memref<64x32xf32, #tpu.memory_space<vmem>>, vector<64x32xf32>
    %cst_348 = arith.constant dense<0.000000e+00> : vector<1x32xf32>
    %960 = tpu.matmul %958, %959, %cst_348 {dimension_numbers = #tpu.dot_dimension_numbers<[1], [0], [0], [1], [0, 0, 1, 1], [], []>} : vector<1x64xf32>, vector<64x32xf32>, vector<1x32xf32> -> vector<1x32xf32>
    %c0_349 = arith.constant 0 : index
    %c0_350 = arith.constant 0 : index
    %961 = vector.load %arg18[%c0_349, %c0_350] : memref<1x32xf32, #tpu.memory_space<vmem>>, vector<1x32xf32>
    %962 = arith.addf %960, %961 : vector<1x32xf32>
    %cst_351 = arith.constant 0.000000e+00 : f32
    %963 = vector.broadcast %cst_351 : f32 to vector<1x32xf32>
    %964 = arith.cmpf ogt, %962, %963 : vector<1x32xf32>
    %cst_352 = arith.constant 0.00999999977 : f32
    %965 = vector.broadcast %cst_352 : f32 to vector<1x32xf32>
    %966 = arith.mulf %965, %962 : vector<1x32xf32>
    %967 = arith.select %964, %962, %966 : vector<1x32xi1>, vector<1x32xf32>
    %c0_353 = arith.constant 0 : index
    %c0_354 = arith.constant 0 : index
    %968 = vector.load %arg19[%c0_353, %c0_354] : memref<64x16xf32, #tpu.memory_space<vmem>>, vector<64x16xf32>
    %cst_355 = arith.constant dense<0.000000e+00> : vector<1x16xf32>
    %969 = tpu.matmul %958, %968, %cst_355 {dimension_numbers = #tpu.dot_dimension_numbers<[1], [0], [0], [1], [0, 0, 1, 1], [], []>} : vector<1x64xf32>, vector<64x16xf32>, vector<1x16xf32> -> vector<1x16xf32>
    %c0_356 = arith.constant 0 : index
    %c0_357 = arith.constant 0 : index
    %970 = vector.load %arg20[%c0_356, %c0_357] : memref<1x16xf32, #tpu.memory_space<vmem>>, vector<1x16xf32>
    %971 = arith.addf %969, %970 : vector<1x16xf32>
    %c4 = arith.constant 4 : index
    %c0_358 = arith.constant 0 : index
    %c0_359 = arith.constant 0 : index
    %972 = vector.load %arg21[%c4, %c0_358, %c0_359] : memref<7x1x16xf32, #tpu.memory_space<vmem>>, vector<1x1x16xf32>
    %973 = vector.shape_cast %972 : vector<1x1x16xf32> to vector<1x16xf32>
    %974 = vector.shape_cast %971 : vector<1x16xf32> to vector<1x1x16xf32>
    tpu.vector_store %arg21[%c4, %c0_358, %c0_359], %974 {strides = array<i32>} : memref<7x1x16xf32, #tpu.memory_space<vmem>>, vector<1x1x16xf32>,
    %c4_360 = arith.constant 4 : index
    %c0_361 = arith.constant 0 : index
    %c0_362 = arith.constant 0 : index
    %975 = vector.load %arg22[%c4_360, %c0_361, %c0_362] : memref<7x1x32xf32, #tpu.memory_space<vmem>>, vector<1x1x32xf32>
    %976 = vector.shape_cast %975 : vector<1x1x32xf32> to vector<1x32xf32>
    %977 = vector.shape_cast %967 : vector<1x32xf32> to vector<1x1x32xf32>
    tpu.vector_store %arg22[%c4_360, %c0_361, %c0_362], %977 {strides = array<i32>} : memref<7x1x32xf32, #tpu.memory_space<vmem>>, vector<1x1x32xf32>,
    %c4_363 = arith.constant 4 : index
    %c0_364 = arith.constant 0 : index
    %c0_365 = arith.constant 0 : index
    %978 = vector.load %arg23[%c4_363, %c0_364, %c0_365] : memref<7x1x16xf32, #tpu.memory_space<vmem>>, vector<1x1x16xf32>
    %979 = vector.shape_cast %978 : vector<1x1x16xf32> to vector<1x16xf32>
    %980 = vector.shape_cast %946 : vector<1x16xf32> to vector<1x1x16xf32>
    tpu.vector_store %arg23[%c4_363, %c0_364, %c0_365], %980 {strides = array<i32>} : memref<7x1x16xf32, #tpu.memory_space<vmem>>, vector<1x1x16xf32>,
    %c4_366 = arith.constant 4 : index
    %981 = memref.load %arg2[%c4_366] : memref<7xi32, #tpu.memory_space<smem>>
    %c1_i32_367 = arith.constant 1 : i32
    %982 = arith.cmpi eq, %981, %c1_i32_367 : i32
    %983 = arith.extui %982 : i1 to i32
    %c0_i32_368 = arith.constant 0 : i32
    %984 = arith.cmpi ne, %983, %c0_i32_368 : i32
    scf.if %984 {
      %c5_521 = arith.constant 5 : index
      %1383 = memref.load %arg1[%c5_521] : memref<8xi32, #tpu.memory_space<smem>>
      %c0_522 = arith.constant 0 : index
      %1384 = memref.load %arg25[%c0_522] : memref<1xi32, #tpu.memory_space<smem>>
      memref.store %1383, %arg25[%c0_522] : memref<1xi32, #tpu.memory_space<smem>>
    } else {
    }
    %c0_i32_369 = arith.constant 0 : i32
    %985 = arith.cmpi eq, %981, %c0_i32_369 : i32
    %986 = arith.extui %985 : i1 to i32
    %c0_i32_370 = arith.constant 0 : i32
    %987 = arith.cmpi ne, %986, %c0_i32_370 : i32
    scf.if %987 {
      %c0_521 = arith.constant 0 : index
      %c0_522 = arith.constant 0 : index
      %1383 = vector.load %arg4[%c0_521, %c0_522] : memref<16x12xf32, #tpu.memory_space<vmem>>, vector<16x12xf32>
      %cst_523 = arith.constant dense<0.000000e+00> : vector<1x12xf32>
      %1384 = tpu.matmul %971, %1383, %cst_523 {dimension_numbers = #tpu.dot_dimension_numbers<[1], [0], [0], [1], [0, 0, 1, 1], [], []>} : vector<1x16xf32>, vector<16x12xf32>, vector<1x12xf32> -> vector<1x12xf32>
      %cst_524 = arith.constant dense<0xFF800000> : vector<1xf32>
      %1385 = vector.multi_reduction <maximumf>, %1384, %cst_524 [1] : vector<1x12xf32> to vector<1xf32>
      %1386 = vector.shape_cast %1385 : vector<1xf32> to vector<1x1xf32>
      %1387 = tpu.iota {dimensions = array<i32: 1>} : vector<1x12xi32>
      %1388 = vector.broadcast %1386 : vector<1x1xf32> to vector<1x12xf32>
      %1389 = arith.cmpf oge, %1384, %1388 : vector<1x12xf32>
      %c12_i32 = arith.constant 12 : i32
      %1390 = vector.broadcast %c12_i32 : i32 to vector<1x12xi32>
      %1391 = arith.select %1389, %1387, %1390 : vector<1x12xi1>, vector<1x12xi32>
      %1392 = vector.shape_cast %1391 : vector<1x12xi32> to vector<1x1x12xi32>
      %cst_525 = arith.constant dense<2147483647> : vector<1xi32>
      %1393 = vector.multi_reduction <minsi>, %1392, %cst_525 [1, 2] : vector<1x1x12xi32> to vector<1xi32>
      %1394 = vector.shape_cast %1393 : vector<1xi32> to vector<1x1x1xi32>
      %1395 = vector.extract %1394[0, 0, 0] : i32 from vector<1x1x1xi32>
      %c0_526 = arith.constant 0 : index
      %1396 = memref.load %arg25[%c0_526] : memref<1xi32, #tpu.memory_space<smem>>
      memref.store %1395, %arg25[%c0_526] : memref<1xi32, #tpu.memory_space<smem>>
    } else {
    }
    %c0_371 = arith.constant 0 : index
    %988 = memref.load %arg25[%c0_371] : memref<1xi32, #tpu.memory_space<smem>>
    %989 = arith.index_cast %988 : i32 to index
    %c0_372 = arith.constant 0 : index
    %c0_373 = arith.constant 0 : index
    %990 = vector.load %arg3[%989, %c0_372, %c0_373] : memref<12x1x16xf32, #tpu.memory_space<vmem>>, vector<1x1x16xf32>
    %991 = vector.shape_cast %990 : vector<1x1x16xf32> to vector<1x16xf32>
    %c0_374 = arith.constant 0 : index
    %c0_375 = arith.constant 0 : index
    %992 = vector.load %arg10[%c0_374, %c0_375] : memref<128x384xf32, #tpu.memory_space<vmem>>, vector<128x384xf32>
    %cst_376 = arith.constant dense<0.000000e+00> : vector<1x384xf32>
    %993 = tpu.matmul %925, %992, %cst_376 {dimension_numbers = #tpu.dot_dimension_numbers<[1], [0], [0], [1], [0, 0, 1, 1], [], []>} : vector<1x128xf32>, vector<128x384xf32>, vector<1x384xf32> -> vector<1x384xf32>
    %c0_377 = arith.constant 0 : index
    %c0_378 = arith.constant 0 : index
    %994 = vector.load %arg11[%c0_377, %c0_378] : memref<1x384xf32, #tpu.memory_space<vmem>>, vector<1x384xf32>
    %995 = arith.addf %993, %994 : vector<1x384xf32>
    %c0_379 = arith.constant 0 : index
    %c0_380 = arith.constant 0 : index
    %996 = vector.load %arg6[%c0_379, %c0_380] : memref<16x192xf32, #tpu.memory_space<vmem>>, vector<16x192xf32>
    %cst_381 = arith.constant dense<0.000000e+00> : vector<1x192xf32>
    %997 = tpu.matmul %991, %996, %cst_381 {dimension_numbers = #tpu.dot_dimension_numbers<[1], [0], [0], [1], [0, 0, 1, 1], [], []>} : vector<1x16xf32>, vector<16x192xf32>, vector<1x192xf32> -> vector<1x192xf32>
    %c0_382 = arith.constant 0 : index
    %c0_383 = arith.constant 0 : index
    %998 = vector.load %arg7[%c0_382, %c0_383] : memref<1x192xf32, #tpu.memory_space<vmem>>, vector<1x192xf32>
    %999 = arith.addf %997, %998 : vector<1x192xf32>
    %1000 = vector.extract_strided_slice %999 {offsets = [0, 0], sizes = [1, 96], strides = [1, 1]} : vector<1x192xf32> to vector<1x96xf32>
    %1001 = vector.extract_strided_slice %995 {offsets = [0, 0], sizes = [1, 96], strides = [1, 1]} : vector<1x384xf32> to vector<1x96xf32>
    %1002 = vector.extract_strided_slice %925 {offsets = [0, 0], sizes = [1, 32], strides = [1, 1]} : vector<1x128xf32> to vector<1x32xf32>
    %1003 = vector.extract_strided_slice %1000 {offsets = [0, 0], sizes = [1, 32], strides = [1, 1]} : vector<1x96xf32> to vector<1x32xf32>
    %1004 = vector.extract_strided_slice %1001 {offsets = [0, 0], sizes = [1, 32], strides = [1, 1]} : vector<1x96xf32> to vector<1x32xf32>
    %1005 = arith.addf %1003, %1004 : vector<1x32xf32>
    %1006 = arith.negf %1005 : vector<1x32xf32>
    %1007 = math.exp %1006 : vector<1x32xf32>
    %cst_384 = arith.constant 1.000000e+00 : f32
    %1008 = vector.broadcast %cst_384 : f32 to vector<1x32xf32>
    %1009 = arith.addf %1008, %1007 : vector<1x32xf32>
    %1010 = arith.divf %1008, %1009 : vector<1x32xf32>
    %1011 = vector.extract_strided_slice %1000 {offsets = [0, 32], sizes = [1, 32], strides = [1, 1]} : vector<1x96xf32> to vector<1x32xf32>
    %1012 = vector.extract_strided_slice %1001 {offsets = [0, 32], sizes = [1, 32], strides = [1, 1]} : vector<1x96xf32> to vector<1x32xf32>
    %1013 = arith.addf %1011, %1012 : vector<1x32xf32>
    %1014 = arith.negf %1013 : vector<1x32xf32>
    %1015 = math.exp %1014 : vector<1x32xf32>
    %cst_385 = arith.constant 1.000000e+00 : f32
    %1016 = vector.broadcast %cst_385 : f32 to vector<1x32xf32>
    %1017 = arith.addf %1016, %1015 : vector<1x32xf32>
    %1018 = arith.divf %1016, %1017 : vector<1x32xf32>
    %1019 = vector.extract_strided_slice %1000 {offsets = [0, 64], sizes = [1, 32], strides = [1, 1]} : vector<1x96xf32> to vector<1x32xf32>
    %1020 = vector.extract_strided_slice %1001 {offsets = [0, 64], sizes = [1, 32], strides = [1, 1]} : vector<1x96xf32> to vector<1x32xf32>
    %1021 = arith.mulf %1010, %1020 : vector<1x32xf32>
    %1022 = arith.addf %1019, %1021 : vector<1x32xf32>
    %1023 = math.tanh %1022 : vector<1x32xf32>
    %cst_386 = arith.constant 1.000000e+00 : f32
    %1024 = vector.broadcast %cst_386 : f32 to vector<1x32xf32>
    %1025 = arith.subf %1024, %1018 : vector<1x32xf32>
    %1026 = arith.mulf %1025, %1023 : vector<1x32xf32>
    %1027 = arith.mulf %1018, %1002 : vector<1x32xf32>
    %1028 = arith.addf %1026, %1027 : vector<1x32xf32>
    %1029 = vector.extract_strided_slice %999 {offsets = [0, 96], sizes = [1, 96], strides = [1, 1]} : vector<1x192xf32> to vector<1x96xf32>
    %1030 = vector.extract_strided_slice %995 {offsets = [0, 96], sizes = [1, 96], strides = [1, 1]} : vector<1x384xf32> to vector<1x96xf32>
    %1031 = vector.extract_strided_slice %925 {offsets = [0, 32], sizes = [1, 32], strides = [1, 1]} : vector<1x128xf32> to vector<1x32xf32>
    %1032 = vector.extract_strided_slice %1029 {offsets = [0, 0], sizes = [1, 32], strides = [1, 1]} : vector<1x96xf32> to vector<1x32xf32>
    %1033 = vector.extract_strided_slice %1030 {offsets = [0, 0], sizes = [1, 32], strides = [1, 1]} : vector<1x96xf32> to vector<1x32xf32>
    %1034 = arith.addf %1032, %1033 : vector<1x32xf32>
    %1035 = arith.negf %1034 : vector<1x32xf32>
    %1036 = math.exp %1035 : vector<1x32xf32>
    %cst_387 = arith.constant 1.000000e+00 : f32
    %1037 = vector.broadcast %cst_387 : f32 to vector<1x32xf32>
    %1038 = arith.addf %1037, %1036 : vector<1x32xf32>
    %1039 = arith.divf %1037, %1038 : vector<1x32xf32>
    %1040 = vector.extract_strided_slice %1029 {offsets = [0, 32], sizes = [1, 32], strides = [1, 1]} : vector<1x96xf32> to vector<1x32xf32>
    %1041 = vector.extract_strided_slice %1030 {offsets = [0, 32], sizes = [1, 32], strides = [1, 1]} : vector<1x96xf32> to vector<1x32xf32>
    %1042 = arith.addf %1040, %1041 : vector<1x32xf32>
    %1043 = arith.negf %1042 : vector<1x32xf32>
    %1044 = math.exp %1043 : vector<1x32xf32>
    %cst_388 = arith.constant 1.000000e+00 : f32
    %1045 = vector.broadcast %cst_388 : f32 to vector<1x32xf32>
    %1046 = arith.addf %1045, %1044 : vector<1x32xf32>
    %1047 = arith.divf %1045, %1046 : vector<1x32xf32>
    %1048 = vector.extract_strided_slice %1029 {offsets = [0, 64], sizes = [1, 32], strides = [1, 1]} : vector<1x96xf32> to vector<1x32xf32>
    %1049 = vector.extract_strided_slice %1030 {offsets = [0, 64], sizes = [1, 32], strides = [1, 1]} : vector<1x96xf32> to vector<1x32xf32>
    %1050 = arith.mulf %1039, %1049 : vector<1x32xf32>
    %1051 = arith.addf %1048, %1050 : vector<1x32xf32>
    %1052 = math.tanh %1051 : vector<1x32xf32>
    %cst_389 = arith.constant 1.000000e+00 : f32
    %1053 = vector.broadcast %cst_389 : f32 to vector<1x32xf32>
    %1054 = arith.subf %1053, %1047 : vector<1x32xf32>
    %1055 = arith.mulf %1054, %1052 : vector<1x32xf32>
    %1056 = arith.mulf %1047, %1031 : vector<1x32xf32>
    %1057 = arith.addf %1055, %1056 : vector<1x32xf32>
    %1058 = tpu.concatenate %1028, %1057 in 1 : vector<1x32xf32>, vector<1x32xf32> -> vector<1x64xf32>
    %c0_390 = arith.constant 0 : index
    %c0_391 = arith.constant 0 : index
    %1059 = vector.load %arg8[%c0_390, %c0_391] : memref<64x192xf32, #tpu.memory_space<vmem>>, vector<64x192xf32>
    %cst_392 = arith.constant dense<0.000000e+00> : vector<1x192xf32>
    %1060 = tpu.matmul %1058, %1059, %cst_392 {dimension_numbers = #tpu.dot_dimension_numbers<[1], [0], [0], [1], [0, 0, 1, 1], [], []>} : vector<1x64xf32>, vector<64x192xf32>, vector<1x192xf32> -> vector<1x192xf32>
    %c0_393 = arith.constant 0 : index
    %c0_394 = arith.constant 0 : index
    %1061 = vector.load %arg9[%c0_393, %c0_394] : memref<1x192xf32, #tpu.memory_space<vmem>>, vector<1x192xf32>
    %1062 = arith.addf %1060, %1061 : vector<1x192xf32>
    %1063 = vector.extract_strided_slice %1062 {offsets = [0, 0], sizes = [1, 96], strides = [1, 1]} : vector<1x192xf32> to vector<1x96xf32>
    %1064 = vector.extract_strided_slice %995 {offsets = [0, 192], sizes = [1, 96], strides = [1, 1]} : vector<1x384xf32> to vector<1x96xf32>
    %1065 = vector.extract_strided_slice %925 {offsets = [0, 64], sizes = [1, 32], strides = [1, 1]} : vector<1x128xf32> to vector<1x32xf32>
    %1066 = vector.extract_strided_slice %1063 {offsets = [0, 0], sizes = [1, 32], strides = [1, 1]} : vector<1x96xf32> to vector<1x32xf32>
    %1067 = vector.extract_strided_slice %1064 {offsets = [0, 0], sizes = [1, 32], strides = [1, 1]} : vector<1x96xf32> to vector<1x32xf32>
    %1068 = arith.addf %1066, %1067 : vector<1x32xf32>
    %1069 = arith.negf %1068 : vector<1x32xf32>
    %1070 = math.exp %1069 : vector<1x32xf32>
    %cst_395 = arith.constant 1.000000e+00 : f32
    %1071 = vector.broadcast %cst_395 : f32 to vector<1x32xf32>
    %1072 = arith.addf %1071, %1070 : vector<1x32xf32>
    %1073 = arith.divf %1071, %1072 : vector<1x32xf32>
    %1074 = vector.extract_strided_slice %1063 {offsets = [0, 32], sizes = [1, 32], strides = [1, 1]} : vector<1x96xf32> to vector<1x32xf32>
    %1075 = vector.extract_strided_slice %1064 {offsets = [0, 32], sizes = [1, 32], strides = [1, 1]} : vector<1x96xf32> to vector<1x32xf32>
    %1076 = arith.addf %1074, %1075 : vector<1x32xf32>
    %1077 = arith.negf %1076 : vector<1x32xf32>
    %1078 = math.exp %1077 : vector<1x32xf32>
    %cst_396 = arith.constant 1.000000e+00 : f32
    %1079 = vector.broadcast %cst_396 : f32 to vector<1x32xf32>
    %1080 = arith.addf %1079, %1078 : vector<1x32xf32>
    %1081 = arith.divf %1079, %1080 : vector<1x32xf32>
    %1082 = vector.extract_strided_slice %1063 {offsets = [0, 64], sizes = [1, 32], strides = [1, 1]} : vector<1x96xf32> to vector<1x32xf32>
    %1083 = vector.extract_strided_slice %1064 {offsets = [0, 64], sizes = [1, 32], strides = [1, 1]} : vector<1x96xf32> to vector<1x32xf32>
    %1084 = arith.mulf %1073, %1083 : vector<1x32xf32>
    %1085 = arith.addf %1082, %1084 : vector<1x32xf32>
    %1086 = math.tanh %1085 : vector<1x32xf32>
    %cst_397 = arith.constant 1.000000e+00 : f32
    %1087 = vector.broadcast %cst_397 : f32 to vector<1x32xf32>
    %1088 = arith.subf %1087, %1081 : vector<1x32xf32>
    %1089 = arith.mulf %1088, %1086 : vector<1x32xf32>
    %1090 = arith.mulf %1081, %1065 : vector<1x32xf32>
    %1091 = arith.addf %1089, %1090 : vector<1x32xf32>
    %1092 = vector.extract_strided_slice %1062 {offsets = [0, 96], sizes = [1, 96], strides = [1, 1]} : vector<1x192xf32> to vector<1x96xf32>
    %1093 = vector.extract_strided_slice %995 {offsets = [0, 288], sizes = [1, 96], strides = [1, 1]} : vector<1x384xf32> to vector<1x96xf32>
    %1094 = vector.extract_strided_slice %925 {offsets = [0, 96], sizes = [1, 32], strides = [1, 1]} : vector<1x128xf32> to vector<1x32xf32>
    %1095 = vector.extract_strided_slice %1092 {offsets = [0, 0], sizes = [1, 32], strides = [1, 1]} : vector<1x96xf32> to vector<1x32xf32>
    %1096 = vector.extract_strided_slice %1093 {offsets = [0, 0], sizes = [1, 32], strides = [1, 1]} : vector<1x96xf32> to vector<1x32xf32>
    %1097 = arith.addf %1095, %1096 : vector<1x32xf32>
    %1098 = arith.negf %1097 : vector<1x32xf32>
    %1099 = math.exp %1098 : vector<1x32xf32>
    %cst_398 = arith.constant 1.000000e+00 : f32
    %1100 = vector.broadcast %cst_398 : f32 to vector<1x32xf32>
    %1101 = arith.addf %1100, %1099 : vector<1x32xf32>
    %1102 = arith.divf %1100, %1101 : vector<1x32xf32>
    %1103 = vector.extract_strided_slice %1092 {offsets = [0, 32], sizes = [1, 32], strides = [1, 1]} : vector<1x96xf32> to vector<1x32xf32>
    %1104 = vector.extract_strided_slice %1093 {offsets = [0, 32], sizes = [1, 32], strides = [1, 1]} : vector<1x96xf32> to vector<1x32xf32>
    %1105 = arith.addf %1103, %1104 : vector<1x32xf32>
    %1106 = arith.negf %1105 : vector<1x32xf32>
    %1107 = math.exp %1106 : vector<1x32xf32>
    %cst_399 = arith.constant 1.000000e+00 : f32
    %1108 = vector.broadcast %cst_399 : f32 to vector<1x32xf32>
    %1109 = arith.addf %1108, %1107 : vector<1x32xf32>
    %1110 = arith.divf %1108, %1109 : vector<1x32xf32>
    %1111 = vector.extract_strided_slice %1092 {offsets = [0, 64], sizes = [1, 32], strides = [1, 1]} : vector<1x96xf32> to vector<1x32xf32>
    %1112 = vector.extract_strided_slice %1093 {offsets = [0, 64], sizes = [1, 32], strides = [1, 1]} : vector<1x96xf32> to vector<1x32xf32>
    %1113 = arith.mulf %1102, %1112 : vector<1x32xf32>
    %1114 = arith.addf %1111, %1113 : vector<1x32xf32>
    %1115 = math.tanh %1114 : vector<1x32xf32>
    %cst_400 = arith.constant 1.000000e+00 : f32
    %1116 = vector.broadcast %cst_400 : f32 to vector<1x32xf32>
    %1117 = arith.subf %1116, %1110 : vector<1x32xf32>
    %1118 = arith.mulf %1117, %1115 : vector<1x32xf32>
    %1119 = arith.mulf %1110, %1094 : vector<1x32xf32>
    %1120 = arith.addf %1118, %1119 : vector<1x32xf32>
    %1121 = tpu.concatenate %1091, %1120 in 1 : vector<1x32xf32>, vector<1x32xf32> -> vector<1x64xf32>
    %1122 = tpu.concatenate %1028, %1057, %1091, %1120 in 1 : vector<1x32xf32>, vector<1x32xf32>, vector<1x32xf32>, vector<1x32xf32> -> vector<1x128xf32>
    %c0_401 = arith.constant 0 : index
    %c0_402 = arith.constant 0 : index
    %1123 = vector.load %arg12[%c0_401, %c0_402] : memref<64x32xf32, #tpu.memory_space<vmem>>, vector<64x32xf32>
    %cst_403 = arith.constant dense<0.000000e+00> : vector<1x32xf32>
    %1124 = tpu.matmul %1121, %1123, %cst_403 {dimension_numbers = #tpu.dot_dimension_numbers<[1], [0], [0], [1], [0, 0, 1, 1], [], []>} : vector<1x64xf32>, vector<64x32xf32>, vector<1x32xf32> -> vector<1x32xf32>
    %c0_404 = arith.constant 0 : index
    %c0_405 = arith.constant 0 : index
    %1125 = vector.load %arg13[%c0_404, %c0_405] : memref<1x32xf32, #tpu.memory_space<vmem>>, vector<1x32xf32>
    %1126 = arith.addf %1124, %1125 : vector<1x32xf32>
    %c0_406 = arith.constant 0 : index
    %c0_407 = arith.constant 0 : index
    %1127 = vector.load %arg15[%c0_406, %c0_407] : memref<16x32xf32, #tpu.memory_space<vmem>>, vector<16x32xf32>
    %1128 = vector.broadcast %1126 : vector<1x32xf32> to vector<16x32xf32>
    %1129 = arith.addf %1127, %1128 : vector<16x32xf32>
    %1130 = math.tanh %1129 : vector<16x32xf32>
    %c0_408 = arith.constant 0 : index
    %c0_409 = arith.constant 0 : index
    %1131 = vector.load %arg14[%c0_408, %c0_409] : memref<1x32xf32, #tpu.memory_space<vmem>>, vector<1x32xf32>
    %1132 = tpu.transpose %1130, [1, 0] : vector<16x32xf32> -> vector<32x16xf32>
    %cst_410 = arith.constant dense<0.000000e+00> : vector<1x16xf32>
    %1133 = tpu.matmul %1131, %1132, %cst_410 {dimension_numbers = #tpu.dot_dimension_numbers<[1], [0], [0], [1], [0, 0, 1, 1], [], []>} : vector<1x32xf32>, vector<32x16xf32>, vector<1x16xf32> -> vector<1x16xf32>
    %cst_411 = arith.constant dense<0xFF800000> : vector<1xf32>
    %1134 = vector.multi_reduction <maximumf>, %1133, %cst_411 [1] : vector<1x16xf32> to vector<1xf32>
    %1135 = vector.shape_cast %1134 : vector<1xf32> to vector<1x1xf32>
    %1136 = vector.broadcast %1135 : vector<1x1xf32> to vector<1x16xf32>
    %1137 = arith.subf %1133, %1136 : vector<1x16xf32>
    %1138 = math.exp %1137 : vector<1x16xf32>
    %cst_412 = arith.constant dense<0.000000e+00> : vector<1xf32>
    %1139 = vector.multi_reduction <add>, %1138, %cst_412 [1] : vector<1x16xf32> to vector<1xf32>
    %1140 = vector.shape_cast %1139 : vector<1xf32> to vector<1x1xf32>
    %1141 = tpu.reciprocal %1140 {approx = true} : vector<1x1xf32> -> vector<1x1xf32>
    %1142 = vector.broadcast %1141 : vector<1x1xf32> to vector<1x16xf32>
    %1143 = arith.mulf %1138, %1142 : vector<1x16xf32>
    %c0_413 = arith.constant 0 : index
    %c0_414 = arith.constant 0 : index
    %1144 = vector.load %arg16[%c0_413, %c0_414] : memref<16x64xf32, #tpu.memory_space<vmem>>, vector<16x64xf32>
    %cst_415 = arith.constant dense<0.000000e+00> : vector<1x64xf32>
    %1145 = tpu.matmul %1143, %1144, %cst_415 {dimension_numbers = #tpu.dot_dimension_numbers<[1], [0], [0], [1], [0, 0, 1, 1], [], []>} : vector<1x16xf32>, vector<16x64xf32>, vector<1x64xf32> -> vector<1x64xf32>
    %cst_416 = arith.constant 0.000000e+00 : f32
    %1146 = vector.broadcast %cst_416 : f32 to vector<1x64xf32>
    %1147 = arith.cmpf ogt, %1145, %1146 : vector<1x64xf32>
    %cst_417 = arith.constant 0.00999999977 : f32
    %1148 = vector.broadcast %cst_417 : f32 to vector<1x64xf32>
    %1149 = arith.mulf %1148, %1145 : vector<1x64xf32>
    %1150 = arith.select %1147, %1145, %1149 : vector<1x64xi1>, vector<1x64xf32>
    %cst_418 = arith.constant 0.000000e+00 : f32
    %1151 = vector.broadcast %cst_418 : f32 to vector<1x64xf32>
    %1152 = arith.cmpf ogt, %1150, %1151 : vector<1x64xf32>
    %cst_419 = arith.constant 0.00999999977 : f32
    %1153 = vector.broadcast %cst_419 : f32 to vector<1x64xf32>
    %1154 = arith.mulf %1153, %1150 : vector<1x64xf32>
    %1155 = arith.select %1152, %1150, %1154 : vector<1x64xi1>, vector<1x64xf32>
    %c0_420 = arith.constant 0 : index
    %c0_421 = arith.constant 0 : index
    %1156 = vector.load %arg17[%c0_420, %c0_421] : memref<64x32xf32, #tpu.memory_space<vmem>>, vector<64x32xf32>
    %cst_422 = arith.constant dense<0.000000e+00> : vector<1x32xf32>
    %1157 = tpu.matmul %1155, %1156, %cst_422 {dimension_numbers = #tpu.dot_dimension_numbers<[1], [0], [0], [1], [0, 0, 1, 1], [], []>} : vector<1x64xf32>, vector<64x32xf32>, vector<1x32xf32> -> vector<1x32xf32>
    %c0_423 = arith.constant 0 : index
    %c0_424 = arith.constant 0 : index
    %1158 = vector.load %arg18[%c0_423, %c0_424] : memref<1x32xf32, #tpu.memory_space<vmem>>, vector<1x32xf32>
    %1159 = arith.addf %1157, %1158 : vector<1x32xf32>
    %cst_425 = arith.constant 0.000000e+00 : f32
    %1160 = vector.broadcast %cst_425 : f32 to vector<1x32xf32>
    %1161 = arith.cmpf ogt, %1159, %1160 : vector<1x32xf32>
    %cst_426 = arith.constant 0.00999999977 : f32
    %1162 = vector.broadcast %cst_426 : f32 to vector<1x32xf32>
    %1163 = arith.mulf %1162, %1159 : vector<1x32xf32>
    %1164 = arith.select %1161, %1159, %1163 : vector<1x32xi1>, vector<1x32xf32>
    %c0_427 = arith.constant 0 : index
    %c0_428 = arith.constant 0 : index
    %1165 = vector.load %arg19[%c0_427, %c0_428] : memref<64x16xf32, #tpu.memory_space<vmem>>, vector<64x16xf32>
    %cst_429 = arith.constant dense<0.000000e+00> : vector<1x16xf32>
    %1166 = tpu.matmul %1155, %1165, %cst_429 {dimension_numbers = #tpu.dot_dimension_numbers<[1], [0], [0], [1], [0, 0, 1, 1], [], []>} : vector<1x64xf32>, vector<64x16xf32>, vector<1x16xf32> -> vector<1x16xf32>
    %c0_430 = arith.constant 0 : index
    %c0_431 = arith.constant 0 : index
    %1167 = vector.load %arg20[%c0_430, %c0_431] : memref<1x16xf32, #tpu.memory_space<vmem>>, vector<1x16xf32>
    %1168 = arith.addf %1166, %1167 : vector<1x16xf32>
    %c5 = arith.constant 5 : index
    %c0_432 = arith.constant 0 : index
    %c0_433 = arith.constant 0 : index
    %1169 = vector.load %arg21[%c5, %c0_432, %c0_433] : memref<7x1x16xf32, #tpu.memory_space<vmem>>, vector<1x1x16xf32>
    %1170 = vector.shape_cast %1169 : vector<1x1x16xf32> to vector<1x16xf32>
    %1171 = vector.shape_cast %1168 : vector<1x16xf32> to vector<1x1x16xf32>
    tpu.vector_store %arg21[%c5, %c0_432, %c0_433], %1171 {strides = array<i32>} : memref<7x1x16xf32, #tpu.memory_space<vmem>>, vector<1x1x16xf32>,
    %c5_434 = arith.constant 5 : index
    %c0_435 = arith.constant 0 : index
    %c0_436 = arith.constant 0 : index
    %1172 = vector.load %arg22[%c5_434, %c0_435, %c0_436] : memref<7x1x32xf32, #tpu.memory_space<vmem>>, vector<1x1x32xf32>
    %1173 = vector.shape_cast %1172 : vector<1x1x32xf32> to vector<1x32xf32>
    %1174 = vector.shape_cast %1164 : vector<1x32xf32> to vector<1x1x32xf32>
    tpu.vector_store %arg22[%c5_434, %c0_435, %c0_436], %1174 {strides = array<i32>} : memref<7x1x32xf32, #tpu.memory_space<vmem>>, vector<1x1x32xf32>,
    %c5_437 = arith.constant 5 : index
    %c0_438 = arith.constant 0 : index
    %c0_439 = arith.constant 0 : index
    %1175 = vector.load %arg23[%c5_437, %c0_438, %c0_439] : memref<7x1x16xf32, #tpu.memory_space<vmem>>, vector<1x1x16xf32>
    %1176 = vector.shape_cast %1175 : vector<1x1x16xf32> to vector<1x16xf32>
    %1177 = vector.shape_cast %1143 : vector<1x16xf32> to vector<1x1x16xf32>
    tpu.vector_store %arg23[%c5_437, %c0_438, %c0_439], %1177 {strides = array<i32>} : memref<7x1x16xf32, #tpu.memory_space<vmem>>, vector<1x1x16xf32>,
    %c5_440 = arith.constant 5 : index
    %1178 = memref.load %arg2[%c5_440] : memref<7xi32, #tpu.memory_space<smem>>
    %c1_i32_441 = arith.constant 1 : i32
    %1179 = arith.cmpi eq, %1178, %c1_i32_441 : i32
    %1180 = arith.extui %1179 : i1 to i32
    %c0_i32_442 = arith.constant 0 : i32
    %1181 = arith.cmpi ne, %1180, %c0_i32_442 : i32
    scf.if %1181 {
      %c6_521 = arith.constant 6 : index
      %1383 = memref.load %arg1[%c6_521] : memref<8xi32, #tpu.memory_space<smem>>
      %c0_522 = arith.constant 0 : index
      %1384 = memref.load %arg25[%c0_522] : memref<1xi32, #tpu.memory_space<smem>>
      memref.store %1383, %arg25[%c0_522] : memref<1xi32, #tpu.memory_space<smem>>
    } else {
    }
    %c0_i32_443 = arith.constant 0 : i32
    %1182 = arith.cmpi eq, %1178, %c0_i32_443 : i32
    %1183 = arith.extui %1182 : i1 to i32
    %c0_i32_444 = arith.constant 0 : i32
    %1184 = arith.cmpi ne, %1183, %c0_i32_444 : i32
    scf.if %1184 {
      %c0_521 = arith.constant 0 : index
      %c0_522 = arith.constant 0 : index
      %1383 = vector.load %arg4[%c0_521, %c0_522] : memref<16x12xf32, #tpu.memory_space<vmem>>, vector<16x12xf32>
      %cst_523 = arith.constant dense<0.000000e+00> : vector<1x12xf32>
      %1384 = tpu.matmul %1168, %1383, %cst_523 {dimension_numbers = #tpu.dot_dimension_numbers<[1], [0], [0], [1], [0, 0, 1, 1], [], []>} : vector<1x16xf32>, vector<16x12xf32>, vector<1x12xf32> -> vector<1x12xf32>
      %cst_524 = arith.constant dense<0xFF800000> : vector<1xf32>
      %1385 = vector.multi_reduction <maximumf>, %1384, %cst_524 [1] : vector<1x12xf32> to vector<1xf32>
      %1386 = vector.shape_cast %1385 : vector<1xf32> to vector<1x1xf32>
      %1387 = tpu.iota {dimensions = array<i32: 1>} : vector<1x12xi32>
      %1388 = vector.broadcast %1386 : vector<1x1xf32> to vector<1x12xf32>
      %1389 = arith.cmpf oge, %1384, %1388 : vector<1x12xf32>
      %c12_i32 = arith.constant 12 : i32
      %1390 = vector.broadcast %c12_i32 : i32 to vector<1x12xi32>
      %1391 = arith.select %1389, %1387, %1390 : vector<1x12xi1>, vector<1x12xi32>
      %1392 = vector.shape_cast %1391 : vector<1x12xi32> to vector<1x1x12xi32>
      %cst_525 = arith.constant dense<2147483647> : vector<1xi32>
      %1393 = vector.multi_reduction <minsi>, %1392, %cst_525 [1, 2] : vector<1x1x12xi32> to vector<1xi32>
      %1394 = vector.shape_cast %1393 : vector<1xi32> to vector<1x1x1xi32>
      %1395 = vector.extract %1394[0, 0, 0] : i32 from vector<1x1x1xi32>
      %c0_526 = arith.constant 0 : index
      %1396 = memref.load %arg25[%c0_526] : memref<1xi32, #tpu.memory_space<smem>>
      memref.store %1395, %arg25[%c0_526] : memref<1xi32, #tpu.memory_space<smem>>
    } else {
    }
    %c0_445 = arith.constant 0 : index
    %1185 = memref.load %arg25[%c0_445] : memref<1xi32, #tpu.memory_space<smem>>
    %1186 = arith.index_cast %1185 : i32 to index
    %c0_446 = arith.constant 0 : index
    %c0_447 = arith.constant 0 : index
    %1187 = vector.load %arg3[%1186, %c0_446, %c0_447] : memref<12x1x16xf32, #tpu.memory_space<vmem>>, vector<1x1x16xf32>
    %1188 = vector.shape_cast %1187 : vector<1x1x16xf32> to vector<1x16xf32>
    %c0_448 = arith.constant 0 : index
    %c0_449 = arith.constant 0 : index
    %1189 = vector.load %arg10[%c0_448, %c0_449] : memref<128x384xf32, #tpu.memory_space<vmem>>, vector<128x384xf32>
    %cst_450 = arith.constant dense<0.000000e+00> : vector<1x384xf32>
    %1190 = tpu.matmul %1122, %1189, %cst_450 {dimension_numbers = #tpu.dot_dimension_numbers<[1], [0], [0], [1], [0, 0, 1, 1], [], []>} : vector<1x128xf32>, vector<128x384xf32>, vector<1x384xf32> -> vector<1x384xf32>
    %c0_451 = arith.constant 0 : index
    %c0_452 = arith.constant 0 : index
    %1191 = vector.load %arg11[%c0_451, %c0_452] : memref<1x384xf32, #tpu.memory_space<vmem>>, vector<1x384xf32>
    %1192 = arith.addf %1190, %1191 : vector<1x384xf32>
    %c0_453 = arith.constant 0 : index
    %c0_454 = arith.constant 0 : index
    %1193 = vector.load %arg6[%c0_453, %c0_454] : memref<16x192xf32, #tpu.memory_space<vmem>>, vector<16x192xf32>
    %cst_455 = arith.constant dense<0.000000e+00> : vector<1x192xf32>
    %1194 = tpu.matmul %1188, %1193, %cst_455 {dimension_numbers = #tpu.dot_dimension_numbers<[1], [0], [0], [1], [0, 0, 1, 1], [], []>} : vector<1x16xf32>, vector<16x192xf32>, vector<1x192xf32> -> vector<1x192xf32>
    %c0_456 = arith.constant 0 : index
    %c0_457 = arith.constant 0 : index
    %1195 = vector.load %arg7[%c0_456, %c0_457] : memref<1x192xf32, #tpu.memory_space<vmem>>, vector<1x192xf32>
    %1196 = arith.addf %1194, %1195 : vector<1x192xf32>
    %1197 = vector.extract_strided_slice %1196 {offsets = [0, 0], sizes = [1, 96], strides = [1, 1]} : vector<1x192xf32> to vector<1x96xf32>
    %1198 = vector.extract_strided_slice %1192 {offsets = [0, 0], sizes = [1, 96], strides = [1, 1]} : vector<1x384xf32> to vector<1x96xf32>
    %1199 = vector.extract_strided_slice %1122 {offsets = [0, 0], sizes = [1, 32], strides = [1, 1]} : vector<1x128xf32> to vector<1x32xf32>
    %1200 = vector.extract_strided_slice %1197 {offsets = [0, 0], sizes = [1, 32], strides = [1, 1]} : vector<1x96xf32> to vector<1x32xf32>
    %1201 = vector.extract_strided_slice %1198 {offsets = [0, 0], sizes = [1, 32], strides = [1, 1]} : vector<1x96xf32> to vector<1x32xf32>
    %1202 = arith.addf %1200, %1201 : vector<1x32xf32>
    %1203 = arith.negf %1202 : vector<1x32xf32>
    %1204 = math.exp %1203 : vector<1x32xf32>
    %cst_458 = arith.constant 1.000000e+00 : f32
    %1205 = vector.broadcast %cst_458 : f32 to vector<1x32xf32>
    %1206 = arith.addf %1205, %1204 : vector<1x32xf32>
    %1207 = arith.divf %1205, %1206 : vector<1x32xf32>
    %1208 = vector.extract_strided_slice %1197 {offsets = [0, 32], sizes = [1, 32], strides = [1, 1]} : vector<1x96xf32> to vector<1x32xf32>
    %1209 = vector.extract_strided_slice %1198 {offsets = [0, 32], sizes = [1, 32], strides = [1, 1]} : vector<1x96xf32> to vector<1x32xf32>
    %1210 = arith.addf %1208, %1209 : vector<1x32xf32>
    %1211 = arith.negf %1210 : vector<1x32xf32>
    %1212 = math.exp %1211 : vector<1x32xf32>
    %cst_459 = arith.constant 1.000000e+00 : f32
    %1213 = vector.broadcast %cst_459 : f32 to vector<1x32xf32>
    %1214 = arith.addf %1213, %1212 : vector<1x32xf32>
    %1215 = arith.divf %1213, %1214 : vector<1x32xf32>
    %1216 = vector.extract_strided_slice %1197 {offsets = [0, 64], sizes = [1, 32], strides = [1, 1]} : vector<1x96xf32> to vector<1x32xf32>
    %1217 = vector.extract_strided_slice %1198 {offsets = [0, 64], sizes = [1, 32], strides = [1, 1]} : vector<1x96xf32> to vector<1x32xf32>
    %1218 = arith.mulf %1207, %1217 : vector<1x32xf32>
    %1219 = arith.addf %1216, %1218 : vector<1x32xf32>
    %1220 = math.tanh %1219 : vector<1x32xf32>
    %cst_460 = arith.constant 1.000000e+00 : f32
    %1221 = vector.broadcast %cst_460 : f32 to vector<1x32xf32>
    %1222 = arith.subf %1221, %1215 : vector<1x32xf32>
    %1223 = arith.mulf %1222, %1220 : vector<1x32xf32>
    %1224 = arith.mulf %1215, %1199 : vector<1x32xf32>
    %1225 = arith.addf %1223, %1224 : vector<1x32xf32>
    %1226 = vector.extract_strided_slice %1196 {offsets = [0, 96], sizes = [1, 96], strides = [1, 1]} : vector<1x192xf32> to vector<1x96xf32>
    %1227 = vector.extract_strided_slice %1192 {offsets = [0, 96], sizes = [1, 96], strides = [1, 1]} : vector<1x384xf32> to vector<1x96xf32>
    %1228 = vector.extract_strided_slice %1122 {offsets = [0, 32], sizes = [1, 32], strides = [1, 1]} : vector<1x128xf32> to vector<1x32xf32>
    %1229 = vector.extract_strided_slice %1226 {offsets = [0, 0], sizes = [1, 32], strides = [1, 1]} : vector<1x96xf32> to vector<1x32xf32>
    %1230 = vector.extract_strided_slice %1227 {offsets = [0, 0], sizes = [1, 32], strides = [1, 1]} : vector<1x96xf32> to vector<1x32xf32>
    %1231 = arith.addf %1229, %1230 : vector<1x32xf32>
    %1232 = arith.negf %1231 : vector<1x32xf32>
    %1233 = math.exp %1232 : vector<1x32xf32>
    %cst_461 = arith.constant 1.000000e+00 : f32
    %1234 = vector.broadcast %cst_461 : f32 to vector<1x32xf32>
    %1235 = arith.addf %1234, %1233 : vector<1x32xf32>
    %1236 = arith.divf %1234, %1235 : vector<1x32xf32>
    %1237 = vector.extract_strided_slice %1226 {offsets = [0, 32], sizes = [1, 32], strides = [1, 1]} : vector<1x96xf32> to vector<1x32xf32>
    %1238 = vector.extract_strided_slice %1227 {offsets = [0, 32], sizes = [1, 32], strides = [1, 1]} : vector<1x96xf32> to vector<1x32xf32>
    %1239 = arith.addf %1237, %1238 : vector<1x32xf32>
    %1240 = arith.negf %1239 : vector<1x32xf32>
    %1241 = math.exp %1240 : vector<1x32xf32>
    %cst_462 = arith.constant 1.000000e+00 : f32
    %1242 = vector.broadcast %cst_462 : f32 to vector<1x32xf32>
    %1243 = arith.addf %1242, %1241 : vector<1x32xf32>
    %1244 = arith.divf %1242, %1243 : vector<1x32xf32>
    %1245 = vector.extract_strided_slice %1226 {offsets = [0, 64], sizes = [1, 32], strides = [1, 1]} : vector<1x96xf32> to vector<1x32xf32>
    %1246 = vector.extract_strided_slice %1227 {offsets = [0, 64], sizes = [1, 32], strides = [1, 1]} : vector<1x96xf32> to vector<1x32xf32>
    %1247 = arith.mulf %1236, %1246 : vector<1x32xf32>
    %1248 = arith.addf %1245, %1247 : vector<1x32xf32>
    %1249 = math.tanh %1248 : vector<1x32xf32>
    %cst_463 = arith.constant 1.000000e+00 : f32
    %1250 = vector.broadcast %cst_463 : f32 to vector<1x32xf32>
    %1251 = arith.subf %1250, %1244 : vector<1x32xf32>
    %1252 = arith.mulf %1251, %1249 : vector<1x32xf32>
    %1253 = arith.mulf %1244, %1228 : vector<1x32xf32>
    %1254 = arith.addf %1252, %1253 : vector<1x32xf32>
    %1255 = tpu.concatenate %1225, %1254 in 1 : vector<1x32xf32>, vector<1x32xf32> -> vector<1x64xf32>
    %c0_464 = arith.constant 0 : index
    %c0_465 = arith.constant 0 : index
    %1256 = vector.load %arg8[%c0_464, %c0_465] : memref<64x192xf32, #tpu.memory_space<vmem>>, vector<64x192xf32>
    %cst_466 = arith.constant dense<0.000000e+00> : vector<1x192xf32>
    %1257 = tpu.matmul %1255, %1256, %cst_466 {dimension_numbers = #tpu.dot_dimension_numbers<[1], [0], [0], [1], [0, 0, 1, 1], [], []>} : vector<1x64xf32>, vector<64x192xf32>, vector<1x192xf32> -> vector<1x192xf32>
    %c0_467 = arith.constant 0 : index
    %c0_468 = arith.constant 0 : index
    %1258 = vector.load %arg9[%c0_467, %c0_468] : memref<1x192xf32, #tpu.memory_space<vmem>>, vector<1x192xf32>
    %1259 = arith.addf %1257, %1258 : vector<1x192xf32>
    %1260 = vector.extract_strided_slice %1259 {offsets = [0, 0], sizes = [1, 96], strides = [1, 1]} : vector<1x192xf32> to vector<1x96xf32>
    %1261 = vector.extract_strided_slice %1192 {offsets = [0, 192], sizes = [1, 96], strides = [1, 1]} : vector<1x384xf32> to vector<1x96xf32>
    %1262 = vector.extract_strided_slice %1122 {offsets = [0, 64], sizes = [1, 32], strides = [1, 1]} : vector<1x128xf32> to vector<1x32xf32>
    %1263 = vector.extract_strided_slice %1260 {offsets = [0, 0], sizes = [1, 32], strides = [1, 1]} : vector<1x96xf32> to vector<1x32xf32>
    %1264 = vector.extract_strided_slice %1261 {offsets = [0, 0], sizes = [1, 32], strides = [1, 1]} : vector<1x96xf32> to vector<1x32xf32>
    %1265 = arith.addf %1263, %1264 : vector<1x32xf32>
    %1266 = arith.negf %1265 : vector<1x32xf32>
    %1267 = math.exp %1266 : vector<1x32xf32>
    %cst_469 = arith.constant 1.000000e+00 : f32
    %1268 = vector.broadcast %cst_469 : f32 to vector<1x32xf32>
    %1269 = arith.addf %1268, %1267 : vector<1x32xf32>
    %1270 = arith.divf %1268, %1269 : vector<1x32xf32>
    %1271 = vector.extract_strided_slice %1260 {offsets = [0, 32], sizes = [1, 32], strides = [1, 1]} : vector<1x96xf32> to vector<1x32xf32>
    %1272 = vector.extract_strided_slice %1261 {offsets = [0, 32], sizes = [1, 32], strides = [1, 1]} : vector<1x96xf32> to vector<1x32xf32>
    %1273 = arith.addf %1271, %1272 : vector<1x32xf32>
    %1274 = arith.negf %1273 : vector<1x32xf32>
    %1275 = math.exp %1274 : vector<1x32xf32>
    %cst_470 = arith.constant 1.000000e+00 : f32
    %1276 = vector.broadcast %cst_470 : f32 to vector<1x32xf32>
    %1277 = arith.addf %1276, %1275 : vector<1x32xf32>
    %1278 = arith.divf %1276, %1277 : vector<1x32xf32>
    %1279 = vector.extract_strided_slice %1260 {offsets = [0, 64], sizes = [1, 32], strides = [1, 1]} : vector<1x96xf32> to vector<1x32xf32>
    %1280 = vector.extract_strided_slice %1261 {offsets = [0, 64], sizes = [1, 32], strides = [1, 1]} : vector<1x96xf32> to vector<1x32xf32>
    %1281 = arith.mulf %1270, %1280 : vector<1x32xf32>
    %1282 = arith.addf %1279, %1281 : vector<1x32xf32>
    %1283 = math.tanh %1282 : vector<1x32xf32>
    %cst_471 = arith.constant 1.000000e+00 : f32
    %1284 = vector.broadcast %cst_471 : f32 to vector<1x32xf32>
    %1285 = arith.subf %1284, %1278 : vector<1x32xf32>
    %1286 = arith.mulf %1285, %1283 : vector<1x32xf32>
    %1287 = arith.mulf %1278, %1262 : vector<1x32xf32>
    %1288 = arith.addf %1286, %1287 : vector<1x32xf32>
    %1289 = vector.extract_strided_slice %1259 {offsets = [0, 96], sizes = [1, 96], strides = [1, 1]} : vector<1x192xf32> to vector<1x96xf32>
    %1290 = vector.extract_strided_slice %1192 {offsets = [0, 288], sizes = [1, 96], strides = [1, 1]} : vector<1x384xf32> to vector<1x96xf32>
    %1291 = vector.extract_strided_slice %1122 {offsets = [0, 96], sizes = [1, 32], strides = [1, 1]} : vector<1x128xf32> to vector<1x32xf32>
    %1292 = vector.extract_strided_slice %1289 {offsets = [0, 0], sizes = [1, 32], strides = [1, 1]} : vector<1x96xf32> to vector<1x32xf32>
    %1293 = vector.extract_strided_slice %1290 {offsets = [0, 0], sizes = [1, 32], strides = [1, 1]} : vector<1x96xf32> to vector<1x32xf32>
    %1294 = arith.addf %1292, %1293 : vector<1x32xf32>
    %1295 = arith.negf %1294 : vector<1x32xf32>
    %1296 = math.exp %1295 : vector<1x32xf32>
    %cst_472 = arith.constant 1.000000e+00 : f32
    %1297 = vector.broadcast %cst_472 : f32 to vector<1x32xf32>
    %1298 = arith.addf %1297, %1296 : vector<1x32xf32>
    %1299 = arith.divf %1297, %1298 : vector<1x32xf32>
    %1300 = vector.extract_strided_slice %1289 {offsets = [0, 32], sizes = [1, 32], strides = [1, 1]} : vector<1x96xf32> to vector<1x32xf32>
    %1301 = vector.extract_strided_slice %1290 {offsets = [0, 32], sizes = [1, 32], strides = [1, 1]} : vector<1x96xf32> to vector<1x32xf32>
    %1302 = arith.addf %1300, %1301 : vector<1x32xf32>
    %1303 = arith.negf %1302 : vector<1x32xf32>
    %1304 = math.exp %1303 : vector<1x32xf32>
    %cst_473 = arith.constant 1.000000e+00 : f32
    %1305 = vector.broadcast %cst_473 : f32 to vector<1x32xf32>
    %1306 = arith.addf %1305, %1304 : vector<1x32xf32>
    %1307 = arith.divf %1305, %1306 : vector<1x32xf32>
    %1308 = vector.extract_strided_slice %1289 {offsets = [0, 64], sizes = [1, 32], strides = [1, 1]} : vector<1x96xf32> to vector<1x32xf32>
    %1309 = vector.extract_strided_slice %1290 {offsets = [0, 64], sizes = [1, 32], strides = [1, 1]} : vector<1x96xf32> to vector<1x32xf32>
    %1310 = arith.mulf %1299, %1309 : vector<1x32xf32>
    %1311 = arith.addf %1308, %1310 : vector<1x32xf32>
    %1312 = math.tanh %1311 : vector<1x32xf32>
    %cst_474 = arith.constant 1.000000e+00 : f32
    %1313 = vector.broadcast %cst_474 : f32 to vector<1x32xf32>
    %1314 = arith.subf %1313, %1307 : vector<1x32xf32>
    %1315 = arith.mulf %1314, %1312 : vector<1x32xf32>
    %1316 = arith.mulf %1307, %1291 : vector<1x32xf32>
    %1317 = arith.addf %1315, %1316 : vector<1x32xf32>
    %1318 = tpu.concatenate %1288, %1317 in 1 : vector<1x32xf32>, vector<1x32xf32> -> vector<1x64xf32>
    %1319 = tpu.concatenate %1225, %1254, %1288, %1317 in 1 : vector<1x32xf32>, vector<1x32xf32>, vector<1x32xf32>, vector<1x32xf32> -> vector<1x128xf32>
    %c0_475 = arith.constant 0 : index
    %c0_476 = arith.constant 0 : index
    %1320 = vector.load %arg12[%c0_475, %c0_476] : memref<64x32xf32, #tpu.memory_space<vmem>>, vector<64x32xf32>
    %cst_477 = arith.constant dense<0.000000e+00> : vector<1x32xf32>
    %1321 = tpu.matmul %1318, %1320, %cst_477 {dimension_numbers = #tpu.dot_dimension_numbers<[1], [0], [0], [1], [0, 0, 1, 1], [], []>} : vector<1x64xf32>, vector<64x32xf32>, vector<1x32xf32> -> vector<1x32xf32>
    %c0_478 = arith.constant 0 : index
    %c0_479 = arith.constant 0 : index
    %1322 = vector.load %arg13[%c0_478, %c0_479] : memref<1x32xf32, #tpu.memory_space<vmem>>, vector<1x32xf32>
    %1323 = arith.addf %1321, %1322 : vector<1x32xf32>
    %c0_480 = arith.constant 0 : index
    %c0_481 = arith.constant 0 : index
    %1324 = vector.load %arg15[%c0_480, %c0_481] : memref<16x32xf32, #tpu.memory_space<vmem>>, vector<16x32xf32>
    %1325 = vector.broadcast %1323 : vector<1x32xf32> to vector<16x32xf32>
    %1326 = arith.addf %1324, %1325 : vector<16x32xf32>
    %1327 = math.tanh %1326 : vector<16x32xf32>
    %c0_482 = arith.constant 0 : index
    %c0_483 = arith.constant 0 : index
    %1328 = vector.load %arg14[%c0_482, %c0_483] : memref<1x32xf32, #tpu.memory_space<vmem>>, vector<1x32xf32>
    %1329 = tpu.transpose %1327, [1, 0] : vector<16x32xf32> -> vector<32x16xf32>
    %cst_484 = arith.constant dense<0.000000e+00> : vector<1x16xf32>
    %1330 = tpu.matmul %1328, %1329, %cst_484 {dimension_numbers = #tpu.dot_dimension_numbers<[1], [0], [0], [1], [0, 0, 1, 1], [], []>} : vector<1x32xf32>, vector<32x16xf32>, vector<1x16xf32> -> vector<1x16xf32>
    %cst_485 = arith.constant dense<0xFF800000> : vector<1xf32>
    %1331 = vector.multi_reduction <maximumf>, %1330, %cst_485 [1] : vector<1x16xf32> to vector<1xf32>
    %1332 = vector.shape_cast %1331 : vector<1xf32> to vector<1x1xf32>
    %1333 = vector.broadcast %1332 : vector<1x1xf32> to vector<1x16xf32>
    %1334 = arith.subf %1330, %1333 : vector<1x16xf32>
    %1335 = math.exp %1334 : vector<1x16xf32>
    %cst_486 = arith.constant dense<0.000000e+00> : vector<1xf32>
    %1336 = vector.multi_reduction <add>, %1335, %cst_486 [1] : vector<1x16xf32> to vector<1xf32>
    %1337 = vector.shape_cast %1336 : vector<1xf32> to vector<1x1xf32>
    %1338 = tpu.reciprocal %1337 {approx = true} : vector<1x1xf32> -> vector<1x1xf32>
    %1339 = vector.broadcast %1338 : vector<1x1xf32> to vector<1x16xf32>
    %1340 = arith.mulf %1335, %1339 : vector<1x16xf32>
    %c0_487 = arith.constant 0 : index
    %c0_488 = arith.constant 0 : index
    %1341 = vector.load %arg16[%c0_487, %c0_488] : memref<16x64xf32, #tpu.memory_space<vmem>>, vector<16x64xf32>
    %cst_489 = arith.constant dense<0.000000e+00> : vector<1x64xf32>
    %1342 = tpu.matmul %1340, %1341, %cst_489 {dimension_numbers = #tpu.dot_dimension_numbers<[1], [0], [0], [1], [0, 0, 1, 1], [], []>} : vector<1x16xf32>, vector<16x64xf32>, vector<1x64xf32> -> vector<1x64xf32>
    %cst_490 = arith.constant 0.000000e+00 : f32
    %1343 = vector.broadcast %cst_490 : f32 to vector<1x64xf32>
    %1344 = arith.cmpf ogt, %1342, %1343 : vector<1x64xf32>
    %cst_491 = arith.constant 0.00999999977 : f32
    %1345 = vector.broadcast %cst_491 : f32 to vector<1x64xf32>
    %1346 = arith.mulf %1345, %1342 : vector<1x64xf32>
    %1347 = arith.select %1344, %1342, %1346 : vector<1x64xi1>, vector<1x64xf32>
    %cst_492 = arith.constant 0.000000e+00 : f32
    %1348 = vector.broadcast %cst_492 : f32 to vector<1x64xf32>
    %1349 = arith.cmpf ogt, %1347, %1348 : vector<1x64xf32>
    %cst_493 = arith.constant 0.00999999977 : f32
    %1350 = vector.broadcast %cst_493 : f32 to vector<1x64xf32>
    %1351 = arith.mulf %1350, %1347 : vector<1x64xf32>
    %1352 = arith.select %1349, %1347, %1351 : vector<1x64xi1>, vector<1x64xf32>
    %c0_494 = arith.constant 0 : index
    %c0_495 = arith.constant 0 : index
    %1353 = vector.load %arg17[%c0_494, %c0_495] : memref<64x32xf32, #tpu.memory_space<vmem>>, vector<64x32xf32>
    %cst_496 = arith.constant dense<0.000000e+00> : vector<1x32xf32>
    %1354 = tpu.matmul %1352, %1353, %cst_496 {dimension_numbers = #tpu.dot_dimension_numbers<[1], [0], [0], [1], [0, 0, 1, 1], [], []>} : vector<1x64xf32>, vector<64x32xf32>, vector<1x32xf32> -> vector<1x32xf32>
    %c0_497 = arith.constant 0 : index
    %c0_498 = arith.constant 0 : index
    %1355 = vector.load %arg18[%c0_497, %c0_498] : memref<1x32xf32, #tpu.memory_space<vmem>>, vector<1x32xf32>
    %1356 = arith.addf %1354, %1355 : vector<1x32xf32>
    %cst_499 = arith.constant 0.000000e+00 : f32
    %1357 = vector.broadcast %cst_499 : f32 to vector<1x32xf32>
    %1358 = arith.cmpf ogt, %1356, %1357 : vector<1x32xf32>
    %cst_500 = arith.constant 0.00999999977 : f32
    %1359 = vector.broadcast %cst_500 : f32 to vector<1x32xf32>
    %1360 = arith.mulf %1359, %1356 : vector<1x32xf32>
    %1361 = arith.select %1358, %1356, %1360 : vector<1x32xi1>, vector<1x32xf32>
    %c0_501 = arith.constant 0 : index
    %c0_502 = arith.constant 0 : index
    %1362 = vector.load %arg19[%c0_501, %c0_502] : memref<64x16xf32, #tpu.memory_space<vmem>>, vector<64x16xf32>
    %cst_503 = arith.constant dense<0.000000e+00> : vector<1x16xf32>
    %1363 = tpu.matmul %1352, %1362, %cst_503 {dimension_numbers = #tpu.dot_dimension_numbers<[1], [0], [0], [1], [0, 0, 1, 1], [], []>} : vector<1x64xf32>, vector<64x16xf32>, vector<1x16xf32> -> vector<1x16xf32>
    %c0_504 = arith.constant 0 : index
    %c0_505 = arith.constant 0 : index
    %1364 = vector.load %arg20[%c0_504, %c0_505] : memref<1x16xf32, #tpu.memory_space<vmem>>, vector<1x16xf32>
    %1365 = arith.addf %1363, %1364 : vector<1x16xf32>
    %c6 = arith.constant 6 : index
    %c0_506 = arith.constant 0 : index
    %c0_507 = arith.constant 0 : index
    %1366 = vector.load %arg21[%c6, %c0_506, %c0_507] : memref<7x1x16xf32, #tpu.memory_space<vmem>>, vector<1x1x16xf32>
    %1367 = vector.shape_cast %1366 : vector<1x1x16xf32> to vector<1x16xf32>
    %1368 = vector.shape_cast %1365 : vector<1x16xf32> to vector<1x1x16xf32>
    tpu.vector_store %arg21[%c6, %c0_506, %c0_507], %1368 {strides = array<i32>} : memref<7x1x16xf32, #tpu.memory_space<vmem>>, vector<1x1x16xf32>,
    %c6_508 = arith.constant 6 : index
    %c0_509 = arith.constant 0 : index
    %c0_510 = arith.constant 0 : index
    %1369 = vector.load %arg22[%c6_508, %c0_509, %c0_510] : memref<7x1x32xf32, #tpu.memory_space<vmem>>, vector<1x1x32xf32>
    %1370 = vector.shape_cast %1369 : vector<1x1x32xf32> to vector<1x32xf32>
    %1371 = vector.shape_cast %1361 : vector<1x32xf32> to vector<1x1x32xf32>
    tpu.vector_store %arg22[%c6_508, %c0_509, %c0_510], %1371 {strides = array<i32>} : memref<7x1x32xf32, #tpu.memory_space<vmem>>, vector<1x1x32xf32>,
    %c6_511 = arith.constant 6 : index
    %c0_512 = arith.constant 0 : index
    %c0_513 = arith.constant 0 : index
    %1372 = vector.load %arg23[%c6_511, %c0_512, %c0_513] : memref<7x1x16xf32, #tpu.memory_space<vmem>>, vector<1x1x16xf32>
    %1373 = vector.shape_cast %1372 : vector<1x1x16xf32> to vector<1x16xf32>
    %1374 = vector.shape_cast %1340 : vector<1x16xf32> to vector<1x1x16xf32>
    tpu.vector_store %arg23[%c6_511, %c0_512, %c0_513], %1374 {strides = array<i32>} : memref<7x1x16xf32, #tpu.memory_space<vmem>>, vector<1x1x16xf32>,
    %c6_514 = arith.constant 6 : index
    %1375 = memref.load %arg2[%c6_514] : memref<7xi32, #tpu.memory_space<smem>>
    %c1_i32_515 = arith.constant 1 : i32
    %1376 = arith.cmpi eq, %1375, %c1_i32_515 : i32
    %1377 = arith.extui %1376 : i1 to i32
    %c0_i32_516 = arith.constant 0 : i32
    %1378 = arith.cmpi ne, %1377, %c0_i32_516 : i32
    scf.if %1378 {
      %c7 = arith.constant 7 : index
      %1383 = memref.load %arg1[%c7] : memref<8xi32, #tpu.memory_space<smem>>
      %c0_521 = arith.constant 0 : index
      %1384 = memref.load %arg25[%c0_521] : memref<1xi32, #tpu.memory_space<smem>>
      memref.store %1383, %arg25[%c0_521] : memref<1xi32, #tpu.memory_space<smem>>
    } else {
    }
    %c0_i32_517 = arith.constant 0 : i32
    %1379 = arith.cmpi eq, %1375, %c0_i32_517 : i32
    %1380 = arith.extui %1379 : i1 to i32
    %c0_i32_518 = arith.constant 0 : i32
    %1381 = arith.cmpi ne, %1380, %c0_i32_518 : i32
    scf.if %1381 {
      %c0_521 = arith.constant 0 : index
      %c0_522 = arith.constant 0 : index
      %1383 = vector.load %arg4[%c0_521, %c0_522] : memref<16x12xf32, #tpu.memory_space<vmem>>, vector<16x12xf32>
      %cst_523 = arith.constant dense<0.000000e+00> : vector<1x12xf32>
      %1384 = tpu.matmul %1365, %1383, %cst_523 {dimension_numbers = #tpu.dot_dimension_numbers<[1], [0], [0], [1], [0, 0, 1, 1], [], []>} : vector<1x16xf32>, vector<16x12xf32>, vector<1x12xf32> -> vector<1x12xf32>
      %cst_524 = arith.constant dense<0xFF800000> : vector<1xf32>
      %1385 = vector.multi_reduction <maximumf>, %1384, %cst_524 [1] : vector<1x12xf32> to vector<1xf32>
      %1386 = vector.shape_cast %1385 : vector<1xf32> to vector<1x1xf32>
      %1387 = tpu.iota {dimensions = array<i32: 1>} : vector<1x12xi32>
      %1388 = vector.broadcast %1386 : vector<1x1xf32> to vector<1x12xf32>
      %1389 = arith.cmpf oge, %1384, %1388 : vector<1x12xf32>
      %c12_i32 = arith.constant 12 : i32
      %1390 = vector.broadcast %c12_i32 : i32 to vector<1x12xi32>
      %1391 = arith.select %1389, %1387, %1390 : vector<1x12xi1>, vector<1x12xi32>
      %1392 = vector.shape_cast %1391 : vector<1x12xi32> to vector<1x1x12xi32>
      %cst_525 = arith.constant dense<2147483647> : vector<1xi32>
      %1393 = vector.multi_reduction <minsi>, %1392, %cst_525 [1, 2] : vector<1x1x12xi32> to vector<1xi32>
      %1394 = vector.shape_cast %1393 : vector<1xi32> to vector<1x1x1xi32>
      %1395 = vector.extract %1394[0, 0, 0] : i32 from vector<1x1x1xi32>
      %c0_526 = arith.constant 0 : index
      %1396 = memref.load %arg25[%c0_526] : memref<1xi32, #tpu.memory_space<smem>>
      memref.store %1395, %arg25[%c0_526] : memref<1xi32, #tpu.memory_space<smem>>
    } else {
    }
    %c0_519 = arith.constant 0 : index
    %c0_520 = arith.constant 0 : index
    %1382 = vector.load %arg24[%c0_519, %c0_520] : memref<1x128xf32, #tpu.memory_space<vmem>>, vector<1x128xf32>
    tpu.vector_store %arg24[%c0_519, %c0_520], %1319 {strides = array<i32>} : memref<1x128xf32, #tpu.memory_space<vmem>>, vector<1x128xf32>,
    return
  }
  func.func @transform_0(%arg0: i32, %arg1: memref<8xi32, #tpu.memory_space<smem>>, %arg2: memref<7xi32, #tpu.memory_space<smem>>) -> (i32, i32, i32) {
    %c0_i32 = arith.constant 0 : i32
    %c0_i32_0 = arith.constant 0 : i32
    %c0_i32_1 = arith.constant 0 : i32
    %c0_i32_2 = arith.constant 0 : i32
    return %c0_i32, %c0_i32_0, %c0_i32_1 : i32, i32, i32
  }
  func.func @transform_1(%arg0: i32, %arg1: memref<8xi32, #tpu.memory_space<smem>>, %arg2: memref<7xi32, #tpu.memory_space<smem>>) -> (i32, i32) {
    %c0_i32 = arith.constant 0 : i32
    %c0_i32_0 = arith.constant 0 : i32
    %c0_i32_1 = arith.constant 0 : i32
    return %c0_i32, %c0_i32_0 : i32, i32
  }
  func.func @transform_2(%arg0: i32, %arg1: memref<8xi32, #tpu.memory_space<smem>>, %arg2: memref<7xi32, #tpu.memory_space<smem>>) -> (i32, i32) {
    %c0_i32 = arith.constant 0 : i32
    %c0_i32_0 = arith.constant 0 : i32
    %c0_i32_1 = arith.constant 0 : i32
    return %c0_i32, %c0_i32_0 : i32, i32
  }
  func.func @transform_3(%arg0: i32, %arg1: memref<8xi32, #tpu.memory_space<smem>>, %arg2: memref<7xi32, #tpu.memory_space<smem>>) -> (i32, i32) {
    %c0_i32 = arith.constant 0 : i32
    %c0_i32_0 = arith.constant 0 : i32
    %c0_i32_1 = arith.constant 0 : i32
    return %c0_i32, %c0_i32_0 : i32, i32
  }
  func.func @transform_4(%arg0: i32, %arg1: memref<8xi32, #tpu.memory_space<smem>>, %arg2: memref<7xi32, #tpu.memory_space<smem>>) -> (i32, i32) {
    %c0_i32 = arith.constant 0 : i32
    %c0_i32_0 = arith.constant 0 : i32
    %c0_i32_1 = arith.constant 0 : i32
    return %c0_i32, %c0_i32_0 : i32, i32
  }
  func.func @transform_5(%arg0: i32, %arg1: memref<8xi32, #tpu.memory_space<smem>>, %arg2: memref<7xi32, #tpu.memory_space<smem>>) -> (i32, i32) {
    %c0_i32 = arith.constant 0 : i32
    %c0_i32_0 = arith.constant 0 : i32
    %c0_i32_1 = arith.constant 0 : i32
    return %c0_i32, %c0_i32_0 : i32, i32
  }
  func.func @transform_6(%arg0: i32, %arg1: memref<8xi32, #tpu.memory_space<smem>>, %arg2: memref<7xi32, #tpu.memory_space<smem>>) -> (i32, i32) {
    %c0_i32 = arith.constant 0 : i32
    %c0_i32_0 = arith.constant 0 : i32
    %c0_i32_1 = arith.constant 0 : i32
    return %c0_i32, %c0_i32_0 : i32, i32
  }
  func.func @transform_7(%arg0: i32, %arg1: memref<8xi32, #tpu.memory_space<smem>>, %arg2: memref<7xi32, #tpu.memory_space<smem>>) -> (i32, i32) {
    %c0_i32 = arith.constant 0 : i32
    %c0_i32_0 = arith.constant 0 : i32
    %c0_i32_1 = arith.constant 0 : i32
    return %c0_i32, %c0_i32_0 : i32, i32
  }
  func.func @transform_8(%arg0: i32, %arg1: memref<8xi32, #tpu.memory_space<smem>>, %arg2: memref<7xi32, #tpu.memory_space<smem>>) -> (i32, i32) {
    %c0_i32 = arith.constant 0 : i32
    %c0_i32_0 = arith.constant 0 : i32
    %c0_i32_1 = arith.constant 0 : i32
    return %c0_i32, %c0_i32_0 : i32, i32
  }
  func.func @transform_9(%arg0: i32, %arg1: memref<8xi32, #tpu.memory_space<smem>>, %arg2: memref<7xi32, #tpu.memory_space<smem>>) -> (i32, i32) {
    %c0_i32 = arith.constant 0 : i32
    %c0_i32_0 = arith.constant 0 : i32
    %c0_i32_1 = arith.constant 0 : i32
    return %c0_i32, %c0_i32_0 : i32, i32
  }
  func.func @transform_10(%arg0: i32, %arg1: memref<8xi32, #tpu.memory_space<smem>>, %arg2: memref<7xi32, #tpu.memory_space<smem>>) -> (i32, i32) {
    %c0_i32 = arith.constant 0 : i32
    %c0_i32_0 = arith.constant 0 : i32
    %c0_i32_1 = arith.constant 0 : i32
    return %c0_i32, %c0_i32_0 : i32, i32
  }
  func.func @transform_11(%arg0: i32, %arg1: memref<8xi32, #tpu.memory_space<smem>>, %arg2: memref<7xi32, #tpu.memory_space<smem>>) -> (i32, i32) {
    %c0_i32 = arith.constant 0 : i32
    %c0_i32_0 = arith.constant 0 : i32
    %c0_i32_1 = arith.constant 0 : i32
    return %c0_i32, %c0_i32_0 : i32, i32
  }
  func.func @transform_12(%arg0: i32, %arg1: memref<8xi32, #tpu.memory_space<smem>>, %arg2: memref<7xi32, #tpu.memory_space<smem>>) -> (i32, i32) {
    %c0_i32 = arith.constant 0 : i32
    %c0_i32_0 = arith.constant 0 : i32
    %c0_i32_1 = arith.constant 0 : i32
    return %c0_i32, %c0_i32_0 : i32, i32
  }
  func.func @transform_13(%arg0: i32, %arg1: memref<8xi32, #tpu.memory_space<smem>>, %arg2: memref<7xi32, #tpu.memory_space<smem>>) -> (i32, i32) {
    %c0_i32 = arith.constant 0 : i32
    %c0_i32_0 = arith.constant 0 : i32
    %c0_i32_1 = arith.constant 0 : i32
    return %c0_i32, %c0_i32_0 : i32, i32
  }
  func.func @transform_14(%arg0: i32, %arg1: memref<8xi32, #tpu.memory_space<smem>>, %arg2: memref<7xi32, #tpu.memory_space<smem>>) -> (i32, i32) {
    %c0_i32 = arith.constant 0 : i32
    %c0_i32_0 = arith.constant 0 : i32
    %c0_i32_1 = arith.constant 0 : i32
    return %c0_i32, %c0_i32_0 : i32, i32
  }
  func.func @transform_15(%arg0: i32, %arg1: memref<8xi32, #tpu.memory_space<smem>>, %arg2: memref<7xi32, #tpu.memory_space<smem>>) -> (i32, i32) {
    %c0_i32 = arith.constant 0 : i32
    %c0_i32_0 = arith.constant 0 : i32
    %c0_i32_1 = arith.constant 0 : i32
    return %c0_i32, %c0_i32_0 : i32, i32
  }
  func.func @transform_16(%arg0: i32, %arg1: memref<8xi32, #tpu.memory_space<smem>>, %arg2: memref<7xi32, #tpu.memory_space<smem>>) -> (i32, i32) {
    %c0_i32 = arith.constant 0 : i32
    %c0_i32_0 = arith.constant 0 : i32
    %c0_i32_1 = arith.constant 0 : i32
    return %c0_i32, %c0_i32_0 : i32, i32
  }
  func.func @transform_17(%arg0: i32, %arg1: memref<8xi32, #tpu.memory_space<smem>>, %arg2: memref<7xi32, #tpu.memory_space<smem>>) -> (i32, i32) {
    %c0_i32 = arith.constant 0 : i32
    %c0_i32_0 = arith.constant 0 : i32
    %c0_i32_1 = arith.constant 0 : i32
    return %c0_i32, %c0_i32_0 : i32, i32
  }
  func.func @transform_18(%arg0: i32, %arg1: memref<8xi32, #tpu.memory_space<smem>>, %arg2: memref<7xi32, #tpu.memory_space<smem>>) -> (i32, i32, i32) {
    %c0_i32 = arith.constant 0 : i32
    %c0_i32_0 = arith.constant 0 : i32
    %c0_i32_1 = arith.constant 0 : i32
    %c0_i32_2 = arith.constant 0 : i32
    return %c0_i32, %c0_i32_0, %c0_i32_1 : i32, i32, i32
  }
  func.func @transform_19(%arg0: i32, %arg1: memref<8xi32, #tpu.memory_space<smem>>, %arg2: memref<7xi32, #tpu.memory_space<smem>>) -> (i32, i32, i32) {
    %c0_i32 = arith.constant 0 : i32
    %c0_i32_0 = arith.constant 0 : i32
    %c0_i32_1 = arith.constant 0 : i32
    %c0_i32_2 = arith.constant 0 : i32
    return %c0_i32, %c0_i32_0, %c0_i32_1 : i32, i32, i32
  }
  func.func @transform_20(%arg0: i32, %arg1: memref<8xi32, #tpu.memory_space<smem>>, %arg2: memref<7xi32, #tpu.memory_space<smem>>) -> (i32, i32, i32) {
    %c0_i32 = arith.constant 0 : i32
    %c0_i32_0 = arith.constant 0 : i32
    %c0_i32_1 = arith.constant 0 : i32
    %c0_i32_2 = arith.constant 0 : i32
    return %c0_i32, %c0_i32_0, %c0_i32_1 : i32, i32, i32
  }
  func.func @transform_21(%arg0: i32, %arg1: memref<8xi32, #tpu.memory_space<smem>>, %arg2: memref<7xi32, #tpu.memory_space<smem>>) -> (i32, i32) {
    %c0_i32 = arith.constant 0 : i32
    %c0_i32_0 = arith.constant 0 : i32
    %c0_i32_1 = arith.constant 0 : i32
    return %c0_i32, %c0_i32_0 : i32, i32
  }
}

</mosaic_0001>

<bundles_post_ra>
// kernel: tpu_custom_call.1
= control target key start
LH: loop header
LB: loop body
LE: loop exit
PB: predicated region body
PF: predicated region fallthrough
CT: control target
= control target key end

     0   :  { %s12873_s0 = inlined_call_operand.hbm [shape: s32[8], index: 0, kind: input, shape index: {}]   ;;  %s12874_s2 = inlined_call_operand.vmem [shape: f32[12,1,16], index: 2, kind: input, shape index: {}]   ;;  %s12875_s3 = inlined_call_operand.vmem [shape: f32[16,12], index: 3, kind: input, shape index: {}]   ;;  %s12876_s4 = inlined_call_operand.vmem [shape: f32[1,128], index: 4, kind: input, shape index: {}]   ;;  %s12877_s5 = inlined_call_operand.vmem [shape: f32[16,192], index: 5, kind: input, shape index: {}]   ;;  %s12878_s6 = inlined_call_operand.vmem [shape: f32[1,192], index: 6, kind: input, shape index: {}]   ;;  %s12879_s7 = inlined_call_operand.vmem [shape: f32[64,192], index: 7, kind: input, shape index: {}]   ;;  %s12880_s8 = inlined_call_operand.vmem [shape: f32[1,192], index: 8, kind: input, shape index: {}]   ;;  %s12881_s9 = inlined_call_operand.hbm [shape: f32[128,384], index: 9, kind: input, shape index: {}]   ;;  %s12882_s10 = inlined_call_operand.vmem [shape: f32[1,384], index: 10, kind: input, shape index: {}]   ;;  %s12883_s11 = inlined_call_operand.vmem [shape: f32[64,32], index: 11, kind: input, shape index: {}]   ;;  %s12884_s12 = inlined_call_operand.vmem [shape: f32[1,32], index: 12, kind: input, shape index: {}]   ;;  %s12885_s13 = inlined_call_operand.vmem [shape: f32[1,32], index: 13, kind: input, shape index: {}]   ;;  %s12886_s14 = inlined_call_operand.vmem [shape: f32[16,32], index: 14, kind: input, shape index: {}]   ;;  %s12887_s15 = inlined_call_operand.vmem [shape: f32[16,64], index: 15, kind: input, shape index: {}]   ;;  %s12888_s16 = inlined_call_operand.vmem [shape: f32[64,32], index: 16, kind: input, shape index: {}]   ;;  %s12889_s17 = inlined_call_operand.vmem [shape: f32[1,32], index: 17, kind: input, shape index: {}]   ;;  %s12890_s18 = inlined_call_operand.vmem [shape: f32[64,16], index: 18, kind: input, shape index: {}]   ;;  %s12891_s19 = inlined_call_operand.vmem [shape: f32[1,16], index: 19, kind: input, shape index: {}]   ;;  %s12892_s20 = inlined_call_operand.hbm [shape: f32[7,1,16], index: 20, kind: output, shape index: {0}]   ;;  %s12893_s21 = inlined_call_operand.hbm [shape: f32[7,1,32], index: 21, kind: output, shape index: {1}]   ;;  %s12894_s22 = inlined_call_operand.hbm [shape: f32[7,1,16], index: 22, kind: output, shape index: {2}]   ;;  %s12895_s23 = inlined_call_operand.hbm [shape: f32[1,128], index: 23, kind: output, shape index: {3}]   ;;  %s12896_s1 = inlined_call_operand.hbm [shape: s32[7], index: 1, kind: input, shape index: {}]  }
   0x1   :  { %12919 = sst [smem:[#allocation20_spill]] %s12873_s0 }
   0x2   :  { %12920 = sst [smem:[#allocation21_spill]] %s12874_s2  ;;  %s12928_s24 = sld [smem:[#allocation20_spill]] }
   0x3   :  { %12921 = sst [smem:[#allocation22_spill]] %s12875_s3 }
   0x4   :  { %12922 = sst [smem:[#allocation23_spill]] %s12876_s4 }
   0x5   :  { %12923 = sst [smem:[#allocation24_spill]] %s12877_s5 }
   0x6   :  { %12924 = sst [smem:[#allocation25_spill]] %s12878_s6 }
   0x7   :  { %12925 = sst [smem:[#allocation26_spill]] %s12879_s7 }
   0x8   :  { %12926 = sst [smem:[#allocation27_spill]] %s12880_s8 }
   0x9   :  { %12927 = sst [smem:[#allocation28_spill]] %s12889_s17  ;;  %s10307_s17 = scalar_lea.hbm %s12928_s24, 16 }
   0xa   :  { %p10308_p0 = scmp.ne.s32.totalorder %s12928_s24, %s10307_s17  ;;  %p10311_p1 = scmp.lt.u32.totalorder %s10307_s17, %s12928_s24 }
   0xc   :  { %p10313_p2 = pnand %p10311_p1, %p10308_p0 }
   0xe   :  { %10316 = shalt.err (!%p10313_p2)  }
   0xf   :  { %s10447_s3 = smov [#allocation4]   ;;  %s10317_s29 = scalar_lea.hbm %s12896_s1, 16 }
  0x10   :  { %30 = dma.hbm_to_smem %s12928_s24, 16, %s10447_s3, [#allocation3] }
  0x11   :  { %p10318_p3 = scmp.ne.s32.totalorder %s12896_s1, %s10317_s29  ;;  %p10321_p4 = scmp.lt.u32.totalorder %s10317_s29, %s12896_s1 }
  0x13   :  { %p10323_p5 = pnand %p10321_p4, %p10318_p3 }
  0x15   :  { %10326 = shalt.err (!%p10323_p5)  }
  0x16   :  { %s10448_s17 = smov [#allocation5]  }
  0x17   :  { %32 = dma.hbm_to_smem %s12896_s1, 16, %s10448_s17, [#allocation3] }
  0x18   :  { %10437 = dma.done.wait [#allocation3], 32 }
  0x19   :  { %10438 = vsyncadd [#allocation3], 4294967264 }
  0x1a   :  { %34 = sfence }
  0x1b   :  { %35 = vsyncpa [#allocation7], 0 }
  0x1c   :  { %36 = vsyncpa [#allocation8], 0 }
  0x1d   :  { %37 = vsyncpa [#allocation11], 0 }
  0x1e   :  { %38 = vsyncpa [#allocation14], 0  ;;  %s10449_s24 = smov [#allocation6]   ;;  %s10327_s7 = scalar_lea.hbm %s12881_s9, 6144 }
  0x1f   :  { %s58_s2 = sshll.u32 %s10449_s24, 4  ;;  %p10328_p6 = scmp.ne.s32.totalorder %s12881_s9, %s10327_s7  ;;  %s59_s2 = int_to_ptr.vmem [resolvable:$true] %s58_s2 }
  0x20   :  { %p10331_p7 = scmp.lt.u32.totalorder %s10327_s7, %s12881_s9 }
  0x22   :  { %p10333_p8 = pnand %p10331_p7, %p10328_p6 }
  0x24   :  { %10336 = shalt.err (!%p10333_p8)
}
  0x25   :  { %s10337_s29 = scalar_lea.vmem %s59_s2, 6144  ;;  %p10342_p10 = scmp.lt.s32.totalorder %s59_s2, %s59_s2 }
  0x26   :  { %p10338_p9 = scmp.ne.s32.totalorder %s59_s2, %s10337_s29  ;;  %p10343_p11 = scmp.lt.s32.totalorder %s10337_s29, %s10337_s29 }
  0x28   :  { %p10344_p12 = por %p10343_p11, %p10342_p10 }
  0x2a   :  { %p10345_p13 = pnand %p10344_p12, %p10338_p9 }
  0x2c   :  { %10348 = shalt.err (!%p10345_p13)
}
  0x2d   :  { %s10450_s4 = smov 384   ;;  %s10451_s0 = smov 24  }
  0x2e   :  { %64 = dma.hbm_to_vmem [thread:$0]  %s12881_s9, 6144, %s59_s2, [#allocation7], %s10450_s4, %s10450_s4, %s10451_s0  }
  0x2f   :  { %10439 = dma.done.wait [#allocation7], 6144  }
  0x30   :  { %10440 = vsyncadd [#allocation7], 4294961152  ;;  %v10452_v0 = vmov 0.0   ;;  %s10642_s17 = sld [smem:[#allocation4]]  ;;  %s7849_s6 = sld [smem:[#allocation4 + $0x1]]  ;;  %v96_v1 = vld [vmem:[#allocation6 + $0x8] sm:$0xff]  ;;  %v145_v57 = vlaneseq }
  0x31   :  { %224 = vmatprep.mubr.f32.mxu0 %v10452_v0  ;;  %s10644_s25 = sld [smem:[#allocation5]]  ;;  %v99_v2 = vld [vmem:[#allocation6 + $0x20] sm:$0xff]  ;;  %v98_v5 = vld [vmem:[#allocation6 + $0x18] sm:$0xff]  ;;  %v105_v7 = vld [vmem:[#allocation6 + $0x50] sm:$0xff]  ;;  %s12929_s2 = sld [smem:[#allocation24_spill]]  ;;  %vm317_vm0 = vcmask 130048  }
  0x32   :  { %v95_v3 = vld [vmem:[#allocation6] sm:$0xff]  ;;  %v9128_v4 = vpack.c.bf16 %v99_v2, %v96_v1  ;;  %v102_v6 = vld [vmem:[#allocation6 + $0x38] sm:$0xff]  ;;  %v101_v10 = vld [vmem:[#allocation6 + $0x30] sm:$0xff]  ;;  %s12930_s4 = sld [smem:[#allocation23_spill]]  ;;  %s12931_s30 = sld [smem:[#allocation21_spill]]  ;;  %v10673_v58 = vshrl.u32 %v145_v57, 7 }
  0x33   :  { %v9130_v8 = vpack.c.bf16 %v98_v5, %v95_v3  ;;  %v9132_v9 = vpack.c.bf16 %v105_v7, %v102_v6  ;;  %v104_v11 = vld [vmem:[#allocation6 + $0x48] sm:$0xff]  ;;  %v111_v13 = vld [vmem:[#allocation6 + $0x80] sm:$0xff]  ;;  %v110_v17 = vld [vmem:[#allocation6 + $0x78] sm:$0xff]  ;;  %s12932_s26 = sld [smem:[#allocation25_spill]]  ;;  %s10453_s3 = smov 64   ;;  %vm10457_vm1 = vmmov 0  }
  0x34   :  { %v108_v12 = vld [vmem:[#allocation6 + $0x68] sm:$0xff]  ;;  %9129 = vmatprep.subr.bf16.mxu0 %v9128_v4  ;;  %v9134_v14 = vpack.c.bf16 %v104_v11, %v101_v10  ;;  %v107_v16 = vld [vmem:[#allocation6 + $0x60] sm:$0xff]  ;;  %v114_v18 = vld [vmem:[#allocation6 + $0x98] sm:$0xff]  ;;  %v10676_v59 = vsub.s32 0, %v10673_v58  ;;  %v10686_v62 = vsub.s32 1, %v10673_v58  ;;  %s10455_s7 = smov 32   ;;  %8369 = vmatprep.mubr.msk.f32.mxu1 %vm10457_vm1, %v10452_v0 }
  0x35   :  { %9131 = vmatpush1.bf16.msra.mxu0 %v9130_v8  ;;  %v9136_v15 = vpack.c.bf16 %v111_v13, %v108_v12  ;;  %v117_v19 = vld [vmem:[#allocation6 + $0xb0] sm:$0xff]  ;;  %v9138_v20 = vpack.c.bf16 %v110_v17, %v107_v16  ;;  %v116_v23 = vld [vmem:[#allocation6 + $0xa8] sm:$0xff]  ;;  %v123_v25 = vld [vmem:[#allocation6 + $0xe0] sm:$0xff]  ;;  %s10456_s27 = smov 96   ;;  %s12933_s1 = sld [smem:[#allocation26_spill]]  ;;  %vm463_vm2 = vcmask 261120  }
  0x36   :  { %90 = sst [smem:[#allocation2]] %s10642_s17  ;;  %9133 = vmatprep.subr.bf16.mxu0 %v9132_v9  ;;  %v9140_v21 = vpack.c.bf16 %v117_v19, %v114_v18  ;;  %v113_v22 = vld [vmem:[#allocation6 + $0x90] sm:$0xff]  ;;  %v120_v24 = vld [vmem:[#allocation6 + $0xc8] sm:$0xff]  ;;  %v119_v28 = vld [vmem:[#allocation6 + $0xc0] sm:$0xff]  ;;  %vm493_vm3 = vcmask 523264   ;;  %vm813_vm5 = vcmask 122880  }
  0x37   :  { %p10010_p0 = scmp.eq.s32.totalorder %s10644_s25, 1  ;;  %v9142_v26 = vpack.c.bf16 %v116_v23, %v113_v22  ;;  %v9144_v27 = vpack.c.bf16 %v123_v25, %v120_v24  ;;  %v122_v29 = vld [vmem:[#allocation6 + $0xd8] sm:$0xff]  ;;  %v129_v31 = vld [vmem:[#allocation6 + $0x110] sm:$0xff]  ;;  %v128_v35 = vld [vmem:[#allocation6 + $0x108] sm:$0xff]  ;;  %v10454_v25 = vmov 0.0|0.0   ;;  %vm639_vm6 = vcmask 785408  }
  0x38   :  { %v126_v30 = vld [vmem:[#allocation6 + $0xf8] sm:$0xff]  ;;  %v9146_v32 = vpack.c.bf16 %v122_v29, %v119_v28  ;;  %v125_v34 = vld [vmem:[#allocation6 + $0xf0] sm:$0xff]  ;;  %v132_v36 = vld [vmem:[#allocation6 + $0x128] sm:$0xff]  ;;  %9160 = vmatprep.subr.bf16.mxu1 %v10454_v25  ;;  %s12937_s28 = sld [smem:[#allocation28_spill]]  ;;  %vm1071_vm10 = vcmask 253952   ;;  %p7850_p1 = scmp.ne.s32.totalorder %s10644_s25, 0 }
  0x39   :  { %9997 = sst [smem:[#allocation2]] (%p10010_p0), %s7849_s6  ;;  %9135 = vmatpush1.bf16.msra.mxu0 %v9134_v14  ;;  %v9148_v33 = vpack.c.bf16 %v129_v31, %v126_v30  ;;  %v135_v37 = vld [vmem:[#allocation6 + $0x140] sm:$0xff]  ;;  %v9150_v38 = vpack.c.bf16 %v128_v35, %v125_v34  ;;  %v134_v41 = vld [vmem:[#allocation6 + $0x138] sm:$0xff]  ;;  %v141_v43 = vld [vmem:[#allocation6 + $0x170] sm:$0xff]  ;;  %s93_s6 = scalar_lea.vmem %s12931_s30, %s10642_s17  ;;  %vm10459_vm11 = vmmov (!%p7850_p1), 0   ;;  %vm1160_vm12 = vcmask (!%p7850_p1), 90112  }
  0x3a   :  { %9137 = vmatprep.subr.bf16.mxu0 %v9136_v15  ;;  %v9152_v39 = vpack.c.bf16 %v135_v37, %v132_v36  ;;  %v131_v40 = vld [vmem:[#allocation6 + $0x120] sm:$0xff]  ;;  %v138_v42 = vld [vmem:[#allocation6 + $0x158] sm:$0xff]  ;;  %v137_v46 = vld [vmem:[#allocation6 + $0x150] sm:$0xff] }
  0x3b   :  { %v9154_v44 = vpack.c.bf16 %v134_v41, %v131_v40  ;;  %v9156_v45 = vpack.c.bf16 %v141_v43, %v138_v42  ;;  %v140_v47 = vld [vmem:[#allocation6 + $0x168] sm:$0xff]  ;;  %v304_v49 = vld [vmem:[%s12929_s2 + $0x18] sm:$0xff]  ;;  %v301_v52 = vld [vmem:[%s12929_s2] sm:$0xff] }
  0x3c   :  { %v302_v48 = vld [vmem:[%s12929_s2 + $0x8] sm:$0xff]  ;;  %v9158_v50 = vpack.c.bf16 %v140_v47, %v137_v46  ;;  %v303_v53 = vld [vmem:[%s12929_s2 + $0x10] sm:$0xff]  ;;  %v10663_v54 = vld [vmem:[%s12930_s4] sm:$0x1] }
  0x3d   :  { %9139 = vmatpush1.bf16.msra.mxu0 %v9138_v20  ;;  %v9184_v51 = vpack.c.bf16 %v304_v49, %v302_v48  ;;  %v9186_v55 = vpack.c.bf16 %v303_v53, %v301_v52  ;;  %v94_v56 = vld [vmem:[%s93_s6] sm:$0x1]  ;;  %v97_v22 = vld [vmem:[#allocation6 + $0x10] sm:$0xff]  ;;  %v100_v23 = vld [vmem:[#allocation6 + $0x28] sm:$0xff]  ;;  %s12934_s6 = sld [smem:[#allocation27_spill]] }
  0x3e   :  { %9141 = vmatprep.subr.bf16.mxu0 %v9140_v21  ;;  %v10681_v60 = vld [vmem:[%s12882_s10] sm:$0x7]  ;;  %v420_v21 = vrot.slane %v10663_v54, %v10676_v59  ;;  %v109_v29 = vld [vmem:[#allocation6 + $0x70] sm:$0xff]  ;;  %v112_v30 = vld [vmem:[#allocation6 + $0x88] sm:$0xff] }
  0x3f   :  { %v148_v61 = vrot.slane %v10681_v60, %v10676_v59  ;;  %v305_v63 = vld [vmem:[%s12932_s26] sm:$0x3]  ;;  %v152_v3 = vrot.slane %v10681_v60, %v10686_v62  ;;  %v9167_v31 = vpack.c.bf16 %v112_v30, %v109_v29  ;;  %v121_v35 = vld [vmem:[#allocation6 + $0xd0] sm:$0xff]  ;;  %v124_v36 = vld [vmem:[#allocation6 + $0xe8] sm:$0xff] }
  0x40   :  { %v314_v5 = vrot.slane %v305_v63, %v10686_v62  ;;  %v310_v10 = vrot.slane %v305_v63, %v10676_v59  ;;  %v103_v24 = vld [vmem:[#allocation6 + $0x40] sm:$0xff]  ;;  %v9173_v37 = vpack.c.bf16 %v124_v36, %v121_v35  ;;  %v133_v41 = vld [vmem:[#allocation6 + $0x130] sm:$0xff]  ;;  %v136_v42 = vld [vmem:[#allocation6 + $0x148] sm:$0xff] }
  0x41   :  { %9143 = vmatpush1.bf16.msra.mxu0 %v9142_v26  ;;  %v9161_v26 = vpack.c.bf16 %v100_v23, %v97_v22  ;;  %v139_v46 = vld [vmem:[#allocation6 + $0x160] sm:$0xff]  ;;  %v142_v47 = vld [vmem:[#allocation6 + $0x178] sm:$0xff]  ;;  %vm10865_vm4 = vmpackc.low %vm463_vm2, %vm463_vm2 }
  0x42   :  { %9145 = vmatprep.subr.bf16.mxu0 %v9144_v27  ;;  %v106_v27 = vld [vmem:[#allocation6 + $0x58] sm:$0xff]  ;;  %v9182_v49 = vpack.c.bf16 %v142_v47, %v139_v46  ;;  %v465_v53 = vld [vmem:[%s12933_s1] sm:$0xff] }
  0x43   :  { %9162 = vmatpush3.bf16.msra.mxu1 %v9161_v26  ;;  %v9164_v28 = vpack.c.bf16 %v106_v27, %v103_v24  ;;  %v468_v52 = vld [vmem:[%s12933_s1 + $0x18] sm:$0xff]  ;;  %v477_v24 = vld [vmem:[%s12933_s1 + $0x60] sm:$0xff] }
  0x44   :  { %9163 = vmatprep.subr.bf16.mxu1 %v10454_v25  ;;  %v480_v22 = vld [vmem:[%s12933_s1 + $0x78] sm:$0xff] }
  0x45   :  { %9147 = vmatpush1.bf16.msra.mxu0 %v9146_v32  ;;  %v115_v32 = vld [vmem:[#allocation6 + $0xa0] sm:$0xff] }
  0x46   :  { %9149 = vmatprep.subr.bf16.mxu0 %v9148_v33  ;;  %v118_v33 = vld [vmem:[#allocation6 + $0xb8] sm:$0xff] }
  0x47   :  { %9165 = vmatpush3.bf16.msra.mxu1 %v9164_v28  ;;  %v9170_v34 = vpack.c.bf16 %v118_v33, %v115_v32 }
  0x48   :  { %9166 = vmatprep.subr.bf16.mxu1 %v10454_v25 }
  0x49   :  { %9151 = vmatpush1.bf16.msra.mxu0 %v9150_v38  ;;  %v127_v38 = vld [vmem:[#allocation6 + $0x100] sm:$0xff] }
  0x4a   :  { %9153 = vmatprep.subr.bf16.mxu0 %v9152_v39  ;;  %v130_v39 = vld [vmem:[#allocation6 + $0x118] sm:$0xff] }
  0x4b   :  { %9168 = vmatpush3.bf16.msra.mxu1 %v9167_v31  ;;  %v9176_v40 = vpack.c.bf16 %v130_v39, %v127_v38  ;;  %v10795_v39 = vsub.s32 2, %v10673_v58  ;;  %v481_v58 = vld [vmem:[%s12934_s6] sm:$0x3] }
  0x4c   :  { %9169 = vmatprep.subr.bf16.mxu1 %v10454_v25 }
  0x4d   :  { %9155 = vmatpush1.bf16.msra.mxu0 %v9154_v44  ;;  %v9179_v44 = vpack.c.bf16 %v136_v42, %v133_v41 }
  0x4e   :  { %9157 = vmatprep.subr.bf16.mxu0 %v9156_v45 }
  0x4f   :  { %9171 = vmatpush3.bf16.msra.mxu1 %v9170_v34 }
  0x50   :  { %9172 = vmatprep.subr.bf16.mxu1 %v10454_v25 }
  0x51   :  { %9159 = vmatpush1.bf16.msra.mxu0 %v9158_v50 }
  0x52   :  { %9185 = vmatprep.subr.bf16.mxu0 %v9184_v51  ;;  %v466_v51 = vld [vmem:[%s12933_s1 + $0x8] sm:$0xff] }
  0x53   :  { %9174 = vmatpush3.bf16.msra.mxu1 %v9173_v37 }
  0x54   :  { %225 = vmatmul.mubr.f32.vlgmr.msra.gmra.mrb[0].mxu0 %v10663_v54  ;;  %9175 = vmatprep.subr.bf16.mxu1 %v10454_v25 }
  0x55   :  { %9187 = vmatpush1.bf16.msra.mxu0 %v9186_v55  ;;  %385 = vmatprep.mubr.f32.mxu0 %v10452_v0  ;;  %v9188_v55 = vpack.c.bf16 %v468_v52, %v466_v51 }
  0x56   :  { %9204 = vmatprep.subr.bf16.mxu0 %v10454_v25 }
  0x57   :  { %9177 = vmatpush3.bf16.msra.mxu1 %v9176_v40 }
  0x58   :  { %7834 = vmatmul.mubr.msk.f32.vlgmr.msra.gmra.mrb[2].mxu0 %vm317_vm0, %v94_v56  ;;  %9178 = vmatprep.subr.bf16.mxu1 %v10454_v25  ;;  %v467_v56 = vld [vmem:[%s12933_s1 + $0x10] sm:$0xff] }
  0x59   :  { %8388 = vmatprep.mubr.msk.f32.mxu0 %vm10457_vm1, %v10452_v0  ;;  %v9190_v63 = vpack.c.bf16 %v467_v56, %v465_v53 }
  0x5b   :  { %9180 = vmatpush3.bf16.msra.mxu1 %v9179_v44 }
  0x5c   :  { %9181 = vmatprep.subr.bf16.mxu1 %v10454_v25 }
  0x5f   :  { %9183 = vmatpush3.bf16.msra.mxu1 %v9182_v49 }
  0x60   :  { %9189 = vmatprep.subr.bf16.mxu1 %v9188_v55 }
  0x62   :  { %8370 = vmatmul.mubr.f32.vlgmr.msra.gmra.mrb[0].mxu1 %v10663_v54  ;;  %v470_v54 = vld [vmem:[%s12933_s1 + $0x28] sm:$0xff] }
  0x63   :  { %561 = vmatprep.mubr.f32.mxu1 %v10452_v0  ;;  %9191 = vmatpush1.bf16.msra.mxu1 %v9190_v63 }
 0x127   :  { %v226_v1 = vpop.f32.mrb[0].mxu0 }
 0x128   :  { %v227_v2 = vadd.f32 %v226_v1, %v148_v61  ;;  %v228_v4 = vpop.f32.mrb[1].mxu0  ;;  %v472_v61 = vld [vmem:[%s12933_s1 + $0x38] sm:$0xff] }
 0x129   :  { %v10695_v7 = vadd.f32 %v228_v4, %v152_v3  ;;  %v9192_v1 = vpack.c.bf16 %v472_v61, %v470_v54  ;;  %v471_v3 = vld [vmem:[%s12933_s1 + $0x30] sm:$0xff]  ;;  %v474_v4 = vld [vmem:[%s12933_s1 + $0x48] sm:$0xff] }
 0x12a   :  { %400 = vrot.lane.b32.xlu0 %v227_v2, %s10453_s3 }
 0x12b   :  { %v387_v6 = vpop.f32.mrb[2].mxu0  ;;  %9193 = vmatprep.subr.bf16.mxu1 %v9192_v1 }
 0x12c   :  { %v389_v8 = vpop.f32.mrb[3].mxu0  ;;  %v388_v11 = vadd.f32 %v387_v6, %v310_v10 }
 0x12d   :  { %v10697_v9 = vadd.f32 %v389_v8, %v314_v5  ;;  %v476_v5 = vld [vmem:[%s12933_s1 + $0x58] sm:$0xff] }
 0x12e   :  { %434 = vrot.lane.b32.xlu0 %v10695_v7, %s10453_s3  ;;  %v392_v12 = vadd.f32 %v388_v11, %v227_v2  ;;  %v469_v2 = vld [vmem:[%s12933_s1 + $0x20] sm:$0xff]  ;;  %v9196_v10 = vpack.c.bf16 %v476_v5, %v474_v4 }
 0x12f   :  { %v9194_v8 = vpack.c.bf16 %v471_v3, %v469_v2 }
 0x130   :  { %v7835_v13 = vmul.f32 -1.442695, %v392_v12  ;;  %v475_v12 = vld [vmem:[%s12933_s1 + $0x50] sm:$0xff] }
 0x131   :  { %9195 = vmatpush1.bf16.msra.mxu1 %v9194_v8 }
 0x132   :  { %10055 = vpow2.f32 %v7835_v13  ;;  %9197 = vmatprep.subr.bf16.mxu1 %v9196_v10 }
 0x135   :  { %v297_v40 = vpop.f32.mrb[0].mxu1 }
 0x136   :  { %v8371_v42 = vpop.f32.mrb[1].mxu1 }
 0x13c   :  { %v10056_v14 = vpop.eup %10055 }
 0x13d   :  { %v396_v15 = vadd.f32 1.0, %v10056_v14 }
 0x13f   :  { %10057 = vrcp.f32 %v396_v15  ;;  %v426_v15 = vadd.f32 %v10697_v9, %v10695_v7  ;;  %v479_v7 = vld [vmem:[%s12933_s1 + $0x70] sm:$0xff] }
 0x149   :  { %v10702_v16 = vpop.eup %10057 }
 0x14a   :  { %v410_v27 = vsub.f32 1.0, %v10702_v16 }
 0x19c   :  { %v401_v17 = vpop.permute.xlu0 %400 }
 0x19d   :  { %v403_v18 = vmul.f32 %v10702_v16, %v401_v17  ;;  %v7836_v17 = vmul.f32 -1.442695, %v426_v15  ;;  %v644_v15 = vld [vmem:[%s12883_s11 + $0x18] sm:$0xff] }
 0x19f   :  { %405 = vrot.lane.b32.xlu1 %v403_v18, %s10453_s3 }
 0x1a0   :  { %v10706_v19 = vpop.permute.xlu0 %434 }
 0x1a1   :  { %v437_v20 = vmul.f32 %v10702_v16, %v10706_v19 }
 0x1a3   :  { %439 = vrot.lane.b32.xlu1 %v437_v20, %s10453_s3 }
 0x1a7   :  { %421 = vrot.lane.b32.xlu1 %v420_v21, %s10455_s7 }
 0x1ab   :  { %450 = vrot.lane.b32.xlu1 %v420_v21, %s10456_s27  ;;  %v478_v21 = vld [vmem:[%s12933_s1 + $0x68] sm:$0xff] }
 0x1ac   :  { %v9200_v23 = vpack.c.bf16 %v480_v22, %v478_v21 }
 0x211   :  { %v406_v43 = vpop.permute.xlu1 %405 }
 0x212   :  { %v408_v45 = vadd.f32 %v406_v43, %v388_v11  ;;  %v473_v11 = vld [vmem:[%s12933_s1 + $0x40] sm:$0xff]  ;;  %s12938_s1 = sld [smem:[#allocation22_spill]] (!%p7850_p1) }
 0x213   :  { %v9198_v14 = vpack.c.bf16 %v475_v12, %v473_v11  ;;  %v641_v11 = vld [vmem:[%s12883_s11] sm:$0xff]  ;;  %v642_v12 = vld [vmem:[%s12883_s11 + $0x8] sm:$0xff] }
 0x214   :  { %10059 = vtanh.f32 %v408_v45 }
 0x215   :  { %v440_v48 = vpop.permute.xlu1 %439  ;;  %9199 = vmatpush1.bf16.msra.mxu1 %v9198_v14  ;;  %v9205_v14 = vpack.c.bf16 %v642_v12, %v641_v11  ;;  %v991_v11 = vld [vmem:[%s12890_s18] sm:$0xff]  ;;  %v992_v12 = vld [vmem:[%s12890_s18 + $0x8] sm:$0xff] }
 0x216   :  { %v442_v50 = vadd.f32 %v440_v48, %v10697_v9  ;;  %v9202_v9 = vpack.c.bf16 %v479_v7, %v477_v24  ;;  %9201 = vmatprep.subr.bf16.mxu1 %v9200_v23  ;;  %v647_v24 = vld [vmem:[%s12883_s11 + $0x30] sm:$0xff]  ;;  %v648_v7 = vld [vmem:[%s12883_s11 + $0x38] sm:$0xff] }
 0x217   :  { %9206 = vmatpush3.bf16.msra.mxu0 %v9205_v14  ;;  %v993_v14 = vld [vmem:[%s12890_s18 + $0x10] sm:$0xff] }
 0x218   :  { %10061 = vtanh.f32 %v442_v50  ;;  %9207 = vmatprep.subr.bf16.mxu0 %v10454_v25 }
 0x219   :  { %10063 = vpow2.f32 %v7836_v17  ;;  %9203 = vmatpush1.bf16.msra.mxu1 %v9202_v9  ;;  %v10784_v26 = vpop.permute.xlu1 %421  ;;  %v9214_v9 = vpack.c.bf16 %v648_v7, %v647_v24  ;;  %v906_v24 = vld [vmem:[%s12888_s16] sm:$0xff]  ;;  %v907_v7 = vld [vmem:[%s12888_s16 + $0x8] sm:$0xff] }
 0x21a   :  { %9216 = vmatprep.subr.bf16.mxu1 %v10454_v25  ;;  %v424_v30 = vmul.f32 %v10702_v16, %v10784_v26  ;;  %v156_v16 = vrot.slane %v10681_v60, %v10795_v39  ;;  %v486_v60 = vrot.slane %v481_v58, %v10676_v59 }
 0x21c   :  { %v298_v41 = vadd.f32 %v297_v40, %v156_v16 }
 0x21d   :  { %v10789_v32 = vpop.permute.xlu1 %450 }
 0x21e   :  { %v10060_v6 = vpop.eup %10059 }
 0x21f   :  { %412 = vrot.lane.b32.xlu0 %v10060_v6, %s10456_s27 }
 0x222   :  { %v10062_v13 = vpop.eup %10061 }
 0x223   :  { %446 = vrot.lane.b32.xlu0 %v10062_v13, %s10456_s27  ;;  %v10064_v18 = vpop.eup %10063  ;;  %v643_v13 = vld [vmem:[%s12883_s11 + $0x10] sm:$0xff] }
 0x224   :  { %v430_v20 = vadd.f32 1.0, %v10064_v18  ;;  %v9208_v17 = vpack.c.bf16 %v644_v15, %v643_v13  ;;  %v645_v18 = vld [vmem:[%s12883_s11 + $0x20] sm:$0xff]  ;;  %v9236_v13 = vpack.c.bf16 %v992_v12, %v991_v11  ;;  %v994_v15 = vld [vmem:[%s12890_s18 + $0x18] sm:$0xff] }
 0x226   :  { %10065 = vrcp.f32 %v430_v20  ;;  %v646_v20 = vld [vmem:[%s12883_s11 + $0x28] sm:$0xff]  ;;  %9209 = vmatpush3.bf16.msra.mxu0 %v9208_v17  ;;  %v9239_v17 = vpack.c.bf16 %v994_v15, %v993_v14 }
 0x227   :  { %v9211_v22 = vpack.c.bf16 %v646_v20, %v645_v18  ;;  %9210 = vmatprep.subr.bf16.mxu0 %v10454_v25 }
 0x22a   :  { %9212 = vmatpush3.bf16.msra.mxu0 %v9211_v22 }
 0x22b   :  { %9213 = vmatprep.subr.bf16.mxu0 %v10454_v25 }
 0x22e   :  { %9215 = vmatpush3.bf16.msra.mxu0 %v9214_v9 }
 0x22f   :  { %9220 = vmatprep.subr.bf16.mxu0 %v10454_v25 }
 0x230   :  { %v10066_v28 = vpop.eup %10065 }
 0x231   :  { %v444_v34 = vsub.f32 1.0, %v10066_v28  ;;  %v453_v36 = vmul.f32 %v10066_v28, %v10789_v32 }
 0x291   :  { %v413_v29 = vpop.permute.xlu0 %412 }
 0x292   :  { %v415_v31 = vmul.f32 %v413_v29, %v410_v27 }
 0x294   :  { %v425_v33 = vadd.f32 %v424_v30, %v415_v31 }
 0x295   :  { %v447_v35 = vpop.permute.xlu0 %446 }
 0x296   :  { %v449_v37 = vmul.f32 %v447_v35, %v444_v34  ;;  %456 = vrot.lane.b32.xlu0 %v425_v33, %s10456_s27 }
 0x298   :  { %v454_v38 = vadd.f32 %v453_v36, %v449_v37 }
 0x29a   :  { %460 = vrot.lane.b32.xlu1 %v454_v38, %s10455_s7  ;;  %591 = vrot.lane.b32.xlu0 %v298_v41, %s10453_s3 }
 0x308   :  { %v457_v43 = vpop.permute.xlu0 %456 }
 0x30c   :  { %v461_v44 = vpop.permute.xlu1 %460  ;;  %v592_v47 = vpop.permute.xlu0 %591 }
 0x30d   :  { %v10801_v45 = vsel %vm463_vm2, %v457_v43, %v461_v44 }
 0x30e   :  { %7837 = vmatmul.mubr.msk.f32.vlgmr.msra.gmra.mrb[2].mxu1 %vm493_vm3, %v10801_v45 }
 0x30f   :  { %8395 = vmatprep.mubr.msk.f32.mxu1 %vm10457_vm1, %v10452_v0 }
 0x3e1   :  { %v563_v46 = vpop.f32.mrb[2].mxu1 }
 0x3e2   :  { %v564_v48 = vadd.f32 %v563_v46, %v486_v60  ;;  %v565_v49 = vpop.f32.mrb[3].mxu1 }
 0x3e4   :  { %v568_v50 = vadd.f32 %v564_v48, %v10706_v19  ;;  %v594_v51 = vadd.f32 %v592_v47, %v564_v48  ;;  %v490_v19 = vrot.slane %v481_v58, %v10686_v62 }
 0x3e6   :  { %v7838_v52 = vmul.f32 -1.442695, %v568_v50  ;;  %v7839_v53 = vmul.f32 -1.442695, %v594_v51  ;;  %v566_v4 = vadd.f32 %v565_v49, %v490_v19 }
 0x3e8   :  { %10067 = vpow2.f32 %v7838_v52  ;;  %v601_v27 = vadd.f32 %v592_v47, %v566_v4  ;;  %v723_v47 = vld [vmem:[%s12886_s14] sm:$0xff] }
 0x3e9   :  { %10069 = vpow2.f32 %v7839_v53 }
 0x3ea   :  { %v7840_v28 = vmul.f32 -1.442695, %v601_v27  ;;  %v9224_v27 = vpack.c.bf16 %v907_v7, %v906_v24 }
 0x3f2   :  { %v10068_v55 = vpop.eup %10067 }
 0x3f3   :  { %v10070_v56 = vpop.eup %10069  ;;  %v572_v54 = vadd.f32 1.0, %v10068_v55 }
 0x3f4   :  { %v598_v61 = vadd.f32 1.0, %v10070_v56 }
 0x3f5   :  { %10071 = vrcp.f32 %v572_v54  ;;  %v733_v54 = vld [vmem:[%s12885_s13] sm:$0x1] }
 0x3f6   :  { %10073 = vrcp.f32 %v598_v61 }
 0x3ff   :  { %v10072_v63 = vpop.eup %10071 }
 0x400   :  { %v10074_v1 = vpop.eup %10073  ;;  %v575_v2 = vmul.f32 %v10072_v63, %v298_v41  ;;  %v582_v33 = vsub.f32 1.0, %v10072_v63  ;;  %v588_v37 = vmul.f32 %v10072_v63, %v10789_v32 }
 0x401   :  { %v608_v3 = vmul.f32 %v10074_v1, %v298_v41 }
 0x402   :  { %577 = vrot.lane.b32.xlu1 %v575_v2, %s10453_s3 }
 0x403   :  { %610 = vrot.lane.b32.xlu0 %v608_v3, %s10453_s3 }
 0x474   :  { %v578_v5 = vpop.permute.xlu1 %577 }
 0x475   :  { %v611_v6 = vpop.permute.xlu0 %610  ;;  %v580_v8 = vadd.f32 %v578_v5, %v564_v48  ;;  %v724_v48 = vld [vmem:[%s12886_s14 + $0x8] sm:$0xff] }
 0x476   :  { %v613_v10 = vadd.f32 %v611_v6, %v566_v4  ;;  %v825_v6 = vld [vmem:[%s12887_s15] sm:$0xff] }
 0x477   :  { %10075 = vtanh.f32 %v580_v8  ;;  %v826_v8 = vld [vmem:[%s12887_s15 + $0x8] sm:$0xff] }
 0x478   :  { %10077 = vtanh.f32 %v613_v10  ;;  %v9221_v10 = vpack.c.bf16 %v826_v8, %v825_v6  ;;  %v1165_v8 = vand.u32 (!%p7850_p1), 127, %v145_v57 }
 0x479   :  { %10079 = vpow2.f32 %v7840_v28 }
 0x481   :  { %v10076_v21 = vpop.eup %10075 }
 0x482   :  { %v10078_v23 = vpop.eup %10077  ;;  %584 = vrot.lane.b32.xlu1 %v10076_v21, %s10456_s27 }
 0x483   :  { %617 = vrot.lane.b32.xlu0 %v10078_v23, %s10456_s27  ;;  %v10080_v29 = vpop.eup %10079 }
 0x484   :  { %v605_v30 = vadd.f32 1.0, %v10080_v29  ;;  %v908_v29 = vld [vmem:[%s12888_s16 + $0x10] sm:$0xff] }
 0x486   :  { %10081 = vrcp.f32 %v605_v30 }
 0x490   :  { %v10082_v31 = vpop.eup %10081 }
 0x491   :  { %v615_v34 = vsub.f32 1.0, %v10082_v31  ;;  %v621_v16 = vmul.f32 %v10082_v31, %v10784_v26  ;;  %v649_v26 = vld [vmem:[%s12884_s12] sm:$0x1] }
 0x492   :  { %v910_v31 = vld [vmem:[%s12888_s16 + $0x20] sm:$0xff] }
 0x4f4   :  { %v585_v35 = vpop.permute.xlu1 %584 }
 0x4f5   :  { %v618_v36 = vpop.permute.xlu0 %617  ;;  %v587_v38 = vmul.f32 %v585_v35, %v582_v33  ;;  %v911_v33 = vld [vmem:[%s12888_s16 + $0x28] sm:$0xff] }
 0x4f6   :  { %v620_v40 = vmul.f32 %v618_v36, %v615_v34  ;;  %v995_v34 = vld [vmem:[%s12890_s18 + $0x20] sm:$0xff]  ;;  %v9230_v35 = vpack.c.bf16 %v911_v33, %v910_v31  ;;  %v996_v36 = vld [vmem:[%s12890_s18 + $0x28] sm:$0xff] }
 0x4f7   :  { %v589_v41 = vadd.f32 %v588_v37, %v587_v38  ;;  %v9242_v37 = vpack.c.bf16 %v996_v36, %v995_v34  ;;  %v912_v38 = vld [vmem:[%s12888_s16 + $0x30] sm:$0xff] }
 0x4f8   :  { %v622_v42 = vadd.f32 %v621_v16, %v620_v40  ;;  %v913_v16 = vld [vmem:[%s12888_s16 + $0x38] sm:$0xff]  ;;  %v997_v40 = vld [vmem:[%s12890_s18 + $0x30] sm:$0xff] }
 0x4f9   :  { %624 = vrot.lane.b32.xlu1 %v589_v41, %s10456_s27 }
 0x4fa   :  { %628 = vrot.lane.b32.xlu0 %v622_v42, %s10455_s7 }
 0x56b   :  { %v625_v43 = vpop.permute.xlu1 %624 }
 0x56c   :  { %v629_v44 = vpop.permute.xlu0 %628 }
 0x56d   :  { %v631_v58 = vsel %vm463_vm2, %v625_v43, %v629_v44 }
 0x56e   :  { %8389 = vmatmul.mubr.msk.f32.vlgmr.msra.gmra.mrb[4].mxu0 %vm493_vm3, %v631_v58 }
 0x56f   :  { %8402 = vmatprep.mubr.msk.f32.mxu0 %vm10457_vm1, %v10452_v0  ;;  %9222 = vmatpush3.bf16.msra.mxu0 %v9221_v10 }
 0x570   :  { %9223 = vmatprep.subr.bf16.mxu0 %v10454_v25 }
 0x641   :  { %v719_v32 = vpop.f32.mrb[4].mxu0 }
 0x642   :  { %v720_v60 = vadd.f32 %v719_v32, %v649_v26  ;;  %v8390_v46 = vpop.f32.mrb[5].mxu0 }
 0x644   :  { %v728_v49 = vrot.slane %v720_v60, %v10676_v59 }
 0x646   :  { %v729_v50 = vadd.f32 %v728_v49, %v723_v47  ;;  %v730_v51 = vadd.f32 %v728_v49, %v724_v48  ;;  %v914_v47 = vld [vmem:[%s12937_s28] sm:$0x1] }
 0x647   :  { %v999_v48 = vld [vmem:[%s12891_s19] sm:$0x1] }
 0x648   :  { %10083 = vtanh.f32 %v729_v50 }
 0x649   :  { %10085 = vtanh.f32 %v730_v51 }
 0x652   :  { %v10084_v52 = vpop.eup %10083 }
 0x653   :  { %v10086_v53 = vpop.eup %10085 }
 0x654   :  { %v9217_v56 = vpack.c.bf16 %v10086_v53, %v10084_v52 }
 0x656   :  { %9219 = vmatpush3.bf16.xpose.msk.msra.mxu1 %vm10865_vm4, %v9217_v56 }
 0x657   :  { %9235 = vmatprep.subr.bf16.mxu1 %v10454_v25 }
 0x65d   :  { %8396 = vmatmul.mubr.msk.f32.vlgmr.msra.gmra.mrb[4].mxu1 %vm463_vm2, %v733_v54 }
 0x65e   :  { %8440 = vmatprep.mubr.msk.f32.mxu1 %vm10457_vm1, %v10452_v0  ;;  %9237 = vmatpush3.bf16.msra.mxu1 %v9236_v13 }
 0x65f   :  { %9238 = vmatprep.subr.bf16.mxu1 %v10454_v25 }
 0x662   :  { %9240 = vmatpush3.bf16.msra.mxu1 %v9239_v17 }
 0x663   :  { %9241 = vmatprep.subr.bf16.mxu1 %v10454_v25 }
 0x666   :  { %9243 = vmatpush3.bf16.msra.mxu1 %v9242_v37 }
 0x667   :  { %9244 = vmatprep.subr.bf16.mxu1 %v10454_v25 }
 0x730   :  { %v809_v61 = vpop.f32.mrb[4].mxu1 }
 0x731   :  { %v8397_v63 = vpop.f32.mrb[5].mxu1  ;;  %v814_v1 = vsel %vm813_vm5, %v809_v61, -inf }
 0x732   :  { %815 = vmax.xlane.f32.xlu1 %v814_v1  ;;  %v1085_v63 = vld [vmem:[%s12938_s1] sm:$0xff] (!%p7850_p1)  ;;  %v1086_v1 = vld [vmem:[%s12938_s1 + $0x8] sm:$0xff] (!%p7850_p1) }
 0x743   :  { %635 = vrot.lane.b32.xlu1 %v622_v42, %s10456_s27  ;;  %v998_v42 = vld [vmem:[%s12890_s18 + $0x38] sm:$0xff] }
 0x744   :  { %v9245_v43 = vpack.c.bf16 %v998_v42, %v997_v40 }
 0x746   :  { %9246 = vmatpush3.bf16.msra.mxu1 %v9245_v43 }
 0x7bf   :  { %v816_v2 = vpop.xlane.xlu1 %815 }
 0x7c0   :  { %v817_v3 = vsub.f32 %v809_v61, %v816_v2  ;;  %v10458_v2 = vmov (!%p7850_p1), 0.0|0.0  }
 0x7c2   :  { %v818_v19 = vmul.f32 1.442695, %v817_v3  ;;  %v9248_v3 = vpack.c.bf16 (!%p7850_p1), %v1086_v1, %v1085_v63 }
 0x7c3   :  { %v636_v21 = vpop.permute.xlu1 %635 }
 0x7c4   :  { %10087 = vpow2.f32 %v818_v19  ;;  %v10460_v19 = vmov (!%p7850_p1), 0.0  }
 0x7ce   :  { %v10088_v4 = vpop.eup %10087 }
 0x7cf   :  { %v820_v5 = vsel %vm813_vm5, %v10088_v4, 0.0 }
 0x7d0   :  { %821 = vadd.xlane.f32.xlu0 %v820_v5 }
 0x7e6   :  { %632 = vrot.lane.b32.xlu0 %v589_v41, %s10455_s7  ;;  %v9233_v41 = vpack.c.bf16 %v913_v16, %v912_v38 }
 0x85d   :  { %v822_v18 = vpop.xlane.xlu0 %821 }
 0x85e   :  { %10089 = vrcp.f32 %v822_v18 }
 0x861   :  { %v633_v20 = vpop.permute.xlu0 %632 }
 0x862   :  { %v638_v22 = vsel %vm493_vm3, %v10801_v45, %v633_v20  ;;  %v909_v45 = vld [vmem:[%s12888_s16 + $0x18] sm:$0xff] }
 0x863   :  { %v10906_v23 = vsel %vm639_vm6, %v638_v22, %v636_v21  ;;  %v9227_v30 = vpack.c.bf16 %v909_v45, %v908_v29 }
 0x868   :  { %v10090_v9 = vpop.eup %10089 }
 0x869   :  { %v824_v28 = vmul.f32 %v10090_v9, %v10088_v4 }
 0x86b   :  { %1073 = vst.msk [vmem:[#allocation12] sm:$0x1] %vm813_vm5, %v824_v28  ;;  %8403 = vmatmul.mubr.msk.f32.vlgmr.msra.gmra.mrb[6].mxu0 %vm317_vm0, %v824_v28 }
 0x86c   :  { %9225 = vmatpush3.bf16.msra.mxu0 %v9224_v27  ;;  %8421 = vmatprep.mubr.msk.f32.mxu0 %vm10457_vm1, %v10452_v0 }
 0x86d   :  { %9226 = vmatprep.subr.bf16.mxu0 %v10454_v25 }
 0x870   :  { %9228 = vmatpush3.bf16.msra.mxu0 %v9227_v30 }
 0x871   :  { %9229 = vmatprep.subr.bf16.mxu0 %v10454_v25 }
 0x874   :  { %9231 = vmatpush3.bf16.msra.mxu0 %v9230_v35 }
 0x875   :  { %9232 = vmatprep.subr.bf16.mxu0 %v10454_v25 }
 0x878   :  { %9234 = vmatpush3.bf16.msra.mxu0 %v9233_v41 }
 0x879   :  { %9247 = vmatprep.subr.bf16.mxu0 (!%p7850_p1), %v10458_v2 }
 0x93e   :  { %v896_v44 = vpop.f32.mrb[6].mxu0 }
 0x93f   :  { %vm900_vm7 = vcmp.gt.f32.partialorder %v896_v44, 0.0  ;;  %v901_v58 = vmul.f32 0.01, %v896_v44  ;;  %v8404_v26 = vpop.f32.mrb[7].mxu0 }
 0x941   :  { %v902_v32 = vsel %vm900_vm7, %v896_v44, %v901_v58 }
 0x942   :  { %vm903_vm8 = vcmp.gt.f32.partialorder %v902_v32, 0.0  ;;  %v904_v60 = vmul.f32 0.01, %v902_v32 }
 0x944   :  { %v905_v46 = vsel %vm903_vm8, %v902_v32, %v904_v60 }
 0x945   :  { %8422 = vmatmul.mubr.msk.f32.vlgmr.msra.gmra.mrb[8].mxu0 %vm493_vm3, %v905_v46  ;;  %8441 = vmatmul.mubr.msk.f32.vlgmr.msra.gmra.mrb[6].mxu1 %vm493_vm3, %v905_v46 }
 0x946   :  { %8447 = vmatprep.mubr.msk.f32.mxu0 (!%p7850_p1), %vm10459_vm11, %v10460_v19  ;;  %9249 = vmatpush3.bf16.msra.mxu0 (!%p7850_p1), %v9248_v3 }
 0xa18   :  { %v984_v49 = vpop.f32.mrb[8].mxu0  ;;  %v1066_v50 = vpop.f32.mrb[6].mxu1  ;;  %1084 = sbr.rel (%p7850_p1) target bundleno = 3302 (0xce6), region = 85 }
 0xa19   :  { %v985_v51 = vadd.f32 %v984_v49, %v914_v47  ;;  %v1067_v52 = vadd.f32 %v1066_v50, %v999_v48  ;;  %v8423_v53 = vpop.f32.mrb[9].mxu0  ;;  %v8442_v56 = vpop.f32.mrb[7].mxu1 }
 0xa1b   :  { %vm988_vm9 = vcmp.gt.f32.partialorder %v985_v51, 0.0  ;;  %v989_v54 = vmul.f32 0.01, %v985_v51  ;;  %1070 = vst.msk [vmem:[#allocation9] sm:$0x1] %vm813_vm5, %v1067_v52  ;;  %8448 = vmatmul.mubr.msk.f32.vlgmr.msra.gmra.mrb[0].mxu0 (!%p7850_p1), %vm317_vm0, %v1067_v52 }
 0xa1d   :  { %v990_v61 = vsel %vm988_vm9, %v985_v51, %v989_v54 }
 0xa1e   :  { %1072 = vst.msk [vmem:[#allocation10] sm:$0x1] %vm1071_vm10, %v990_v61 }
 0xaee   :  { %v1156_v4 = vpop.f32.mrb[0].mxu0 }
 0xaef   :  { %v8449_v5 = vpop.f32.mrb[1].mxu0  ;;  %v1161_v6 = vsel %vm1160_vm12, %v1156_v4, -inf }
 0xaf0   :  { %1162 = vmax.xlane.f32.xlu0 %v1161_v6 }
 0xb7d   :  { %v1163_v10 = vpop.xlane.xlu0 %1162 }
 0xb7e   :  { %vm1166_vm13 = vcmp.ge.f32.partialorder %v1156_v4, %v1163_v10 }
 0xb7f   :  { %v1167_v11 = vsel %vm1166_vm13, %v1165_v8, 12 }
 0xb80   :  { %v1168_v12 = vsel %vm1160_vm12, %v1167_v11, 2147483647 }
 0xb81   :  { %v1170_v13 = vshra.s32 %v1168_v12, 16  ;;  %v1169_v15 = vand.u32 65535, %v1168_v12 }
 0xb83   :  { %v1172_v14 = vcvt.s32.f32 %v1170_v13  ;;  %v1171_v18 = vcvt.s32.f32 %v1169_v15 }
 0xb85   :  { %1173 = vmin.xlane.f32.xlu0 %v1172_v14 }
 0xc12   :  { %v1174_v17 = vpop.xlane.xlu0 %1173 }
 0xc13   :  { %vm1175_vm14 = vcmp.eq.f32.partialorder %v1172_v14, %v1174_v17  ;;  %v1180_v21 = vcvt.f32.s32 %v1174_v17 }
 0xc14   :  { %v1176_v20 = vsel %vm1175_vm14, %v1171_v18, inf }
 0xc15   :  { %1177 = vmin.xlane.f32.xlu1 %v1176_v20  ;;  %v1181_v24 = vshll.u32 %v1180_v21, 16 }
 0xca2   :  { %v1178_v22 = vpop.xlane.xlu1 %1177 }
 0xca3   :  { %v1179_v7 = vcvt.f32.s32 %v1178_v22 }
 0xca5   :  { %v1182_v9 = vadd.s32 %v1181_v24, %v1179_v7 }
 0xca7   :  { %v1183_v27 = vrot.slane %v1182_v9, 4 }
 0xca9   :  { %vm1184_vm15 = vcmp.lt.s32.totalorder %v1182_v9, %v1183_v27 }
 0xcaa   :  { %v1185_v28 = vsel %vm1184_vm15, %v1182_v9, %v1183_v27 }
 0xcab   :  { %v1186_v29 = vrot.slane %v1185_v28, 2 }
 0xcad   :  { %vm1187_vm7 = vcmp.lt.s32.totalorder %v1185_v28, %v1186_v29 }
 0xcae   :  { %v1188_v45 = vsel %vm1187_vm7, %v1185_v28, %v1186_v29 }
 0xcaf   :  { %v1189_v30 = vrot.slane %v1188_v45, 1 }
 0xcb1   :  { %vm1190_vm8 = vcmp.lt.s32.totalorder %v1188_v45, %v1189_v30 }
 0xcb2   :  { %v1191_v31 = vsel %vm1190_vm8, %v1188_v45, %v1189_v30 }
 0xcb3   :  { %9982 = vpush %v1191_v31 }
 0xce4   :  { %s9983_s25 = spop %9982 }
 0xce5   :  { %1193 = sst [smem:[#allocation2]] %s9983_s25 }
 0xce6 PF:  { %v1198_v33 = vld [vmem:[#allocation6 + $0x8] sm:$0xff]  ;;  %v1201_v34 = vld [vmem:[#allocation6 + $0x20] sm:$0xff]  ;;  %1326 = vmatprep.mubr.f32.mxu0 %v10452_v0  ;;  %9282 = vmatprep.subr.bf16.mxu1 %v10454_v25  ;;  %v1200_v37 = vld [vmem:[#allocation6 + $0x18] sm:$0xff]  ;;  %s10973_s9 = sld [smem:[#allocation5 + $0x1]]  ;;  %s7868_s24 = sld [smem:[#allocation4 + $0x2]] }
 0xce7   :  { %v1197_v35 = vld [vmem:[#allocation6] sm:$0xff]  ;;  %v9250_v36 = vpack.c.bf16 %v1201_v34, %v1198_v33  ;;  %v1204_v38 = vld [vmem:[#allocation6 + $0x38] sm:$0xff]  ;;  %v1207_v16 = vld [vmem:[#allocation6 + $0x50] sm:$0xff]  ;;  %8482 = vmatprep.mubr.msk.f32.mxu1 %vm10457_vm1, %v10452_v0  ;;  %s10978_s17 = sld [smem:[#allocation2]]  ;;  %s12939_s8 = sld [smem:[#allocation24_spill]] }
 0xce8   :  { %v9252_v40 = vpack.c.bf16 %v1200_v37, %v1197_v35  ;;  %v9254_v41 = vpack.c.bf16 %v1207_v16, %v1204_v38  ;;  %v1203_v42 = vld [vmem:[#allocation6 + $0x30] sm:$0xff]  ;;  %v1206_v43 = vld [vmem:[#allocation6 + $0x48] sm:$0xff]  ;;  %v1213_v58 = vld [vmem:[#allocation6 + $0x80] sm:$0xff]  ;;  %s12940_s25 = sld [smem:[#allocation21_spill]]  ;;  %s12941_s28 = sld [smem:[#allocation25_spill]] }
 0xce9   :  { %v1210_v44 = vld [vmem:[#allocation6 + $0x68] sm:$0xff]  ;;  %9251 = vmatprep.subr.bf16.mxu0 %v9250_v36  ;;  %v9256_v26 = vpack.c.bf16 %v1206_v43, %v1203_v42  ;;  %v1209_v60 = vld [vmem:[#allocation6 + $0x60] sm:$0xff]  ;;  %v1212_v46 = vld [vmem:[#allocation6 + $0x78] sm:$0xff]  ;;  %s12942_s0 = sld [smem:[#allocation26_spill]]  ;;  %s12944_s4 = sld [smem:[#allocation28_spill]] }
 0xcea   :  { %9253 = vmatpush1.bf16.msra.mxu0 %v9252_v40  ;;  %v9258_v32 = vpack.c.bf16 %v1213_v58, %v1210_v44  ;;  %v1216_v47 = vld [vmem:[#allocation6 + $0x98] sm:$0xff]  ;;  %v1219_v48 = vld [vmem:[#allocation6 + $0xb0] sm:$0xff]  ;;  %v9260_v49 = vpack.c.bf16 %v1212_v46, %v1209_v60  ;;  %v1218_v52 = vld [vmem:[#allocation6 + $0xa8] sm:$0xff] }
 0xceb   :  { %9255 = vmatprep.subr.bf16.mxu0 %v9254_v41  ;;  %v9262_v50 = vpack.c.bf16 %v1219_v48, %v1216_v47  ;;  %v1215_v51 = vld [vmem:[#allocation6 + $0x90] sm:$0xff]  ;;  %v1222_v53 = vld [vmem:[#allocation6 + $0xc8] sm:$0xff]  ;;  %v1225_v56 = vld [vmem:[#allocation6 + $0xe0] sm:$0xff] }
 0xcec   :  { %p10011_p2 = scmp.eq.s32.totalorder %s10973_s9, 1  ;;  %v9264_v54 = vpack.c.bf16 %v1218_v52, %v1215_v51  ;;  %v9266_v61 = vpack.c.bf16 %v1225_v56, %v1222_v53  ;;  %v1221_v63 = vld [vmem:[#allocation6 + $0xc0] sm:$0xff]  ;;  %v1224_v1 = vld [vmem:[#allocation6 + $0xd8] sm:$0xff]  ;;  %v1231_v3 = vld [vmem:[#allocation6 + $0x110] sm:$0xff]  ;;  %p7869_p3 = scmp.ne.s32.totalorder %s10973_s9, 0 }
 0xced   :  { %v1228_v2 = vld [vmem:[#allocation6 + $0xf8] sm:$0xff]  ;;  %v9268_v19 = vpack.c.bf16 %v1224_v1, %v1221_v63  ;;  %v1227_v5 = vld [vmem:[#allocation6 + $0xf0] sm:$0xff]  ;;  %v1230_v6 = vld [vmem:[#allocation6 + $0x108] sm:$0xff]  ;;  %vm10462_vm13 = vmmov (!%p7869_p3), 0   ;;  %vm2255_vm14 = vcmask (!%p7869_p3), 90112  }
 0xcee   :  { %9257 = vmatpush1.bf16.msra.mxu0 %v9256_v26  ;;  %9999 = sst [smem:[#allocation2]] (%p10011_p2), %s7868_s24  ;;  %v9270_v4 = vpack.c.bf16 %v1231_v3, %v1228_v2  ;;  %v1234_v8 = vld [vmem:[#allocation6 + $0x128] sm:$0xff]  ;;  %v1237_v10 = vld [vmem:[#allocation6 + $0x140] sm:$0xff]  ;;  %v9272_v11 = vpack.c.bf16 %v1230_v6, %v1227_v5  ;;  %v1236_v14 = vld [vmem:[#allocation6 + $0x138] sm:$0xff]  ;;  %s1195_s24 = scalar_lea.vmem %s12940_s25, %s10978_s17 }
 0xcef   :  { %9259 = vmatprep.subr.bf16.mxu0 %v9258_v32  ;;  %v9274_v12 = vpack.c.bf16 %v1237_v10, %v1234_v8  ;;  %v1233_v13 = vld [vmem:[#allocation6 + $0x120] sm:$0xff]  ;;  %v1240_v15 = vld [vmem:[#allocation6 + $0x158] sm:$0xff]  ;;  %v1243_v17 = vld [vmem:[#allocation6 + $0x170] sm:$0xff] }
 0xcf0   :  { %v9276_v18 = vpack.c.bf16 %v1236_v14, %v1233_v13  ;;  %v9278_v20 = vpack.c.bf16 %v1243_v17, %v1240_v15  ;;  %v1239_v21 = vld [vmem:[#allocation6 + $0x150] sm:$0xff]  ;;  %v1242_v22 = vld [vmem:[#allocation6 + $0x168] sm:$0xff]  ;;  %v1406_v7 = vld [vmem:[%s12939_s8 + $0x18] sm:$0xff] }
 0xcf1   :  { %v1404_v24 = vld [vmem:[%s12939_s8 + $0x8] sm:$0xff]  ;;  %v9280_v9 = vpack.c.bf16 %v1242_v22, %v1239_v21  ;;  %v1403_v28 = vld [vmem:[%s12939_s8] sm:$0xff]  ;;  %v1405_v29 = vld [vmem:[%s12939_s8 + $0x10] sm:$0xff] }
 0xcf2   :  { %9261 = vmatpush1.bf16.msra.mxu0 %v9260_v49  ;;  %v9306_v27 = vpack.c.bf16 %v1406_v7, %v1404_v24  ;;  %v9308_v45 = vpack.c.bf16 %v1405_v29, %v1403_v28  ;;  %v1196_v30 = vld [vmem:[%s1195_s24] sm:$0x1]  ;;  %v1199_v52 = vld [vmem:[#allocation6 + $0x10] sm:$0xff]  ;;  %v1202_v53 = vld [vmem:[#allocation6 + $0x28] sm:$0xff]  ;;  %s12943_s24 = sld [smem:[#allocation27_spill]] }
 0xcf3   :  { %9263 = vmatprep.subr.bf16.mxu0 %v9262_v50  ;;  %v11005_v31 = vld [vmem:[%s12882_s10] sm:$0x7]  ;;  %v1211_v1 = vld [vmem:[#allocation6 + $0x70] sm:$0xff]  ;;  %v1214_v2 = vld [vmem:[#allocation6 + $0x88] sm:$0xff] }
 0xcf4   :  { %v1250_v33 = vrot.slane %v11005_v31, %v10676_v59  ;;  %v1407_v34 = vld [vmem:[%s12941_s28] sm:$0x3]  ;;  %v1254_v37 = vrot.slane %v11005_v31, %v10686_v62  ;;  %v9289_v3 = vpack.c.bf16 %v1214_v2, %v1211_v1  ;;  %v1223_v6 = vld [vmem:[#allocation6 + $0xd0] sm:$0xff]  ;;  %v1226_v8 = vld [vmem:[#allocation6 + $0xe8] sm:$0xff] }
 0xcf5   :  { %v1416_v16 = vrot.slane %v1407_v34, %v10686_v62  ;;  %v1412_v44 = vrot.slane %v1407_v34, %v10676_v59  ;;  %v1205_v56 = vld [vmem:[#allocation6 + $0x40] sm:$0xff]  ;;  %v9295_v10 = vpack.c.bf16 %v1226_v8, %v1223_v6  ;;  %v1235_v14 = vld [vmem:[#allocation6 + $0x130] sm:$0xff]  ;;  %v1238_v15 = vld [vmem:[#allocation6 + $0x148] sm:$0xff] }
 0xcf6   :  { %9265 = vmatpush1.bf16.msra.mxu0 %v9264_v54  ;;  %v9283_v54 = vpack.c.bf16 %v1202_v53, %v1199_v52  ;;  %v1241_v21 = vld [vmem:[#allocation6 + $0x160] sm:$0xff]  ;;  %v1244_v22 = vld [vmem:[#allocation6 + $0x178] sm:$0xff]  ;;  %v1574_v52 = vld [vmem:[%s12942_s0 + $0x68] sm:$0xff] }
 0xcf7   :  { %9267 = vmatprep.subr.bf16.mxu0 %v9266_v61  ;;  %v1208_v61 = vld [vmem:[#allocation6 + $0x58] sm:$0xff]  ;;  %v9304_v7 = vpack.c.bf16 %v1244_v22, %v1241_v21  ;;  %v1561_v29 = vld [vmem:[%s12942_s0] sm:$0xff] }
 0xcf8   :  { %9284 = vmatpush3.bf16.msra.mxu1 %v9283_v54  ;;  %v9286_v63 = vpack.c.bf16 %v1208_v61, %v1205_v56  ;;  %v1564_v28 = vld [vmem:[%s12942_s0 + $0x18] sm:$0xff]  ;;  %v1573_v54 = vld [vmem:[%s12942_s0 + $0x60] sm:$0xff] }
 0xcf9   :  { %9285 = vmatprep.subr.bf16.mxu1 %v10454_v25  ;;  %v1576_v53 = vld [vmem:[%s12942_s0 + $0x78] sm:$0xff] }
 0xcfa   :  { %9269 = vmatpush1.bf16.msra.mxu0 %v9268_v19  ;;  %v1217_v19 = vld [vmem:[#allocation6 + $0xa0] sm:$0xff]  ;;  %v9322_v56 = vpack.c.bf16 %v1576_v53, %v1574_v52  ;;  %v1740_v52 = vld [vmem:[%s12883_s11 + $0x28] sm:$0xff] }
 0xcfb   :  { %9271 = vmatprep.subr.bf16.mxu0 %v9270_v4  ;;  %v1220_v4 = vld [vmem:[#allocation6 + $0xb8] sm:$0xff] }
 0xcfc   :  { %9287 = vmatpush3.bf16.msra.mxu1 %v9286_v63  ;;  %v9292_v5 = vpack.c.bf16 %v1220_v4, %v1217_v19 }
 0xcfd   :  { %9288 = vmatprep.subr.bf16.mxu1 %v10454_v25 }
 0xcfe   :  { %9273 = vmatpush1.bf16.msra.mxu0 %v9272_v11  ;;  %v1229_v11 = vld [vmem:[#allocation6 + $0x100] sm:$0xff] }
 0xcff   :  { %9275 = vmatprep.subr.bf16.mxu0 %v9274_v12  ;;  %v1232_v12 = vld [vmem:[#allocation6 + $0x118] sm:$0xff] }
 0xd00   :  { %9290 = vmatpush3.bf16.msra.mxu1 %v9289_v3  ;;  %v9298_v13 = vpack.c.bf16 %v1232_v12, %v1229_v11 }
 0xd01   :  { %9291 = vmatprep.subr.bf16.mxu1 %v10454_v25 }
 0xd02   :  { %9277 = vmatpush1.bf16.msra.mxu0 %v9276_v18  ;;  %v9301_v18 = vpack.c.bf16 %v1238_v15, %v1235_v14 }
 0xd03   :  { %9279 = vmatprep.subr.bf16.mxu0 %v9278_v20 }
 0xd04   :  { %9293 = vmatpush3.bf16.msra.mxu1 %v9292_v5 }
 0xd05   :  { %9294 = vmatprep.subr.bf16.mxu1 %v10454_v25 }
 0xd06   :  { %9281 = vmatpush1.bf16.msra.mxu0 %v9280_v9 }
 0xd07   :  { %9307 = vmatprep.subr.bf16.mxu0 %v9306_v27  ;;  %v1562_v27 = vld [vmem:[%s12942_s0 + $0x8] sm:$0xff] }
 0xd08   :  { %9296 = vmatpush3.bf16.msra.mxu1 %v9295_v10 }
 0xd09   :  { %1327 = vmatmul.mubr.f32.vlgmr.msra.gmra.mrb[0].mxu0 %v10906_v23  ;;  %9297 = vmatprep.subr.bf16.mxu1 %v10454_v25 }
 0xd0a   :  { %9309 = vmatpush1.bf16.msra.mxu0 %v9308_v45  ;;  %1486 = vmatprep.mubr.f32.mxu0 %v10452_v0  ;;  %v9310_v45 = vpack.c.bf16 %v1564_v28, %v1562_v27 }
 0xd0b   :  { %9326 = vmatprep.subr.bf16.mxu0 %v10454_v25 }
 0xd0c   :  { %9299 = vmatpush3.bf16.msra.mxu1 %v9298_v13  ;;  %v1258_v13 = vrot.slane %v11005_v31, %v10795_v39  ;;  %v1577_v31 = vld [vmem:[%s12943_s24] sm:$0x3] }
 0xd0d   :  { %7852 = vmatmul.mubr.msk.f32.vlgmr.msra.gmra.mrb[2].mxu0 %vm317_vm0, %v1196_v30  ;;  %9300 = vmatprep.subr.bf16.mxu1 %v10454_v25  ;;  %v1563_v30 = vld [vmem:[%s12942_s0 + $0x10] sm:$0xff]  ;;  %v1582_v21 = vrot.slane %v1577_v31, %v10676_v59 }
 0xd0e   :  { %8501 = vmatprep.mubr.msk.f32.mxu0 %vm10457_vm1, %v10452_v0  ;;  %v9312_v34 = vpack.c.bf16 %v1563_v30, %v1561_v29 }
 0xd10   :  { %9302 = vmatpush3.bf16.msra.mxu1 %v9301_v18 }
 0xd11   :  { %9303 = vmatprep.subr.bf16.mxu1 %v10454_v25 }
 0xd14   :  { %9305 = vmatpush3.bf16.msra.mxu1 %v9304_v7 }
 0xd15   :  { %9311 = vmatprep.subr.bf16.mxu1 %v9310_v45 }
 0xd17   :  { %8483 = vmatmul.mubr.f32.vlgmr.msra.gmra.mrb[0].mxu1 %v10906_v23 }
 0xd18   :  { %1656 = vmatprep.mubr.f32.mxu1 %v10452_v0  ;;  %9313 = vmatpush1.bf16.msra.mxu1 %v9312_v34 }
 0xddc   :  { %v1328_v35 = vpop.f32.mrb[0].mxu0 }
 0xddd   :  { %v1329_v36 = vadd.f32 %v1328_v35, %v1250_v33  ;;  %v1330_v38 = vpop.f32.mrb[1].mxu0  ;;  %v1568_v33 = vld [vmem:[%s12942_s0 + $0x38] sm:$0xff] }
 0xdde   :  { %v11016_v41 = vadd.f32 %v1330_v38, %v1254_v37  ;;  %v1567_v37 = vld [vmem:[%s12942_s0 + $0x30] sm:$0xff]  ;;  %v1570_v38 = vld [vmem:[%s12942_s0 + $0x48] sm:$0xff] }
 0xddf   :  { %1501 = vrot.lane.b32.xlu0 %v1329_v36, %s10453_s3 }
 0xde0   :  { %v1488_v40 = vpop.f32.mrb[2].mxu0 }
 0xde1   :  { %v1490_v42 = vpop.f32.mrb[3].mxu0  ;;  %v1489_v58 = vadd.f32 %v1488_v40, %v1412_v44 }
 0xde2   :  { %v11018_v43 = vadd.f32 %v1490_v42, %v1416_v16  ;;  %v1572_v16 = vld [vmem:[%s12942_s0 + $0x58] sm:$0xff] }
 0xde3   :  { %1531 = vrot.lane.b32.xlu0 %v11016_v41, %s10453_s3  ;;  %v1493_v26 = vadd.f32 %v1489_v58, %v1329_v36  ;;  %v1565_v36 = vld [vmem:[%s12942_s0 + $0x20] sm:$0xff]  ;;  %v9318_v44 = vpack.c.bf16 %v1572_v16, %v1570_v38 }
 0xde4   :  { %v9316_v42 = vpack.c.bf16 %v1567_v37, %v1565_v36 }
 0xde5   :  { %v7853_v32 = vmul.f32 -1.442695, %v1493_v26  ;;  %v1571_v26 = vld [vmem:[%s12942_s0 + $0x50] sm:$0xff] }
 0xde7   :  { %10091 = vpow2.f32 %v7853_v32 }
 0xdea   :  { %v1399_v14 = vpop.f32.mrb[0].mxu1 }
 0xdeb   :  { %v1400_v15 = vadd.f32 %v1399_v14, %v1258_v13 }
 0xdf1   :  { %v10092_v60 = vpop.eup %10091 }
 0xdf2   :  { %v1497_v46 = vadd.f32 1.0, %v10092_v60 }
 0xdf4   :  { %10093 = vrcp.f32 %v1497_v46  ;;  %v1523_v46 = vadd.f32 %v11018_v43, %v11016_v41  ;;  %v1575_v41 = vld [vmem:[%s12942_s0 + $0x70] sm:$0xff] }
 0xdfe   :  { %v11023_v47 = vpop.eup %10093 }
 0xdff   :  { %v1511_v63 = vsub.f32 1.0, %v11023_v47 }
 0xe51   :  { %v1502_v48 = vpop.permute.xlu0 %1501 }
 0xe52   :  { %v1504_v49 = vmul.f32 %v11023_v47, %v1502_v48  ;;  %v7854_v48 = vmul.f32 -1.442695, %v1523_v46 }
 0xe54   :  { %1506 = vrot.lane.b32.xlu1 %v1504_v49, %s10453_s3 }
 0xe55   :  { %v11027_v50 = vpop.permute.xlu0 %1531 }
 0xe56   :  { %v1534_v51 = vmul.f32 %v11023_v47, %v11027_v50 }
 0xe58   :  { %1536 = vrot.lane.b32.xlu1 %v1534_v51, %s10453_s3 }
 0xe5c   :  { %1518 = vrot.lane.b32.xlu1 %v10906_v23, %s10455_s7 }
 0xe60   :  { %1547 = vrot.lane.b32.xlu1 %v10906_v23, %s10456_s27  ;;  %v1566_v23 = vld [vmem:[%s12942_s0 + $0x28] sm:$0xff] }
 0xe61   :  { %v9314_v35 = vpack.c.bf16 %v1568_v33, %v1566_v23 }
 0xe63   :  { %9315 = vmatprep.subr.bf16.mxu1 %v9314_v35 }
 0xe64   :  { %9317 = vmatpush1.bf16.msra.mxu1 %v9316_v42 }
 0xe65   :  { %9319 = vmatprep.subr.bf16.mxu1 %v9318_v44 }
 0xec6   :  { %v1507_v17 = vpop.permute.xlu1 %1506 }
 0xec7   :  { %v1509_v20 = vadd.f32 %v1507_v17, %v1489_v58  ;;  %v1569_v58 = vld [vmem:[%s12942_s0 + $0x40] sm:$0xff]  ;;  %s12945_s0 = sld [smem:[#allocation22_spill]] (!%p7869_p3) }
 0xec8   :  { %v9320_v60 = vpack.c.bf16 %v1571_v26, %v1569_v58  ;;  %v1735_v26 = vld [vmem:[%s12883_s11] sm:$0xff] }
 0xec9   :  { %10095 = vtanh.f32 %v1509_v20 }
 0xeca   :  { %v1537_v24 = vpop.permute.xlu1 %1536  ;;  %9321 = vmatpush1.bf16.msra.mxu1 %v9320_v60  ;;  %v1737_v60 = vld [vmem:[%s12883_s11 + $0x10] sm:$0xff] }
 0xecb   :  { %v1539_v9 = vadd.f32 %v1537_v24, %v11018_v43  ;;  %v9324_v43 = vpack.c.bf16 %v1575_v41, %v1573_v54  ;;  %9323 = vmatprep.subr.bf16.mxu1 %v9322_v56  ;;  %v1741_v41 = vld [vmem:[%s12883_s11 + $0x30] sm:$0xff] }
 0xecd   :  { %10097 = vtanh.f32 %v1539_v9 }
 0xece   :  { %10099 = vpow2.f32 %v7854_v48  ;;  %9325 = vmatpush1.bf16.msra.mxu1 %v9324_v43  ;;  %v11099_v61 = vpop.permute.xlu1 %1518  ;;  %v1738_v48 = vld [vmem:[%s12883_s11 + $0x18] sm:$0xff] }
 0xecf   :  { %9338 = vmatprep.subr.bf16.mxu1 %v10454_v25  ;;  %v1521_v3 = vmul.f32 %v11023_v47, %v11099_v61  ;;  %v8484_v47 = vpop.f32.mrb[1].mxu1  ;;  %v1742_v43 = vld [vmem:[%s12883_s11 + $0x38] sm:$0xff] }
 0xed2   :  { %v11104_v4 = vpop.permute.xlu1 %1547 }
 0xed3   :  { %v10096_v40 = vpop.eup %10095 }
 0xed4   :  { %1513 = vrot.lane.b32.xlu0 %v10096_v40, %s10456_s27 }
 0xed7   :  { %v10098_v32 = vpop.eup %10097 }
 0xed8   :  { %1543 = vrot.lane.b32.xlu0 %v10098_v32, %s10456_s27  ;;  %v10100_v49 = vpop.eup %10099  ;;  %v1736_v32 = vld [vmem:[%s12883_s11 + $0x8] sm:$0xff] }
 0xed9   :  { %v1527_v51 = vadd.f32 1.0, %v10100_v49  ;;  %v9327_v46 = vpack.c.bf16 %v1736_v32, %v1735_v26  ;;  %v9330_v49 = vpack.c.bf16 %v1738_v48, %v1737_v60  ;;  %v2084_v26 = vld [vmem:[%s12890_s18] sm:$0xff]  ;;  %v2085_v32 = vld [vmem:[%s12890_s18 + $0x8] sm:$0xff]  ;;  %v2087_v48 = vld [vmem:[%s12890_s18 + $0x18] sm:$0xff] }
 0xeda   :  { %v9358_v60 = vpack.c.bf16 %v2085_v32, %v2084_v26 }
 0xedb   :  { %10101 = vrcp.f32 %v1527_v51  ;;  %9328 = vmatpush3.bf16.msra.mxu0 %v9327_v46  ;;  %v1739_v51 = vld [vmem:[%s12883_s11 + $0x20] sm:$0xff]  ;;  %v2086_v46 = vld [vmem:[%s12890_s18 + $0x10] sm:$0xff] }
 0xedc   :  { %9329 = vmatprep.subr.bf16.mxu0 %v10454_v25  ;;  %v9333_v56 = vpack.c.bf16 %v1740_v52, %v1739_v51 }
 0xedf   :  { %9331 = vmatpush3.bf16.msra.mxu0 %v9330_v49  ;;  %v9361_v49 = vpack.c.bf16 %v2087_v48, %v2086_v46 }
 0xee0   :  { %9332 = vmatprep.subr.bf16.mxu0 %v10454_v25 }
 0xee3   :  { %9334 = vmatpush3.bf16.msra.mxu0 %v9333_v56 }
 0xee4   :  { %9335 = vmatprep.subr.bf16.mxu0 %v10454_v25 }
 0xee5   :  { %v10102_v1 = vpop.eup %10101 }
 0xee6   :  { %v1541_v5 = vsub.f32 1.0, %v10102_v1  ;;  %v1550_v10 = vmul.f32 %v10102_v1, %v11104_v4 }
 0xf46   :  { %v1514_v2 = vpop.permute.xlu0 %1513 }
 0xf47   :  { %v1516_v19 = vmul.f32 %v1514_v2, %v1511_v63  ;;  %v9336_v63 = vpack.c.bf16 %v1742_v43, %v1741_v41  ;;  %v1999_v41 = vld [vmem:[%s12888_s16] sm:$0xff]  ;;  %v2000_v43 = vld [vmem:[%s12888_s16 + $0x8] sm:$0xff] }
 0xf49   :  { %v1522_v6 = vadd.f32 %v1521_v3, %v1516_v19  ;;  %9337 = vmatpush3.bf16.msra.mxu0 %v9336_v63 }
 0xf4a   :  { %v1544_v8 = vpop.permute.xlu0 %1543  ;;  %9342 = vmatprep.subr.bf16.mxu0 %v10454_v25 }
 0xf4b   :  { %v1546_v11 = vmul.f32 %v1544_v8, %v1541_v5  ;;  %1553 = vrot.lane.b32.xlu0 %v1522_v6, %s10456_s27 }
 0xf4d   :  { %v1551_v12 = vadd.f32 %v1550_v10, %v1546_v11 }
 0xf4f   :  { %1557 = vrot.lane.b32.xlu1 %v1551_v12, %s10455_s7  ;;  %1686 = vrot.lane.b32.xlu0 %v1400_v15, %s10453_s3 }
 0xfbd   :  { %v1554_v17 = vpop.permute.xlu0 %1553 }
 0xfc1   :  { %v1558_v18 = vpop.permute.xlu1 %1557  ;;  %v1687_v24 = vpop.permute.xlu0 %1686 }
 0xfc2   :  { %v11113_v20 = vsel %vm463_vm2, %v1554_v17, %v1558_v18 }
 0xfc3   :  { %7855 = vmatmul.mubr.msk.f32.vlgmr.msra.gmra.mrb[2].mxu1 %vm493_vm3, %v11113_v20 }
 0xfc4   :  { %8508 = vmatprep.mubr.msk.f32.mxu1 %vm10457_vm1, %v10452_v0 }
0x1096   :  { %v1658_v22 = vpop.f32.mrb[2].mxu1 }
0x1097   :  { %v1659_v7 = vadd.f32 %v1658_v22, %v1582_v21  ;;  %v1660_v9 = vpop.f32.mrb[3].mxu1 }
0x1099   :  { %v1663_v27 = vadd.f32 %v1659_v7, %v11027_v50  ;;  %v1689_v28 = vadd.f32 %v1687_v24, %v1659_v7  ;;  %v1586_v50 = vrot.slane %v1577_v31, %v10686_v62 }
0x109b   :  { %v7856_v29 = vmul.f32 -1.442695, %v1663_v27  ;;  %v7857_v45 = vmul.f32 -1.442695, %v1689_v28  ;;  %v1661_v16 = vadd.f32 %v1660_v9, %v1586_v50  ;;  %v1818_v9 = vld [vmem:[%s12886_s14 + $0x8] sm:$0xff] }
0x109d   :  { %10103 = vpow2.f32 %v7856_v29  ;;  %v1696_v1 = vadd.f32 %v1687_v24, %v1661_v16 }
0x109e   :  { %10105 = vpow2.f32 %v7857_v45 }
0x109f   :  { %v7858_v2 = vmul.f32 -1.442695, %v1696_v1  ;;  %v9346_v1 = vpack.c.bf16 %v2000_v43, %v1999_v41 }
0x10a7   :  { %v10104_v30 = vpop.eup %10103 }
0x10a8   :  { %v10106_v23 = vpop.eup %10105  ;;  %v1667_v33 = vadd.f32 1.0, %v10104_v30 }
0x10a9   :  { %v1693_v34 = vadd.f32 1.0, %v10106_v23 }
0x10aa   :  { %10107 = vrcp.f32 %v1667_v33  ;;  %v1827_v33 = vld [vmem:[%s12885_s13] sm:$0x1] }
0x10ab   :  { %10109 = vrcp.f32 %v1693_v34 }
0x10b4   :  { %v10108_v35 = vpop.eup %10107 }
0x10b5   :  { %v10110_v36 = vpop.eup %10109  ;;  %v1670_v37 = vmul.f32 %v10108_v35, %v1400_v15  ;;  %v1677_v6 = vsub.f32 1.0, %v10108_v35  ;;  %v1683_v13 = vmul.f32 %v10108_v35, %v11104_v4  ;;  %v1743_v4 = vld [vmem:[%s12884_s12] sm:$0x1] }
0x10b6   :  { %v1703_v38 = vmul.f32 %v10110_v36, %v1400_v15 }
0x10b7   :  { %1672 = vrot.lane.b32.xlu1 %v1670_v37, %s10453_s3 }
0x10b8   :  { %1705 = vrot.lane.b32.xlu0 %v1703_v38, %s10453_s3 }
0x1129   :  { %v1673_v40 = vpop.permute.xlu1 %1672 }
0x112a   :  { %v1706_v42 = vpop.permute.xlu0 %1705  ;;  %v1675_v44 = vadd.f32 %v1673_v40, %v1659_v7  ;;  %v1817_v7 = vld [vmem:[%s12886_s14] sm:$0xff] }
0x112b   :  { %v1708_v58 = vadd.f32 %v1706_v42, %v1661_v16  ;;  %v1918_v42 = vld [vmem:[%s12887_s15] sm:$0xff] }
0x112c   :  { %10111 = vtanh.f32 %v1675_v44  ;;  %v1919_v44 = vld [vmem:[%s12887_s15 + $0x8] sm:$0xff] }
0x112d   :  { %10113 = vtanh.f32 %v1708_v58  ;;  %v9343_v58 = vpack.c.bf16 %v1919_v44, %v1918_v42  ;;  %v2260_v44 = vand.u32 (!%p7869_p3), 127, %v145_v57 }
0x112e   :  { %10115 = vpow2.f32 %v7858_v2 }
0x1136   :  { %v10112_v53 = vpop.eup %10111 }
0x1137   :  { %v10114_v54 = vpop.eup %10113  ;;  %1679 = vrot.lane.b32.xlu1 %v10112_v53, %s10456_s27 }
0x1138   :  { %1712 = vrot.lane.b32.xlu0 %v10114_v54, %s10456_s27  ;;  %v10116_v3 = vpop.eup %10115 }
0x1139   :  { %v1700_v19 = vadd.f32 1.0, %v10116_v3  ;;  %v2001_v3 = vld [vmem:[%s12888_s16 + $0x10] sm:$0xff] }
0x113b   :  { %10117 = vrcp.f32 %v1700_v19 }
0x1145   :  { %v10118_v5 = vpop.eup %10117 }
0x1146   :  { %v1710_v8 = vsub.f32 1.0, %v10118_v5  ;;  %v1716_v15 = vmul.f32 %v10118_v5, %v11099_v61  ;;  %v2003_v5 = vld [vmem:[%s12888_s16 + $0x20] sm:$0xff] }
0x11a9   :  { %v1680_v10 = vpop.permute.xlu1 %1679 }
0x11aa   :  { %v1713_v11 = vpop.permute.xlu0 %1712  ;;  %v1682_v12 = vmul.f32 %v1680_v10, %v1677_v6  ;;  %v2004_v6 = vld [vmem:[%s12888_s16 + $0x28] sm:$0xff] }
0x11ab   :  { %v1715_v14 = vmul.f32 %v1713_v11, %v1710_v8  ;;  %v2088_v8 = vld [vmem:[%s12890_s18 + $0x20] sm:$0xff]  ;;  %v9352_v10 = vpack.c.bf16 %v2004_v6, %v2003_v5  ;;  %v2089_v11 = vld [vmem:[%s12890_s18 + $0x28] sm:$0xff] }
0x11ac   :  { %v1684_v47 = vadd.f32 %v1683_v13, %v1682_v12  ;;  %v9364_v12 = vpack.c.bf16 %v2089_v11, %v2088_v8  ;;  %v2005_v13 = vld [vmem:[%s12888_s16 + $0x30] sm:$0xff] }
0x11ad   :  { %v1717_v17 = vadd.f32 %v1716_v15, %v1715_v14  ;;  %v2006_v14 = vld [vmem:[%s12888_s16 + $0x38] sm:$0xff]  ;;  %v2090_v15 = vld [vmem:[%s12890_s18 + $0x30] sm:$0xff] }
0x11ae   :  { %1719 = vrot.lane.b32.xlu1 %v1684_v47, %s10456_s27 }
0x11af   :  { %1723 = vrot.lane.b32.xlu0 %v1717_v17, %s10455_s7 }
0x1220   :  { %v1720_v18 = vpop.permute.xlu1 %1719 }
0x1221   :  { %v1724_v31 = vpop.permute.xlu0 %1723 }
0x1222   :  { %v1726_v21 = vsel %vm463_vm2, %v1720_v18, %v1724_v31 }
0x1223   :  { %8502 = vmatmul.mubr.msk.f32.vlgmr.msra.gmra.mrb[4].mxu0 %vm493_vm3, %v1726_v21 }
0x1224   :  { %8515 = vmatprep.mubr.msk.f32.mxu0 %vm10457_vm1, %v10452_v0  ;;  %9344 = vmatpush3.bf16.msra.mxu0 %v9343_v58 }
0x1225   :  { %9345 = vmatprep.subr.bf16.mxu0 %v10454_v25 }
0x12f6   :  { %v1813_v61 = vpop.f32.mrb[4].mxu0 }
0x12f7   :  { %v1814_v22 = vadd.f32 %v1813_v61, %v1743_v4  ;;  %v8503_v24 = vpop.f32.mrb[5].mxu0 }
0x12f9   :  { %v1822_v27 = vrot.slane %v1814_v22, %v10676_v59 }
0x12fb   :  { %v1823_v28 = vadd.f32 %v1822_v27, %v1817_v7  ;;  %v1824_v29 = vadd.f32 %v1822_v27, %v1818_v9  ;;  %v2007_v7 = vld [vmem:[%s12944_s4] sm:$0x1] }
0x12fc   :  { %v2092_v9 = vld [vmem:[%s12891_s19] sm:$0x1] }
0x12fd   :  { %10119 = vtanh.f32 %v1823_v28 }
0x12fe   :  { %10121 = vtanh.f32 %v1824_v29 }
0x1307   :  { %v10120_v45 = vpop.eup %10119 }
0x1308   :  { %v10122_v30 = vpop.eup %10121 }
0x1309   :  { %v9339_v23 = vpack.c.bf16 %v10122_v30, %v10120_v45 }
0x130b   :  { %9341 = vmatpush3.bf16.xpose.msk.msra.mxu1 %vm10865_vm4, %v9339_v23 }
0x130c   :  { %9357 = vmatprep.subr.bf16.mxu1 %v10454_v25 }
0x1312   :  { %8509 = vmatmul.mubr.msk.f32.vlgmr.msra.gmra.mrb[4].mxu1 %vm463_vm2, %v1827_v33 }
0x1313   :  { %8553 = vmatprep.mubr.msk.f32.mxu1 %vm10457_vm1, %v10452_v0  ;;  %9359 = vmatpush3.bf16.msra.mxu1 %v9358_v60 }
0x1314   :  { %9360 = vmatprep.subr.bf16.mxu1 %v10454_v25 }
0x1317   :  { %9362 = vmatpush3.bf16.msra.mxu1 %v9361_v49 }
0x1318   :  { %9363 = vmatprep.subr.bf16.mxu1 %v10454_v25 }
0x131b   :  { %9365 = vmatpush3.bf16.msra.mxu1 %v9364_v12 }
0x131c   :  { %9366 = vmatprep.subr.bf16.mxu1 %v10454_v25 }
0x13e5   :  { %v1903_v34 = vpop.f32.mrb[4].mxu1 }
0x13e6   :  { %v8510_v35 = vpop.f32.mrb[5].mxu1  ;;  %v1907_v36 = vsel %vm813_vm5, %v1903_v34, -inf }
0x13e7   :  { %1908 = vmax.xlane.f32.xlu1 %v1907_v36  ;;  %v2180_v35 = vld [vmem:[%s12945_s0] sm:$0xff] (!%p7869_p3)  ;;  %v2181_v36 = vld [vmem:[%s12945_s0 + $0x8] sm:$0xff] (!%p7869_p3) }
0x13f8   :  { %1730 = vrot.lane.b32.xlu1 %v1717_v17, %s10456_s27  ;;  %v2091_v17 = vld [vmem:[%s12890_s18 + $0x38] sm:$0xff] }
0x13f9   :  { %v9367_v18 = vpack.c.bf16 %v2091_v17, %v2090_v15 }
0x13fb   :  { %9368 = vmatpush3.bf16.msra.mxu1 %v9367_v18 }
0x1474   :  { %v1909_v37 = vpop.xlane.xlu1 %1908 }
0x1475   :  { %v1910_v38 = vsub.f32 %v1903_v34, %v1909_v37  ;;  %v10461_v37 = vmov (!%p7869_p3), 0.0|0.0  }
0x1477   :  { %v1911_v50 = vmul.f32 1.442695, %v1910_v38  ;;  %v9370_v38 = vpack.c.bf16 (!%p7869_p3), %v2181_v36, %v2180_v35 }
0x1478   :  { %v1731_v53 = vpop.permute.xlu1 %1730 }
0x1479   :  { %10123 = vpow2.f32 %v1911_v50  ;;  %v10463_v50 = vmov (!%p7869_p3), 0.0  }
0x1483   :  { %v10124_v16 = vpop.eup %10123 }
0x1484   :  { %v1913_v40 = vsel %vm813_vm5, %v10124_v16, 0.0 }
0x1485   :  { %1914 = vadd.xlane.f32.xlu0 %v1913_v40 }
0x149b   :  { %1727 = vrot.lane.b32.xlu0 %v1684_v47, %s10455_s7  ;;  %v9355_v47 = vpack.c.bf16 %v2006_v14, %v2005_v13 }
0x1512   :  { %v1915_v51 = vpop.xlane.xlu0 %1914 }
0x1513   :  { %10125 = vrcp.f32 %v1915_v51 }
0x1516   :  { %v1728_v52 = vpop.permute.xlu0 %1727 }
0x1517   :  { %v1733_v56 = vsel %vm493_vm3, %v11113_v20, %v1728_v52  ;;  %v2002_v20 = vld [vmem:[%s12888_s16 + $0x18] sm:$0xff] }
0x1518   :  { %v11212_v54 = vsel %vm639_vm6, %v1733_v56, %v1731_v53  ;;  %v9349_v19 = vpack.c.bf16 %v2002_v20, %v2001_v3 }
0x151d   :  { %v10126_v63 = vpop.eup %10125 }
0x151e   :  { %v1917_v2 = vmul.f32 %v10126_v63, %v10124_v16 }
0x1520   :  { %8516 = vmatmul.mubr.msk.f32.vlgmr.msra.gmra.mrb[6].mxu0 %vm317_vm0, %v1917_v2  ;;  %2168 = vst.msk [vmem:[#allocation12 + $0x1] sm:$0x1] %vm813_vm5, %v1917_v2 }
0x1521   :  { %9347 = vmatpush3.bf16.msra.mxu0 %v9346_v1  ;;  %8534 = vmatprep.mubr.msk.f32.mxu0 %vm10457_vm1, %v10452_v0 }
0x1522   :  { %9348 = vmatprep.subr.bf16.mxu0 %v10454_v25 }
0x1525   :  { %9350 = vmatpush3.bf16.msra.mxu0 %v9349_v19 }
0x1526   :  { %9351 = vmatprep.subr.bf16.mxu0 %v10454_v25 }
0x1529   :  { %9353 = vmatpush3.bf16.msra.mxu0 %v9352_v10 }
0x152a   :  { %9354 = vmatprep.subr.bf16.mxu0 %v10454_v25 }
0x152d   :  { %9356 = vmatpush3.bf16.msra.mxu0 %v9355_v47 }
0x152e   :  { %9369 = vmatprep.subr.bf16.mxu0 (!%p7869_p3), %v10461_v37 }
0x15f3   :  { %v1989_v31 = vpop.f32.mrb[6].mxu0 }
0x15f4   :  { %vm1993_vm9 = vcmp.gt.f32.partialorder %v1989_v31, 0.0  ;;  %v1994_v21 = vmul.f32 0.01, %v1989_v31  ;;  %v8517_v4 = vpop.f32.mrb[7].mxu0 }
0x15f6   :  { %v1995_v61 = vsel %vm1993_vm9, %v1989_v31, %v1994_v21 }
0x15f7   :  { %v1997_v22 = vmul.f32 0.01, %v1995_v61  ;;  %vm1996_vm11 = vcmp.gt.f32.partialorder %v1995_v61, 0.0 }
0x15f9   :  { %v1998_v24 = vsel %vm1996_vm11, %v1995_v61, %v1997_v22 }
0x15fa   :  { %8535 = vmatmul.mubr.msk.f32.vlgmr.msra.gmra.mrb[8].mxu0 %vm493_vm3, %v1998_v24  ;;  %8554 = vmatmul.mubr.msk.f32.vlgmr.msra.gmra.mrb[6].mxu1 %vm493_vm3, %v1998_v24 }
0x15fb   :  { %8560 = vmatprep.mubr.msk.f32.mxu0 (!%p7869_p3), %vm10462_vm13, %v10463_v50  ;;  %9371 = vmatpush3.bf16.msra.mxu0 (!%p7869_p3), %v9370_v38 }
0x16cd   :  { %v2077_v27 = vpop.f32.mrb[8].mxu0  ;;  %v2159_v28 = vpop.f32.mrb[6].mxu1  ;;  %2179 = sbr.rel (%p7869_p3) target bundleno = 6555 (0x199b), region = 93 }
0x16ce   :  { %v2078_v29 = vadd.f32 %v2077_v27, %v2007_v7  ;;  %v2160_v45 = vadd.f32 %v2159_v28, %v2092_v9  ;;  %v8536_v30 = vpop.f32.mrb[9].mxu0  ;;  %v8555_v23 = vpop.f32.mrb[7].mxu1 }
0x16d0   :  { %vm2081_vm12 = vcmp.gt.f32.partialorder %v2078_v29, 0.0  ;;  %v2082_v33 = vmul.f32 0.01, %v2078_v29  ;;  %2164 = vst.msk [vmem:[#allocation9 + $0x1] sm:$0x1] %vm813_vm5, %v2160_v45  ;;  %8561 = vmatmul.mubr.msk.f32.vlgmr.msra.gmra.mrb[0].mxu0 (!%p7869_p3), %vm317_vm0, %v2160_v45 }
0x16d2   :  { %v2083_v34 = vsel %vm2081_vm12, %v2078_v29, %v2082_v33 }
0x16d3   :  { %2166 = vst.msk [vmem:[#allocation10 + $0x1] sm:$0x1] %vm1071_vm10, %v2083_v34 }
0x17a3   :  { %v2251_v16 = vpop.f32.mrb[0].mxu0 }
0x17a4   :  { %v8562_v40 = vpop.f32.mrb[1].mxu0  ;;  %v2256_v42 = vsel %vm2255_vm14, %v2251_v16, -inf }
0x17a5   :  { %2257 = vmax.xlane.f32.xlu0 %v2256_v42 }
0x1832   :  { %v2258_v58 = vpop.xlane.xlu0 %2257 }
0x1833   :  { %vm2261_vm15 = vcmp.ge.f32.partialorder %v2251_v16, %v2258_v58 }
0x1834   :  { %v2262_v26 = vsel %vm2261_vm15, %v2260_v44, 12 }
0x1835   :  { %v2263_v32 = vsel %vm2255_vm14, %v2262_v26, 2147483647 }
0x1836   :  { %v2265_v60 = vshra.s32 %v2263_v32, 16  ;;  %v2264_v48 = vand.u32 65535, %v2263_v32 }
0x1838   :  { %v2267_v46 = vcvt.s32.f32 %v2265_v60  ;;  %v2266_v51 = vcvt.s32.f32 %v2264_v48 }
0x183a   :  { %2268 = vmin.xlane.f32.xlu0 %v2267_v46 }
0x18c7   :  { %v2269_v49 = vpop.xlane.xlu0 %2268 }
0x18c8   :  { %vm2270_vm7 = vcmp.eq.f32.partialorder %v2267_v46, %v2269_v49  ;;  %v2275_v53 = vcvt.f32.s32 %v2269_v49 }
0x18c9   :  { %v2271_v52 = vsel %vm2270_vm7, %v2266_v51, inf }
0x18ca   :  { %2272 = vmin.xlane.f32.xlu1 %v2271_v52  ;;  %v2276_v41 = vshll.u32 %v2275_v53, 16 }
0x1957   :  { %v2273_v56 = vpop.xlane.xlu1 %2272 }
0x1958   :  { %v2274_v43 = vcvt.f32.s32 %v2273_v56 }
0x195a   :  { %v2277_v63 = vadd.s32 %v2276_v41, %v2274_v43 }
0x195c   :  { %v2278_v1 = vrot.slane %v2277_v63, 4 }
0x195e   :  { %vm2279_vm8 = vcmp.lt.s32.totalorder %v2277_v63, %v2278_v1 }
0x195f   :  { %v2280_v2 = vsel %vm2279_vm8, %v2277_v63, %v2278_v1 }
0x1960   :  { %v2281_v3 = vrot.slane %v2280_v2, 2 }
0x1962   :  { %vm2282_vm9 = vcmp.lt.s32.totalorder %v2280_v2, %v2281_v3 }
0x1963   :  { %v2283_v20 = vsel %vm2282_vm9, %v2280_v2, %v2281_v3 }
0x1964   :  { %v2284_v19 = vrot.slane %v2283_v20, 1 }
0x1966   :  { %vm2285_vm11 = vcmp.lt.s32.totalorder %v2283_v20, %v2284_v19 }
0x1967   :  { %v2286_v5 = vsel %vm2285_vm11, %v2283_v20, %v2284_v19 }
0x1968   :  { %9984 = vpush %v2286_v5 }
0x1999   :  { %s9985_s9 = spop %9984 }
0x199a   :  { %2288 = sst [smem:[#allocation2]] %s9985_s9 }
0x199b PF:  { %v2293_v6 = vld [vmem:[#allocation6 + $0x8] sm:$0xff]  ;;  %v2296_v8 = vld [vmem:[#allocation6 + $0x20] sm:$0xff]  ;;  %2421 = vmatprep.mubr.f32.mxu0 %v10452_v0  ;;  %9404 = vmatprep.subr.bf16.mxu1 %v10454_v25  ;;  %v2295_v12 = vld [vmem:[#allocation6 + $0x18] sm:$0xff]  ;;  %s11279_s2 = sld [smem:[#allocation5 + $0x2]]  ;;  %s7887_s26 = sld [smem:[#allocation4 + $0x3]] }
0x199c   :  { %v2292_v10 = vld [vmem:[#allocation6] sm:$0xff]  ;;  %v9372_v11 = vpack.c.bf16 %v2296_v8, %v2293_v6  ;;  %v2299_v13 = vld [vmem:[#allocation6 + $0x38] sm:$0xff]  ;;  %v2302_v14 = vld [vmem:[#allocation6 + $0x50] sm:$0xff]  ;;  %8595 = vmatprep.mubr.msk.f32.mxu1 %vm10457_vm1, %v10452_v0  ;;  %s11284_s17 = sld [smem:[#allocation2]]  ;;  %s12946_s29 = sld [smem:[#allocation24_spill]] }
0x199d   :  { %v9374_v15 = vpack.c.bf16 %v2295_v12, %v2292_v10  ;;  %v9376_v47 = vpack.c.bf16 %v2302_v14, %v2299_v13  ;;  %v2298_v17 = vld [vmem:[#allocation6 + $0x30] sm:$0xff]  ;;  %v2301_v18 = vld [vmem:[#allocation6 + $0x48] sm:$0xff]  ;;  %v2308_v21 = vld [vmem:[#allocation6 + $0x80] sm:$0xff]  ;;  %s12947_s9 = sld [smem:[#allocation21_spill]]  ;;  %s12948_s4 = sld [smem:[#allocation25_spill]] }
0x199e   :  { %v2305_v31 = vld [vmem:[#allocation6 + $0x68] sm:$0xff]  ;;  %9373 = vmatprep.subr.bf16.mxu0 %v9372_v11  ;;  %v9378_v4 = vpack.c.bf16 %v2301_v18, %v2298_v17  ;;  %v2304_v22 = vld [vmem:[#allocation6 + $0x60] sm:$0xff]  ;;  %v2307_v24 = vld [vmem:[#allocation6 + $0x78] sm:$0xff]  ;;  %s12949_s30 = sld [smem:[#allocation26_spill]]  ;;  %s12951_s1 = sld [smem:[#allocation28_spill]] }
0x199f   :  { %9375 = vmatpush1.bf16.msra.mxu0 %v9374_v15  ;;  %v9380_v61 = vpack.c.bf16 %v2308_v21, %v2305_v31  ;;  %v2311_v7 = vld [vmem:[#allocation6 + $0x98] sm:$0xff]  ;;  %v2314_v9 = vld [vmem:[#allocation6 + $0xb0] sm:$0xff]  ;;  %v9382_v27 = vpack.c.bf16 %v2307_v24, %v2304_v22  ;;  %v2313_v45 = vld [vmem:[#allocation6 + $0xa8] sm:$0xff] }
0x19a0   :  { %9377 = vmatprep.subr.bf16.mxu0 %v9376_v47  ;;  %v9384_v28 = vpack.c.bf16 %v2314_v9, %v2311_v7  ;;  %v2310_v29 = vld [vmem:[#allocation6 + $0x90] sm:$0xff]  ;;  %v2317_v30 = vld [vmem:[#allocation6 + $0xc8] sm:$0xff]  ;;  %v2320_v23 = vld [vmem:[#allocation6 + $0xe0] sm:$0xff] }
0x19a1   :  { %p10012_p4 = scmp.eq.s32.totalorder %s11279_s2, 1  ;;  %v9386_v33 = vpack.c.bf16 %v2313_v45, %v2310_v29  ;;  %v9388_v34 = vpack.c.bf16 %v2320_v23, %v2317_v30  ;;  %v2316_v35 = vld [vmem:[#allocation6 + $0xc0] sm:$0xff]  ;;  %v2319_v36 = vld [vmem:[#allocation6 + $0xd8] sm:$0xff]  ;;  %v2326_v38 = vld [vmem:[#allocation6 + $0x110] sm:$0xff]  ;;  %p7888_p5 = scmp.ne.s32.totalorder %s11279_s2, 0 }
0x19a2   :  { %v2323_v37 = vld [vmem:[#allocation6 + $0xf8] sm:$0xff]  ;;  %v9390_v50 = vpack.c.bf16 %v2319_v36, %v2316_v35  ;;  %v2322_v40 = vld [vmem:[#allocation6 + $0xf0] sm:$0xff]  ;;  %v2325_v42 = vld [vmem:[#allocation6 + $0x108] sm:$0xff]  ;;  %vm10465_vm15 = vmmov (!%p7888_p5), 0   ;;  %vm3350_vm7 = vcmask (!%p7888_p5), 90112  }
0x19a3   :  { %9379 = vmatpush1.bf16.msra.mxu0 %v9378_v4  ;;  %10001 = sst [smem:[#allocation2]] (%p10012_p4), %s7887_s26  ;;  %v9392_v16 = vpack.c.bf16 %v2326_v38, %v2323_v37  ;;  %v2329_v44 = vld [vmem:[#allocation6 + $0x128] sm:$0xff]  ;;  %v2332_v58 = vld [vmem:[#allocation6 + $0x140] sm:$0xff]  ;;  %v9394_v26 = vpack.c.bf16 %v2325_v42, %v2322_v40  ;;  %v2331_v46 = vld [vmem:[#allocation6 + $0x138] sm:$0xff]  ;;  %s2290_s26 = scalar_lea.vmem %s12947_s9, %s11284_s17 }
0x19a4   :  { %9381 = vmatprep.subr.bf16.mxu0 %v9380_v61  ;;  %v9396_v32 = vpack.c.bf16 %v2332_v58, %v2329_v44  ;;  %v2328_v60 = vld [vmem:[#allocation6 + $0x120] sm:$0xff]  ;;  %v2335_v48 = vld [vmem:[#allocation6 + $0x158] sm:$0xff]  ;;  %v2338_v49 = vld [vmem:[#allocation6 + $0x170] sm:$0xff] }
0x19a5   :  { %v9398_v51 = vpack.c.bf16 %v2331_v46, %v2328_v60  ;;  %v9400_v52 = vpack.c.bf16 %v2338_v49, %v2335_v48  ;;  %v2334_v53 = vld [vmem:[#allocation6 + $0x150] sm:$0xff]  ;;  %v2337_v56 = vld [vmem:[#allocation6 + $0x168] sm:$0xff]  ;;  %v2501_v43 = vld [vmem:[%s12946_s29 + $0x18] sm:$0xff] }
0x19a6   :  { %v2499_v41 = vld [vmem:[%s12946_s29 + $0x8] sm:$0xff]  ;;  %v9402_v63 = vpack.c.bf16 %v2337_v56, %v2334_v53  ;;  %v2498_v2 = vld [vmem:[%s12946_s29] sm:$0xff]  ;;  %v2500_v3 = vld [vmem:[%s12946_s29 + $0x10] sm:$0xff] }
0x19a7   :  { %9383 = vmatpush1.bf16.msra.mxu0 %v9382_v27  ;;  %v9428_v1 = vpack.c.bf16 %v2501_v43, %v2499_v41  ;;  %v9430_v20 = vpack.c.bf16 %v2500_v3, %v2498_v2  ;;  %v2291_v19 = vld [vmem:[%s2290_s26] sm:$0x1]  ;;  %v2294_v45 = vld [vmem:[#allocation6 + $0x10] sm:$0xff]  ;;  %v2297_v30 = vld [vmem:[#allocation6 + $0x28] sm:$0xff]  ;;  %s12950_s26 = sld [smem:[#allocation27_spill]] }
0x19a8   :  { %9385 = vmatprep.subr.bf16.mxu0 %v9384_v28  ;;  %v11311_v5 = vld [vmem:[%s12882_s10] sm:$0x7]  ;;  %v2306_v36 = vld [vmem:[#allocation6 + $0x70] sm:$0xff]  ;;  %v2309_v37 = vld [vmem:[#allocation6 + $0x88] sm:$0xff] }
0x19a9   :  { %v2345_v6 = vrot.slane %v11311_v5, %v10676_v59  ;;  %v2502_v8 = vld [vmem:[%s12948_s4] sm:$0x3]  ;;  %v2349_v12 = vrot.slane %v11311_v5, %v10686_v62  ;;  %v9411_v38 = vpack.c.bf16 %v2309_v37, %v2306_v36  ;;  %v2318_v42 = vld [vmem:[#allocation6 + $0xd0] sm:$0xff]  ;;  %v2321_v44 = vld [vmem:[#allocation6 + $0xe8] sm:$0xff] }
0x19aa   :  { %v2511_v14 = vrot.slane %v2502_v8, %v10686_v62  ;;  %v2507_v31 = vrot.slane %v2502_v8, %v10676_v59  ;;  %v2300_v23 = vld [vmem:[#allocation6 + $0x40] sm:$0xff]  ;;  %v9417_v58 = vpack.c.bf16 %v2321_v44, %v2318_v42  ;;  %v2330_v46 = vld [vmem:[#allocation6 + $0x130] sm:$0xff]  ;;  %v2333_v48 = vld [vmem:[#allocation6 + $0x148] sm:$0xff] }
0x19ab   :  { %9387 = vmatpush1.bf16.msra.mxu0 %v9386_v33  ;;  %v9405_v33 = vpack.c.bf16 %v2297_v30, %v2294_v45  ;;  %v2336_v53 = vld [vmem:[#allocation6 + $0x160] sm:$0xff]  ;;  %v2339_v56 = vld [vmem:[#allocation6 + $0x178] sm:$0xff]  ;;  %v2669_v45 = vld [vmem:[%s12949_s30 + $0x68] sm:$0xff] }
0x19ac   :  { %9389 = vmatprep.subr.bf16.mxu0 %v9388_v34  ;;  %v2303_v34 = vld [vmem:[#allocation6 + $0x58] sm:$0xff]  ;;  %v9426_v43 = vpack.c.bf16 %v2339_v56, %v2336_v53  ;;  %v2656_v3 = vld [vmem:[%s12949_s30] sm:$0xff] }
0x19ad   :  { %9406 = vmatpush3.bf16.msra.mxu1 %v9405_v33  ;;  %v9408_v35 = vpack.c.bf16 %v2303_v34, %v2300_v23  ;;  %v2659_v2 = vld [vmem:[%s12949_s30 + $0x18] sm:$0xff]  ;;  %v2668_v33 = vld [vmem:[%s12949_s30 + $0x60] sm:$0xff] }
0x19ae   :  { %9407 = vmatprep.subr.bf16.mxu1 %v10454_v25  ;;  %v2671_v30 = vld [vmem:[%s12949_s30 + $0x78] sm:$0xff] }
0x19af   :  { %9391 = vmatpush1.bf16.msra.mxu0 %v9390_v50  ;;  %v2312_v50 = vld [vmem:[#allocation6 + $0xa0] sm:$0xff]  ;;  %v9444_v23 = vpack.c.bf16 %v2671_v30, %v2669_v45  ;;  %v2835_v45 = vld [vmem:[%s12883_s11 + $0x28] sm:$0xff] }
0x19b0   :  { %9393 = vmatprep.subr.bf16.mxu0 %v9392_v16  ;;  %v2315_v16 = vld [vmem:[#allocation6 + $0xb8] sm:$0xff] }
0x19b1   :  { %9409 = vmatpush3.bf16.msra.mxu1 %v9408_v35  ;;  %v9414_v40 = vpack.c.bf16 %v2315_v16, %v2312_v50 }
0x19b2   :  { %9410 = vmatprep.subr.bf16.mxu1 %v10454_v25 }
0x19b3   :  { %9395 = vmatpush1.bf16.msra.mxu0 %v9394_v26  ;;  %v2324_v26 = vld [vmem:[#allocation6 + $0x100] sm:$0xff] }
0x19b4   :  { %9397 = vmatprep.subr.bf16.mxu0 %v9396_v32  ;;  %v2327_v32 = vld [vmem:[#allocation6 + $0x118] sm:$0xff] }
0x19b5   :  { %9412 = vmatpush3.bf16.msra.mxu1 %v9411_v38  ;;  %v9420_v60 = vpack.c.bf16 %v2327_v32, %v2324_v26 }
0x19b6   :  { %9413 = vmatprep.subr.bf16.mxu1 %v10454_v25 }
0x19b7   :  { %9399 = vmatpush1.bf16.msra.mxu0 %v9398_v51  ;;  %v9423_v51 = vpack.c.bf16 %v2333_v48, %v2330_v46 }
0x19b8   :  { %9401 = vmatprep.subr.bf16.mxu0 %v9400_v52 }
0x19b9   :  { %9415 = vmatpush3.bf16.msra.mxu1 %v9414_v40 }
0x19ba   :  { %9416 = vmatprep.subr.bf16.mxu1 %v10454_v25 }
0x19bb   :  { %9403 = vmatpush1.bf16.msra.mxu0 %v9402_v63 }
0x19bc   :  { %9429 = vmatprep.subr.bf16.mxu0 %v9428_v1  ;;  %v2657_v1 = vld [vmem:[%s12949_s30 + $0x8] sm:$0xff] }
0x19bd   :  { %9418 = vmatpush3.bf16.msra.mxu1 %v9417_v58 }
0x19be   :  { %2422 = vmatmul.mubr.f32.vlgmr.msra.gmra.mrb[0].mxu0 %v11212_v54  ;;  %9419 = vmatprep.subr.bf16.mxu1 %v10454_v25 }
0x19bf   :  { %9431 = vmatpush1.bf16.msra.mxu0 %v9430_v20  ;;  %2581 = vmatprep.mubr.f32.mxu0 %v10452_v0  ;;  %v9432_v20 = vpack.c.bf16 %v2659_v2, %v2657_v1 }
0x19c0   :  { %9448 = vmatprep.subr.bf16.mxu0 %v10454_v25 }
0x19c1   :  { %9421 = vmatpush3.bf16.msra.mxu1 %v9420_v60  ;;  %v2353_v60 = vrot.slane %v11311_v5, %v10795_v39  ;;  %v2672_v5 = vld [vmem:[%s12950_s26] sm:$0x3] }
0x19c2   :  { %7871 = vmatmul.mubr.msk.f32.vlgmr.msra.gmra.mrb[2].mxu0 %vm317_vm0, %v2291_v19  ;;  %9422 = vmatprep.subr.bf16.mxu1 %v10454_v25  ;;  %v2658_v19 = vld [vmem:[%s12949_s30 + $0x10] sm:$0xff]  ;;  %v2677_v53 = vrot.slane %v2672_v5, %v10676_v59 }
0x19c3   :  { %8614 = vmatprep.mubr.msk.f32.mxu0 %vm10457_vm1, %v10452_v0  ;;  %v9434_v8 = vpack.c.bf16 %v2658_v19, %v2656_v3 }
0x19c5   :  { %9424 = vmatpush3.bf16.msra.mxu1 %v9423_v51 }
0x19c6   :  { %9425 = vmatprep.subr.bf16.mxu1 %v10454_v25 }
0x19c9   :  { %9427 = vmatpush3.bf16.msra.mxu1 %v9426_v43 }
0x19ca   :  { %9433 = vmatprep.subr.bf16.mxu1 %v9432_v20 }
0x19cc   :  { %8596 = vmatmul.mubr.f32.vlgmr.msra.gmra.mrb[0].mxu1 %v11212_v54 }
0x19cd   :  { %2751 = vmatprep.mubr.f32.mxu1 %v10452_v0  ;;  %9435 = vmatpush1.bf16.msra.mxu1 %v9434_v8 }
0x1a91   :  { %v2423_v10 = vpop.f32.mrb[0].mxu0 }
0x1a92   :  { %v2424_v11 = vadd.f32 %v2423_v10, %v2345_v6  ;;  %v2425_v13 = vpop.f32.mrb[1].mxu0  ;;  %v2663_v6 = vld [vmem:[%s12949_s30 + $0x38] sm:$0xff] }
0x1a93   :  { %v11322_v47 = vadd.f32 %v2425_v13, %v2349_v12  ;;  %v2662_v12 = vld [vmem:[%s12949_s30 + $0x30] sm:$0xff]  ;;  %v2665_v13 = vld [vmem:[%s12949_s30 + $0x48] sm:$0xff] }
0x1a94   :  { %2596 = vrot.lane.b32.xlu0 %v2424_v11, %s10453_s3 }
0x1a95   :  { %v2583_v15 = vpop.f32.mrb[2].mxu0 }
0x1a96   :  { %v2585_v17 = vpop.f32.mrb[3].mxu0  ;;  %v2584_v21 = vadd.f32 %v2583_v15, %v2507_v31 }
0x1a97   :  { %v11324_v18 = vadd.f32 %v2585_v17, %v2511_v14  ;;  %v2667_v14 = vld [vmem:[%s12949_s30 + $0x58] sm:$0xff] }
0x1a98   :  { %2626 = vrot.lane.b32.xlu0 %v11322_v47, %s10453_s3  ;;  %v2588_v4 = vadd.f32 %v2584_v21, %v2424_v11  ;;  %v2660_v11 = vld [vmem:[%s12949_s30 + $0x20] sm:$0xff]  ;;  %v9440_v31 = vpack.c.bf16 %v2667_v14, %v2665_v13 }
0x1a99   :  { %v9438_v17 = vpack.c.bf16 %v2662_v12, %v2660_v11 }
0x1a9a   :  { %v7872_v61 = vmul.f32 -1.442695, %v2588_v4  ;;  %v2666_v4 = vld [vmem:[%s12949_s30 + $0x50] sm:$0xff] }
0x1a9c   :  { %10127 = vpow2.f32 %v7872_v61 }
0x1a9f   :  { %v2494_v46 = vpop.f32.mrb[0].mxu1 }
0x1aa0   :  { %v2495_v48 = vadd.f32 %v2494_v46, %v2353_v60 }
0x1aa6   :  { %v10128_v22 = vpop.eup %10127 }
0x1aa7   :  { %v2592_v24 = vadd.f32 1.0, %v10128_v22 }
0x1aa9   :  { %10129 = vrcp.f32 %v2592_v24  ;;  %v2618_v24 = vadd.f32 %v11324_v18, %v11322_v47  ;;  %v2670_v47 = vld [vmem:[%s12949_s30 + $0x70] sm:$0xff] }
0x1ab3   :  { %v11329_v7 = vpop.eup %10129 }
0x1ab4   :  { %v2606_v35 = vsub.f32 1.0, %v11329_v7 }
0x1b06   :  { %v2597_v9 = vpop.permute.xlu0 %2596 }
0x1b07   :  { %v2599_v27 = vmul.f32 %v11329_v7, %v2597_v9  ;;  %v7873_v9 = vmul.f32 -1.442695, %v2618_v24 }
0x1b09   :  { %2601 = vrot.lane.b32.xlu1 %v2599_v27, %s10453_s3 }
0x1b0a   :  { %v11333_v28 = vpop.permute.xlu0 %2626 }
0x1b0b   :  { %v2629_v29 = vmul.f32 %v11329_v7, %v11333_v28 }
0x1b0d   :  { %2631 = vrot.lane.b32.xlu1 %v2629_v29, %s10453_s3 }
0x1b11   :  { %2613 = vrot.lane.b32.xlu1 %v11212_v54, %s10455_s7 }
0x1b15   :  { %2642 = vrot.lane.b32.xlu1 %v11212_v54, %s10456_s27  ;;  %v2661_v54 = vld [vmem:[%s12949_s30 + $0x28] sm:$0xff] }
0x1b16   :  { %v9436_v10 = vpack.c.bf16 %v2663_v6, %v2661_v54 }
0x1b18   :  { %9437 = vmatprep.subr.bf16.mxu1 %v9436_v10 }
0x1b19   :  { %9439 = vmatpush1.bf16.msra.mxu1 %v9438_v17 }
0x1b1a   :  { %9441 = vmatprep.subr.bf16.mxu1 %v9440_v31 }
0x1b7b   :  { %v2602_v49 = vpop.permute.xlu1 %2601 }
0x1b7c   :  { %v2604_v52 = vadd.f32 %v2602_v49, %v2584_v21  ;;  %v2664_v21 = vld [vmem:[%s12949_s30 + $0x40] sm:$0xff]  ;;  %s12952_s30 = sld [smem:[#allocation22_spill]] (!%p7888_p5) }
0x1b7d   :  { %v9442_v22 = vpack.c.bf16 %v2666_v4, %v2664_v21  ;;  %v2830_v4 = vld [vmem:[%s12883_s11] sm:$0xff] }
0x1b7e   :  { %10131 = vtanh.f32 %v2604_v52 }
0x1b7f   :  { %v2632_v41 = vpop.permute.xlu1 %2631  ;;  %9443 = vmatpush1.bf16.msra.mxu1 %v9442_v22  ;;  %v2832_v22 = vld [vmem:[%s12883_s11 + $0x10] sm:$0xff] }
0x1b80   :  { %v2634_v63 = vadd.f32 %v2632_v41, %v11324_v18  ;;  %v9446_v18 = vpack.c.bf16 %v2670_v47, %v2668_v33  ;;  %9445 = vmatprep.subr.bf16.mxu1 %v9444_v23  ;;  %v2836_v47 = vld [vmem:[%s12883_s11 + $0x30] sm:$0xff] }
0x1b82   :  { %10133 = vtanh.f32 %v2634_v63 }
0x1b83   :  { %10135 = vpow2.f32 %v7873_v9  ;;  %9447 = vmatpush1.bf16.msra.mxu1 %v9446_v18  ;;  %v11405_v34 = vpop.permute.xlu1 %2613  ;;  %v2833_v9 = vld [vmem:[%s12883_s11 + $0x18] sm:$0xff] }
0x1b84   :  { %9460 = vmatprep.subr.bf16.mxu1 %v10454_v25  ;;  %v2616_v38 = vmul.f32 %v11329_v7, %v11405_v34  ;;  %v8597_v7 = vpop.f32.mrb[1].mxu1  ;;  %v2837_v18 = vld [vmem:[%s12883_s11 + $0x38] sm:$0xff] }
0x1b87   :  { %v11410_v16 = vpop.permute.xlu1 %2642 }
0x1b88   :  { %v10132_v15 = vpop.eup %10131 }
0x1b89   :  { %2608 = vrot.lane.b32.xlu0 %v10132_v15, %s10456_s27 }
0x1b8c   :  { %v10134_v61 = vpop.eup %10133 }
0x1b8d   :  { %2638 = vrot.lane.b32.xlu0 %v10134_v61, %s10456_s27  ;;  %v10136_v27 = vpop.eup %10135  ;;  %v2831_v61 = vld [vmem:[%s12883_s11 + $0x8] sm:$0xff] }
0x1b8e   :  { %v2622_v29 = vadd.f32 1.0, %v10136_v27  ;;  %v9449_v24 = vpack.c.bf16 %v2831_v61, %v2830_v4  ;;  %v9452_v27 = vpack.c.bf16 %v2833_v9, %v2832_v22  ;;  %v3179_v4 = vld [vmem:[%s12890_s18] sm:$0xff]  ;;  %v3180_v61 = vld [vmem:[%s12890_s18 + $0x8] sm:$0xff]  ;;  %v3182_v9 = vld [vmem:[%s12890_s18 + $0x18] sm:$0xff] }
0x1b8f   :  { %v9480_v22 = vpack.c.bf16 %v3180_v61, %v3179_v4 }
0x1b90   :  { %10137 = vrcp.f32 %v2622_v29  ;;  %9450 = vmatpush3.bf16.msra.mxu0 %v9449_v24  ;;  %v2834_v29 = vld [vmem:[%s12883_s11 + $0x20] sm:$0xff]  ;;  %v3181_v24 = vld [vmem:[%s12890_s18 + $0x10] sm:$0xff] }
0x1b91   :  { %9451 = vmatprep.subr.bf16.mxu0 %v10454_v25  ;;  %v9455_v23 = vpack.c.bf16 %v2835_v45, %v2834_v29 }
0x1b94   :  { %9453 = vmatpush3.bf16.msra.mxu0 %v9452_v27  ;;  %v9483_v27 = vpack.c.bf16 %v3182_v9, %v3181_v24 }
0x1b95   :  { %9454 = vmatprep.subr.bf16.mxu0 %v10454_v25 }
0x1b98   :  { %9456 = vmatpush3.bf16.msra.mxu0 %v9455_v23 }
0x1b99   :  { %9457 = vmatprep.subr.bf16.mxu0 %v10454_v25 }
0x1b9a   :  { %v10138_v36 = vpop.eup %10137 }
0x1b9b   :  { %v2636_v40 = vsub.f32 1.0, %v10138_v36  ;;  %v2645_v58 = vmul.f32 %v10138_v36, %v11410_v16 }
0x1bfb   :  { %v2609_v37 = vpop.permute.xlu0 %2608 }
0x1bfc   :  { %v2611_v50 = vmul.f32 %v2609_v37, %v2606_v35  ;;  %v9458_v35 = vpack.c.bf16 %v2837_v18, %v2836_v47  ;;  %v3094_v47 = vld [vmem:[%s12888_s16] sm:$0xff]  ;;  %v3095_v18 = vld [vmem:[%s12888_s16 + $0x8] sm:$0xff] }
0x1bfe   :  { %v2617_v42 = vadd.f32 %v2616_v38, %v2611_v50  ;;  %9459 = vmatpush3.bf16.msra.mxu0 %v9458_v35 }
0x1bff   :  { %v2639_v44 = vpop.permute.xlu0 %2638  ;;  %9464 = vmatprep.subr.bf16.mxu0 %v10454_v25 }
0x1c00   :  { %v2641_v26 = vmul.f32 %v2639_v44, %v2636_v40  ;;  %2648 = vrot.lane.b32.xlu0 %v2617_v42, %s10456_s27 }
0x1c02   :  { %v2646_v32 = vadd.f32 %v2645_v58, %v2641_v26 }
0x1c04   :  { %2652 = vrot.lane.b32.xlu1 %v2646_v32, %s10455_s7  ;;  %2781 = vrot.lane.b32.xlu0 %v2495_v48, %s10453_s3 }
0x1c72   :  { %v2649_v49 = vpop.permute.xlu0 %2648 }
0x1c76   :  { %v2653_v51 = vpop.permute.xlu1 %2652  ;;  %v2782_v41 = vpop.permute.xlu0 %2781 }
0x1c77   :  { %v11419_v52 = vsel %vm463_vm2, %v2649_v49, %v2653_v51 }
0x1c78   :  { %7874 = vmatmul.mubr.msk.f32.vlgmr.msra.gmra.mrb[2].mxu1 %vm493_vm3, %v11419_v52 }
0x1c79   :  { %8621 = vmatprep.mubr.msk.f32.mxu1 %vm10457_vm1, %v10452_v0 }
0x1d4b   :  { %v2753_v56 = vpop.f32.mrb[2].mxu1 }
0x1d4c   :  { %v2754_v43 = vadd.f32 %v2753_v56, %v2677_v53  ;;  %v2755_v63 = vpop.f32.mrb[3].mxu1 }
0x1d4e   :  { %v2758_v1 = vadd.f32 %v2754_v43, %v11333_v28  ;;  %v2784_v2 = vadd.f32 %v2782_v41, %v2754_v43  ;;  %v2681_v28 = vrot.slane %v2672_v5, %v10686_v62 }
0x1d50   :  { %v7875_v3 = vmul.f32 -1.442695, %v2758_v1  ;;  %v7876_v20 = vmul.f32 -1.442695, %v2784_v2  ;;  %v2756_v14 = vadd.f32 %v2755_v63, %v2681_v28  ;;  %v2913_v63 = vld [vmem:[%s12886_s14 + $0x8] sm:$0xff] }
0x1d52   :  { %10139 = vpow2.f32 %v7875_v3  ;;  %v2791_v36 = vadd.f32 %v2782_v41, %v2756_v14 }
0x1d53   :  { %10141 = vpow2.f32 %v7876_v20 }
0x1d54   :  { %v7877_v37 = vmul.f32 -1.442695, %v2791_v36  ;;  %v9468_v36 = vpack.c.bf16 %v3095_v18, %v3094_v47 }
0x1d5c   :  { %v10140_v19 = vpop.eup %10139 }
0x1d5d   :  { %v10142_v54 = vpop.eup %10141  ;;  %v2762_v6 = vadd.f32 1.0, %v10140_v19 }
0x1d5e   :  { %v2788_v8 = vadd.f32 1.0, %v10142_v54 }
0x1d5f   :  { %10143 = vrcp.f32 %v2762_v6  ;;  %v2922_v6 = vld [vmem:[%s12885_s13] sm:$0x1] }
0x1d60   :  { %10145 = vrcp.f32 %v2788_v8 }
0x1d69   :  { %v10144_v10 = vpop.eup %10143 }
0x1d6a   :  { %v10146_v11 = vpop.eup %10145  ;;  %v2765_v12 = vmul.f32 %v10144_v10, %v2495_v48  ;;  %v2772_v42 = vsub.f32 1.0, %v10144_v10  ;;  %v2778_v60 = vmul.f32 %v10144_v10, %v11410_v16  ;;  %v2838_v16 = vld [vmem:[%s12884_s12] sm:$0x1] }
0x1d6b   :  { %v2798_v13 = vmul.f32 %v10146_v11, %v2495_v48 }
0x1d6c   :  { %2767 = vrot.lane.b32.xlu1 %v2765_v12, %s10453_s3 }
0x1d6d   :  { %2800 = vrot.lane.b32.xlu0 %v2798_v13, %s10453_s3 }
0x1dde   :  { %v2768_v15 = vpop.permute.xlu1 %2767 }
0x1ddf   :  { %v2801_v17 = vpop.permute.xlu0 %2800  ;;  %v2770_v31 = vadd.f32 %v2768_v15, %v2754_v43  ;;  %v2912_v43 = vld [vmem:[%s12886_s14] sm:$0xff] }
0x1de0   :  { %v2803_v21 = vadd.f32 %v2801_v17, %v2756_v14  ;;  %v3013_v17 = vld [vmem:[%s12887_s15] sm:$0xff] }
0x1de1   :  { %10147 = vtanh.f32 %v2770_v31  ;;  %v3014_v31 = vld [vmem:[%s12887_s15 + $0x8] sm:$0xff] }
0x1de2   :  { %10149 = vtanh.f32 %v2803_v21  ;;  %v9465_v21 = vpack.c.bf16 %v3014_v31, %v3013_v17  ;;  %v3355_v31 = vand.u32 (!%p7888_p5), 127, %v145_v57 }
0x1de3   :  { %10151 = vpow2.f32 %v7877_v37 }
0x1deb   :  { %v10148_v30 = vpop.eup %10147 }
0x1dec   :  { %v10150_v33 = vpop.eup %10149  ;;  %2774 = vrot.lane.b32.xlu1 %v10148_v30, %s10456_s27 }
0x1ded   :  { %2807 = vrot.lane.b32.xlu0 %v10150_v33, %s10456_s27  ;;  %v10152_v38 = vpop.eup %10151 }
0x1dee   :  { %v2795_v50 = vadd.f32 1.0, %v10152_v38  ;;  %v3096_v38 = vld [vmem:[%s12888_s16 + $0x10] sm:$0xff] }
0x1df0   :  { %10153 = vrcp.f32 %v2795_v50 }
0x1dfa   :  { %v10154_v40 = vpop.eup %10153 }
0x1dfb   :  { %v2805_v44 = vsub.f32 1.0, %v10154_v40  ;;  %v2811_v48 = vmul.f32 %v10154_v40, %v11405_v34  ;;  %v3098_v40 = vld [vmem:[%s12888_s16 + $0x20] sm:$0xff] }
0x1e5e   :  { %v2775_v58 = vpop.permute.xlu1 %2774 }
0x1e5f   :  { %v2808_v26 = vpop.permute.xlu0 %2807  ;;  %v2777_v32 = vmul.f32 %v2775_v58, %v2772_v42  ;;  %v3099_v42 = vld [vmem:[%s12888_s16 + $0x28] sm:$0xff] }
0x1e60   :  { %v2810_v46 = vmul.f32 %v2808_v26, %v2805_v44  ;;  %v3183_v44 = vld [vmem:[%s12890_s18 + $0x20] sm:$0xff]  ;;  %v9474_v58 = vpack.c.bf16 %v3099_v42, %v3098_v40  ;;  %v3184_v26 = vld [vmem:[%s12890_s18 + $0x28] sm:$0xff] }
0x1e61   :  { %v2779_v7 = vadd.f32 %v2778_v60, %v2777_v32  ;;  %v9486_v32 = vpack.c.bf16 %v3184_v26, %v3183_v44  ;;  %v3100_v60 = vld [vmem:[%s12888_s16 + $0x30] sm:$0xff] }
0x1e62   :  { %v2812_v49 = vadd.f32 %v2811_v48, %v2810_v46  ;;  %v3101_v46 = vld [vmem:[%s12888_s16 + $0x38] sm:$0xff]  ;;  %v3185_v48 = vld [vmem:[%s12890_s18 + $0x30] sm:$0xff] }
0x1e63   :  { %2814 = vrot.lane.b32.xlu1 %v2779_v7, %s10456_s27 }
0x1e64   :  { %2818 = vrot.lane.b32.xlu0 %v2812_v49, %s10455_s7 }
0x1ed5   :  { %v2815_v51 = vpop.permute.xlu1 %2814 }
0x1ed6   :  { %v2819_v5 = vpop.permute.xlu0 %2818 }
0x1ed7   :  { %v2821_v53 = vsel %vm463_vm2, %v2815_v51, %v2819_v5 }
0x1ed8   :  { %8615 = vmatmul.mubr.msk.f32.vlgmr.msra.gmra.mrb[4].mxu0 %vm493_vm3, %v2821_v53 }
0x1ed9   :  { %8628 = vmatprep.mubr.msk.f32.mxu0 %vm10457_vm1, %v10452_v0  ;;  %9466 = vmatpush3.bf16.msra.mxu0 %v9465_v21 }
0x1eda   :  { %9467 = vmatprep.subr.bf16.mxu0 %v10454_v25 }
0x1fab   :  { %v2908_v34 = vpop.f32.mrb[4].mxu0 }
0x1fac   :  { %v2909_v56 = vadd.f32 %v2908_v34, %v2838_v16  ;;  %v8616_v41 = vpop.f32.mrb[5].mxu0 }
0x1fae   :  { %v2917_v1 = vrot.slane %v2909_v56, %v10676_v59 }
0x1fb0   :  { %v2918_v2 = vadd.f32 %v2917_v1, %v2912_v43  ;;  %v2919_v3 = vadd.f32 %v2917_v1, %v2913_v63  ;;  %v3102_v43 = vld [vmem:[%s12951_s1] sm:$0x1] }
0x1fb1   :  { %v3187_v63 = vld [vmem:[%s12891_s19] sm:$0x1] }
0x1fb2   :  { %10155 = vtanh.f32 %v2918_v2 }
0x1fb3   :  { %10157 = vtanh.f32 %v2919_v3 }
0x1fbc   :  { %v10156_v20 = vpop.eup %10155 }
0x1fbd   :  { %v10158_v19 = vpop.eup %10157 }
0x1fbe   :  { %v9461_v54 = vpack.c.bf16 %v10158_v19, %v10156_v20 }
0x1fc0   :  { %9463 = vmatpush3.bf16.xpose.msk.msra.mxu1 %vm10865_vm4, %v9461_v54 }
0x1fc1   :  { %9479 = vmatprep.subr.bf16.mxu1 %v10454_v25 }
0x1fc7   :  { %8622 = vmatmul.mubr.msk.f32.vlgmr.msra.gmra.mrb[4].mxu1 %vm463_vm2, %v2922_v6 }
0x1fc8   :  { %8666 = vmatprep.mubr.msk.f32.mxu1 %vm10457_vm1, %v10452_v0  ;;  %9481 = vmatpush3.bf16.msra.mxu1 %v9480_v22 }
0x1fc9   :  { %9482 = vmatprep.subr.bf16.mxu1 %v10454_v25 }
0x1fcc   :  { %9484 = vmatpush3.bf16.msra.mxu1 %v9483_v27 }
0x1fcd   :  { %9485 = vmatprep.subr.bf16.mxu1 %v10454_v25 }
0x1fd0   :  { %9487 = vmatpush3.bf16.msra.mxu1 %v9486_v32 }
0x1fd1   :  { %9488 = vmatprep.subr.bf16.mxu1 %v10454_v25 }
0x209a   :  { %v2998_v8 = vpop.f32.mrb[4].mxu1 }
0x209b   :  { %v8623_v10 = vpop.f32.mrb[5].mxu1  ;;  %v3002_v11 = vsel %vm813_vm5, %v2998_v8, -inf }
0x209c   :  { %3003 = vmax.xlane.f32.xlu1 %v3002_v11  ;;  %v3275_v10 = vld [vmem:[%s12952_s30] sm:$0xff] (!%p7888_p5)  ;;  %v3276_v11 = vld [vmem:[%s12952_s30 + $0x8] sm:$0xff] (!%p7888_p5) }
0x20ad   :  { %2825 = vrot.lane.b32.xlu1 %v2812_v49, %s10456_s27  ;;  %v3186_v49 = vld [vmem:[%s12890_s18 + $0x38] sm:$0xff] }
0x20ae   :  { %v9489_v51 = vpack.c.bf16 %v3186_v49, %v3185_v48 }
0x20b0   :  { %9490 = vmatpush3.bf16.msra.mxu1 %v9489_v51 }
0x2129   :  { %v3004_v12 = vpop.xlane.xlu1 %3003 }
0x212a   :  { %v3005_v13 = vsub.f32 %v2998_v8, %v3004_v12  ;;  %v10464_v12 = vmov (!%p7888_p5), 0.0|0.0  }
0x212c   :  { %v3006_v28 = vmul.f32 1.442695, %v3005_v13  ;;  %v9492_v13 = vpack.c.bf16 (!%p7888_p5), %v3276_v11, %v3275_v10 }
0x212d   :  { %v2826_v30 = vpop.permute.xlu1 %2825 }
0x212e   :  { %10159 = vpow2.f32 %v3006_v28  ;;  %v10466_v28 = vmov (!%p7888_p5), 0.0  }
0x2138   :  { %v10160_v14 = vpop.eup %10159 }
0x2139   :  { %v3008_v15 = vsel %vm813_vm5, %v10160_v14, 0.0 }
0x213a   :  { %3009 = vadd.xlane.f32.xlu0 %v3008_v15 }
0x2150   :  { %2822 = vrot.lane.b32.xlu0 %v2779_v7, %s10455_s7  ;;  %v9477_v7 = vpack.c.bf16 %v3101_v46, %v3100_v60 }
0x21c7   :  { %v3010_v29 = vpop.xlane.xlu0 %3009 }
0x21c8   :  { %10161 = vrcp.f32 %v3010_v29 }
0x21cb   :  { %v2823_v45 = vpop.permute.xlu0 %2822 }
0x21cc   :  { %v2828_v23 = vsel %vm493_vm3, %v11419_v52, %v2823_v45  ;;  %v3097_v52 = vld [vmem:[%s12888_s16 + $0x18] sm:$0xff] }
0x21cd   :  { %v11518_v33 = vsel %vm639_vm6, %v2828_v23, %v2826_v30  ;;  %v9471_v50 = vpack.c.bf16 %v3097_v52, %v3096_v38 }
0x21d2   :  { %v10162_v35 = vpop.eup %10161 }
0x21d3   :  { %v3012_v37 = vmul.f32 %v10162_v35, %v10160_v14 }
0x21d5   :  { %8629 = vmatmul.mubr.msk.f32.vlgmr.msra.gmra.mrb[6].mxu0 %vm317_vm0, %v3012_v37  ;;  %3263 = vst.msk [vmem:[#allocation12 + $0x2] sm:$0x1] %vm813_vm5, %v3012_v37 }
0x21d6   :  { %9469 = vmatpush3.bf16.msra.mxu0 %v9468_v36  ;;  %8647 = vmatprep.mubr.msk.f32.mxu0 %vm10457_vm1, %v10452_v0 }
0x21d7   :  { %9470 = vmatprep.subr.bf16.mxu0 %v10454_v25 }
0x21da   :  { %9472 = vmatpush3.bf16.msra.mxu0 %v9471_v50 }
0x21db   :  { %9473 = vmatprep.subr.bf16.mxu0 %v10454_v25 }
0x21de   :  { %9475 = vmatpush3.bf16.msra.mxu0 %v9474_v58 }
0x21df   :  { %9476 = vmatprep.subr.bf16.mxu0 %v10454_v25 }
0x21e2   :  { %9478 = vmatpush3.bf16.msra.mxu0 %v9477_v7 }
0x21e3   :  { %9491 = vmatprep.subr.bf16.mxu0 (!%p7888_p5), %v10464_v12 }
0x22a8   :  { %v3084_v5 = vpop.f32.mrb[6].mxu0 }
0x22a9   :  { %vm3088_vm12 = vcmp.gt.f32.partialorder %v3084_v5, 0.0  ;;  %v3089_v53 = vmul.f32 0.01, %v3084_v5  ;;  %v8630_v16 = vpop.f32.mrb[7].mxu0 }
0x22ab   :  { %v3090_v34 = vsel %vm3088_vm12, %v3084_v5, %v3089_v53 }
0x22ac   :  { %v3092_v56 = vmul.f32 0.01, %v3090_v34  ;;  %vm3091_vm13 = vcmp.gt.f32.partialorder %v3090_v34, 0.0 }
0x22ae   :  { %v3093_v41 = vsel %vm3091_vm13, %v3090_v34, %v3092_v56 }
0x22af   :  { %8648 = vmatmul.mubr.msk.f32.vlgmr.msra.gmra.mrb[8].mxu0 %vm493_vm3, %v3093_v41  ;;  %8667 = vmatmul.mubr.msk.f32.vlgmr.msra.gmra.mrb[6].mxu1 %vm493_vm3, %v3093_v41 }
0x22b0   :  { %8673 = vmatprep.mubr.msk.f32.mxu0 (!%p7888_p5), %vm10465_vm15, %v10466_v28  ;;  %9493 = vmatpush3.bf16.msra.mxu0 (!%p7888_p5), %v9492_v13 }
0x2382   :  { %v3172_v1 = vpop.f32.mrb[8].mxu0  ;;  %v3254_v2 = vpop.f32.mrb[6].mxu1  ;;  %3274 = sbr.rel (%p7888_p5) target bundleno = 9808 (0x2650), region = 101 }
0x2383   :  { %v3173_v3 = vadd.f32 %v3172_v1, %v3102_v43  ;;  %v3255_v20 = vadd.f32 %v3254_v2, %v3187_v63  ;;  %v8649_v19 = vpop.f32.mrb[9].mxu0  ;;  %v8668_v54 = vpop.f32.mrb[7].mxu1 }
0x2385   :  { %vm3176_vm14 = vcmp.gt.f32.partialorder %v3173_v3, 0.0  ;;  %v3177_v6 = vmul.f32 0.01, %v3173_v3  ;;  %3259 = vst.msk [vmem:[#allocation9 + $0x2] sm:$0x1] %vm813_vm5, %v3255_v20  ;;  %8674 = vmatmul.mubr.msk.f32.vlgmr.msra.gmra.mrb[0].mxu0 (!%p7888_p5), %vm317_vm0, %v3255_v20 }
0x2387   :  { %v3178_v8 = vsel %vm3176_vm14, %v3173_v3, %v3177_v6 }
0x2388   :  { %3261 = vst.msk [vmem:[#allocation10 + $0x2] sm:$0x1] %vm1071_vm10, %v3178_v8 }
0x2458   :  { %v3346_v14 = vpop.f32.mrb[0].mxu0 }
0x2459   :  { %v8675_v15 = vpop.f32.mrb[1].mxu0  ;;  %v3351_v17 = vsel %vm3350_vm7, %v3346_v14, -inf }
0x245a   :  { %3352 = vmax.xlane.f32.xlu0 %v3351_v17 }
0x24e7   :  { %v3353_v21 = vpop.xlane.xlu0 %3352 }
0x24e8   :  { %vm3356_vm8 = vcmp.ge.f32.partialorder %v3346_v14, %v3353_v21 }
0x24e9   :  { %v3357_v4 = vsel %vm3356_vm8, %v3355_v31, 12 }
0x24ea   :  { %v3358_v61 = vsel %vm3350_vm7, %v3357_v4, 2147483647 }
0x24eb   :  { %v3360_v22 = vshra.s32 %v3358_v61, 16  ;;  %v3359_v9 = vand.u32 65535, %v3358_v61 }
0x24ed   :  { %v3362_v24 = vcvt.s32.f32 %v3360_v22  ;;  %v3361_v29 = vcvt.s32.f32 %v3359_v9 }
0x24ef   :  { %3363 = vmin.xlane.f32.xlu0 %v3362_v24 }
0x257c   :  { %v3364_v27 = vpop.xlane.xlu0 %3363 }
0x257d   :  { %vm3365_vm9 = vcmp.eq.f32.partialorder %v3362_v24, %v3364_v27  ;;  %v3370_v30 = vcvt.f32.s32 %v3364_v27 }
0x257e   :  { %v3366_v45 = vsel %vm3365_vm9, %v3361_v29, inf }
0x257f   :  { %3367 = vmin.xlane.f32.xlu1 %v3366_v45  ;;  %v3371_v47 = vshll.u32 %v3370_v30, 16 }
0x260c   :  { %v3368_v23 = vpop.xlane.xlu1 %3367 }
0x260d   :  { %v3369_v18 = vcvt.f32.s32 %v3368_v23 }
0x260f   :  { %v3372_v35 = vadd.s32 %v3371_v47, %v3369_v18 }
0x2611   :  { %v3373_v36 = vrot.slane %v3372_v35, 4 }
0x2613   :  { %vm3374_vm11 = vcmp.lt.s32.totalorder %v3372_v35, %v3373_v36 }
0x2614   :  { %v3375_v37 = vsel %vm3374_vm11, %v3372_v35, %v3373_v36 }
0x2615   :  { %v3376_v38 = vrot.slane %v3375_v37, 2 }
0x2617   :  { %vm3377_vm12 = vcmp.lt.s32.totalorder %v3375_v37, %v3376_v38 }
0x2618   :  { %v3378_v52 = vsel %vm3377_vm12, %v3375_v37, %v3376_v38 }
0x2619   :  { %v3379_v50 = vrot.slane %v3378_v52, 1 }
0x261b   :  { %vm3380_vm13 = vcmp.lt.s32.totalorder %v3378_v52, %v3379_v50 }
0x261c   :  { %v3381_v40 = vsel %vm3380_vm13, %v3378_v52, %v3379_v50 }
0x261d   :  { %9986 = vpush %v3381_v40 }
0x264e   :  { %s9987_s2 = spop %9986 }
0x264f   :  { %3383 = sst [smem:[#allocation2]] %s9987_s2 }
0x2650 PF:  { %v3388_v42 = vld [vmem:[#allocation6 + $0x8] sm:$0xff]  ;;  %v3391_v44 = vld [vmem:[#allocation6 + $0x20] sm:$0xff]  ;;  %3516 = vmatprep.mubr.f32.mxu0 %v10452_v0  ;;  %9526 = vmatprep.subr.bf16.mxu1 %v10454_v25  ;;  %v3390_v32 = vld [vmem:[#allocation6 + $0x18] sm:$0xff]  ;;  %s11585_s8 = sld [smem:[#allocation5 + $0x3]]  ;;  %s7906_s28 = sld [smem:[#allocation4 + $0x4]] }
0x2651   :  { %v3387_v58 = vld [vmem:[#allocation6] sm:$0xff]  ;;  %v9494_v26 = vpack.c.bf16 %v3391_v44, %v3388_v42  ;;  %v3394_v60 = vld [vmem:[#allocation6 + $0x38] sm:$0xff]  ;;  %v3397_v46 = vld [vmem:[#allocation6 + $0x50] sm:$0xff]  ;;  %8708 = vmatprep.mubr.msk.f32.mxu1 %vm10457_vm1, %v10452_v0  ;;  %s11590_s17 = sld [smem:[#allocation2]]  ;;  %s12953_s5 = sld [smem:[#allocation24_spill]] }
0x2652   :  { %v9496_v48 = vpack.c.bf16 %v3390_v32, %v3387_v58  ;;  %v9498_v7 = vpack.c.bf16 %v3397_v46, %v3394_v60  ;;  %v3393_v49 = vld [vmem:[#allocation6 + $0x30] sm:$0xff]  ;;  %v3396_v51 = vld [vmem:[#allocation6 + $0x48] sm:$0xff]  ;;  %v3403_v53 = vld [vmem:[#allocation6 + $0x80] sm:$0xff]  ;;  %s12954_s2 = sld [smem:[#allocation21_spill]]  ;;  %s12955_s1 = sld [smem:[#allocation25_spill]] }
0x2653   :  { %v3400_v5 = vld [vmem:[#allocation6 + $0x68] sm:$0xff]  ;;  %9495 = vmatprep.subr.bf16.mxu0 %v9494_v26  ;;  %v9500_v16 = vpack.c.bf16 %v3396_v51, %v3393_v49  ;;  %v3399_v56 = vld [vmem:[#allocation6 + $0x60] sm:$0xff]  ;;  %v3402_v41 = vld [vmem:[#allocation6 + $0x78] sm:$0xff]  ;;  %s12956_s25 = sld [smem:[#allocation26_spill]]  ;;  %s12958_s0 = sld [smem:[#allocation28_spill]] }
0x2654   :  { %9497 = vmatpush1.bf16.msra.mxu0 %v9496_v48  ;;  %v9502_v34 = vpack.c.bf16 %v3403_v53, %v3400_v5  ;;  %v3406_v43 = vld [vmem:[#allocation6 + $0x98] sm:$0xff]  ;;  %v3409_v63 = vld [vmem:[#allocation6 + $0xb0] sm:$0xff]  ;;  %v9504_v1 = vpack.c.bf16 %v3402_v41, %v3399_v56  ;;  %v3408_v20 = vld [vmem:[#allocation6 + $0xa8] sm:$0xff] }
0x2655   :  { %9499 = vmatprep.subr.bf16.mxu0 %v9498_v7  ;;  %v9506_v2 = vpack.c.bf16 %v3409_v63, %v3406_v43  ;;  %v3405_v3 = vld [vmem:[#allocation6 + $0x90] sm:$0xff]  ;;  %v3412_v19 = vld [vmem:[#allocation6 + $0xc8] sm:$0xff]  ;;  %v3415_v54 = vld [vmem:[#allocation6 + $0xe0] sm:$0xff] }
0x2656   :  { %p10013_p6 = scmp.eq.s32.totalorder %s11585_s8, 1  ;;  %v9508_v6 = vpack.c.bf16 %v3408_v20, %v3405_v3  ;;  %v9510_v8 = vpack.c.bf16 %v3415_v54, %v3412_v19  ;;  %v3411_v10 = vld [vmem:[#allocation6 + $0xc0] sm:$0xff]  ;;  %v3414_v11 = vld [vmem:[#allocation6 + $0xd8] sm:$0xff]  ;;  %v3421_v13 = vld [vmem:[#allocation6 + $0x110] sm:$0xff]  ;;  %p7907_p7 = scmp.ne.s32.totalorder %s11585_s8, 0 }
0x2657   :  { %v3418_v12 = vld [vmem:[#allocation6 + $0xf8] sm:$0xff]  ;;  %v9512_v28 = vpack.c.bf16 %v3414_v11, %v3411_v10  ;;  %v3417_v15 = vld [vmem:[#allocation6 + $0xf0] sm:$0xff]  ;;  %v3420_v17 = vld [vmem:[#allocation6 + $0x108] sm:$0xff]  ;;  %vm10468_vm8 = vmmov (!%p7907_p7), 0   ;;  %vm4445_vm9 = vcmask (!%p7907_p7), 90112  }
0x2658   :  { %9501 = vmatpush1.bf16.msra.mxu0 %v9500_v16  ;;  %10003 = sst [smem:[#allocation2]] (%p10013_p6), %s7906_s28  ;;  %v9514_v14 = vpack.c.bf16 %v3421_v13, %v3418_v12  ;;  %v3424_v31 = vld [vmem:[#allocation6 + $0x128] sm:$0xff]  ;;  %v3427_v21 = vld [vmem:[#allocation6 + $0x140] sm:$0xff]  ;;  %v9516_v4 = vpack.c.bf16 %v3420_v17, %v3417_v15  ;;  %v3426_v24 = vld [vmem:[#allocation6 + $0x138] sm:$0xff]  ;;  %s3385_s28 = scalar_lea.vmem %s12954_s2, %s11590_s17 }
0x2659   :  { %9503 = vmatprep.subr.bf16.mxu0 %v9502_v34  ;;  %v9518_v61 = vpack.c.bf16 %v3427_v21, %v3424_v31  ;;  %v3423_v22 = vld [vmem:[#allocation6 + $0x120] sm:$0xff]  ;;  %v3430_v9 = vld [vmem:[#allocation6 + $0x158] sm:$0xff]  ;;  %v3433_v27 = vld [vmem:[#allocation6 + $0x170] sm:$0xff] }
0x265a   :  { %v9520_v29 = vpack.c.bf16 %v3426_v24, %v3423_v22  ;;  %v9522_v45 = vpack.c.bf16 %v3433_v27, %v3430_v9  ;;  %v3429_v30 = vld [vmem:[#allocation6 + $0x150] sm:$0xff]  ;;  %v3432_v23 = vld [vmem:[#allocation6 + $0x168] sm:$0xff]  ;;  %v3596_v18 = vld [vmem:[%s12953_s5 + $0x18] sm:$0xff] }
0x265b   :  { %v3594_v47 = vld [vmem:[%s12953_s5 + $0x8] sm:$0xff]  ;;  %v9524_v35 = vpack.c.bf16 %v3432_v23, %v3429_v30  ;;  %v3593_v37 = vld [vmem:[%s12953_s5] sm:$0xff]  ;;  %v3595_v38 = vld [vmem:[%s12953_s5 + $0x10] sm:$0xff] }
0x265c   :  { %9505 = vmatpush1.bf16.msra.mxu0 %v9504_v1  ;;  %v9550_v36 = vpack.c.bf16 %v3596_v18, %v3594_v47  ;;  %v9552_v52 = vpack.c.bf16 %v3595_v38, %v3593_v37  ;;  %v3386_v50 = vld [vmem:[%s3385_s28] sm:$0x1]  ;;  %v3389_v20 = vld [vmem:[#allocation6 + $0x10] sm:$0xff]  ;;  %v3392_v19 = vld [vmem:[#allocation6 + $0x28] sm:$0xff]  ;;  %s12957_s28 = sld [smem:[#allocation27_spill]] }
0x265d   :  { %9507 = vmatprep.subr.bf16.mxu0 %v9506_v2  ;;  %v11617_v40 = vld [vmem:[%s12882_s10] sm:$0x7]  ;;  %v3401_v11 = vld [vmem:[#allocation6 + $0x70] sm:$0xff]  ;;  %v3404_v12 = vld [vmem:[#allocation6 + $0x88] sm:$0xff] }
0x265e   :  { %v3440_v42 = vrot.slane %v11617_v40, %v10676_v59  ;;  %v3597_v44 = vld [vmem:[%s12955_s1] sm:$0x3]  ;;  %v3444_v32 = vrot.slane %v11617_v40, %v10686_v62  ;;  %v9533_v13 = vpack.c.bf16 %v3404_v12, %v3401_v11  ;;  %v3413_v17 = vld [vmem:[#allocation6 + $0xd0] sm:$0xff]  ;;  %v3416_v31 = vld [vmem:[#allocation6 + $0xe8] sm:$0xff] }
0x265f   :  { %v3606_v46 = vrot.slane %v3597_v44, %v10686_v62  ;;  %v3602_v5 = vrot.slane %v3597_v44, %v10676_v59  ;;  %v3395_v54 = vld [vmem:[#allocation6 + $0x40] sm:$0xff]  ;;  %v9539_v21 = vpack.c.bf16 %v3416_v31, %v3413_v17  ;;  %v3425_v24 = vld [vmem:[#allocation6 + $0x130] sm:$0xff]  ;;  %v3428_v9 = vld [vmem:[#allocation6 + $0x148] sm:$0xff] }
0x2660   :  { %9509 = vmatpush1.bf16.msra.mxu0 %v9508_v6  ;;  %v9527_v6 = vpack.c.bf16 %v3392_v19, %v3389_v20  ;;  %v3431_v30 = vld [vmem:[#allocation6 + $0x160] sm:$0xff]  ;;  %v3434_v23 = vld [vmem:[#allocation6 + $0x178] sm:$0xff]  ;;  %v3764_v20 = vld [vmem:[%s12956_s25 + $0x68] sm:$0xff] }
0x2661   :  { %9511 = vmatprep.subr.bf16.mxu0 %v9510_v8  ;;  %v3398_v8 = vld [vmem:[#allocation6 + $0x58] sm:$0xff]  ;;  %v9548_v18 = vpack.c.bf16 %v3434_v23, %v3431_v30  ;;  %v3751_v38 = vld [vmem:[%s12956_s25] sm:$0xff] }
0x2662   :  { %9528 = vmatpush3.bf16.msra.mxu1 %v9527_v6  ;;  %v9530_v10 = vpack.c.bf16 %v3398_v8, %v3395_v54  ;;  %v3754_v37 = vld [vmem:[%s12956_s25 + $0x18] sm:$0xff]  ;;  %v3763_v6 = vld [vmem:[%s12956_s25 + $0x60] sm:$0xff] }
0x2663   :  { %9529 = vmatprep.subr.bf16.mxu1 %v10454_v25  ;;  %v3766_v19 = vld [vmem:[%s12956_s25 + $0x78] sm:$0xff] }
0x2664   :  { %9513 = vmatpush1.bf16.msra.mxu0 %v9512_v28  ;;  %v3407_v28 = vld [vmem:[#allocation6 + $0xa0] sm:$0xff]  ;;  %v9566_v54 = vpack.c.bf16 %v3766_v19, %v3764_v20  ;;  %v3930_v20 = vld [vmem:[%s12883_s11 + $0x28] sm:$0xff] }
0x2665   :  { %9515 = vmatprep.subr.bf16.mxu0 %v9514_v14  ;;  %v3410_v14 = vld [vmem:[#allocation6 + $0xb8] sm:$0xff] }
0x2666   :  { %9531 = vmatpush3.bf16.msra.mxu1 %v9530_v10  ;;  %v9536_v15 = vpack.c.bf16 %v3410_v14, %v3407_v28 }
0x2667   :  { %9532 = vmatprep.subr.bf16.mxu1 %v10454_v25 }
0x2668   :  { %9517 = vmatpush1.bf16.msra.mxu0 %v9516_v4  ;;  %v3419_v4 = vld [vmem:[#allocation6 + $0x100] sm:$0xff] }
0x2669   :  { %9519 = vmatprep.subr.bf16.mxu0 %v9518_v61  ;;  %v3422_v61 = vld [vmem:[#allocation6 + $0x118] sm:$0xff] }
0x266a   :  { %9534 = vmatpush3.bf16.msra.mxu1 %v9533_v13  ;;  %v9542_v22 = vpack.c.bf16 %v3422_v61, %v3419_v4 }
0x266b   :  { %9535 = vmatprep.subr.bf16.mxu1 %v10454_v25 }
0x266c   :  { %9521 = vmatpush1.bf16.msra.mxu0 %v9520_v29  ;;  %v9545_v29 = vpack.c.bf16 %v3428_v9, %v3425_v24 }
0x266d   :  { %9523 = vmatprep.subr.bf16.mxu0 %v9522_v45 }
0x266e   :  { %9537 = vmatpush3.bf16.msra.mxu1 %v9536_v15 }
0x266f   :  { %9538 = vmatprep.subr.bf16.mxu1 %v10454_v25 }
0x2670   :  { %9525 = vmatpush1.bf16.msra.mxu0 %v9524_v35 }
0x2671   :  { %9551 = vmatprep.subr.bf16.mxu0 %v9550_v36  ;;  %v3752_v36 = vld [vmem:[%s12956_s25 + $0x8] sm:$0xff] }
0x2672   :  { %9540 = vmatpush3.bf16.msra.mxu1 %v9539_v21 }
0x2673   :  { %3517 = vmatmul.mubr.f32.vlgmr.msra.gmra.mrb[0].mxu0 %v11518_v33  ;;  %9541 = vmatprep.subr.bf16.mxu1 %v10454_v25 }
0x2674   :  { %9553 = vmatpush1.bf16.msra.mxu0 %v9552_v52  ;;  %3676 = vmatprep.mubr.f32.mxu0 %v10452_v0  ;;  %v9554_v52 = vpack.c.bf16 %v3754_v37, %v3752_v36 }
0x2675   :  { %9570 = vmatprep.subr.bf16.mxu0 %v10454_v25 }
0x2676   :  { %9543 = vmatpush3.bf16.msra.mxu1 %v9542_v22  ;;  %v3448_v22 = vrot.slane %v11617_v40, %v10795_v39  ;;  %v3767_v40 = vld [vmem:[%s12957_s28] sm:$0x3] }
0x2677   :  { %7890 = vmatmul.mubr.msk.f32.vlgmr.msra.gmra.mrb[2].mxu0 %vm317_vm0, %v3386_v50  ;;  %9544 = vmatprep.subr.bf16.mxu1 %v10454_v25  ;;  %v3753_v50 = vld [vmem:[%s12956_s25 + $0x10] sm:$0xff]  ;;  %v3772_v30 = vrot.slane %v3767_v40, %v10676_v59 }
0x2678   :  { %8727 = vmatprep.mubr.msk.f32.mxu0 %vm10457_vm1, %v10452_v0  ;;  %v9556_v44 = vpack.c.bf16 %v3753_v50, %v3751_v38 }
0x267a   :  { %9546 = vmatpush3.bf16.msra.mxu1 %v9545_v29 }
0x267b   :  { %9547 = vmatprep.subr.bf16.mxu1 %v10454_v25 }
0x267e   :  { %9549 = vmatpush3.bf16.msra.mxu1 %v9548_v18 }
0x267f   :  { %9555 = vmatprep.subr.bf16.mxu1 %v9554_v52 }
0x2681   :  { %8709 = vmatmul.mubr.f32.vlgmr.msra.gmra.mrb[0].mxu1 %v11518_v33 }
0x2682   :  { %3846 = vmatprep.mubr.f32.mxu1 %v10452_v0  ;;  %9557 = vmatpush1.bf16.msra.mxu1 %v9556_v44 }
0x2746   :  { %v3518_v58 = vpop.f32.mrb[0].mxu0 }
0x2747   :  { %v3519_v26 = vadd.f32 %v3518_v58, %v3440_v42  ;;  %v3520_v60 = vpop.f32.mrb[1].mxu0  ;;  %v3758_v42 = vld [vmem:[%s12956_s25 + $0x38] sm:$0xff] }
0x2748   :  { %v11628_v7 = vadd.f32 %v3520_v60, %v3444_v32  ;;  %v3757_v32 = vld [vmem:[%s12956_s25 + $0x30] sm:$0xff]  ;;  %v3760_v60 = vld [vmem:[%s12956_s25 + $0x48] sm:$0xff] }
0x2749   :  { %3691 = vrot.lane.b32.xlu0 %v3519_v26, %s10453_s3 }
0x274a   :  { %v3678_v48 = vpop.f32.mrb[2].mxu0 }
0x274b   :  { %v3680_v49 = vpop.f32.mrb[3].mxu0  ;;  %v3679_v53 = vadd.f32 %v3678_v48, %v3602_v5 }
0x274c   :  { %v11630_v51 = vadd.f32 %v3680_v49, %v3606_v46  ;;  %v3762_v46 = vld [vmem:[%s12956_s25 + $0x58] sm:$0xff] }
0x274d   :  { %3721 = vrot.lane.b32.xlu0 %v11628_v7, %s10453_s3  ;;  %v3683_v16 = vadd.f32 %v3679_v53, %v3519_v26  ;;  %v3755_v26 = vld [vmem:[%s12956_s25 + $0x20] sm:$0xff]  ;;  %v9562_v5 = vpack.c.bf16 %v3762_v46, %v3760_v60 }
0x274e   :  { %v9560_v49 = vpack.c.bf16 %v3757_v32, %v3755_v26 }
0x274f   :  { %v7891_v34 = vmul.f32 -1.442695, %v3683_v16  ;;  %v3761_v16 = vld [vmem:[%s12956_s25 + $0x50] sm:$0xff] }
0x2751   :  { %10163 = vpow2.f32 %v7891_v34 }
0x2754   :  { %v3589_v24 = vpop.f32.mrb[0].mxu1 }
0x2755   :  { %v3590_v9 = vadd.f32 %v3589_v24, %v3448_v22 }
0x275b   :  { %v10164_v56 = vpop.eup %10163 }
0x275c   :  { %v3687_v41 = vadd.f32 1.0, %v10164_v56 }
0x275e   :  { %10165 = vrcp.f32 %v3687_v41  ;;  %v3713_v41 = vadd.f32 %v11630_v51, %v11628_v7  ;;  %v3765_v7 = vld [vmem:[%s12956_s25 + $0x70] sm:$0xff] }
0x2768   :  { %v11635_v43 = vpop.eup %10165 }
0x2769   :  { %v3701_v10 = vsub.f32 1.0, %v11635_v43 }
0x27bb   :  { %v3692_v63 = vpop.permute.xlu0 %3691 }
0x27bc   :  { %v3694_v1 = vmul.f32 %v11635_v43, %v3692_v63  ;;  %v7892_v63 = vmul.f32 -1.442695, %v3713_v41 }
0x27be   :  { %3696 = vrot.lane.b32.xlu1 %v3694_v1, %s10453_s3 }
0x27bf   :  { %v11639_v2 = vpop.permute.xlu0 %3721 }
0x27c0   :  { %v3724_v3 = vmul.f32 %v11635_v43, %v11639_v2 }
0x27c2   :  { %3726 = vrot.lane.b32.xlu1 %v3724_v3, %s10453_s3 }
0x27c6   :  { %3708 = vrot.lane.b32.xlu1 %v11518_v33, %s10455_s7 }
0x27ca   :  { %3737 = vrot.lane.b32.xlu1 %v11518_v33, %s10456_s27  ;;  %v3756_v33 = vld [vmem:[%s12956_s25 + $0x28] sm:$0xff] }
0x27cb   :  { %v9558_v58 = vpack.c.bf16 %v3758_v42, %v3756_v33 }
0x27cd   :  { %9559 = vmatprep.subr.bf16.mxu1 %v9558_v58 }
0x27ce   :  { %9561 = vmatpush1.bf16.msra.mxu1 %v9560_v49 }
0x27cf   :  { %9563 = vmatprep.subr.bf16.mxu1 %v9562_v5 }
0x2830   :  { %v3697_v27 = vpop.permute.xlu1 %3696 }
0x2831   :  { %v3699_v45 = vadd.f32 %v3697_v27, %v3679_v53  ;;  %v3759_v53 = vld [vmem:[%s12956_s25 + $0x40] sm:$0xff]  ;;  %s12959_s25 = sld [smem:[#allocation22_spill]] (!%p7907_p7) }
0x2832   :  { %v9564_v56 = vpack.c.bf16 %v3761_v16, %v3759_v53  ;;  %v3925_v16 = vld [vmem:[%s12883_s11] sm:$0xff] }
0x2833   :  { %10167 = vtanh.f32 %v3699_v45 }
0x2834   :  { %v3727_v47 = vpop.permute.xlu1 %3726  ;;  %9565 = vmatpush1.bf16.msra.mxu1 %v9564_v56  ;;  %v3927_v56 = vld [vmem:[%s12883_s11 + $0x10] sm:$0xff] }
0x2835   :  { %v3729_v35 = vadd.f32 %v3727_v47, %v11630_v51  ;;  %v9568_v51 = vpack.c.bf16 %v3765_v7, %v3763_v6  ;;  %9567 = vmatprep.subr.bf16.mxu1 %v9566_v54  ;;  %v3931_v7 = vld [vmem:[%s12883_s11 + $0x30] sm:$0xff] }
0x2837   :  { %10169 = vtanh.f32 %v3729_v35 }
0x2838   :  { %10171 = vpow2.f32 %v7892_v63  ;;  %9569 = vmatpush1.bf16.msra.mxu1 %v9568_v51  ;;  %v11711_v8 = vpop.permute.xlu1 %3708  ;;  %v3928_v63 = vld [vmem:[%s12883_s11 + $0x18] sm:$0xff] }
0x2839   :  { %9582 = vmatprep.subr.bf16.mxu1 %v10454_v25  ;;  %v3711_v13 = vmul.f32 %v11635_v43, %v11711_v8  ;;  %v8710_v43 = vpop.f32.mrb[1].mxu1  ;;  %v3932_v51 = vld [vmem:[%s12883_s11 + $0x38] sm:$0xff] }
0x283c   :  { %v11716_v14 = vpop.permute.xlu1 %3737 }
0x283d   :  { %v10168_v48 = vpop.eup %10167 }
0x283e   :  { %3703 = vrot.lane.b32.xlu0 %v10168_v48, %s10456_s27 }
0x2841   :  { %v10170_v34 = vpop.eup %10169 }
0x2842   :  { %3733 = vrot.lane.b32.xlu0 %v10170_v34, %s10456_s27  ;;  %v10172_v1 = vpop.eup %10171  ;;  %v3926_v34 = vld [vmem:[%s12883_s11 + $0x8] sm:$0xff] }
0x2843   :  { %v3717_v3 = vadd.f32 1.0, %v10172_v1  ;;  %v9571_v41 = vpack.c.bf16 %v3926_v34, %v3925_v16  ;;  %v9574_v1 = vpack.c.bf16 %v3928_v63, %v3927_v56  ;;  %v4274_v16 = vld [vmem:[%s12890_s18] sm:$0xff]  ;;  %v4275_v34 = vld [vmem:[%s12890_s18 + $0x8] sm:$0xff]  ;;  %v4277_v63 = vld [vmem:[%s12890_s18 + $0x18] sm:$0xff] }
0x2844   :  { %v9602_v56 = vpack.c.bf16 %v4275_v34, %v4274_v16 }
0x2845   :  { %10173 = vrcp.f32 %v3717_v3  ;;  %9572 = vmatpush3.bf16.msra.mxu0 %v9571_v41  ;;  %v3929_v3 = vld [vmem:[%s12883_s11 + $0x20] sm:$0xff]  ;;  %v4276_v41 = vld [vmem:[%s12890_s18 + $0x10] sm:$0xff] }
0x2846   :  { %9573 = vmatprep.subr.bf16.mxu0 %v10454_v25  ;;  %v9577_v54 = vpack.c.bf16 %v3930_v20, %v3929_v3 }
0x2849   :  { %9575 = vmatpush3.bf16.msra.mxu0 %v9574_v1  ;;  %v9605_v1 = vpack.c.bf16 %v4277_v63, %v4276_v41 }
0x284a   :  { %9576 = vmatprep.subr.bf16.mxu0 %v10454_v25 }
0x284d   :  { %9578 = vmatpush3.bf16.msra.mxu0 %v9577_v54 }
0x284e   :  { %9579 = vmatprep.subr.bf16.mxu0 %v10454_v25 }
0x284f   :  { %v10174_v11 = vpop.eup %10173 }
0x2850   :  { %v3731_v15 = vsub.f32 1.0, %v10174_v11  ;;  %v3740_v21 = vmul.f32 %v10174_v11, %v11716_v14 }
0x28b0   :  { %v3704_v12 = vpop.permute.xlu0 %3703 }
0x28b1   :  { %v3706_v28 = vmul.f32 %v3704_v12, %v3701_v10  ;;  %v9580_v10 = vpack.c.bf16 %v3932_v51, %v3931_v7  ;;  %v4189_v7 = vld [vmem:[%s12888_s16] sm:$0xff]  ;;  %v4190_v51 = vld [vmem:[%s12888_s16 + $0x8] sm:$0xff] }
0x28b3   :  { %v3712_v17 = vadd.f32 %v3711_v13, %v3706_v28  ;;  %9581 = vmatpush3.bf16.msra.mxu0 %v9580_v10 }
0x28b4   :  { %v3734_v31 = vpop.permute.xlu0 %3733  ;;  %9586 = vmatprep.subr.bf16.mxu0 %v10454_v25 }
0x28b5   :  { %v3736_v4 = vmul.f32 %v3734_v31, %v3731_v15  ;;  %3743 = vrot.lane.b32.xlu0 %v3712_v17, %s10456_s27 }
0x28b7   :  { %v3741_v61 = vadd.f32 %v3740_v21, %v3736_v4 }
0x28b9   :  { %3747 = vrot.lane.b32.xlu1 %v3741_v61, %s10455_s7  ;;  %3876 = vrot.lane.b32.xlu0 %v3590_v9, %s10453_s3 }
0x2927   :  { %v3744_v27 = vpop.permute.xlu0 %3743 }
0x292b   :  { %v3748_v29 = vpop.permute.xlu1 %3747  ;;  %v3877_v47 = vpop.permute.xlu0 %3876 }
0x292c   :  { %v11725_v45 = vsel %vm463_vm2, %v3744_v27, %v3748_v29 }
0x292d   :  { %7893 = vmatmul.mubr.msk.f32.vlgmr.msra.gmra.mrb[2].mxu1 %vm493_vm3, %v11725_v45 }
0x292e   :  { %8734 = vmatprep.mubr.msk.f32.mxu1 %vm10457_vm1, %v10452_v0 }
0x2a00   :  { %v3848_v23 = vpop.f32.mrb[2].mxu1 }
0x2a01   :  { %v3849_v18 = vadd.f32 %v3848_v23, %v3772_v30  ;;  %v3850_v35 = vpop.f32.mrb[3].mxu1 }
0x2a03   :  { %v3853_v36 = vadd.f32 %v3849_v18, %v11639_v2  ;;  %v3879_v37 = vadd.f32 %v3877_v47, %v3849_v18  ;;  %v3776_v2 = vrot.slane %v3767_v40, %v10686_v62 }
0x2a05   :  { %v7894_v38 = vmul.f32 -1.442695, %v3853_v36  ;;  %v7895_v52 = vmul.f32 -1.442695, %v3879_v37  ;;  %v3851_v46 = vadd.f32 %v3850_v35, %v3776_v2  ;;  %v4008_v35 = vld [vmem:[%s12886_s14 + $0x8] sm:$0xff] }
0x2a07   :  { %10175 = vpow2.f32 %v7894_v38  ;;  %v3886_v11 = vadd.f32 %v3877_v47, %v3851_v46 }
0x2a08   :  { %10177 = vpow2.f32 %v7895_v52 }
0x2a09   :  { %v7896_v12 = vmul.f32 -1.442695, %v3886_v11  ;;  %v9590_v11 = vpack.c.bf16 %v4190_v51, %v4189_v7 }
0x2a11   :  { %v10176_v50 = vpop.eup %10175 }
0x2a12   :  { %v10178_v33 = vpop.eup %10177  ;;  %v3857_v42 = vadd.f32 1.0, %v10176_v50 }
0x2a13   :  { %v3883_v44 = vadd.f32 1.0, %v10178_v33 }
0x2a14   :  { %10179 = vrcp.f32 %v3857_v42  ;;  %v4017_v42 = vld [vmem:[%s12885_s13] sm:$0x1] }
0x2a15   :  { %10181 = vrcp.f32 %v3883_v44 }
0x2a1e   :  { %v10180_v58 = vpop.eup %10179 }
0x2a1f   :  { %v10182_v26 = vpop.eup %10181  ;;  %v3860_v32 = vmul.f32 %v10180_v58, %v3590_v9  ;;  %v3867_v17 = vsub.f32 1.0, %v10180_v58  ;;  %v3873_v22 = vmul.f32 %v10180_v58, %v11716_v14  ;;  %v3933_v14 = vld [vmem:[%s12884_s12] sm:$0x1] }
0x2a20   :  { %v3893_v60 = vmul.f32 %v10182_v26, %v3590_v9 }
0x2a21   :  { %3862 = vrot.lane.b32.xlu1 %v3860_v32, %s10453_s3 }
0x2a22   :  { %3895 = vrot.lane.b32.xlu0 %v3893_v60, %s10453_s3 }
0x2a93   :  { %v3863_v48 = vpop.permute.xlu1 %3862 }
0x2a94   :  { %v3896_v49 = vpop.permute.xlu0 %3895  ;;  %v3865_v5 = vadd.f32 %v3863_v48, %v3849_v18  ;;  %v4007_v18 = vld [vmem:[%s12886_s14] sm:$0xff] }
0x2a95   :  { %v3898_v53 = vadd.f32 %v3896_v49, %v3851_v46  ;;  %v4108_v49 = vld [vmem:[%s12887_s15] sm:$0xff] }
0x2a96   :  { %10183 = vtanh.f32 %v3865_v5  ;;  %v4109_v5 = vld [vmem:[%s12887_s15 + $0x8] sm:$0xff] }
0x2a97   :  { %10185 = vtanh.f32 %v3898_v53  ;;  %v9587_v53 = vpack.c.bf16 %v4109_v5, %v4108_v49  ;;  %v4450_v5 = vand.u32 (!%p7907_p7), 127, %v145_v57 }
0x2a98   :  { %10187 = vpow2.f32 %v7896_v12 }
0x2aa0   :  { %v10184_v19 = vpop.eup %10183 }
0x2aa1   :  { %v10186_v6 = vpop.eup %10185  ;;  %3869 = vrot.lane.b32.xlu1 %v10184_v19, %s10456_s27 }
0x2aa2   :  { %3902 = vrot.lane.b32.xlu0 %v10186_v6, %s10456_s27  ;;  %v10188_v13 = vpop.eup %10187 }
0x2aa3   :  { %v3890_v28 = vadd.f32 1.0, %v10188_v13  ;;  %v4191_v13 = vld [vmem:[%s12888_s16 + $0x10] sm:$0xff] }
0x2aa5   :  { %10189 = vrcp.f32 %v3890_v28 }
0x2aaf   :  { %v10190_v15 = vpop.eup %10189 }
0x2ab0   :  { %v3900_v31 = vsub.f32 1.0, %v10190_v15  ;;  %v3906_v9 = vmul.f32 %v10190_v15, %v11711_v8  ;;  %v4193_v15 = vld [vmem:[%s12888_s16 + $0x20] sm:$0xff] }
0x2b13   :  { %v3870_v21 = vpop.permute.xlu1 %3869 }
0x2b14   :  { %v3903_v4 = vpop.permute.xlu0 %3902  ;;  %v3872_v61 = vmul.f32 %v3870_v21, %v3867_v17  ;;  %v4194_v17 = vld [vmem:[%s12888_s16 + $0x28] sm:$0xff] }
0x2b15   :  { %v3905_v24 = vmul.f32 %v3903_v4, %v3900_v31  ;;  %v4278_v31 = vld [vmem:[%s12890_s18 + $0x20] sm:$0xff]  ;;  %v9596_v21 = vpack.c.bf16 %v4194_v17, %v4193_v15  ;;  %v4279_v4 = vld [vmem:[%s12890_s18 + $0x28] sm:$0xff] }
0x2b16   :  { %v3874_v43 = vadd.f32 %v3873_v22, %v3872_v61  ;;  %v9608_v61 = vpack.c.bf16 %v4279_v4, %v4278_v31  ;;  %v4195_v22 = vld [vmem:[%s12888_s16 + $0x30] sm:$0xff] }
0x2b17   :  { %v3907_v27 = vadd.f32 %v3906_v9, %v3905_v24  ;;  %v4196_v24 = vld [vmem:[%s12888_s16 + $0x38] sm:$0xff]  ;;  %v4280_v9 = vld [vmem:[%s12890_s18 + $0x30] sm:$0xff] }
0x2b18   :  { %3909 = vrot.lane.b32.xlu1 %v3874_v43, %s10456_s27 }
0x2b19   :  { %3913 = vrot.lane.b32.xlu0 %v3907_v27, %s10455_s7 }
0x2b8a   :  { %v3910_v29 = vpop.permute.xlu1 %3909 }
0x2b8b   :  { %v3914_v40 = vpop.permute.xlu0 %3913 }
0x2b8c   :  { %v3916_v30 = vsel %vm463_vm2, %v3910_v29, %v3914_v40 }
0x2b8d   :  { %8728 = vmatmul.mubr.msk.f32.vlgmr.msra.gmra.mrb[4].mxu0 %vm493_vm3, %v3916_v30 }
0x2b8e   :  { %8741 = vmatprep.mubr.msk.f32.mxu0 %vm10457_vm1, %v10452_v0  ;;  %9588 = vmatpush3.bf16.msra.mxu0 %v9587_v53 }
0x2b8f   :  { %9589 = vmatprep.subr.bf16.mxu0 %v10454_v25 }
0x2c60   :  { %v4003_v8 = vpop.f32.mrb[4].mxu0 }
0x2c61   :  { %v4004_v23 = vadd.f32 %v4003_v8, %v3933_v14  ;;  %v8729_v47 = vpop.f32.mrb[5].mxu0 }
0x2c63   :  { %v4012_v36 = vrot.slane %v4004_v23, %v10676_v59 }
0x2c65   :  { %v4013_v37 = vadd.f32 %v4012_v36, %v4007_v18  ;;  %v4014_v38 = vadd.f32 %v4012_v36, %v4008_v35  ;;  %v4197_v18 = vld [vmem:[%s12958_s0] sm:$0x1] }
0x2c66   :  { %v4282_v35 = vld [vmem:[%s12891_s19] sm:$0x1] }
0x2c67   :  { %10191 = vtanh.f32 %v4013_v37 }
0x2c68   :  { %10193 = vtanh.f32 %v4014_v38 }
0x2c71   :  { %v10192_v52 = vpop.eup %10191 }
0x2c72   :  { %v10194_v50 = vpop.eup %10193 }
0x2c73   :  { %v9583_v33 = vpack.c.bf16 %v10194_v50, %v10192_v52 }
0x2c75   :  { %9585 = vmatpush3.bf16.xpose.msk.msra.mxu1 %vm10865_vm4, %v9583_v33 }
0x2c76   :  { %9601 = vmatprep.subr.bf16.mxu1 %v10454_v25 }
0x2c7c   :  { %8735 = vmatmul.mubr.msk.f32.vlgmr.msra.gmra.mrb[4].mxu1 %vm463_vm2, %v4017_v42 }
0x2c7d   :  { %8779 = vmatprep.mubr.msk.f32.mxu1 %vm10457_vm1, %v10452_v0  ;;  %9603 = vmatpush3.bf16.msra.mxu1 %v9602_v56 }
0x2c7e   :  { %9604 = vmatprep.subr.bf16.mxu1 %v10454_v25 }
0x2c81   :  { %9606 = vmatpush3.bf16.msra.mxu1 %v9605_v1 }
0x2c82   :  { %9607 = vmatprep.subr.bf16.mxu1 %v10454_v25 }
0x2c85   :  { %9609 = vmatpush3.bf16.msra.mxu1 %v9608_v61 }
0x2c86   :  { %9610 = vmatprep.subr.bf16.mxu1 %v10454_v25 }
0x2d4f   :  { %v4093_v44 = vpop.f32.mrb[4].mxu1 }
0x2d50   :  { %v8736_v58 = vpop.f32.mrb[5].mxu1  ;;  %v4097_v26 = vsel %vm813_vm5, %v4093_v44, -inf }
0x2d51   :  { %4098 = vmax.xlane.f32.xlu1 %v4097_v26  ;;  %v4370_v58 = vld [vmem:[%s12959_s25] sm:$0xff] (!%p7907_p7)  ;;  %v4371_v26 = vld [vmem:[%s12959_s25 + $0x8] sm:$0xff] (!%p7907_p7) }
0x2d62   :  { %3920 = vrot.lane.b32.xlu1 %v3907_v27, %s10456_s27  ;;  %v4281_v27 = vld [vmem:[%s12890_s18 + $0x38] sm:$0xff] }
0x2d63   :  { %v9611_v29 = vpack.c.bf16 %v4281_v27, %v4280_v9 }
0x2d65   :  { %9612 = vmatpush3.bf16.msra.mxu1 %v9611_v29 }
0x2dde   :  { %v4099_v32 = vpop.xlane.xlu1 %4098 }
0x2ddf   :  { %v4100_v60 = vsub.f32 %v4093_v44, %v4099_v32  ;;  %v10467_v32 = vmov (!%p7907_p7), 0.0|0.0  }
0x2de1   :  { %v4101_v2 = vmul.f32 1.442695, %v4100_v60  ;;  %v9614_v60 = vpack.c.bf16 (!%p7907_p7), %v4371_v26, %v4370_v58 }
0x2de2   :  { %v3921_v19 = vpop.permute.xlu1 %3920 }
0x2de3   :  { %10195 = vpow2.f32 %v4101_v2  ;;  %v10469_v2 = vmov (!%p7907_p7), 0.0  }
0x2ded   :  { %v10196_v46 = vpop.eup %10195 }
0x2dee   :  { %v4103_v48 = vsel %vm813_vm5, %v10196_v46, 0.0 }
0x2def   :  { %4104 = vadd.xlane.f32.xlu0 %v4103_v48 }
0x2e05   :  { %3917 = vrot.lane.b32.xlu0 %v3874_v43, %s10455_s7  ;;  %v9599_v43 = vpack.c.bf16 %v4196_v24, %v4195_v22 }
0x2e7c   :  { %v4105_v3 = vpop.xlane.xlu0 %4104 }
0x2e7d   :  { %10197 = vrcp.f32 %v4105_v3 }
0x2e80   :  { %v3918_v20 = vpop.permute.xlu0 %3917 }
0x2e81   :  { %v3923_v54 = vsel %vm493_vm3, %v11725_v45, %v3918_v20  ;;  %v4192_v45 = vld [vmem:[%s12888_s16 + $0x18] sm:$0xff] }
0x2e82   :  { %v11824_v6 = vsel %vm639_vm6, %v3923_v54, %v3921_v19  ;;  %v9593_v28 = vpack.c.bf16 %v4192_v45, %v4191_v13 }
0x2e87   :  { %v10198_v10 = vpop.eup %10197 }
0x2e88   :  { %v4107_v12 = vmul.f32 %v10198_v10, %v10196_v46 }
0x2e8a   :  { %8742 = vmatmul.mubr.msk.f32.vlgmr.msra.gmra.mrb[6].mxu0 %vm317_vm0, %v4107_v12  ;;  %4358 = vst.msk [vmem:[#allocation12 + $0x3] sm:$0x1] %vm813_vm5, %v4107_v12 }
0x2e8b   :  { %9591 = vmatpush3.bf16.msra.mxu0 %v9590_v11  ;;  %8760 = vmatprep.mubr.msk.f32.mxu0 %vm10457_vm1, %v10452_v0 }
0x2e8c   :  { %9592 = vmatprep.subr.bf16.mxu0 %v10454_v25 }
0x2e8f   :  { %9594 = vmatpush3.bf16.msra.mxu0 %v9593_v28 }
0x2e90   :  { %9595 = vmatprep.subr.bf16.mxu0 %v10454_v25 }
0x2e93   :  { %9597 = vmatpush3.bf16.msra.mxu0 %v9596_v21 }
0x2e94   :  { %9598 = vmatprep.subr.bf16.mxu0 %v10454_v25 }
0x2e97   :  { %9600 = vmatpush3.bf16.msra.mxu0 %v9599_v43 }
0x2e98   :  { %9613 = vmatprep.subr.bf16.mxu0 (!%p7907_p7), %v10467_v32 }
0x2f5d   :  { %v4179_v40 = vpop.f32.mrb[6].mxu0 }
0x2f5e   :  { %vm4183_vm14 = vcmp.gt.f32.partialorder %v4179_v40, 0.0  ;;  %v4184_v30 = vmul.f32 0.01, %v4179_v40  ;;  %v8743_v14 = vpop.f32.mrb[7].mxu0 }
0x2f60   :  { %v4185_v8 = vsel %vm4183_vm14, %v4179_v40, %v4184_v30 }
0x2f61   :  { %v4187_v23 = vmul.f32 0.01, %v4185_v8  ;;  %vm4186_vm15 = vcmp.gt.f32.partialorder %v4185_v8, 0.0 }
0x2f63   :  { %v4188_v47 = vsel %vm4186_vm15, %v4185_v8, %v4187_v23 }
0x2f64   :  { %8761 = vmatmul.mubr.msk.f32.vlgmr.msra.gmra.mrb[8].mxu0 %vm493_vm3, %v4188_v47  ;;  %8780 = vmatmul.mubr.msk.f32.vlgmr.msra.gmra.mrb[6].mxu1 %vm493_vm3, %v4188_v47 }
0x2f65   :  { %8786 = vmatprep.mubr.msk.f32.mxu0 (!%p7907_p7), %vm10468_vm8, %v10469_v2  ;;  %9615 = vmatpush3.bf16.msra.mxu0 (!%p7907_p7), %v9614_v60 }
0x3037   :  { %v4267_v36 = vpop.f32.mrb[8].mxu0  ;;  %v4349_v37 = vpop.f32.mrb[6].mxu1  ;;  %4369 = sbr.rel (%p7907_p7) target bundleno = 13061 (0x3305), region = 109 }
0x3038   :  { %v4268_v38 = vadd.f32 %v4267_v36, %v4197_v18  ;;  %v4350_v52 = vadd.f32 %v4349_v37, %v4282_v35  ;;  %v8762_v50 = vpop.f32.mrb[9].mxu0  ;;  %v8781_v33 = vpop.f32.mrb[7].mxu1 }
0x303a   :  { %vm4271_vm7 = vcmp.gt.f32.partialorder %v4268_v38, 0.0  ;;  %v4272_v42 = vmul.f32 0.01, %v4268_v38  ;;  %4354 = vst.msk [vmem:[#allocation9 + $0x3] sm:$0x1] %vm813_vm5, %v4350_v52  ;;  %8787 = vmatmul.mubr.msk.f32.vlgmr.msra.gmra.mrb[0].mxu0 (!%p7907_p7), %vm317_vm0, %v4350_v52 }
0x303c   :  { %v4273_v44 = vsel %vm4271_vm7, %v4268_v38, %v4272_v42 }
0x303d   :  { %4356 = vst.msk [vmem:[#allocation10 + $0x3] sm:$0x1] %vm1071_vm10, %v4273_v44 }
0x310d   :  { %v4441_v46 = vpop.f32.mrb[0].mxu0 }
0x310e   :  { %v8788_v48 = vpop.f32.mrb[1].mxu0  ;;  %v4446_v49 = vsel %vm4445_vm9, %v4441_v46, -inf }
0x310f   :  { %4447 = vmax.xlane.f32.xlu0 %v4446_v49 }
0x319c   :  { %v4448_v53 = vpop.xlane.xlu0 %4447 }
0x319d   :  { %vm4451_vm11 = vcmp.ge.f32.partialorder %v4441_v46, %v4448_v53 }
0x319e   :  { %v4452_v16 = vsel %vm4451_vm11, %v4450_v5, 12 }
0x319f   :  { %v4453_v34 = vsel %vm4445_vm9, %v4452_v16, 2147483647 }
0x31a0   :  { %v4455_v56 = vshra.s32 %v4453_v34, 16  ;;  %v4454_v63 = vand.u32 65535, %v4453_v34 }
0x31a2   :  { %v4457_v41 = vcvt.s32.f32 %v4455_v56  ;;  %v4456_v3 = vcvt.s32.f32 %v4454_v63 }
0x31a4   :  { %4458 = vmin.xlane.f32.xlu0 %v4457_v41 }
0x3231   :  { %v4459_v1 = vpop.xlane.xlu0 %4458 }
0x3232   :  { %vm4460_vm12 = vcmp.eq.f32.partialorder %v4457_v41, %v4459_v1  ;;  %v4465_v19 = vcvt.f32.s32 %v4459_v1 }
0x3233   :  { %v4461_v20 = vsel %vm4460_vm12, %v4456_v3, inf }
0x3234   :  { %4462 = vmin.xlane.f32.xlu1 %v4461_v20  ;;  %v4466_v7 = vshll.u32 %v4465_v19, 16 }
0x32c1   :  { %v4463_v54 = vpop.xlane.xlu1 %4462 }
0x32c2   :  { %v4464_v51 = vcvt.f32.s32 %v4463_v54 }
0x32c4   :  { %v4467_v10 = vadd.s32 %v4466_v7, %v4464_v51 }
0x32c6   :  { %v4468_v11 = vrot.slane %v4467_v10, 4 }
0x32c8   :  { %vm4469_vm13 = vcmp.lt.s32.totalorder %v4467_v10, %v4468_v11 }
0x32c9   :  { %v4470_v12 = vsel %vm4469_vm13, %v4467_v10, %v4468_v11 }
0x32ca   :  { %v4471_v13 = vrot.slane %v4470_v12, 2 }
0x32cc   :  { %vm4472_vm14 = vcmp.lt.s32.totalorder %v4470_v12, %v4471_v13 }
0x32cd   :  { %v4473_v45 = vsel %vm4472_vm14, %v4470_v12, %v4471_v13 }
0x32ce   :  { %v4474_v28 = vrot.slane %v4473_v45, 1 }
0x32d0   :  { %vm4475_vm15 = vcmp.lt.s32.totalorder %v4473_v45, %v4474_v28 }
0x32d1   :  { %v4476_v15 = vsel %vm4475_vm15, %v4473_v45, %v4474_v28 }
0x32d2   :  { %9988 = vpush %v4476_v15 }
0x3303   :  { %s9989_s8 = spop %9988 }
0x3304   :  { %4478 = sst [smem:[#allocation2]] %s9989_s8 }
0x3305 PF:  { %v4483_v17 = vld [vmem:[#allocation6 + $0x8] sm:$0xff]  ;;  %v4486_v31 = vld [vmem:[#allocation6 + $0x20] sm:$0xff]  ;;  %4611 = vmatprep.mubr.f32.mxu0 %v10452_v0  ;;  %9648 = vmatprep.subr.bf16.mxu1 %v10454_v25  ;;  %v4485_v61 = vld [vmem:[#allocation6 + $0x18] sm:$0xff]  ;;  %s11891_s29 = sld [smem:[#allocation5 + $0x4]]  ;;  %s7925_s4 = sld [smem:[#allocation4 + $0x5]] }
0x3306   :  { %v4482_v21 = vld [vmem:[#allocation6] sm:$0xff]  ;;  %v9616_v4 = vpack.c.bf16 %v4486_v31, %v4483_v17  ;;  %v4489_v22 = vld [vmem:[#allocation6 + $0x38] sm:$0xff]  ;;  %v4492_v24 = vld [vmem:[#allocation6 + $0x50] sm:$0xff]  ;;  %8821 = vmatprep.mubr.msk.f32.mxu1 %vm10457_vm1, %v10452_v0  ;;  %s11896_s17 = sld [smem:[#allocation2]]  ;;  %s12960_s6 = sld [smem:[#allocation24_spill]] }
0x3307   :  { %v9618_v9 = vpack.c.bf16 %v4485_v61, %v4482_v21  ;;  %v9620_v43 = vpack.c.bf16 %v4492_v24, %v4489_v22  ;;  %v4488_v27 = vld [vmem:[#allocation6 + $0x30] sm:$0xff]  ;;  %v4491_v29 = vld [vmem:[#allocation6 + $0x48] sm:$0xff]  ;;  %v4498_v30 = vld [vmem:[#allocation6 + $0x80] sm:$0xff]  ;;  %s12961_s8 = sld [smem:[#allocation21_spill]]  ;;  %s12962_s0 = sld [smem:[#allocation25_spill]] }
0x3308   :  { %v4495_v40 = vld [vmem:[#allocation6 + $0x68] sm:$0xff]  ;;  %9617 = vmatprep.subr.bf16.mxu0 %v9616_v4  ;;  %v9622_v14 = vpack.c.bf16 %v4491_v29, %v4488_v27  ;;  %v4494_v23 = vld [vmem:[#allocation6 + $0x60] sm:$0xff]  ;;  %v4497_v47 = vld [vmem:[#allocation6 + $0x78] sm:$0xff]  ;;  %s12963_s9 = sld [smem:[#allocation26_spill]]  ;;  %s12965_s30 = sld [smem:[#allocation28_spill]] }
0x3309   :  { %9619 = vmatpush1.bf16.msra.mxu0 %v9618_v9  ;;  %v9624_v8 = vpack.c.bf16 %v4498_v30, %v4495_v40  ;;  %v4501_v18 = vld [vmem:[#allocation6 + $0x98] sm:$0xff]  ;;  %v4504_v35 = vld [vmem:[#allocation6 + $0xb0] sm:$0xff]  ;;  %v9626_v36 = vpack.c.bf16 %v4497_v47, %v4494_v23  ;;  %v4503_v52 = vld [vmem:[#allocation6 + $0xa8] sm:$0xff] }
0x330a   :  { %9621 = vmatprep.subr.bf16.mxu0 %v9620_v43  ;;  %v9628_v37 = vpack.c.bf16 %v4504_v35, %v4501_v18  ;;  %v4500_v38 = vld [vmem:[#allocation6 + $0x90] sm:$0xff]  ;;  %v4507_v50 = vld [vmem:[#allocation6 + $0xc8] sm:$0xff]  ;;  %v4510_v33 = vld [vmem:[#allocation6 + $0xe0] sm:$0xff] }
0x330b   :  { %p10014_p8 = scmp.eq.s32.totalorder %s11891_s29, 1  ;;  %v9630_v42 = vpack.c.bf16 %v4503_v52, %v4500_v38  ;;  %v9632_v44 = vpack.c.bf16 %v4510_v33, %v4507_v50  ;;  %v4506_v58 = vld [vmem:[#allocation6 + $0xc0] sm:$0xff]  ;;  %v4509_v26 = vld [vmem:[#allocation6 + $0xd8] sm:$0xff]  ;;  %v4516_v60 = vld [vmem:[#allocation6 + $0x110] sm:$0xff]  ;;  %p7926_p9 = scmp.ne.s32.totalorder %s11891_s29, 0 }
0x330c   :  { %v4513_v32 = vld [vmem:[#allocation6 + $0xf8] sm:$0xff]  ;;  %v9634_v2 = vpack.c.bf16 %v4509_v26, %v4506_v58  ;;  %v4512_v48 = vld [vmem:[#allocation6 + $0xf0] sm:$0xff]  ;;  %v4515_v49 = vld [vmem:[#allocation6 + $0x108] sm:$0xff]  ;;  %vm10471_vm11 = vmmov (!%p7926_p9), 0   ;;  %vm5540_vm12 = vcmask (!%p7926_p9), 90112  }
0x330d   :  { %9623 = vmatpush1.bf16.msra.mxu0 %v9622_v14  ;;  %10005 = sst [smem:[#allocation2]] (%p10014_p8), %s7925_s4  ;;  %v9636_v46 = vpack.c.bf16 %v4516_v60, %v4513_v32  ;;  %v4519_v5 = vld [vmem:[#allocation6 + $0x128] sm:$0xff]  ;;  %v4522_v53 = vld [vmem:[#allocation6 + $0x140] sm:$0xff]  ;;  %v9638_v16 = vpack.c.bf16 %v4515_v49, %v4512_v48  ;;  %v4521_v41 = vld [vmem:[#allocation6 + $0x138] sm:$0xff]  ;;  %s4480_s4 = scalar_lea.vmem %s12961_s8, %s11896_s17 }
0x330e   :  { %9625 = vmatprep.subr.bf16.mxu0 %v9624_v8  ;;  %v9640_v34 = vpack.c.bf16 %v4522_v53, %v4519_v5  ;;  %v4518_v56 = vld [vmem:[#allocation6 + $0x120] sm:$0xff]  ;;  %v4525_v63 = vld [vmem:[#allocation6 + $0x158] sm:$0xff]  ;;  %v4528_v1 = vld [vmem:[#allocation6 + $0x170] sm:$0xff] }
0x330f   :  { %v9642_v3 = vpack.c.bf16 %v4521_v41, %v4518_v56  ;;  %v9644_v20 = vpack.c.bf16 %v4528_v1, %v4525_v63  ;;  %v4524_v19 = vld [vmem:[#allocation6 + $0x150] sm:$0xff]  ;;  %v4527_v54 = vld [vmem:[#allocation6 + $0x168] sm:$0xff]  ;;  %v4691_v51 = vld [vmem:[%s12960_s6 + $0x18] sm:$0xff] }
0x3310   :  { %v4689_v7 = vld [vmem:[%s12960_s6 + $0x8] sm:$0xff]  ;;  %v9646_v10 = vpack.c.bf16 %v4527_v54, %v4524_v19  ;;  %v4688_v12 = vld [vmem:[%s12960_s6] sm:$0xff]  ;;  %v4690_v13 = vld [vmem:[%s12960_s6 + $0x10] sm:$0xff] }
0x3311   :  { %9627 = vmatpush1.bf16.msra.mxu0 %v9626_v36  ;;  %v9672_v11 = vpack.c.bf16 %v4691_v51, %v4689_v7  ;;  %v9674_v45 = vpack.c.bf16 %v4690_v13, %v4688_v12  ;;  %v4481_v28 = vld [vmem:[%s4480_s4] sm:$0x1]  ;;  %v4484_v52 = vld [vmem:[#allocation6 + $0x10] sm:$0xff]  ;;  %v4487_v50 = vld [vmem:[#allocation6 + $0x28] sm:$0xff]  ;;  %s12964_s4 = sld [smem:[#allocation27_spill]] }
0x3312   :  { %9629 = vmatprep.subr.bf16.mxu0 %v9628_v37  ;;  %v11923_v15 = vld [vmem:[%s12882_s10] sm:$0x7]  ;;  %v4496_v26 = vld [vmem:[#allocation6 + $0x70] sm:$0xff]  ;;  %v4499_v32 = vld [vmem:[#allocation6 + $0x88] sm:$0xff] }
0x3313   :  { %v4535_v17 = vrot.slane %v11923_v15, %v10676_v59  ;;  %v4692_v31 = vld [vmem:[%s12962_s0] sm:$0x3]  ;;  %v4539_v61 = vrot.slane %v11923_v15, %v10686_v62  ;;  %v9655_v60 = vpack.c.bf16 %v4499_v32, %v4496_v26  ;;  %v4508_v49 = vld [vmem:[#allocation6 + $0xd0] sm:$0xff]  ;;  %v4511_v5 = vld [vmem:[#allocation6 + $0xe8] sm:$0xff] }
0x3314   :  { %v4701_v24 = vrot.slane %v4692_v31, %v10686_v62  ;;  %v4697_v40 = vrot.slane %v4692_v31, %v10676_v59  ;;  %v4490_v33 = vld [vmem:[#allocation6 + $0x40] sm:$0xff]  ;;  %v9661_v53 = vpack.c.bf16 %v4511_v5, %v4508_v49  ;;  %v4520_v41 = vld [vmem:[#allocation6 + $0x130] sm:$0xff]  ;;  %v4523_v63 = vld [vmem:[#allocation6 + $0x148] sm:$0xff] }
0x3315   :  { %9631 = vmatpush1.bf16.msra.mxu0 %v9630_v42  ;;  %v9649_v42 = vpack.c.bf16 %v4487_v50, %v4484_v52  ;;  %v4526_v19 = vld [vmem:[#allocation6 + $0x160] sm:$0xff]  ;;  %v4529_v54 = vld [vmem:[#allocation6 + $0x178] sm:$0xff]  ;;  %v4859_v52 = vld [vmem:[%s12963_s9 + $0x68] sm:$0xff] }
0x3316   :  { %9633 = vmatprep.subr.bf16.mxu0 %v9632_v44  ;;  %v4493_v44 = vld [vmem:[#allocation6 + $0x58] sm:$0xff]  ;;  %v9670_v51 = vpack.c.bf16 %v4529_v54, %v4526_v19  ;;  %v4846_v13 = vld [vmem:[%s12963_s9] sm:$0xff] }
0x3317   :  { %9650 = vmatpush3.bf16.msra.mxu1 %v9649_v42  ;;  %v9652_v58 = vpack.c.bf16 %v4493_v44, %v4490_v33  ;;  %v4849_v12 = vld [vmem:[%s12963_s9 + $0x18] sm:$0xff]  ;;  %v4858_v42 = vld [vmem:[%s12963_s9 + $0x60] sm:$0xff] }
0x3318   :  { %9651 = vmatprep.subr.bf16.mxu1 %v10454_v25  ;;  %v4861_v50 = vld [vmem:[%s12963_s9 + $0x78] sm:$0xff] }
0x3319   :  { %9635 = vmatpush1.bf16.msra.mxu0 %v9634_v2  ;;  %v4502_v2 = vld [vmem:[#allocation6 + $0xa0] sm:$0xff]  ;;  %v9688_v33 = vpack.c.bf16 %v4861_v50, %v4859_v52  ;;  %v5025_v52 = vld [vmem:[%s12883_s11 + $0x28] sm:$0xff] }
0x331a   :  { %9637 = vmatprep.subr.bf16.mxu0 %v9636_v46  ;;  %v4505_v46 = vld [vmem:[#allocation6 + $0xb8] sm:$0xff] }
0x331b   :  { %9653 = vmatpush3.bf16.msra.mxu1 %v9652_v58  ;;  %v9658_v48 = vpack.c.bf16 %v4505_v46, %v4502_v2 }
0x331c   :  { %9654 = vmatprep.subr.bf16.mxu1 %v10454_v25 }
0x331d   :  { %9639 = vmatpush1.bf16.msra.mxu0 %v9638_v16  ;;  %v4514_v16 = vld [vmem:[#allocation6 + $0x100] sm:$0xff] }
0x331e   :  { %9641 = vmatprep.subr.bf16.mxu0 %v9640_v34  ;;  %v4517_v34 = vld [vmem:[#allocation6 + $0x118] sm:$0xff] }
0x331f   :  { %9656 = vmatpush3.bf16.msra.mxu1 %v9655_v60  ;;  %v9664_v56 = vpack.c.bf16 %v4517_v34, %v4514_v16 }
0x3320   :  { %9657 = vmatprep.subr.bf16.mxu1 %v10454_v25 }
0x3321   :  { %9643 = vmatpush1.bf16.msra.mxu0 %v9642_v3  ;;  %v9667_v3 = vpack.c.bf16 %v4523_v63, %v4520_v41 }
0x3322   :  { %9645 = vmatprep.subr.bf16.mxu0 %v9644_v20 }
0x3323   :  { %9659 = vmatpush3.bf16.msra.mxu1 %v9658_v48 }
0x3324   :  { %9660 = vmatprep.subr.bf16.mxu1 %v10454_v25 }
0x3325   :  { %9647 = vmatpush1.bf16.msra.mxu0 %v9646_v10 }
0x3326   :  { %9673 = vmatprep.subr.bf16.mxu0 %v9672_v11  ;;  %v4847_v11 = vld [vmem:[%s12963_s9 + $0x8] sm:$0xff] }
0x3327   :  { %9662 = vmatpush3.bf16.msra.mxu1 %v9661_v53 }
0x3328   :  { %4612 = vmatmul.mubr.f32.vlgmr.msra.gmra.mrb[0].mxu0 %v11824_v6  ;;  %9663 = vmatprep.subr.bf16.mxu1 %v10454_v25 }
0x3329   :  { %9675 = vmatpush1.bf16.msra.mxu0 %v9674_v45  ;;  %4771 = vmatprep.mubr.f32.mxu0 %v10452_v0  ;;  %v9676_v45 = vpack.c.bf16 %v4849_v12, %v4847_v11 }
0x332a   :  { %9692 = vmatprep.subr.bf16.mxu0 %v10454_v25 }
0x332b   :  { %9665 = vmatpush3.bf16.msra.mxu1 %v9664_v56  ;;  %v4543_v56 = vrot.slane %v11923_v15, %v10795_v39  ;;  %v4862_v15 = vld [vmem:[%s12964_s4] sm:$0x3] }
0x332c   :  { %7909 = vmatmul.mubr.msk.f32.vlgmr.msra.gmra.mrb[2].mxu0 %vm317_vm0, %v4481_v28  ;;  %9666 = vmatprep.subr.bf16.mxu1 %v10454_v25  ;;  %v4848_v28 = vld [vmem:[%s12963_s9 + $0x10] sm:$0xff]  ;;  %v4867_v19 = vrot.slane %v4862_v15, %v10676_v59 }
0x332d   :  { %8840 = vmatprep.mubr.msk.f32.mxu0 %vm10457_vm1, %v10452_v0  ;;  %v9678_v31 = vpack.c.bf16 %v4848_v28, %v4846_v13 }
0x332f   :  { %9668 = vmatpush3.bf16.msra.mxu1 %v9667_v3 }
0x3330   :  { %9669 = vmatprep.subr.bf16.mxu1 %v10454_v25 }
0x3333   :  { %9671 = vmatpush3.bf16.msra.mxu1 %v9670_v51 }
0x3334   :  { %9677 = vmatprep.subr.bf16.mxu1 %v9676_v45 }
0x3336   :  { %8822 = vmatmul.mubr.f32.vlgmr.msra.gmra.mrb[0].mxu1 %v11824_v6 }
0x3337   :  { %4941 = vmatprep.mubr.f32.mxu1 %v10452_v0  ;;  %9679 = vmatpush1.bf16.msra.mxu1 %v9678_v31 }
0x33fb   :  { %v4613_v21 = vpop.f32.mrb[0].mxu0 }
0x33fc   :  { %v4614_v4 = vadd.f32 %v4613_v21, %v4535_v17  ;;  %v4615_v22 = vpop.f32.mrb[1].mxu0  ;;  %v4853_v17 = vld [vmem:[%s12963_s9 + $0x38] sm:$0xff] }
0x33fd   :  { %v11934_v43 = vadd.f32 %v4615_v22, %v4539_v61  ;;  %v4852_v61 = vld [vmem:[%s12963_s9 + $0x30] sm:$0xff]  ;;  %v4855_v22 = vld [vmem:[%s12963_s9 + $0x48] sm:$0xff] }
0x33fe   :  { %4786 = vrot.lane.b32.xlu0 %v4614_v4, %s10453_s3 }
0x33ff   :  { %v4773_v9 = vpop.f32.mrb[2].mxu0 }
0x3400   :  { %v4775_v27 = vpop.f32.mrb[3].mxu0  ;;  %v4774_v30 = vadd.f32 %v4773_v9, %v4697_v40 }
0x3401   :  { %v11936_v29 = vadd.f32 %v4775_v27, %v4701_v24  ;;  %v4857_v24 = vld [vmem:[%s12963_s9 + $0x58] sm:$0xff] }
0x3402   :  { %4816 = vrot.lane.b32.xlu0 %v11934_v43, %s10453_s3  ;;  %v4778_v14 = vadd.f32 %v4774_v30, %v4614_v4  ;;  %v4850_v4 = vld [vmem:[%s12963_s9 + $0x20] sm:$0xff]  ;;  %v9684_v40 = vpack.c.bf16 %v4857_v24, %v4855_v22 }
0x3403   :  { %v9682_v27 = vpack.c.bf16 %v4852_v61, %v4850_v4 }
0x3404   :  { %v7910_v8 = vmul.f32 -1.442695, %v4778_v14  ;;  %v4856_v14 = vld [vmem:[%s12963_s9 + $0x50] sm:$0xff] }
0x3406   :  { %10199 = vpow2.f32 %v7910_v8 }
0x3409   :  { %v4684_v41 = vpop.f32.mrb[0].mxu1 }
0x340a   :  { %v4685_v63 = vadd.f32 %v4684_v41, %v4543_v56 }
0x3410   :  { %v10200_v23 = vpop.eup %10199 }
0x3411   :  { %v4782_v47 = vadd.f32 1.0, %v10200_v23 }
0x3413   :  { %10201 = vrcp.f32 %v4782_v47  ;;  %v4808_v47 = vadd.f32 %v11936_v29, %v11934_v43  ;;  %v4860_v43 = vld [vmem:[%s12963_s9 + $0x70] sm:$0xff] }
0x341d   :  { %v11941_v18 = vpop.eup %10201 }
0x341e   :  { %v4796_v58 = vsub.f32 1.0, %v11941_v18 }
0x3470   :  { %v4787_v35 = vpop.permute.xlu0 %4786 }
0x3471   :  { %v4789_v36 = vmul.f32 %v11941_v18, %v4787_v35  ;;  %v7911_v35 = vmul.f32 -1.442695, %v4808_v47 }
0x3473   :  { %4791 = vrot.lane.b32.xlu1 %v4789_v36, %s10453_s3 }
0x3474   :  { %v11945_v37 = vpop.permute.xlu0 %4816 }
0x3475   :  { %v4819_v38 = vmul.f32 %v11941_v18, %v11945_v37 }
0x3477   :  { %4821 = vrot.lane.b32.xlu1 %v4819_v38, %s10453_s3 }
0x347b   :  { %4803 = vrot.lane.b32.xlu1 %v11824_v6, %s10455_s7 }
0x347f   :  { %4832 = vrot.lane.b32.xlu1 %v11824_v6, %s10456_s27  ;;  %v4851_v6 = vld [vmem:[%s12963_s9 + $0x28] sm:$0xff] }
0x3480   :  { %v9680_v21 = vpack.c.bf16 %v4853_v17, %v4851_v6 }
0x3482   :  { %9681 = vmatprep.subr.bf16.mxu1 %v9680_v21 }
0x3483   :  { %9683 = vmatpush1.bf16.msra.mxu1 %v9682_v27 }
0x3484   :  { %9685 = vmatprep.subr.bf16.mxu1 %v9684_v40 }
0x34e5   :  { %v4792_v1 = vpop.permute.xlu1 %4791 }
0x34e6   :  { %v4794_v20 = vadd.f32 %v4792_v1, %v4774_v30  ;;  %v4854_v30 = vld [vmem:[%s12963_s9 + $0x40] sm:$0xff]  ;;  %s12966_s9 = sld [smem:[#allocation22_spill]] (!%p7926_p9) }
0x34e7   :  { %v9686_v23 = vpack.c.bf16 %v4856_v14, %v4854_v30  ;;  %v5020_v14 = vld [vmem:[%s12883_s11] sm:$0xff] }
0x34e8   :  { %10203 = vtanh.f32 %v4794_v20 }
0x34e9   :  { %v4822_v7 = vpop.permute.xlu1 %4821  ;;  %9687 = vmatpush1.bf16.msra.mxu1 %v9686_v23  ;;  %v5022_v23 = vld [vmem:[%s12883_s11 + $0x10] sm:$0xff] }
0x34ea   :  { %v4824_v10 = vadd.f32 %v4822_v7, %v11936_v29  ;;  %v9690_v29 = vpack.c.bf16 %v4860_v43, %v4858_v42  ;;  %9689 = vmatprep.subr.bf16.mxu1 %v9688_v33  ;;  %v5026_v43 = vld [vmem:[%s12883_s11 + $0x30] sm:$0xff] }
0x34ec   :  { %10205 = vtanh.f32 %v4824_v10 }
0x34ed   :  { %10207 = vpow2.f32 %v7911_v35  ;;  %9691 = vmatpush1.bf16.msra.mxu1 %v9690_v29  ;;  %v12017_v44 = vpop.permute.xlu1 %4803  ;;  %v5023_v35 = vld [vmem:[%s12883_s11 + $0x18] sm:$0xff] }
0x34ee   :  { %9704 = vmatprep.subr.bf16.mxu1 %v10454_v25  ;;  %v4806_v60 = vmul.f32 %v11941_v18, %v12017_v44  ;;  %v8823_v18 = vpop.f32.mrb[1].mxu1  ;;  %v5027_v29 = vld [vmem:[%s12883_s11 + $0x38] sm:$0xff] }
0x34f1   :  { %v12022_v46 = vpop.permute.xlu1 %4832 }
0x34f2   :  { %v10204_v9 = vpop.eup %10203 }
0x34f3   :  { %4798 = vrot.lane.b32.xlu0 %v10204_v9, %s10456_s27 }
0x34f6   :  { %v10206_v8 = vpop.eup %10205 }
0x34f7   :  { %4828 = vrot.lane.b32.xlu0 %v10206_v8, %s10456_s27  ;;  %v10208_v36 = vpop.eup %10207  ;;  %v5021_v8 = vld [vmem:[%s12883_s11 + $0x8] sm:$0xff] }
0x34f8   :  { %v4812_v38 = vadd.f32 1.0, %v10208_v36  ;;  %v9693_v47 = vpack.c.bf16 %v5021_v8, %v5020_v14  ;;  %v9696_v36 = vpack.c.bf16 %v5023_v35, %v5022_v23  ;;  %v5369_v14 = vld [vmem:[%s12890_s18] sm:$0xff]  ;;  %v5370_v8 = vld [vmem:[%s12890_s18 + $0x8] sm:$0xff]  ;;  %v5372_v35 = vld [vmem:[%s12890_s18 + $0x18] sm:$0xff] }
0x34f9   :  { %v9724_v23 = vpack.c.bf16 %v5370_v8, %v5369_v14 }
0x34fa   :  { %10209 = vrcp.f32 %v4812_v38  ;;  %9694 = vmatpush3.bf16.msra.mxu0 %v9693_v47  ;;  %v5024_v38 = vld [vmem:[%s12883_s11 + $0x20] sm:$0xff]  ;;  %v5371_v47 = vld [vmem:[%s12890_s18 + $0x10] sm:$0xff] }
0x34fb   :  { %9695 = vmatprep.subr.bf16.mxu0 %v10454_v25  ;;  %v9699_v33 = vpack.c.bf16 %v5025_v52, %v5024_v38 }
0x34fe   :  { %9697 = vmatpush3.bf16.msra.mxu0 %v9696_v36  ;;  %v9727_v36 = vpack.c.bf16 %v5372_v35, %v5371_v47 }
0x34ff   :  { %9698 = vmatprep.subr.bf16.mxu0 %v10454_v25 }
0x3502   :  { %9700 = vmatpush3.bf16.msra.mxu0 %v9699_v33 }
0x3503   :  { %9701 = vmatprep.subr.bf16.mxu0 %v10454_v25 }
0x3504   :  { %v10210_v26 = vpop.eup %10209 }
0x3505   :  { %v4826_v48 = vsub.f32 1.0, %v10210_v26  ;;  %v4835_v53 = vmul.f32 %v10210_v26, %v12022_v46 }
0x3565   :  { %v4799_v32 = vpop.permute.xlu0 %4798 }
0x3566   :  { %v4801_v2 = vmul.f32 %v4799_v32, %v4796_v58  ;;  %v9702_v58 = vpack.c.bf16 %v5027_v29, %v5026_v43  ;;  %v5284_v43 = vld [vmem:[%s12888_s16] sm:$0xff]  ;;  %v5285_v29 = vld [vmem:[%s12888_s16 + $0x8] sm:$0xff] }
0x3568   :  { %v4807_v49 = vadd.f32 %v4806_v60, %v4801_v2  ;;  %9703 = vmatpush3.bf16.msra.mxu0 %v9702_v58 }
0x3569   :  { %v4829_v5 = vpop.permute.xlu0 %4828  ;;  %9708 = vmatprep.subr.bf16.mxu0 %v10454_v25 }
0x356a   :  { %v4831_v16 = vmul.f32 %v4829_v5, %v4826_v48  ;;  %4838 = vrot.lane.b32.xlu0 %v4807_v49, %s10456_s27 }
0x356c   :  { %v4836_v34 = vadd.f32 %v4835_v53, %v4831_v16 }
0x356e   :  { %4842 = vrot.lane.b32.xlu1 %v4836_v34, %s10455_s7  ;;  %4971 = vrot.lane.b32.xlu0 %v4685_v63, %s10453_s3 }
0x35dc   :  { %v4839_v1 = vpop.permute.xlu0 %4838 }
0x35e0   :  { %v4843_v3 = vpop.permute.xlu1 %4842  ;;  %v4972_v7 = vpop.permute.xlu0 %4971 }
0x35e1   :  { %v12031_v20 = vsel %vm463_vm2, %v4839_v1, %v4843_v3 }
0x35e2   :  { %7912 = vmatmul.mubr.msk.f32.vlgmr.msra.gmra.mrb[2].mxu1 %vm493_vm3, %v12031_v20 }
0x35e3   :  { %8847 = vmatprep.mubr.msk.f32.mxu1 %vm10457_vm1, %v10452_v0 }
0x36b5   :  { %v4943_v54 = vpop.f32.mrb[2].mxu1 }
0x36b6   :  { %v4944_v51 = vadd.f32 %v4943_v54, %v4867_v19  ;;  %v4945_v10 = vpop.f32.mrb[3].mxu1 }
0x36b8   :  { %v4948_v11 = vadd.f32 %v4944_v51, %v11945_v37  ;;  %v4974_v12 = vadd.f32 %v4972_v7, %v4944_v51  ;;  %v4871_v37 = vrot.slane %v4862_v15, %v10686_v62 }
0x36ba   :  { %v7913_v13 = vmul.f32 -1.442695, %v4948_v11  ;;  %v7914_v45 = vmul.f32 -1.442695, %v4974_v12  ;;  %v4946_v24 = vadd.f32 %v4945_v10, %v4871_v37  ;;  %v5103_v10 = vld [vmem:[%s12886_s14 + $0x8] sm:$0xff] }
0x36bc   :  { %10211 = vpow2.f32 %v7913_v13  ;;  %v4981_v26 = vadd.f32 %v4972_v7, %v4946_v24 }
0x36bd   :  { %10213 = vpow2.f32 %v7914_v45 }
0x36be   :  { %v7915_v32 = vmul.f32 -1.442695, %v4981_v26  ;;  %v9712_v26 = vpack.c.bf16 %v5285_v29, %v5284_v43 }
0x36c6   :  { %v10212_v28 = vpop.eup %10211 }
0x36c7   :  { %v10214_v6 = vpop.eup %10213  ;;  %v4952_v17 = vadd.f32 1.0, %v10212_v28 }
0x36c8   :  { %v4978_v31 = vadd.f32 1.0, %v10214_v6 }
0x36c9   :  { %10215 = vrcp.f32 %v4952_v17  ;;  %v5112_v17 = vld [vmem:[%s12885_s13] sm:$0x1] }
0x36ca   :  { %10217 = vrcp.f32 %v4978_v31 }
0x36d3   :  { %v10216_v21 = vpop.eup %10215 }
0x36d4   :  { %v10218_v4 = vpop.eup %10217  ;;  %v4955_v61 = vmul.f32 %v10216_v21, %v4685_v63  ;;  %v4962_v49 = vsub.f32 1.0, %v10216_v21  ;;  %v4968_v56 = vmul.f32 %v10216_v21, %v12022_v46  ;;  %v5028_v46 = vld [vmem:[%s12884_s12] sm:$0x1] }
0x36d5   :  { %v4988_v22 = vmul.f32 %v10218_v4, %v4685_v63 }
0x36d6   :  { %4957 = vrot.lane.b32.xlu1 %v4955_v61, %s10453_s3 }
0x36d7   :  { %4990 = vrot.lane.b32.xlu0 %v4988_v22, %s10453_s3 }
0x3748   :  { %v4958_v9 = vpop.permute.xlu1 %4957 }
0x3749   :  { %v4991_v27 = vpop.permute.xlu0 %4990  ;;  %v4960_v40 = vadd.f32 %v4958_v9, %v4944_v51  ;;  %v5102_v51 = vld [vmem:[%s12886_s14] sm:$0xff] }
0x374a   :  { %v4993_v30 = vadd.f32 %v4991_v27, %v4946_v24  ;;  %v5203_v27 = vld [vmem:[%s12887_s15] sm:$0xff] }
0x374b   :  { %10219 = vtanh.f32 %v4960_v40  ;;  %v5204_v40 = vld [vmem:[%s12887_s15 + $0x8] sm:$0xff] }
0x374c   :  { %10221 = vtanh.f32 %v4993_v30  ;;  %v9709_v30 = vpack.c.bf16 %v5204_v40, %v5203_v27  ;;  %v5545_v40 = vand.u32 (!%p7926_p9), 127, %v145_v57 }
0x374d   :  { %10223 = vpow2.f32 %v7915_v32 }
0x3755   :  { %v10220_v50 = vpop.eup %10219 }
0x3756   :  { %v10222_v42 = vpop.eup %10221  ;;  %4964 = vrot.lane.b32.xlu1 %v10220_v50, %s10456_s27 }
0x3757   :  { %4997 = vrot.lane.b32.xlu0 %v10222_v42, %s10456_s27  ;;  %v10224_v60 = vpop.eup %10223 }
0x3758   :  { %v4985_v2 = vadd.f32 1.0, %v10224_v60  ;;  %v5286_v60 = vld [vmem:[%s12888_s16 + $0x10] sm:$0xff] }
0x375a   :  { %10225 = vrcp.f32 %v4985_v2 }
0x3764   :  { %v10226_v48 = vpop.eup %10225 }
0x3765   :  { %v4995_v5 = vsub.f32 1.0, %v10226_v48  ;;  %v5001_v63 = vmul.f32 %v10226_v48, %v12017_v44  ;;  %v5288_v48 = vld [vmem:[%s12888_s16 + $0x20] sm:$0xff] }
0x37c8   :  { %v4965_v53 = vpop.permute.xlu1 %4964 }
0x37c9   :  { %v4998_v16 = vpop.permute.xlu0 %4997  ;;  %v4967_v34 = vmul.f32 %v4965_v53, %v4962_v49  ;;  %v5289_v49 = vld [vmem:[%s12888_s16 + $0x28] sm:$0xff] }
0x37ca   :  { %v5000_v41 = vmul.f32 %v4998_v16, %v4995_v5  ;;  %v5373_v5 = vld [vmem:[%s12890_s18 + $0x20] sm:$0xff]  ;;  %v9718_v53 = vpack.c.bf16 %v5289_v49, %v5288_v48  ;;  %v5374_v16 = vld [vmem:[%s12890_s18 + $0x28] sm:$0xff] }
0x37cb   :  { %v4969_v18 = vadd.f32 %v4968_v56, %v4967_v34  ;;  %v9730_v34 = vpack.c.bf16 %v5374_v16, %v5373_v5  ;;  %v5290_v56 = vld [vmem:[%s12888_s16 + $0x30] sm:$0xff] }
0x37cc   :  { %v5002_v1 = vadd.f32 %v5001_v63, %v5000_v41  ;;  %v5291_v41 = vld [vmem:[%s12888_s16 + $0x38] sm:$0xff]  ;;  %v5375_v63 = vld [vmem:[%s12890_s18 + $0x30] sm:$0xff] }
0x37cd   :  { %5004 = vrot.lane.b32.xlu1 %v4969_v18, %s10456_s27 }
0x37ce   :  { %5008 = vrot.lane.b32.xlu0 %v5002_v1, %s10455_s7 }
0x383f   :  { %v5005_v3 = vpop.permute.xlu1 %5004 }
0x3840   :  { %v5009_v15 = vpop.permute.xlu0 %5008 }
0x3841   :  { %v5011_v19 = vsel %vm463_vm2, %v5005_v3, %v5009_v15 }
0x3842   :  { %8841 = vmatmul.mubr.msk.f32.vlgmr.msra.gmra.mrb[4].mxu0 %vm493_vm3, %v5011_v19 }
0x3843   :  { %8854 = vmatprep.mubr.msk.f32.mxu0 %vm10457_vm1, %v10452_v0  ;;  %9710 = vmatpush3.bf16.msra.mxu0 %v9709_v30 }
0x3844   :  { %9711 = vmatprep.subr.bf16.mxu0 %v10454_v25 }
0x3915   :  { %v5098_v44 = vpop.f32.mrb[4].mxu0 }
0x3916   :  { %v5099_v54 = vadd.f32 %v5098_v44, %v5028_v46  ;;  %v8842_v7 = vpop.f32.mrb[5].mxu0 }
0x3918   :  { %v5107_v11 = vrot.slane %v5099_v54, %v10676_v59 }
0x391a   :  { %v5108_v12 = vadd.f32 %v5107_v11, %v5102_v51  ;;  %v5109_v13 = vadd.f32 %v5107_v11, %v5103_v10  ;;  %v5292_v51 = vld [vmem:[%s12965_s30] sm:$0x1] }
0x391b   :  { %v5377_v10 = vld [vmem:[%s12891_s19] sm:$0x1] }
0x391c   :  { %10227 = vtanh.f32 %v5108_v12 }
0x391d   :  { %10229 = vtanh.f32 %v5109_v13 }
0x3926   :  { %v10228_v45 = vpop.eup %10227 }
0x3927   :  { %v10230_v28 = vpop.eup %10229 }
0x3928   :  { %v9705_v6 = vpack.c.bf16 %v10230_v28, %v10228_v45 }
0x392a   :  { %9707 = vmatpush3.bf16.xpose.msk.msra.mxu1 %vm10865_vm4, %v9705_v6 }
0x392b   :  { %9723 = vmatprep.subr.bf16.mxu1 %v10454_v25 }
0x3931   :  { %8848 = vmatmul.mubr.msk.f32.vlgmr.msra.gmra.mrb[4].mxu1 %vm463_vm2, %v5112_v17 }
0x3932   :  { %8892 = vmatprep.mubr.msk.f32.mxu1 %vm10457_vm1, %v10452_v0  ;;  %9725 = vmatpush3.bf16.msra.mxu1 %v9724_v23 }
0x3933   :  { %9726 = vmatprep.subr.bf16.mxu1 %v10454_v25 }
0x3936   :  { %9728 = vmatpush3.bf16.msra.mxu1 %v9727_v36 }
0x3937   :  { %9729 = vmatprep.subr.bf16.mxu1 %v10454_v25 }
0x393a   :  { %9731 = vmatpush3.bf16.msra.mxu1 %v9730_v34 }
0x393b   :  { %9732 = vmatprep.subr.bf16.mxu1 %v10454_v25 }
0x3a04   :  { %v5188_v31 = vpop.f32.mrb[4].mxu1 }
0x3a05   :  { %v8849_v21 = vpop.f32.mrb[5].mxu1  ;;  %v5192_v4 = vsel %vm813_vm5, %v5188_v31, -inf }
0x3a06   :  { %5193 = vmax.xlane.f32.xlu1 %v5192_v4  ;;  %v5465_v21 = vld [vmem:[%s12966_s9] sm:$0xff] (!%p7926_p9)  ;;  %v5466_v4 = vld [vmem:[%s12966_s9 + $0x8] sm:$0xff] (!%p7926_p9) }
0x3a17   :  { %5015 = vrot.lane.b32.xlu1 %v5002_v1, %s10456_s27  ;;  %v5376_v1 = vld [vmem:[%s12890_s18 + $0x38] sm:$0xff] }
0x3a18   :  { %v9733_v3 = vpack.c.bf16 %v5376_v1, %v5375_v63 }
0x3a1a   :  { %9734 = vmatpush3.bf16.msra.mxu1 %v9733_v3 }
0x3a93   :  { %v5194_v61 = vpop.xlane.xlu1 %5193 }
0x3a94   :  { %v5195_v22 = vsub.f32 %v5188_v31, %v5194_v61  ;;  %v10470_v61 = vmov (!%p7926_p9), 0.0|0.0  }
0x3a96   :  { %v5196_v37 = vmul.f32 1.442695, %v5195_v22  ;;  %v9736_v22 = vpack.c.bf16 (!%p7926_p9), %v5466_v4, %v5465_v21 }
0x3a97   :  { %v5016_v50 = vpop.permute.xlu1 %5015 }
0x3a98   :  { %10231 = vpow2.f32 %v5196_v37  ;;  %v10472_v37 = vmov (!%p7926_p9), 0.0  }
0x3aa2   :  { %v10232_v24 = vpop.eup %10231 }
0x3aa3   :  { %v5198_v9 = vsel %vm813_vm5, %v10232_v24, 0.0 }
0x3aa4   :  { %5199 = vadd.xlane.f32.xlu0 %v5198_v9 }
0x3aba   :  { %5012 = vrot.lane.b32.xlu0 %v4969_v18, %s10455_s7  ;;  %v9721_v18 = vpack.c.bf16 %v5291_v41, %v5290_v56 }
0x3b31   :  { %v5200_v38 = vpop.xlane.xlu0 %5199 }
0x3b32   :  { %10233 = vrcp.f32 %v5200_v38 }
0x3b35   :  { %v5013_v52 = vpop.permute.xlu0 %5012 }
0x3b36   :  { %v5018_v33 = vsel %vm493_vm3, %v12031_v20, %v5013_v52  ;;  %v5287_v20 = vld [vmem:[%s12888_s16 + $0x18] sm:$0xff] }
0x3b37   :  { %v12130_v42 = vsel %vm639_vm6, %v5018_v33, %v5016_v50  ;;  %v9715_v2 = vpack.c.bf16 %v5287_v20, %v5286_v60 }
0x3b3c   :  { %v10234_v58 = vpop.eup %10233 }
0x3b3d   :  { %v5202_v32 = vmul.f32 %v10234_v58, %v10232_v24 }
0x3b3f   :  { %8855 = vmatmul.mubr.msk.f32.vlgmr.msra.gmra.mrb[6].mxu0 %vm317_vm0, %v5202_v32  ;;  %5453 = vst.msk [vmem:[#allocation12 + $0x4] sm:$0x1] %vm813_vm5, %v5202_v32 }
0x3b40   :  { %9713 = vmatpush3.bf16.msra.mxu0 %v9712_v26  ;;  %8873 = vmatprep.mubr.msk.f32.mxu0 %vm10457_vm1, %v10452_v0 }
0x3b41   :  { %9714 = vmatprep.subr.bf16.mxu0 %v10454_v25 }
0x3b44   :  { %9716 = vmatpush3.bf16.msra.mxu0 %v9715_v2 }
0x3b45   :  { %9717 = vmatprep.subr.bf16.mxu0 %v10454_v25 }
0x3b48   :  { %9719 = vmatpush3.bf16.msra.mxu0 %v9718_v53 }
0x3b49   :  { %9720 = vmatprep.subr.bf16.mxu0 %v10454_v25 }
0x3b4c   :  { %9722 = vmatpush3.bf16.msra.mxu0 %v9721_v18 }
0x3b4d   :  { %9735 = vmatprep.subr.bf16.mxu0 (!%p7926_p9), %v10470_v61 }
0x3c12   :  { %v5274_v15 = vpop.f32.mrb[6].mxu0 }
0x3c13   :  { %vm5278_vm7 = vcmp.gt.f32.partialorder %v5274_v15, 0.0  ;;  %v5279_v19 = vmul.f32 0.01, %v5274_v15  ;;  %v8856_v46 = vpop.f32.mrb[7].mxu0 }
0x3c15   :  { %v5280_v44 = vsel %vm5278_vm7, %v5274_v15, %v5279_v19 }
0x3c16   :  { %v5282_v54 = vmul.f32 0.01, %v5280_v44  ;;  %vm5281_vm8 = vcmp.gt.f32.partialorder %v5280_v44, 0.0 }
0x3c18   :  { %v5283_v7 = vsel %vm5281_vm8, %v5280_v44, %v5282_v54 }
0x3c19   :  { %8874 = vmatmul.mubr.msk.f32.vlgmr.msra.gmra.mrb[8].mxu0 %vm493_vm3, %v5283_v7  ;;  %8893 = vmatmul.mubr.msk.f32.vlgmr.msra.gmra.mrb[6].mxu1 %vm493_vm3, %v5283_v7 }
0x3c1a   :  { %8899 = vmatprep.mubr.msk.f32.mxu0 (!%p7926_p9), %vm10471_vm11, %v10472_v37  ;;  %9737 = vmatpush3.bf16.msra.mxu0 (!%p7926_p9), %v9736_v22 }
0x3cec   :  { %v5362_v11 = vpop.f32.mrb[8].mxu0  ;;  %v5444_v12 = vpop.f32.mrb[6].mxu1  ;;  %5464 = sbr.rel (%p7926_p9) target bundleno = 16314 (0x3fba), region = 117 }
0x3ced   :  { %v5363_v13 = vadd.f32 %v5362_v11, %v5292_v51  ;;  %v5445_v45 = vadd.f32 %v5444_v12, %v5377_v10  ;;  %v8875_v28 = vpop.f32.mrb[9].mxu0  ;;  %v8894_v6 = vpop.f32.mrb[7].mxu1 }
0x3cef   :  { %vm5366_vm9 = vcmp.gt.f32.partialorder %v5363_v13, 0.0  ;;  %v5367_v17 = vmul.f32 0.01, %v5363_v13  ;;  %5449 = vst.msk [vmem:[#allocation9 + $0x4] sm:$0x1] %vm813_vm5, %v5445_v45  ;;  %8900 = vmatmul.mubr.msk.f32.vlgmr.msra.gmra.mrb[0].mxu0 (!%p7926_p9), %vm317_vm0, %v5445_v45 }
0x3cf1   :  { %v5368_v31 = vsel %vm5366_vm9, %v5363_v13, %v5367_v17 }
0x3cf2   :  { %5451 = vst.msk [vmem:[#allocation10 + $0x4] sm:$0x1] %vm1071_vm10, %v5368_v31 }
0x3dc2   :  { %v5536_v24 = vpop.f32.mrb[0].mxu0 }
0x3dc3   :  { %v8901_v9 = vpop.f32.mrb[1].mxu0  ;;  %v5541_v27 = vsel %vm5540_vm12, %v5536_v24, -inf }
0x3dc4   :  { %5542 = vmax.xlane.f32.xlu0 %v5541_v27 }
0x3e51   :  { %v5543_v30 = vpop.xlane.xlu0 %5542 }
0x3e52   :  { %vm5546_vm13 = vcmp.ge.f32.partialorder %v5536_v24, %v5543_v30 }
0x3e53   :  { %v5547_v14 = vsel %vm5546_vm13, %v5545_v40, 12 }
0x3e54   :  { %v5548_v8 = vsel %vm5540_vm12, %v5547_v14, 2147483647 }
0x3e55   :  { %v5550_v23 = vshra.s32 %v5548_v8, 16  ;;  %v5549_v35 = vand.u32 65535, %v5548_v8 }
0x3e57   :  { %v5552_v47 = vcvt.s32.f32 %v5550_v23  ;;  %v5551_v38 = vcvt.s32.f32 %v5549_v35 }
0x3e59   :  { %5553 = vmin.xlane.f32.xlu0 %v5552_v47 }
0x3ee6   :  { %v5554_v36 = vpop.xlane.xlu0 %5553 }
0x3ee7   :  { %vm5555_vm14 = vcmp.eq.f32.partialorder %v5552_v47, %v5554_v36  ;;  %v5560_v50 = vcvt.f32.s32 %v5554_v36 }
0x3ee8   :  { %v5556_v52 = vsel %vm5555_vm14, %v5551_v38, inf }
0x3ee9   :  { %5557 = vmin.xlane.f32.xlu1 %v5556_v52  ;;  %v5561_v43 = vshll.u32 %v5560_v50, 16 }
0x3f76   :  { %v5558_v33 = vpop.xlane.xlu1 %5557 }
0x3f77   :  { %v5559_v29 = vcvt.f32.s32 %v5558_v33 }
0x3f79   :  { %v5562_v58 = vadd.s32 %v5561_v43, %v5559_v29 }
0x3f7b   :  { %v5563_v26 = vrot.slane %v5562_v58, 4 }
0x3f7d   :  { %vm5564_vm15 = vcmp.lt.s32.totalorder %v5562_v58, %v5563_v26 }
0x3f7e   :  { %v5565_v32 = vsel %vm5564_vm15, %v5562_v58, %v5563_v26 }
0x3f7f   :  { %v5566_v60 = vrot.slane %v5565_v32, 2 }
0x3f81   :  { %vm5567_vm7 = vcmp.lt.s32.totalorder %v5565_v32, %v5566_v60 }
0x3f82   :  { %v5568_v20 = vsel %vm5567_vm7, %v5565_v32, %v5566_v60 }
0x3f83   :  { %v5569_v2 = vrot.slane %v5568_v20, 1 }
0x3f85   :  { %vm5570_vm8 = vcmp.lt.s32.totalorder %v5568_v20, %v5569_v2 }
0x3f86   :  { %v5571_v48 = vsel %vm5570_vm8, %v5568_v20, %v5569_v2 }
0x3f87   :  { %9990 = vpush %v5571_v48 }
0x3fb8   :  { %s9991_s29 = spop %9990 }
0x3fb9   :  { %5573 = sst [smem:[#allocation2]] %s9991_s29 }
0x3fba PF:  { %v5578_v49 = vld [vmem:[#allocation6 + $0x8] sm:$0xff]  ;;  %v5581_v5 = vld [vmem:[#allocation6 + $0x20] sm:$0xff]  ;;  %5706 = vmatprep.mubr.f32.mxu0 %v10452_v0  ;;  %9770 = vmatprep.subr.bf16.mxu1 %v10454_v25  ;;  %v5580_v34 = vld [vmem:[#allocation6 + $0x18] sm:$0xff]  ;;  %s12197_s5 = sld [smem:[#allocation5 + $0x5]]  ;;  %s7944_s1 = sld [smem:[#allocation4 + $0x6]] }
0x3fbb   :  { %v5577_v53 = vld [vmem:[#allocation6] sm:$0xff]  ;;  %v9738_v16 = vpack.c.bf16 %v5581_v5, %v5578_v49  ;;  %v5584_v56 = vld [vmem:[#allocation6 + $0x38] sm:$0xff]  ;;  %v5587_v41 = vld [vmem:[#allocation6 + $0x50] sm:$0xff]  ;;  %8934 = vmatprep.mubr.msk.f32.mxu1 %vm10457_vm1, %v10452_v0  ;;  %s12202_s17 = sld [smem:[#allocation2]]  ;;  %s12967_s24 = sld [smem:[#allocation24_spill]] }
0x3fbc   :  { %v9740_v63 = vpack.c.bf16 %v5580_v34, %v5577_v53  ;;  %v9742_v18 = vpack.c.bf16 %v5587_v41, %v5584_v56  ;;  %v5583_v1 = vld [vmem:[#allocation6 + $0x30] sm:$0xff]  ;;  %v5586_v3 = vld [vmem:[#allocation6 + $0x48] sm:$0xff]  ;;  %v5593_v19 = vld [vmem:[#allocation6 + $0x80] sm:$0xff]  ;;  %s12968_s29 = sld [smem:[#allocation21_spill]]  ;;  %s12969_s30 = sld [smem:[#allocation25_spill]] }
0x3fbd   :  { %v5590_v15 = vld [vmem:[#allocation6 + $0x68] sm:$0xff]  ;;  %9739 = vmatprep.subr.bf16.mxu0 %v9738_v16  ;;  %v9744_v46 = vpack.c.bf16 %v5586_v3, %v5583_v1  ;;  %v5589_v54 = vld [vmem:[#allocation6 + $0x60] sm:$0xff]  ;;  %v5592_v7 = vld [vmem:[#allocation6 + $0x78] sm:$0xff]  ;;  %s12970_s2 = sld [smem:[#allocation26_spill]]  ;;  %s12972_s25 = sld [smem:[#allocation28_spill]] }
0x3fbe   :  { %9741 = vmatpush1.bf16.msra.mxu0 %v9740_v63  ;;  %v9746_v44 = vpack.c.bf16 %v5593_v19, %v5590_v15  ;;  %v5596_v51 = vld [vmem:[#allocation6 + $0x98] sm:$0xff]  ;;  %v5599_v10 = vld [vmem:[#allocation6 + $0xb0] sm:$0xff]  ;;  %v9748_v11 = vpack.c.bf16 %v5592_v7, %v5589_v54  ;;  %v5598_v45 = vld [vmem:[#allocation6 + $0xa8] sm:$0xff] }
0x3fbf   :  { %9743 = vmatprep.subr.bf16.mxu0 %v9742_v18  ;;  %v9750_v12 = vpack.c.bf16 %v5599_v10, %v5596_v51  ;;  %v5595_v13 = vld [vmem:[#allocation6 + $0x90] sm:$0xff]  ;;  %v5602_v28 = vld [vmem:[#allocation6 + $0xc8] sm:$0xff]  ;;  %v5605_v6 = vld [vmem:[#allocation6 + $0xe0] sm:$0xff] }
0x3fc0   :  { %p10015_p10 = scmp.eq.s32.totalorder %s12197_s5, 1  ;;  %v9752_v17 = vpack.c.bf16 %v5598_v45, %v5595_v13  ;;  %v9754_v31 = vpack.c.bf16 %v5605_v6, %v5602_v28  ;;  %v5601_v21 = vld [vmem:[#allocation6 + $0xc0] sm:$0xff]  ;;  %v5604_v4 = vld [vmem:[#allocation6 + $0xd8] sm:$0xff]  ;;  %v5611_v22 = vld [vmem:[#allocation6 + $0x110] sm:$0xff]  ;;  %p7945_p11 = scmp.ne.s32.totalorder %s12197_s5, 0 }
0x3fc1   :  { %v5608_v61 = vld [vmem:[#allocation6 + $0xf8] sm:$0xff]  ;;  %v9756_v37 = vpack.c.bf16 %v5604_v4, %v5601_v21  ;;  %v5607_v9 = vld [vmem:[#allocation6 + $0xf0] sm:$0xff]  ;;  %v5610_v27 = vld [vmem:[#allocation6 + $0x108] sm:$0xff]  ;;  %vm10474_vm13 = vmmov (!%p7945_p11), 0   ;;  %vm6635_vm14 = vcmask (!%p7945_p11), 90112  }
0x3fc2   :  { %9745 = vmatpush1.bf16.msra.mxu0 %v9744_v46  ;;  %10007 = sst [smem:[#allocation2]] (%p10015_p10), %s7944_s1  ;;  %v9758_v24 = vpack.c.bf16 %v5611_v22, %v5608_v61  ;;  %v5614_v40 = vld [vmem:[#allocation6 + $0x128] sm:$0xff]  ;;  %v5617_v30 = vld [vmem:[#allocation6 + $0x140] sm:$0xff]  ;;  %v9760_v14 = vpack.c.bf16 %v5610_v27, %v5607_v9  ;;  %v5616_v47 = vld [vmem:[#allocation6 + $0x138] sm:$0xff]  ;;  %s5575_s1 = scalar_lea.vmem %s12968_s29, %s12202_s17 }
0x3fc3   :  { %9747 = vmatprep.subr.bf16.mxu0 %v9746_v44  ;;  %v9762_v8 = vpack.c.bf16 %v5617_v30, %v5614_v40  ;;  %v5613_v23 = vld [vmem:[#allocation6 + $0x120] sm:$0xff]  ;;  %v5620_v35 = vld [vmem:[#allocation6 + $0x158] sm:$0xff]  ;;  %v5623_v36 = vld [vmem:[#allocation6 + $0x170] sm:$0xff] }
0x3fc4   :  { %v9764_v38 = vpack.c.bf16 %v5616_v47, %v5613_v23  ;;  %v9766_v52 = vpack.c.bf16 %v5623_v36, %v5620_v35  ;;  %v5619_v50 = vld [vmem:[#allocation6 + $0x150] sm:$0xff]  ;;  %v5622_v33 = vld [vmem:[#allocation6 + $0x168] sm:$0xff]  ;;  %v5786_v29 = vld [vmem:[%s12967_s24 + $0x18] sm:$0xff] }
0x3fc5   :  { %v5784_v43 = vld [vmem:[%s12967_s24 + $0x8] sm:$0xff]  ;;  %v9768_v58 = vpack.c.bf16 %v5622_v33, %v5619_v50  ;;  %v5783_v32 = vld [vmem:[%s12967_s24] sm:$0xff]  ;;  %v5785_v60 = vld [vmem:[%s12967_s24 + $0x10] sm:$0xff] }
0x3fc6   :  { %9749 = vmatpush1.bf16.msra.mxu0 %v9748_v11  ;;  %v9794_v26 = vpack.c.bf16 %v5786_v29, %v5784_v43  ;;  %v9796_v20 = vpack.c.bf16 %v5785_v60, %v5783_v32  ;;  %v5576_v2 = vld [vmem:[%s5575_s1] sm:$0x1]  ;;  %v5579_v45 = vld [vmem:[#allocation6 + $0x10] sm:$0xff]  ;;  %v5582_v28 = vld [vmem:[#allocation6 + $0x28] sm:$0xff]  ;;  %s12971_s1 = sld [smem:[#allocation27_spill]] }
0x3fc7   :  { %9751 = vmatprep.subr.bf16.mxu0 %v9750_v12  ;;  %v12229_v48 = vld [vmem:[%s12882_s10] sm:$0x7]  ;;  %v5591_v4 = vld [vmem:[#allocation6 + $0x70] sm:$0xff]  ;;  %v5594_v61 = vld [vmem:[#allocation6 + $0x88] sm:$0xff] }
0x3fc8   :  { %v5630_v49 = vrot.slane %v12229_v48, %v10676_v59  ;;  %v5787_v5 = vld [vmem:[%s12969_s30] sm:$0x3]  ;;  %v5634_v34 = vrot.slane %v12229_v48, %v10686_v62  ;;  %v9777_v22 = vpack.c.bf16 %v5594_v61, %v5591_v4  ;;  %v5603_v27 = vld [vmem:[#allocation6 + $0xd0] sm:$0xff]  ;;  %v5606_v40 = vld [vmem:[#allocation6 + $0xe8] sm:$0xff] }
0x3fc9   :  { %v5796_v41 = vrot.slane %v5787_v5, %v10686_v62  ;;  %v5792_v15 = vrot.slane %v5787_v5, %v10676_v59  ;;  %v5585_v6 = vld [vmem:[#allocation6 + $0x40] sm:$0xff]  ;;  %v9783_v30 = vpack.c.bf16 %v5606_v40, %v5603_v27  ;;  %v5615_v47 = vld [vmem:[#allocation6 + $0x130] sm:$0xff]  ;;  %v5618_v35 = vld [vmem:[#allocation6 + $0x148] sm:$0xff] }
0x3fca   :  { %9753 = vmatpush1.bf16.msra.mxu0 %v9752_v17  ;;  %v9771_v17 = vpack.c.bf16 %v5582_v28, %v5579_v45  ;;  %v5621_v50 = vld [vmem:[#allocation6 + $0x160] sm:$0xff]  ;;  %v5624_v33 = vld [vmem:[#allocation6 + $0x178] sm:$0xff]  ;;  %v5954_v45 = vld [vmem:[%s12970_s2 + $0x68] sm:$0xff] }
0x3fcb   :  { %9755 = vmatprep.subr.bf16.mxu0 %v9754_v31  ;;  %v5588_v31 = vld [vmem:[#allocation6 + $0x58] sm:$0xff]  ;;  %v9792_v29 = vpack.c.bf16 %v5624_v33, %v5621_v50  ;;  %v5941_v60 = vld [vmem:[%s12970_s2] sm:$0xff] }
0x3fcc   :  { %9772 = vmatpush3.bf16.msra.mxu1 %v9771_v17  ;;  %v9774_v21 = vpack.c.bf16 %v5588_v31, %v5585_v6  ;;  %v5944_v32 = vld [vmem:[%s12970_s2 + $0x18] sm:$0xff]  ;;  %v5953_v17 = vld [vmem:[%s12970_s2 + $0x60] sm:$0xff] }
0x3fcd   :  { %9773 = vmatprep.subr.bf16.mxu1 %v10454_v25  ;;  %v5956_v28 = vld [vmem:[%s12970_s2 + $0x78] sm:$0xff] }
0x3fce   :  { %9757 = vmatpush1.bf16.msra.mxu0 %v9756_v37  ;;  %v5597_v37 = vld [vmem:[#allocation6 + $0xa0] sm:$0xff]  ;;  %v9810_v6 = vpack.c.bf16 %v5956_v28, %v5954_v45  ;;  %v6120_v45 = vld [vmem:[%s12883_s11 + $0x28] sm:$0xff] }
0x3fcf   :  { %9759 = vmatprep.subr.bf16.mxu0 %v9758_v24  ;;  %v5600_v24 = vld [vmem:[#allocation6 + $0xb8] sm:$0xff] }
0x3fd0   :  { %9775 = vmatpush3.bf16.msra.mxu1 %v9774_v21  ;;  %v9780_v9 = vpack.c.bf16 %v5600_v24, %v5597_v37 }
0x3fd1   :  { %9776 = vmatprep.subr.bf16.mxu1 %v10454_v25 }
0x3fd2   :  { %9761 = vmatpush1.bf16.msra.mxu0 %v9760_v14  ;;  %v5609_v14 = vld [vmem:[#allocation6 + $0x100] sm:$0xff] }
0x3fd3   :  { %9763 = vmatprep.subr.bf16.mxu0 %v9762_v8  ;;  %v5612_v8 = vld [vmem:[#allocation6 + $0x118] sm:$0xff] }
0x3fd4   :  { %9778 = vmatpush3.bf16.msra.mxu1 %v9777_v22  ;;  %v9786_v23 = vpack.c.bf16 %v5612_v8, %v5609_v14 }
0x3fd5   :  { %9779 = vmatprep.subr.bf16.mxu1 %v10454_v25 }
0x3fd6   :  { %9765 = vmatpush1.bf16.msra.mxu0 %v9764_v38  ;;  %v9789_v38 = vpack.c.bf16 %v5618_v35, %v5615_v47 }
0x3fd7   :  { %9767 = vmatprep.subr.bf16.mxu0 %v9766_v52 }
0x3fd8   :  { %9781 = vmatpush3.bf16.msra.mxu1 %v9780_v9 }
0x3fd9   :  { %9782 = vmatprep.subr.bf16.mxu1 %v10454_v25 }
0x3fda   :  { %9769 = vmatpush1.bf16.msra.mxu0 %v9768_v58 }
0x3fdb   :  { %9795 = vmatprep.subr.bf16.mxu0 %v9794_v26  ;;  %v5942_v26 = vld [vmem:[%s12970_s2 + $0x8] sm:$0xff] }
0x3fdc   :  { %9784 = vmatpush3.bf16.msra.mxu1 %v9783_v30 }
0x3fdd   :  { %5707 = vmatmul.mubr.f32.vlgmr.msra.gmra.mrb[0].mxu0 %v12130_v42  ;;  %9785 = vmatprep.subr.bf16.mxu1 %v10454_v25 }
0x3fde   :  { %9797 = vmatpush1.bf16.msra.mxu0 %v9796_v20  ;;  %5866 = vmatprep.mubr.f32.mxu0 %v10452_v0  ;;  %v9798_v20 = vpack.c.bf16 %v5944_v32, %v5942_v26 }
0x3fdf   :  { %9814 = vmatprep.subr.bf16.mxu0 %v10454_v25 }
0x3fe0   :  { %9787 = vmatpush3.bf16.msra.mxu1 %v9786_v23  ;;  %v5638_v23 = vrot.slane %v12229_v48, %v10795_v39  ;;  %v5957_v48 = vld [vmem:[%s12971_s1] sm:$0x3] }
0x3fe1   :  { %7928 = vmatmul.mubr.msk.f32.vlgmr.msra.gmra.mrb[2].mxu0 %vm317_vm0, %v5576_v2  ;;  %9788 = vmatprep.subr.bf16.mxu1 %v10454_v25  ;;  %v5943_v2 = vld [vmem:[%s12970_s2 + $0x10] sm:$0xff]  ;;  %v5962_v50 = vrot.slane %v5957_v48, %v10676_v59 }
0x3fe2   :  { %8953 = vmatprep.mubr.msk.f32.mxu0 %vm10457_vm1, %v10452_v0  ;;  %v9800_v5 = vpack.c.bf16 %v5943_v2, %v5941_v60 }
0x3fe4   :  { %9790 = vmatpush3.bf16.msra.mxu1 %v9789_v38 }
0x3fe5   :  { %9791 = vmatprep.subr.bf16.mxu1 %v10454_v25 }
0x3fe8   :  { %9793 = vmatpush3.bf16.msra.mxu1 %v9792_v29 }
0x3fe9   :  { %9799 = vmatprep.subr.bf16.mxu1 %v9798_v20 }
0x3feb   :  { %8935 = vmatmul.mubr.f32.vlgmr.msra.gmra.mrb[0].mxu1 %v12130_v42 }
0x3fec   :  { %6036 = vmatprep.mubr.f32.mxu1 %v10452_v0  ;;  %9801 = vmatpush1.bf16.msra.mxu1 %v9800_v5 }
0x40b0   :  { %v5708_v53 = vpop.f32.mrb[0].mxu0 }
0x40b1   :  { %v5709_v16 = vadd.f32 %v5708_v53, %v5630_v49  ;;  %v5710_v56 = vpop.f32.mrb[1].mxu0  ;;  %v5948_v49 = vld [vmem:[%s12970_s2 + $0x38] sm:$0xff] }
0x40b2   :  { %v12240_v18 = vadd.f32 %v5710_v56, %v5634_v34  ;;  %v5947_v34 = vld [vmem:[%s12970_s2 + $0x30] sm:$0xff]  ;;  %v5950_v56 = vld [vmem:[%s12970_s2 + $0x48] sm:$0xff] }
0x40b3   :  { %5881 = vrot.lane.b32.xlu0 %v5709_v16, %s10453_s3 }
0x40b4   :  { %v5868_v63 = vpop.f32.mrb[2].mxu0 }
0x40b5   :  { %v5870_v1 = vpop.f32.mrb[3].mxu0  ;;  %v5869_v19 = vadd.f32 %v5868_v63, %v5792_v15 }
0x40b6   :  { %v12242_v3 = vadd.f32 %v5870_v1, %v5796_v41  ;;  %v5952_v41 = vld [vmem:[%s12970_s2 + $0x58] sm:$0xff] }
0x40b7   :  { %5911 = vrot.lane.b32.xlu0 %v12240_v18, %s10453_s3  ;;  %v5873_v46 = vadd.f32 %v5869_v19, %v5709_v16  ;;  %v5945_v16 = vld [vmem:[%s12970_s2 + $0x20] sm:$0xff]  ;;  %v9806_v15 = vpack.c.bf16 %v5952_v41, %v5950_v56 }
0x40b8   :  { %v9804_v1 = vpack.c.bf16 %v5947_v34, %v5945_v16 }
0x40b9   :  { %v7929_v44 = vmul.f32 -1.442695, %v5873_v46  ;;  %v5951_v46 = vld [vmem:[%s12970_s2 + $0x50] sm:$0xff] }
0x40bb   :  { %10235 = vpow2.f32 %v7929_v44 }
0x40be   :  { %v5779_v47 = vpop.f32.mrb[0].mxu1 }
0x40bf   :  { %v5780_v35 = vadd.f32 %v5779_v47, %v5638_v23 }
0x40c5   :  { %v10236_v54 = vpop.eup %10235 }
0x40c6   :  { %v5877_v7 = vadd.f32 1.0, %v10236_v54 }
0x40c8   :  { %10237 = vrcp.f32 %v5877_v7  ;;  %v5903_v7 = vadd.f32 %v12242_v3, %v12240_v18  ;;  %v5955_v18 = vld [vmem:[%s12970_s2 + $0x70] sm:$0xff] }
0x40d2   :  { %v12247_v51 = vpop.eup %10237 }
0x40d3   :  { %v5891_v21 = vsub.f32 1.0, %v12247_v51 }
0x4125   :  { %v5882_v10 = vpop.permute.xlu0 %5881 }
0x4126   :  { %v5884_v11 = vmul.f32 %v12247_v51, %v5882_v10  ;;  %v7930_v10 = vmul.f32 -1.442695, %v5903_v7 }
0x4128   :  { %5886 = vrot.lane.b32.xlu1 %v5884_v11, %s10453_s3 }
0x4129   :  { %v12251_v12 = vpop.permute.xlu0 %5911 }
0x412a   :  { %v5914_v13 = vmul.f32 %v12247_v51, %v12251_v12 }
0x412c   :  { %5916 = vrot.lane.b32.xlu1 %v5914_v13, %s10453_s3 }
0x4130   :  { %5898 = vrot.lane.b32.xlu1 %v12130_v42, %s10455_s7 }
0x4134   :  { %5927 = vrot.lane.b32.xlu1 %v12130_v42, %s10456_s27  ;;  %v5946_v42 = vld [vmem:[%s12970_s2 + $0x28] sm:$0xff] }
0x4135   :  { %v9802_v53 = vpack.c.bf16 %v5948_v49, %v5946_v42 }
0x4137   :  { %9803 = vmatprep.subr.bf16.mxu1 %v9802_v53 }
0x4138   :  { %9805 = vmatpush1.bf16.msra.mxu1 %v9804_v1 }
0x4139   :  { %9807 = vmatprep.subr.bf16.mxu1 %v9806_v15 }
0x419a   :  { %v5887_v36 = vpop.permute.xlu1 %5886 }
0x419b   :  { %v5889_v52 = vadd.f32 %v5887_v36, %v5869_v19  ;;  %v5949_v19 = vld [vmem:[%s12970_s2 + $0x40] sm:$0xff]  ;;  %s12973_s2 = sld [smem:[#allocation22_spill]] (!%p7945_p11) }
0x419c   :  { %v9808_v54 = vpack.c.bf16 %v5951_v46, %v5949_v19  ;;  %v6115_v46 = vld [vmem:[%s12883_s11] sm:$0xff] }
0x419d   :  { %10239 = vtanh.f32 %v5889_v52 }
0x419e   :  { %v5917_v43 = vpop.permute.xlu1 %5916  ;;  %9809 = vmatpush1.bf16.msra.mxu1 %v9808_v54  ;;  %v6117_v54 = vld [vmem:[%s12883_s11 + $0x10] sm:$0xff] }
0x419f   :  { %v5919_v58 = vadd.f32 %v5917_v43, %v12242_v3  ;;  %v9812_v3 = vpack.c.bf16 %v5955_v18, %v5953_v17  ;;  %9811 = vmatprep.subr.bf16.mxu1 %v9810_v6  ;;  %v6121_v18 = vld [vmem:[%s12883_s11 + $0x30] sm:$0xff] }
0x41a1   :  { %10241 = vtanh.f32 %v5919_v58 }
0x41a2   :  { %10243 = vpow2.f32 %v7930_v10  ;;  %9813 = vmatpush1.bf16.msra.mxu1 %v9812_v3  ;;  %v12323_v31 = vpop.permute.xlu1 %5898  ;;  %v6118_v10 = vld [vmem:[%s12883_s11 + $0x18] sm:$0xff] }
0x41a3   :  { %9826 = vmatprep.subr.bf16.mxu1 %v10454_v25  ;;  %v5901_v22 = vmul.f32 %v12247_v51, %v12323_v31  ;;  %v8936_v51 = vpop.f32.mrb[1].mxu1  ;;  %v6122_v3 = vld [vmem:[%s12883_s11 + $0x38] sm:$0xff] }
0x41a6   :  { %v12328_v24 = vpop.permute.xlu1 %5927 }
0x41a7   :  { %v10240_v63 = vpop.eup %10239 }
0x41a8   :  { %5893 = vrot.lane.b32.xlu0 %v10240_v63, %s10456_s27 }
0x41ab   :  { %v10242_v44 = vpop.eup %10241 }
0x41ac   :  { %5923 = vrot.lane.b32.xlu0 %v10242_v44, %s10456_s27  ;;  %v10244_v11 = vpop.eup %10243  ;;  %v6116_v44 = vld [vmem:[%s12883_s11 + $0x8] sm:$0xff] }
0x41ad   :  { %v5907_v13 = vadd.f32 1.0, %v10244_v11  ;;  %v9815_v7 = vpack.c.bf16 %v6116_v44, %v6115_v46  ;;  %v9818_v11 = vpack.c.bf16 %v6118_v10, %v6117_v54  ;;  %v6464_v46 = vld [vmem:[%s12890_s18] sm:$0xff]  ;;  %v6465_v44 = vld [vmem:[%s12890_s18 + $0x8] sm:$0xff]  ;;  %v6467_v10 = vld [vmem:[%s12890_s18 + $0x18] sm:$0xff] }
0x41ae   :  { %v9846_v54 = vpack.c.bf16 %v6465_v44, %v6464_v46 }
0x41af   :  { %10245 = vrcp.f32 %v5907_v13  ;;  %9816 = vmatpush3.bf16.msra.mxu0 %v9815_v7  ;;  %v6119_v13 = vld [vmem:[%s12883_s11 + $0x20] sm:$0xff]  ;;  %v6466_v7 = vld [vmem:[%s12890_s18 + $0x10] sm:$0xff] }
0x41b0   :  { %9817 = vmatprep.subr.bf16.mxu0 %v10454_v25  ;;  %v9821_v6 = vpack.c.bf16 %v6120_v45, %v6119_v13 }
0x41b3   :  { %9819 = vmatpush3.bf16.msra.mxu0 %v9818_v11  ;;  %v9849_v11 = vpack.c.bf16 %v6467_v10, %v6466_v7 }
0x41b4   :  { %9820 = vmatprep.subr.bf16.mxu0 %v10454_v25 }
0x41b7   :  { %9822 = vmatpush3.bf16.msra.mxu0 %v9821_v6 }
0x41b8   :  { %9823 = vmatprep.subr.bf16.mxu0 %v10454_v25 }
0x41b9   :  { %v10246_v4 = vpop.eup %10245 }
0x41ba   :  { %v5921_v9 = vsub.f32 1.0, %v10246_v4  ;;  %v5930_v30 = vmul.f32 %v10246_v4, %v12328_v24 }
0x421a   :  { %v5894_v61 = vpop.permute.xlu0 %5893 }
0x421b   :  { %v5896_v37 = vmul.f32 %v5894_v61, %v5891_v21  ;;  %v9824_v21 = vpack.c.bf16 %v6122_v3, %v6121_v18  ;;  %v6379_v18 = vld [vmem:[%s12888_s16] sm:$0xff]  ;;  %v6380_v3 = vld [vmem:[%s12888_s16 + $0x8] sm:$0xff] }
0x421d   :  { %v5902_v27 = vadd.f32 %v5901_v22, %v5896_v37  ;;  %9825 = vmatpush3.bf16.msra.mxu0 %v9824_v21 }
0x421e   :  { %v5924_v40 = vpop.permute.xlu0 %5923  ;;  %9830 = vmatprep.subr.bf16.mxu0 %v10454_v25 }
0x421f   :  { %v5926_v14 = vmul.f32 %v5924_v40, %v5921_v9  ;;  %5933 = vrot.lane.b32.xlu0 %v5902_v27, %s10456_s27 }
0x4221   :  { %v5931_v8 = vadd.f32 %v5930_v30, %v5926_v14 }
0x4223   :  { %5937 = vrot.lane.b32.xlu1 %v5931_v8, %s10455_s7  ;;  %6066 = vrot.lane.b32.xlu0 %v5780_v35, %s10453_s3 }
0x4291   :  { %v5934_v36 = vpop.permute.xlu0 %5933 }
0x4295   :  { %v5938_v38 = vpop.permute.xlu1 %5937  ;;  %v6067_v43 = vpop.permute.xlu0 %6066 }
0x4296   :  { %v12337_v52 = vsel %vm463_vm2, %v5934_v36, %v5938_v38 }
0x4297   :  { %7931 = vmatmul.mubr.msk.f32.vlgmr.msra.gmra.mrb[2].mxu1 %vm493_vm3, %v12337_v52 }
0x4298   :  { %8960 = vmatprep.mubr.msk.f32.mxu1 %vm10457_vm1, %v10452_v0 }
0x436a   :  { %v6038_v33 = vpop.f32.mrb[2].mxu1 }
0x436b   :  { %v6039_v29 = vadd.f32 %v6038_v33, %v5962_v50  ;;  %v6040_v58 = vpop.f32.mrb[3].mxu1 }
0x436d   :  { %v6043_v26 = vadd.f32 %v6039_v29, %v12251_v12  ;;  %v6069_v32 = vadd.f32 %v6067_v43, %v6039_v29  ;;  %v5966_v12 = vrot.slane %v5957_v48, %v10686_v62 }
0x436f   :  { %v7932_v60 = vmul.f32 -1.442695, %v6043_v26  ;;  %v7933_v20 = vmul.f32 -1.442695, %v6069_v32  ;;  %v6041_v41 = vadd.f32 %v6040_v58, %v5966_v12  ;;  %v6198_v58 = vld [vmem:[%s12886_s14 + $0x8] sm:$0xff] }
0x4371   :  { %10247 = vpow2.f32 %v7932_v60  ;;  %v6076_v4 = vadd.f32 %v6067_v43, %v6041_v41 }
0x4372   :  { %10249 = vpow2.f32 %v7933_v20 }
0x4373   :  { %v7934_v61 = vmul.f32 -1.442695, %v6076_v4  ;;  %v9834_v4 = vpack.c.bf16 %v6380_v3, %v6379_v18 }
0x437b   :  { %v10248_v2 = vpop.eup %10247 }
0x437c   :  { %v10250_v42 = vpop.eup %10249  ;;  %v6047_v49 = vadd.f32 1.0, %v10248_v2 }
0x437d   :  { %v6073_v5 = vadd.f32 1.0, %v10250_v42 }
0x437e   :  { %10251 = vrcp.f32 %v6047_v49  ;;  %v6207_v49 = vld [vmem:[%s12885_s13] sm:$0x1] }
0x437f   :  { %10253 = vrcp.f32 %v6073_v5 }
0x4388   :  { %v10252_v53 = vpop.eup %10251 }
0x4389   :  { %v10254_v16 = vpop.eup %10253  ;;  %v6050_v34 = vmul.f32 %v10252_v53, %v5780_v35  ;;  %v6057_v27 = vsub.f32 1.0, %v10252_v53  ;;  %v6063_v23 = vmul.f32 %v10252_v53, %v12328_v24  ;;  %v6123_v24 = vld [vmem:[%s12884_s12] sm:$0x1] }
0x438a   :  { %v6083_v56 = vmul.f32 %v10254_v16, %v5780_v35 }
0x438b   :  { %6052 = vrot.lane.b32.xlu1 %v6050_v34, %s10453_s3 }
0x438c   :  { %6085 = vrot.lane.b32.xlu0 %v6083_v56, %s10453_s3 }
0x43fd   :  { %v6053_v63 = vpop.permute.xlu1 %6052 }
0x43fe   :  { %v6086_v1 = vpop.permute.xlu0 %6085  ;;  %v6055_v15 = vadd.f32 %v6053_v63, %v6039_v29  ;;  %v6197_v29 = vld [vmem:[%s12886_s14] sm:$0xff] }
0x43ff   :  { %v6088_v19 = vadd.f32 %v6086_v1, %v6041_v41  ;;  %v6298_v1 = vld [vmem:[%s12887_s15] sm:$0xff] }
0x4400   :  { %10255 = vtanh.f32 %v6055_v15  ;;  %v6299_v15 = vld [vmem:[%s12887_s15 + $0x8] sm:$0xff] }
0x4401   :  { %10257 = vtanh.f32 %v6088_v19  ;;  %v9831_v19 = vpack.c.bf16 %v6299_v15, %v6298_v1  ;;  %v6640_v15 = vand.u32 (!%p7945_p11), 127, %v145_v57 }
0x4402   :  { %10259 = vpow2.f32 %v7934_v61 }
0x440a   :  { %v10256_v28 = vpop.eup %10255 }
0x440b   :  { %v10258_v17 = vpop.eup %10257  ;;  %6059 = vrot.lane.b32.xlu1 %v10256_v28, %s10456_s27 }
0x440c   :  { %6092 = vrot.lane.b32.xlu0 %v10258_v17, %s10456_s27  ;;  %v10260_v22 = vpop.eup %10259 }
0x440d   :  { %v6080_v37 = vadd.f32 1.0, %v10260_v22  ;;  %v6381_v22 = vld [vmem:[%s12888_s16 + $0x10] sm:$0xff] }
0x440f   :  { %10261 = vrcp.f32 %v6080_v37 }
0x4419   :  { %v10262_v9 = vpop.eup %10261 }
0x441a   :  { %v6090_v40 = vsub.f32 1.0, %v10262_v9  ;;  %v6096_v35 = vmul.f32 %v10262_v9, %v12323_v31  ;;  %v6383_v9 = vld [vmem:[%s12888_s16 + $0x20] sm:$0xff] }
0x447d   :  { %v6060_v30 = vpop.permute.xlu1 %6059 }
0x447e   :  { %v6093_v14 = vpop.permute.xlu0 %6092  ;;  %v6062_v8 = vmul.f32 %v6060_v30, %v6057_v27  ;;  %v6384_v27 = vld [vmem:[%s12888_s16 + $0x28] sm:$0xff] }
0x447f   :  { %v6095_v47 = vmul.f32 %v6093_v14, %v6090_v40  ;;  %v6468_v40 = vld [vmem:[%s12890_s18 + $0x20] sm:$0xff]  ;;  %v9840_v30 = vpack.c.bf16 %v6384_v27, %v6383_v9  ;;  %v6469_v14 = vld [vmem:[%s12890_s18 + $0x28] sm:$0xff] }
0x4480   :  { %v6064_v51 = vadd.f32 %v6063_v23, %v6062_v8  ;;  %v9852_v8 = vpack.c.bf16 %v6469_v14, %v6468_v40  ;;  %v6385_v23 = vld [vmem:[%s12888_s16 + $0x30] sm:$0xff] }
0x4481   :  { %v6097_v36 = vadd.f32 %v6096_v35, %v6095_v47  ;;  %v6386_v47 = vld [vmem:[%s12888_s16 + $0x38] sm:$0xff]  ;;  %v6470_v35 = vld [vmem:[%s12890_s18 + $0x30] sm:$0xff] }
0x4482   :  { %6099 = vrot.lane.b32.xlu1 %v6064_v51, %s10456_s27 }
0x4483   :  { %6103 = vrot.lane.b32.xlu0 %v6097_v36, %s10455_s7 }
0x44f4   :  { %v6100_v38 = vpop.permute.xlu1 %6099 }
0x44f5   :  { %v6104_v48 = vpop.permute.xlu0 %6103 }
0x44f6   :  { %v6106_v50 = vsel %vm463_vm2, %v6100_v38, %v6104_v48 }
0x44f7   :  { %8954 = vmatmul.mubr.msk.f32.vlgmr.msra.gmra.mrb[4].mxu0 %vm493_vm3, %v6106_v50 }
0x44f8   :  { %8967 = vmatprep.mubr.msk.f32.mxu0 %vm10457_vm1, %v10452_v0  ;;  %9832 = vmatpush3.bf16.msra.mxu0 %v9831_v19 }
0x44f9   :  { %9833 = vmatprep.subr.bf16.mxu0 %v10454_v25 }
0x45ca   :  { %v6193_v31 = vpop.f32.mrb[4].mxu0 }
0x45cb   :  { %v6194_v33 = vadd.f32 %v6193_v31, %v6123_v24  ;;  %v8955_v43 = vpop.f32.mrb[5].mxu0 }
0x45cd   :  { %v6202_v26 = vrot.slane %v6194_v33, %v10676_v59 }
0x45cf   :  { %v6203_v32 = vadd.f32 %v6202_v26, %v6197_v29  ;;  %v6204_v60 = vadd.f32 %v6202_v26, %v6198_v58  ;;  %v6387_v29 = vld [vmem:[%s12972_s25] sm:$0x1] }
0x45d0   :  { %v6472_v58 = vld [vmem:[%s12891_s19] sm:$0x1] }
0x45d1   :  { %10263 = vtanh.f32 %v6203_v32 }
0x45d2   :  { %10265 = vtanh.f32 %v6204_v60 }
0x45db   :  { %v10264_v20 = vpop.eup %10263 }
0x45dc   :  { %v10266_v2 = vpop.eup %10265 }
0x45dd   :  { %v9827_v42 = vpack.c.bf16 %v10266_v2, %v10264_v20 }
0x45df   :  { %9829 = vmatpush3.bf16.xpose.msk.msra.mxu1 %vm10865_vm4, %v9827_v42 }
0x45e0   :  { %9845 = vmatprep.subr.bf16.mxu1 %v10454_v25 }
0x45e6   :  { %8961 = vmatmul.mubr.msk.f32.vlgmr.msra.gmra.mrb[4].mxu1 %vm463_vm2, %v6207_v49 }
0x45e7   :  { %9005 = vmatprep.mubr.msk.f32.mxu1 %vm10457_vm1, %v10452_v0  ;;  %9847 = vmatpush3.bf16.msra.mxu1 %v9846_v54 }
0x45e8   :  { %9848 = vmatprep.subr.bf16.mxu1 %v10454_v25 }
0x45eb   :  { %9850 = vmatpush3.bf16.msra.mxu1 %v9849_v11 }
0x45ec   :  { %9851 = vmatprep.subr.bf16.mxu1 %v10454_v25 }
0x45ef   :  { %9853 = vmatpush3.bf16.msra.mxu1 %v9852_v8 }
0x45f0   :  { %9854 = vmatprep.subr.bf16.mxu1 %v10454_v25 }
0x46b9   :  { %v6283_v5 = vpop.f32.mrb[4].mxu1 }
0x46ba   :  { %v8962_v53 = vpop.f32.mrb[5].mxu1  ;;  %v6287_v16 = vsel %vm813_vm5, %v6283_v5, -inf }
0x46bb   :  { %6288 = vmax.xlane.f32.xlu1 %v6287_v16  ;;  %v6560_v53 = vld [vmem:[%s12973_s2] sm:$0xff] (!%p7945_p11)  ;;  %v6561_v16 = vld [vmem:[%s12973_s2 + $0x8] sm:$0xff] (!%p7945_p11) }
0x46cc   :  { %6110 = vrot.lane.b32.xlu1 %v6097_v36, %s10456_s27  ;;  %v6471_v36 = vld [vmem:[%s12890_s18 + $0x38] sm:$0xff] }
0x46cd   :  { %v9855_v38 = vpack.c.bf16 %v6471_v36, %v6470_v35 }
0x46cf   :  { %9856 = vmatpush3.bf16.msra.mxu1 %v9855_v38 }
0x4748   :  { %v6289_v34 = vpop.xlane.xlu1 %6288 }
0x4749   :  { %v6290_v56 = vsub.f32 %v6283_v5, %v6289_v34  ;;  %v10473_v34 = vmov (!%p7945_p11), 0.0|0.0  }
0x474b   :  { %v6291_v12 = vmul.f32 1.442695, %v6290_v56  ;;  %v9858_v56 = vpack.c.bf16 (!%p7945_p11), %v6561_v16, %v6560_v53 }
0x474c   :  { %v6111_v28 = vpop.permute.xlu1 %6110 }
0x474d   :  { %10267 = vpow2.f32 %v6291_v12  ;;  %v10475_v12 = vmov (!%p7945_p11), 0.0  }
0x4757   :  { %v10268_v41 = vpop.eup %10267 }
0x4758   :  { %v6293_v63 = vsel %vm813_vm5, %v10268_v41, 0.0 }
0x4759   :  { %6294 = vadd.xlane.f32.xlu0 %v6293_v63 }
0x476f   :  { %6107 = vrot.lane.b32.xlu0 %v6064_v51, %s10455_s7  ;;  %v9843_v51 = vpack.c.bf16 %v6386_v47, %v6385_v23 }
0x47e6   :  { %v6295_v13 = vpop.xlane.xlu0 %6294 }
0x47e7   :  { %10269 = vrcp.f32 %v6295_v13 }
0x47ea   :  { %v6108_v45 = vpop.permute.xlu0 %6107 }
0x47eb   :  { %v6113_v6 = vsel %vm493_vm3, %v12337_v52, %v6108_v45  ;;  %v6382_v52 = vld [vmem:[%s12888_s16 + $0x18] sm:$0xff] }
0x47ec   :  { %v12436_v17 = vsel %vm639_vm6, %v6113_v6, %v6111_v28  ;;  %v9837_v37 = vpack.c.bf16 %v6382_v52, %v6381_v22 }
0x47f1   :  { %v10270_v21 = vpop.eup %10269 }
0x47f2   :  { %v6297_v61 = vmul.f32 %v10270_v21, %v10268_v41 }
0x47f4   :  { %8968 = vmatmul.mubr.msk.f32.vlgmr.msra.gmra.mrb[6].mxu0 %vm317_vm0, %v6297_v61  ;;  %6548 = vst.msk [vmem:[#allocation12 + $0x5] sm:$0x1] %vm813_vm5, %v6297_v61 }
0x47f5   :  { %9835 = vmatpush3.bf16.msra.mxu0 %v9834_v4  ;;  %8986 = vmatprep.mubr.msk.f32.mxu0 %vm10457_vm1, %v10452_v0 }
0x47f6   :  { %9836 = vmatprep.subr.bf16.mxu0 %v10454_v25 }
0x47f9   :  { %9838 = vmatpush3.bf16.msra.mxu0 %v9837_v37 }
0x47fa   :  { %9839 = vmatprep.subr.bf16.mxu0 %v10454_v25 }
0x47fd   :  { %9841 = vmatpush3.bf16.msra.mxu0 %v9840_v30 }
0x47fe   :  { %9842 = vmatprep.subr.bf16.mxu0 %v10454_v25 }
0x4801   :  { %9844 = vmatpush3.bf16.msra.mxu0 %v9843_v51 }
0x4802   :  { %9857 = vmatprep.subr.bf16.mxu0 (!%p7945_p11), %v10473_v34 }
0x48c7   :  { %v6369_v48 = vpop.f32.mrb[6].mxu0 }
0x48c8   :  { %vm6373_vm9 = vcmp.gt.f32.partialorder %v6369_v48, 0.0  ;;  %v6374_v50 = vmul.f32 0.01, %v6369_v48  ;;  %v8969_v24 = vpop.f32.mrb[7].mxu0 }
0x48ca   :  { %v6375_v31 = vsel %vm6373_vm9, %v6369_v48, %v6374_v50 }
0x48cb   :  { %v6377_v33 = vmul.f32 0.01, %v6375_v31  ;;  %vm6376_vm11 = vcmp.gt.f32.partialorder %v6375_v31, 0.0 }
0x48cd   :  { %v6378_v43 = vsel %vm6376_vm11, %v6375_v31, %v6377_v33 }
0x48ce   :  { %8987 = vmatmul.mubr.msk.f32.vlgmr.msra.gmra.mrb[8].mxu0 %vm493_vm3, %v6378_v43  ;;  %9006 = vmatmul.mubr.msk.f32.vlgmr.msra.gmra.mrb[6].mxu1 %vm493_vm3, %v6378_v43 }
0x48cf   :  { %9012 = vmatprep.mubr.msk.f32.mxu0 (!%p7945_p11), %vm10474_vm13, %v10475_v12  ;;  %9859 = vmatpush3.bf16.msra.mxu0 (!%p7945_p11), %v9858_v56 }
0x49a1   :  { %v6457_v26 = vpop.f32.mrb[8].mxu0  ;;  %v6539_v32 = vpop.f32.mrb[6].mxu1  ;;  %6559 = sbr.rel (%p7945_p11) target bundleno = 19567 (0x4c6f), region = 125 }
0x49a2   :  { %v6458_v60 = vadd.f32 %v6457_v26, %v6387_v29  ;;  %v6540_v20 = vadd.f32 %v6539_v32, %v6472_v58  ;;  %v8988_v2 = vpop.f32.mrb[9].mxu0  ;;  %v9007_v42 = vpop.f32.mrb[7].mxu1 }
0x49a4   :  { %vm6461_vm12 = vcmp.gt.f32.partialorder %v6458_v60, 0.0  ;;  %v6462_v49 = vmul.f32 0.01, %v6458_v60  ;;  %6544 = vst.msk [vmem:[#allocation9 + $0x5] sm:$0x1] %vm813_vm5, %v6540_v20  ;;  %9013 = vmatmul.mubr.msk.f32.vlgmr.msra.gmra.mrb[0].mxu0 (!%p7945_p11), %vm317_vm0, %v6540_v20 }
0x49a6   :  { %v6463_v5 = vsel %vm6461_vm12, %v6458_v60, %v6462_v49 }
0x49a7   :  { %6546 = vst.msk [vmem:[#allocation10 + $0x5] sm:$0x1] %vm1071_vm10, %v6463_v5 }
0x4a77   :  { %v6631_v41 = vpop.f32.mrb[0].mxu0 }
0x4a78   :  { %v9014_v63 = vpop.f32.mrb[1].mxu0  ;;  %v6636_v1 = vsel %vm6635_vm14, %v6631_v41, -inf }
0x4a79   :  { %6637 = vmax.xlane.f32.xlu0 %v6636_v1 }
0x4b06   :  { %v6638_v19 = vpop.xlane.xlu0 %6637 }
0x4b07   :  { %vm6641_vm15 = vcmp.ge.f32.partialorder %v6631_v41, %v6638_v19 }
0x4b08   :  { %v6642_v46 = vsel %vm6641_vm15, %v6640_v15, 12 }
0x4b09   :  { %v6643_v44 = vsel %vm6635_vm14, %v6642_v46, 2147483647 }
0x4b0a   :  { %v6645_v54 = vshra.s32 %v6643_v44, 16  ;;  %v6644_v10 = vand.u32 65535, %v6643_v44 }
0x4b0c   :  { %v6647_v7 = vcvt.s32.f32 %v6645_v54  ;;  %v6646_v13 = vcvt.s32.f32 %v6644_v10 }
0x4b0e   :  { %6648 = vmin.xlane.f32.xlu0 %v6647_v7 }
0x4b9b   :  { %v6649_v11 = vpop.xlane.xlu0 %6648 }
0x4b9c   :  { %vm6650_vm7 = vcmp.eq.f32.partialorder %v6647_v7, %v6649_v11  ;;  %v6655_v28 = vcvt.f32.s32 %v6649_v11 }
0x4b9d   :  { %v6651_v45 = vsel %vm6650_vm7, %v6646_v13, inf }
0x4b9e   :  { %6652 = vmin.xlane.f32.xlu1 %v6651_v45  ;;  %v6656_v18 = vshll.u32 %v6655_v28, 16 }
0x4c2b   :  { %v6653_v6 = vpop.xlane.xlu1 %6652 }
0x4c2c   :  { %v6654_v3 = vcvt.f32.s32 %v6653_v6 }
0x4c2e   :  { %v6657_v21 = vadd.s32 %v6656_v18, %v6654_v3 }
0x4c30   :  { %v6658_v4 = vrot.slane %v6657_v21, 4 }
0x4c32   :  { %vm6659_vm8 = vcmp.lt.s32.totalorder %v6657_v21, %v6658_v4 }
0x4c33   :  { %v6660_v61 = vsel %vm6659_vm8, %v6657_v21, %v6658_v4 }
0x4c34   :  { %v6661_v22 = vrot.slane %v6660_v61, 2 }
0x4c36   :  { %vm6662_vm9 = vcmp.lt.s32.totalorder %v6660_v61, %v6661_v22 }
0x4c37   :  { %v6663_v52 = vsel %vm6662_vm9, %v6660_v61, %v6661_v22 }
0x4c38   :  { %v6664_v37 = vrot.slane %v6663_v52, 1 }
0x4c3a   :  { %vm6665_vm11 = vcmp.lt.s32.totalorder %v6663_v52, %v6664_v37 }
0x4c3b   :  { %v6666_v9 = vsel %vm6665_vm11, %v6663_v52, %v6664_v37 }
0x4c3c   :  { %9992 = vpush %v6666_v9 }
0x4c6d   :  { %s9993_s5 = spop %9992 }
0x4c6e   :  { %6668 = sst [smem:[#allocation2]] %s9993_s5 }
0x4c6f PF:  { %v6673_v27 = vld [vmem:[#allocation6 + $0x8] sm:$0xff]  ;;  %v6676_v40 = vld [vmem:[#allocation6 + $0x20] sm:$0xff]  ;;  %6801 = vmatprep.mubr.f32.mxu0 %v10452_v0  ;;  %9892 = vmatprep.subr.bf16.mxu1 %v10454_v25  ;;  %v6675_v8 = vld [vmem:[#allocation6 + $0x18] sm:$0xff]  ;;  %s12503_s6 = sld [smem:[#allocation5 + $0x6]]  ;;  %s7963_s0 = sld [smem:[#allocation4 + $0x7]] }
0x4c70   :  { %v6672_v30 = vld [vmem:[#allocation6] sm:$0xff]  ;;  %v9860_v14 = vpack.c.bf16 %v6676_v40, %v6673_v27  ;;  %v6679_v23 = vld [vmem:[#allocation6 + $0x38] sm:$0xff]  ;;  %v6682_v47 = vld [vmem:[#allocation6 + $0x50] sm:$0xff]  ;;  %9047 = vmatprep.mubr.msk.f32.mxu1 %vm10457_vm1, %v10452_v0  ;;  %s12508_s17 = sld [smem:[#allocation2]]  ;;  %s12974_s26 = sld [smem:[#allocation24_spill]] }
0x4c71   :  { %v9862_v35 = vpack.c.bf16 %v6675_v8, %v6672_v30  ;;  %v9864_v51 = vpack.c.bf16 %v6682_v47, %v6679_v23  ;;  %v6678_v36 = vld [vmem:[#allocation6 + $0x30] sm:$0xff]  ;;  %v6681_v38 = vld [vmem:[#allocation6 + $0x48] sm:$0xff]  ;;  %v6688_v50 = vld [vmem:[#allocation6 + $0x80] sm:$0xff]  ;;  %s12975_s5 = sld [smem:[#allocation21_spill]]  ;;  %s12976_s25 = sld [smem:[#allocation25_spill]] }
0x4c72   :  { %v6685_v48 = vld [vmem:[#allocation6 + $0x68] sm:$0xff]  ;;  %9861 = vmatprep.subr.bf16.mxu0 %v9860_v14  ;;  %v9866_v24 = vpack.c.bf16 %v6681_v38, %v6678_v36  ;;  %v6684_v33 = vld [vmem:[#allocation6 + $0x60] sm:$0xff]  ;;  %v6687_v43 = vld [vmem:[#allocation6 + $0x78] sm:$0xff]  ;;  %s12977_s9 = sld [smem:[#allocation26_spill]]  ;;  %s12978_s29 = sld [smem:[#allocation27_spill]] }
0x4c73   :  { %9863 = vmatpush1.bf16.msra.mxu0 %v9862_v35  ;;  %v9868_v31 = vpack.c.bf16 %v6688_v50, %v6685_v48  ;;  %v6691_v29 = vld [vmem:[#allocation6 + $0x98] sm:$0xff]  ;;  %v6694_v58 = vld [vmem:[#allocation6 + $0xb0] sm:$0xff]  ;;  %v9870_v26 = vpack.c.bf16 %v6687_v43, %v6684_v33  ;;  %v6693_v20 = vld [vmem:[#allocation6 + $0xa8] sm:$0xff] }
0x4c74   :  { %9865 = vmatprep.subr.bf16.mxu0 %v9864_v51  ;;  %v9872_v32 = vpack.c.bf16 %v6694_v58, %v6691_v29  ;;  %v6690_v60 = vld [vmem:[#allocation6 + $0x90] sm:$0xff]  ;;  %v6697_v2 = vld [vmem:[#allocation6 + $0xc8] sm:$0xff]  ;;  %v6700_v42 = vld [vmem:[#allocation6 + $0xe0] sm:$0xff] }
0x4c75   :  { %p10016_p12 = scmp.eq.s32.totalorder %s12503_s6, 1  ;;  %v9874_v49 = vpack.c.bf16 %v6693_v20, %v6690_v60  ;;  %v9876_v5 = vpack.c.bf16 %v6700_v42, %v6697_v2  ;;  %v6696_v53 = vld [vmem:[#allocation6 + $0xc0] sm:$0xff]  ;;  %v6699_v16 = vld [vmem:[#allocation6 + $0xd8] sm:$0xff]  ;;  %v6706_v56 = vld [vmem:[#allocation6 + $0x110] sm:$0xff]  ;;  %p7964_p13 = scmp.ne.s32.totalorder %s12503_s6, 0 }
0x4c76   :  { %v6703_v34 = vld [vmem:[#allocation6 + $0xf8] sm:$0xff]  ;;  %v9878_v12 = vpack.c.bf16 %v6699_v16, %v6696_v53  ;;  %v6702_v63 = vld [vmem:[#allocation6 + $0xf0] sm:$0xff]  ;;  %v6705_v1 = vld [vmem:[#allocation6 + $0x108] sm:$0xff] }
0x4c77   :  { %9867 = vmatpush1.bf16.msra.mxu0 %v9866_v24  ;;  %10009 = sst [smem:[#allocation2]] (%p10016_p12), %s7963_s0  ;;  %v9880_v41 = vpack.c.bf16 %v6706_v56, %v6703_v34  ;;  %v6709_v15 = vld [vmem:[#allocation6 + $0x128] sm:$0xff]  ;;  %v6712_v19 = vld [vmem:[#allocation6 + $0x140] sm:$0xff]  ;;  %v9882_v46 = vpack.c.bf16 %v6705_v1, %v6702_v63  ;;  %v6711_v7 = vld [vmem:[#allocation6 + $0x138] sm:$0xff]  ;;  %s6670_s0 = scalar_lea.vmem %s12975_s5, %s12508_s17 }
0x4c78   :  { %9869 = vmatprep.subr.bf16.mxu0 %v9868_v31  ;;  %v9884_v44 = vpack.c.bf16 %v6712_v19, %v6709_v15  ;;  %v6708_v54 = vld [vmem:[#allocation6 + $0x120] sm:$0xff]  ;;  %v6715_v10 = vld [vmem:[#allocation6 + $0x158] sm:$0xff]  ;;  %v6718_v11 = vld [vmem:[#allocation6 + $0x170] sm:$0xff] }
0x4c79   :  { %v9886_v13 = vpack.c.bf16 %v6711_v7, %v6708_v54  ;;  %v9888_v45 = vpack.c.bf16 %v6718_v11, %v6715_v10  ;;  %v6714_v28 = vld [vmem:[#allocation6 + $0x150] sm:$0xff]  ;;  %v6717_v6 = vld [vmem:[#allocation6 + $0x168] sm:$0xff]  ;;  %v6881_v3 = vld [vmem:[%s12974_s26 + $0x18] sm:$0xff] }
0x4c7a   :  { %v6879_v18 = vld [vmem:[%s12974_s26 + $0x8] sm:$0xff]  ;;  %v9890_v21 = vpack.c.bf16 %v6717_v6, %v6714_v28  ;;  %v6878_v61 = vld [vmem:[%s12974_s26] sm:$0xff]  ;;  %v6880_v22 = vld [vmem:[%s12974_s26 + $0x10] sm:$0xff] }
0x4c7b   :  { %9871 = vmatpush1.bf16.msra.mxu0 %v9870_v26  ;;  %v9916_v4 = vpack.c.bf16 %v6881_v3, %v6879_v18  ;;  %v9918_v52 = vpack.c.bf16 %v6880_v22, %v6878_v61  ;;  %v6671_v37 = vld [vmem:[%s6670_s0] sm:$0x1]  ;;  %v6674_v20 = vld [vmem:[#allocation6 + $0x10] sm:$0xff]  ;;  %v6677_v2 = vld [vmem:[#allocation6 + $0x28] sm:$0xff]  ;;  %s12980_s0 = sld [smem:[#allocation22_spill]] (!%p7964_p13) }
0x4c7c   :  { %9873 = vmatprep.subr.bf16.mxu0 %v9872_v32  ;;  %v12535_v9 = vld [vmem:[%s12882_s10] sm:$0x7]  ;;  %v6686_v16 = vld [vmem:[#allocation6 + $0x70] sm:$0xff]  ;;  %v6689_v34 = vld [vmem:[#allocation6 + $0x88] sm:$0xff] }
0x4c7d   :  { %v6725_v27 = vrot.slane %v12535_v9, %v10676_v59  ;;  %v6882_v40 = vld [vmem:[%s12976_s25] sm:$0x3]  ;;  %v6729_v8 = vrot.slane %v12535_v9, %v10686_v62  ;;  %v9899_v56 = vpack.c.bf16 %v6689_v34, %v6686_v16  ;;  %v6698_v1 = vld [vmem:[#allocation6 + $0xd0] sm:$0xff]  ;;  %v6701_v15 = vld [vmem:[#allocation6 + $0xe8] sm:$0xff] }
0x4c7e   :  { %v6891_v47 = vrot.slane %v6882_v40, %v10686_v62  ;;  %v6887_v48 = vrot.slane %v6882_v40, %v10676_v59  ;;  %v6680_v42 = vld [vmem:[#allocation6 + $0x40] sm:$0xff]  ;;  %v9905_v19 = vpack.c.bf16 %v6701_v15, %v6698_v1  ;;  %v6710_v7 = vld [vmem:[#allocation6 + $0x130] sm:$0xff]  ;;  %v6713_v10 = vld [vmem:[#allocation6 + $0x148] sm:$0xff] }
0x4c7f   :  { %9875 = vmatpush1.bf16.msra.mxu0 %v9874_v49  ;;  %v9893_v49 = vpack.c.bf16 %v6677_v2, %v6674_v20  ;;  %v6716_v28 = vld [vmem:[#allocation6 + $0x160] sm:$0xff]  ;;  %v6719_v6 = vld [vmem:[#allocation6 + $0x178] sm:$0xff]  ;;  %v7049_v20 = vld [vmem:[%s12977_s9 + $0x68] sm:$0xff] }
0x4c80   :  { %9877 = vmatprep.subr.bf16.mxu0 %v9876_v5  ;;  %v6683_v5 = vld [vmem:[#allocation6 + $0x58] sm:$0xff]  ;;  %v9914_v3 = vpack.c.bf16 %v6719_v6, %v6716_v28  ;;  %v7036_v22 = vld [vmem:[%s12977_s9] sm:$0xff] }
0x4c81   :  { %9894 = vmatpush3.bf16.msra.mxu1 %v9893_v49  ;;  %v9896_v53 = vpack.c.bf16 %v6683_v5, %v6680_v42  ;;  %v7039_v61 = vld [vmem:[%s12977_s9 + $0x18] sm:$0xff]  ;;  %v7048_v49 = vld [vmem:[%s12977_s9 + $0x60] sm:$0xff] }
0x4c82   :  { %9895 = vmatprep.subr.bf16.mxu1 %v10454_v25  ;;  %v7051_v2 = vld [vmem:[%s12977_s9 + $0x78] sm:$0xff] }
0x4c83   :  { %9879 = vmatpush1.bf16.msra.mxu0 %v9878_v12  ;;  %v6692_v12 = vld [vmem:[#allocation6 + $0xa0] sm:$0xff]  ;;  %v9932_v42 = vpack.c.bf16 %v7051_v2, %v7049_v20 }
0x4c84   :  { %9881 = vmatprep.subr.bf16.mxu0 %v9880_v41  ;;  %v6695_v41 = vld [vmem:[#allocation6 + $0xb8] sm:$0xff] }
0x4c85   :  { %9897 = vmatpush3.bf16.msra.mxu1 %v9896_v53  ;;  %v9902_v63 = vpack.c.bf16 %v6695_v41, %v6692_v12 }
0x4c86   :  { %9898 = vmatprep.subr.bf16.mxu1 %v10454_v25 }
0x4c87   :  { %9883 = vmatpush1.bf16.msra.mxu0 %v9882_v46  ;;  %v6704_v46 = vld [vmem:[#allocation6 + $0x100] sm:$0xff] }
0x4c88   :  { %9885 = vmatprep.subr.bf16.mxu0 %v9884_v44  ;;  %v6707_v44 = vld [vmem:[#allocation6 + $0x118] sm:$0xff] }
0x4c89   :  { %9900 = vmatpush3.bf16.msra.mxu1 %v9899_v56  ;;  %v9908_v54 = vpack.c.bf16 %v6707_v44, %v6704_v46 }
0x4c8a   :  { %9901 = vmatprep.subr.bf16.mxu1 %v10454_v25 }
0x4c8b   :  { %9887 = vmatpush1.bf16.msra.mxu0 %v9886_v13  ;;  %v9911_v13 = vpack.c.bf16 %v6713_v10, %v6710_v7 }
0x4c8c   :  { %9889 = vmatprep.subr.bf16.mxu0 %v9888_v45 }
0x4c8d   :  { %9903 = vmatpush3.bf16.msra.mxu1 %v9902_v63 }
0x4c8e   :  { %9904 = vmatprep.subr.bf16.mxu1 %v10454_v25 }
0x4c8f   :  { %9891 = vmatpush1.bf16.msra.mxu0 %v9890_v21 }
0x4c90   :  { %9917 = vmatprep.subr.bf16.mxu0 %v9916_v4  ;;  %v7037_v4 = vld [vmem:[%s12977_s9 + $0x8] sm:$0xff] }
0x4c91   :  { %9906 = vmatpush3.bf16.msra.mxu1 %v9905_v19 }
0x4c92   :  { %6802 = vmatmul.mubr.f32.vlgmr.msra.gmra.mrb[0].mxu0 %v12436_v17  ;;  %9907 = vmatprep.subr.bf16.mxu1 %v10454_v25 }
0x4c93   :  { %9919 = vmatpush1.bf16.msra.mxu0 %v9918_v52  ;;  %6961 = vmatprep.mubr.f32.mxu0 %v10452_v0  ;;  %v9920_v52 = vpack.c.bf16 %v7039_v61, %v7037_v4 }
0x4c94   :  { %9936 = vmatprep.subr.bf16.mxu0 %v10454_v25 }
0x4c95   :  { %9909 = vmatpush3.bf16.msra.mxu1 %v9908_v54  ;;  %v6733_v54 = vrot.slane %v12535_v9, %v10795_v39  ;;  %v7052_v39 = vld [vmem:[%s12978_s29] sm:$0x3]  ;;  %s12979_s29 = sld [smem:[#allocation28_spill]] }
0x4c96   :  { %7947 = vmatmul.mubr.msk.f32.vlgmr.msra.gmra.mrb[2].mxu0 %vm317_vm0, %v6671_v37  ;;  %9910 = vmatprep.subr.bf16.mxu1 %v10454_v25  ;;  %v7038_v37 = vld [vmem:[%s12977_s9 + $0x10] sm:$0xff]  ;;  %v7057_v9 = vrot.slane %v7052_v39, %v10676_v59 }
0x4c97   :  { %9066 = vmatprep.mubr.msk.f32.mxu0 %vm10457_vm1, %v10452_v0  ;;  %v9922_v40 = vpack.c.bf16 %v7038_v37, %v7036_v22 }
0x4c99   :  { %9912 = vmatpush3.bf16.msra.mxu1 %v9911_v13 }
0x4c9a   :  { %9913 = vmatprep.subr.bf16.mxu1 %v10454_v25 }
0x4c9d   :  { %9915 = vmatpush3.bf16.msra.mxu1 %v9914_v3 }
0x4c9e   :  { %9921 = vmatprep.subr.bf16.mxu1 %v9920_v52 }
0x4ca0   :  { %9048 = vmatmul.mubr.f32.vlgmr.msra.gmra.mrb[0].mxu1 %v12436_v17 }
0x4ca1   :  { %7131 = vmatprep.mubr.f32.mxu1 %v10452_v0  ;;  %9923 = vmatpush1.bf16.msra.mxu1 %v9922_v40 }
0x4d65   :  { %v6803_v30 = vpop.f32.mrb[0].mxu0 }
0x4d66   :  { %v6804_v14 = vadd.f32 %v6803_v30, %v6725_v27  ;;  %v6805_v23 = vpop.f32.mrb[1].mxu0  ;;  %v7043_v27 = vld [vmem:[%s12977_s9 + $0x38] sm:$0xff] }
0x4d67   :  { %v12546_v51 = vadd.f32 %v6805_v23, %v6729_v8  ;;  %v7042_v8 = vld [vmem:[%s12977_s9 + $0x30] sm:$0xff]  ;;  %v7045_v23 = vld [vmem:[%s12977_s9 + $0x48] sm:$0xff] }
0x4d68   :  { %6976 = vrot.lane.b32.xlu0 %v6804_v14, %s10453_s3 }
0x4d69   :  { %v6963_v35 = vpop.f32.mrb[2].mxu0 }
0x4d6a   :  { %v6965_v36 = vpop.f32.mrb[3].mxu0  ;;  %v6964_v50 = vadd.f32 %v6963_v35, %v6887_v48 }
0x4d6b   :  { %v12548_v38 = vadd.f32 %v6965_v36, %v6891_v47  ;;  %v7047_v47 = vld [vmem:[%s12977_s9 + $0x58] sm:$0xff] }
0x4d6c   :  { %7006 = vrot.lane.b32.xlu0 %v12546_v51, %s10453_s3  ;;  %v6968_v24 = vadd.f32 %v6964_v50, %v6804_v14  ;;  %v7040_v14 = vld [vmem:[%s12977_s9 + $0x20] sm:$0xff]  ;;  %v9928_v48 = vpack.c.bf16 %v7047_v47, %v7045_v23 }
0x4d6d   :  { %v9926_v36 = vpack.c.bf16 %v7042_v8, %v7040_v14 }
0x4d6e   :  { %v7948_v31 = vmul.f32 -1.442695, %v6968_v24  ;;  %v7046_v24 = vld [vmem:[%s12977_s9 + $0x50] sm:$0xff] }
0x4d70   :  { %10271 = vpow2.f32 %v7948_v31 }
0x4d73   :  { %v6874_v7 = vpop.f32.mrb[0].mxu1 }
0x4d74   :  { %v6875_v10 = vadd.f32 %v6874_v7, %v6733_v54 }
0x4d7a   :  { %v10272_v33 = vpop.eup %10271 }
0x4d7b   :  { %v6972_v43 = vadd.f32 1.0, %v10272_v33 }
0x4d7d   :  { %10273 = vrcp.f32 %v6972_v43  ;;  %v6998_v43 = vadd.f32 %v12548_v38, %v12546_v51  ;;  %v7050_v51 = vld [vmem:[%s12977_s9 + $0x70] sm:$0xff] }
0x4d87   :  { %v12553_v29 = vpop.eup %10273 }
0x4d88   :  { %v6986_v53 = vsub.f32 1.0, %v12553_v29 }
0x4dda   :  { %v6977_v58 = vpop.permute.xlu0 %6976 }
0x4ddb   :  { %v6979_v26 = vmul.f32 %v12553_v29, %v6977_v58  ;;  %v7949_v58 = vmul.f32 -1.442695, %v6998_v43 }
0x4ddd   :  { %6981 = vrot.lane.b32.xlu1 %v6979_v26, %s10453_s3 }
0x4dde   :  { %v12557_v32 = vpop.permute.xlu0 %7006 }
0x4ddf   :  { %v7009_v60 = vmul.f32 %v12553_v29, %v12557_v32 }
0x4de1   :  { %7011 = vrot.lane.b32.xlu1 %v7009_v60, %s10453_s3 }
0x4de5   :  { %6993 = vrot.lane.b32.xlu1 %v12436_v17, %s10455_s7 }
0x4de9   :  { %7022 = vrot.lane.b32.xlu1 %v12436_v17, %s10456_s27  ;;  %v7041_v17 = vld [vmem:[%s12977_s9 + $0x28] sm:$0xff] }
0x4dea   :  { %v9924_v30 = vpack.c.bf16 %v7043_v27, %v7041_v17 }
0x4dec   :  { %9925 = vmatprep.subr.bf16.mxu1 %v9924_v30 }
0x4ded   :  { %9927 = vmatpush1.bf16.msra.mxu1 %v9926_v36 }
0x4dee   :  { %9929 = vmatprep.subr.bf16.mxu1 %v9928_v48 }
0x4e4f   :  { %v6982_v11 = vpop.permute.xlu1 %6981 }
0x4e50   :  { %v6984_v45 = vadd.f32 %v6982_v11, %v6964_v50  ;;  %v7044_v50 = vld [vmem:[%s12977_s9 + $0x40] sm:$0xff] }
0x4e51   :  { %v9930_v33 = vpack.c.bf16 %v7046_v24, %v7044_v50  ;;  %v7210_v50 = vld [vmem:[%s12883_s11] sm:$0xff]  ;;  %v7211_v24 = vld [vmem:[%s12883_s11 + $0x8] sm:$0xff] }
0x4e52   :  { %10275 = vtanh.f32 %v6984_v45 }
0x4e53   :  { %v7012_v18 = vpop.permute.xlu1 %7011  ;;  %9931 = vmatpush1.bf16.msra.mxu1 %v9930_v33  ;;  %v7213_v33 = vld [vmem:[%s12883_s11 + $0x18] sm:$0xff] }
0x4e54   :  { %v7014_v21 = vadd.f32 %v7012_v18, %v12548_v38  ;;  %v9934_v38 = vpack.c.bf16 %v7050_v51, %v7048_v49  ;;  %9933 = vmatprep.subr.bf16.mxu1 %v9932_v42  ;;  %v7216_v42 = vld [vmem:[%s12883_s11 + $0x30] sm:$0xff]  ;;  %v7217_v49 = vld [vmem:[%s12883_s11 + $0x38] sm:$0xff] }
0x4e55   :  { %v9946_v51 = vpack.c.bf16 %v7217_v49, %v7216_v42  ;;  %v7476_v49 = vld [vmem:[%s12888_s16 + $0x10] sm:$0xff] }
0x4e56   :  { %10277 = vtanh.f32 %v7014_v21 }
0x4e57   :  { %10279 = vpow2.f32 %v7949_v58  ;;  %9935 = vmatpush1.bf16.msra.mxu1 %v9934_v38  ;;  %v12629_v5 = vpop.permute.xlu1 %6993  ;;  %v7214_v58 = vld [vmem:[%s12883_s11 + $0x20] sm:$0xff] }
0x4e58   :  { %9948 = vmatprep.subr.bf16.mxu1 %v10454_v25  ;;  %v6996_v56 = vmul.f32 %v12553_v29, %v12629_v5  ;;  %v9049_v29 = vpop.f32.mrb[1].mxu1 }
0x4e5b   :  { %v12634_v41 = vpop.permute.xlu1 %7022 }
0x4e5c   :  { %v10276_v35 = vpop.eup %10275 }
0x4e5d   :  { %6988 = vrot.lane.b32.xlu0 %v10276_v35, %s10456_s27 }
0x4e60   :  { %v10278_v31 = vpop.eup %10277 }
0x4e61   :  { %7018 = vrot.lane.b32.xlu0 %v10278_v31, %s10456_s27  ;;  %v10280_v26 = vpop.eup %10279  ;;  %v7212_v31 = vld [vmem:[%s12883_s11 + $0x10] sm:$0xff] }
0x4e62   :  { %v7002_v60 = vadd.f32 1.0, %v10280_v26  ;;  %v9940_v43 = vpack.c.bf16 %v7213_v33, %v7212_v31  ;;  %v7215_v26 = vld [vmem:[%s12883_s11 + $0x28] sm:$0xff] }
0x4e63   :  { %v9943_v20 = vpack.c.bf16 %v7215_v26, %v7214_v58  ;;  %v7474_v26 = vld [vmem:[%s12888_s16] sm:$0xff] }
0x4e64   :  { %10281 = vrcp.f32 %v7002_v60 }
0x4e6e   :  { %v10282_v16 = vpop.eup %10281 }
0x4e6f   :  { %v7016_v63 = vsub.f32 1.0, %v10282_v16  ;;  %v7025_v19 = vmul.f32 %v10282_v16, %v12634_v41 }
0x4ecf   :  { %v6989_v34 = vpop.permute.xlu0 %6988 }
0x4ed0   :  { %v6991_v12 = vmul.f32 %v6989_v34, %v6986_v53 }
0x4ed2   :  { %v6997_v1 = vadd.f32 %v6996_v56, %v6991_v12 }
0x4ed3   :  { %v7019_v15 = vpop.permute.xlu0 %7018 }
0x4ed4   :  { %v7021_v46 = vmul.f32 %v7019_v15, %v7016_v63  ;;  %7028 = vrot.lane.b32.xlu0 %v6997_v1, %s10456_s27 }
0x4ed6   :  { %v7026_v44 = vadd.f32 %v7025_v19, %v7021_v46 }
0x4ed8   :  { %7032 = vrot.lane.b32.xlu1 %v7026_v44, %s10455_s7  ;;  %7161 = vrot.lane.b32.xlu0 %v6875_v10, %s10453_s3 }
0x4f46   :  { %v7029_v11 = vpop.permute.xlu0 %7028 }
0x4f4a   :  { %v7033_v13 = vpop.permute.xlu1 %7032  ;;  %v7162_v6 = vpop.permute.xlu0 %7161 }
0x4f4b   :  { %v12643_v45 = vsel %vm463_vm2, %v7029_v11, %v7033_v13 }
0x4f4c   :  { %7950 = vmatmul.mubr.msk.f32.vlgmr.msra.gmra.mrb[2].mxu1 %vm493_vm3, %v12643_v45 }
0x4f4d   :  { %9073 = vmatprep.mubr.msk.f32.mxu1 %vm10457_vm1, %v10452_v0 }
0x501f   :  { %v7133_v28 = vpop.f32.mrb[2].mxu1 }
0x5020   :  { %v7134_v18 = vadd.f32 %v7133_v28, %v7057_v9  ;;  %v7135_v3 = vpop.f32.mrb[3].mxu1  ;;  %v7292_v28 = vld [vmem:[%s12886_s14] sm:$0xff] }
0x5022   :  { %v7138_v21 = vadd.f32 %v7134_v18, %v12557_v32  ;;  %v7164_v4 = vadd.f32 %v7162_v6, %v7134_v18  ;;  %v7061_v32 = vrot.slane %v7052_v39, %v10686_v62  ;;  %v9937_v62 = vpack.c.bf16 %v7211_v24, %v7210_v50  ;;  %v7562_v50 = vld [vmem:[%s12890_s18 + $0x18] sm:$0xff] }
0x5024   :  { %v7951_v61 = vmul.f32 -1.442695, %v7138_v21  ;;  %v7952_v22 = vmul.f32 -1.442695, %v7164_v4  ;;  %v7136_v23 = vadd.f32 %v7135_v3, %v7061_v32  ;;  %9938 = vmatpush3.bf16.msra.mxu0 %v9937_v62  ;;  %v7394_v32 = vld [vmem:[%s12887_s15 + $0x8] sm:$0xff] }
0x5025   :  { %9939 = vmatprep.subr.bf16.mxu0 %v10454_v25 }
0x5026   :  { %10283 = vpow2.f32 %v7951_v61  ;;  %v7171_v38 = vadd.f32 %v7162_v6, %v7136_v23  ;;  %v7293_v6 = vld [vmem:[%s12886_s14 + $0x8] sm:$0xff] }
0x5027   :  { %10285 = vpow2.f32 %v7952_v22 }
0x5028   :  { %9941 = vmatpush3.bf16.msra.mxu0 %v9940_v43  ;;  %v7953_v53 = vmul.f32 -1.442695, %v7171_v38  ;;  %v7478_v38 = vld [vmem:[%s12888_s16 + $0x20] sm:$0xff] }
0x5029   :  { %9942 = vmatprep.subr.bf16.mxu0 %v10454_v25 }
0x502c   :  { %9944 = vmatpush3.bf16.msra.mxu0 %v9943_v20 }
0x502d   :  { %9945 = vmatprep.subr.bf16.mxu0 %v10454_v25 }
0x5030   :  { %v10284_v52 = vpop.eup %10283  ;;  %9947 = vmatpush3.bf16.msra.mxu0 %v9946_v51 }
0x5031   :  { %v10286_v37 = vpop.eup %10285  ;;  %v7142_v17 = vadd.f32 1.0, %v10284_v52  ;;  %9952 = vmatprep.subr.bf16.mxu0 %v10454_v25  ;;  %v7302_v52 = vld [vmem:[%s12885_s13] sm:$0x1] }
0x5032   :  { %v7168_v27 = vadd.f32 1.0, %v10286_v37 }
0x5033   :  { %10287 = vrcp.f32 %v7142_v17 }
0x5034   :  { %10289 = vrcp.f32 %v7168_v27 }
0x503d   :  { %v10288_v40 = vpop.eup %10287 }
0x503e   :  { %v10290_v30 = vpop.eup %10289  ;;  %v7145_v14 = vmul.f32 %v10288_v40, %v6875_v10  ;;  %v7152_v12 = vsub.f32 1.0, %v10288_v40  ;;  %v7158_v46 = vmul.f32 %v10288_v40, %v12634_v41  ;;  %v7218_v41 = vld [vmem:[%s12884_s12] sm:$0x1] }
0x503f   :  { %v7178_v8 = vmul.f32 %v10290_v30, %v6875_v10 }
0x5040   :  { %7147 = vrot.lane.b32.xlu1 %v7145_v14, %s10453_s3 }
0x5041   :  { %7180 = vrot.lane.b32.xlu0 %v7178_v8, %s10453_s3  ;;  %v7393_v8 = vld [vmem:[%s12887_s15] sm:$0xff] }
0x50b2   :  { %v7148_v47 = vpop.permute.xlu1 %7147 }
0x50b3   :  { %v7181_v35 = vpop.permute.xlu0 %7180  ;;  %v7150_v36 = vadd.f32 %v7148_v47, %v7134_v18  ;;  %v7559_v47 = vld [vmem:[%s12890_s18] sm:$0xff] }
0x50b4   :  { %v7183_v48 = vadd.f32 %v7181_v35, %v7136_v23  ;;  %v9953_v23 = vpack.c.bf16 %v7394_v32, %v7393_v8  ;;  %v7560_v35 = vld [vmem:[%s12890_s18 + $0x8] sm:$0xff] }
0x50b5   :  { %10291 = vtanh.f32 %v7150_v36  ;;  %v9968_v36 = vpack.c.bf16 %v7560_v35, %v7559_v47 }
0x50b6   :  { %10293 = vtanh.f32 %v7183_v48  ;;  %v7561_v48 = vld [vmem:[%s12890_s18 + $0x10] sm:$0xff] }
0x50b7   :  { %10295 = vpow2.f32 %v7953_v53  ;;  %v9971_v24 = vpack.c.bf16 %v7562_v50, %v7561_v48  ;;  %v7479_v53 = vld [vmem:[%s12888_s16 + $0x28] sm:$0xff] }
0x50bf   :  { %v10292_v60 = vpop.eup %10291 }
0x50c0   :  { %v10294_v2 = vpop.eup %10293  ;;  %7154 = vrot.lane.b32.xlu1 %v10292_v60, %s10456_s27  ;;  %v7475_v60 = vld [vmem:[%s12888_s16 + $0x8] sm:$0xff] }
0x50c1   :  { %7187 = vrot.lane.b32.xlu0 %v10294_v2, %s10456_s27  ;;  %v10296_v16 = vpop.eup %10295  ;;  %v9956_v2 = vpack.c.bf16 %v7475_v60, %v7474_v26 }
0x50c2   :  { %v7175_v34 = vadd.f32 1.0, %v10296_v16  ;;  %v7563_v16 = vld [vmem:[%s12890_s18 + $0x20] sm:$0xff] }
0x50c4   :  { %10297 = vrcp.f32 %v7175_v34  ;;  %v9962_v34 = vpack.c.bf16 %v7479_v53, %v7478_v38 }
0x50ce   :  { %v10298_v56 = vpop.eup %10297 }
0x50cf   :  { %v7185_v63 = vsub.f32 1.0, %v10298_v56  ;;  %v7191_v54 = vmul.f32 %v10298_v56, %v12629_v5 }
0x5132   :  { %v7155_v1 = vpop.permute.xlu1 %7154 }
0x5133   :  { %v7188_v15 = vpop.permute.xlu0 %7187  ;;  %v7157_v19 = vmul.f32 %v7155_v1, %v7152_v12  ;;  %v7480_v12 = vld [vmem:[%s12888_s16 + $0x30] sm:$0xff] }
0x5134   :  { %v7190_v44 = vmul.f32 %v7188_v15, %v7185_v63  ;;  %v7481_v63 = vld [vmem:[%s12888_s16 + $0x38] sm:$0xff]  ;;  %v7565_v1 = vld [vmem:[%s12890_s18 + $0x30] sm:$0xff] }
0x5135   :  { %v7159_v7 = vadd.f32 %v7158_v46, %v7157_v19  ;;  %v9965_v15 = vpack.c.bf16 %v7481_v63, %v7480_v12  ;;  %v7566_v19 = vld [vmem:[%s12890_s18 + $0x38] sm:$0xff] }
0x5136   :  { %v7192_v10 = vadd.f32 %v7191_v54, %v7190_v44  ;;  %v9977_v46 = vpack.c.bf16 %v7566_v19, %v7565_v1 }
0x5137   :  { %7194 = vrot.lane.b32.xlu1 %v7159_v7, %s10456_s27 }
0x5138   :  { %7198 = vrot.lane.b32.xlu0 %v7192_v10, %s10455_s7 }
0x51a9   :  { %v7195_v29 = vpop.permute.xlu1 %7194 }
0x51aa   :  { %v7199_v11 = vpop.permute.xlu0 %7198 }
0x51ab   :  { %v7201_v13 = vsel %vm463_vm2, %v7195_v29, %v7199_v11 }
0x51ac   :  { %9067 = vmatmul.mubr.msk.f32.vlgmr.msra.gmra.mrb[4].mxu0 %vm493_vm3, %v7201_v13  ;;  %v7567_v13 = vld [vmem:[%s12891_s19] sm:$0x1] }
0x51ad   :  { %9080 = vmatprep.mubr.msk.f32.mxu0 %vm10457_vm1, %v10452_v0  ;;  %9954 = vmatpush3.bf16.msra.mxu0 %v9953_v23 }
0x51ae   :  { %9955 = vmatprep.subr.bf16.mxu0 %v10454_v25 }
0x527f   :  { %v7288_v5 = vpop.f32.mrb[4].mxu0 }
0x5280   :  { %v7289_v39 = vadd.f32 %v7288_v5, %v7218_v41  ;;  %v9068_v9 = vpop.f32.mrb[5].mxu0 }
0x5282   :  { %v7297_v18 = vrot.slane %v7289_v39, %v10676_v59 }
0x5284   :  { %v7298_v3 = vadd.f32 %v7297_v18, %v7292_v28  ;;  %v7299_v21 = vadd.f32 %v7297_v18, %v7293_v6 }
0x5286   :  { %10299 = vtanh.f32 %v7298_v3 }
0x5287   :  { %10301 = vtanh.f32 %v7299_v21  ;;  %v7655_v21 = vld [vmem:[%s12980_s0] sm:$0xff] (!%p7964_p13) }
0x5290   :  { %v10300_v4 = vpop.eup %10299 }
0x5291   :  { %v10302_v61 = vpop.eup %10301 }
0x5292   :  { %v9949_v22 = vpack.c.bf16 %v10302_v61, %v10300_v4  ;;  %v7656_v4 = vld [vmem:[%s12980_s0 + $0x8] sm:$0xff] (!%p7964_p13)  ;;  %v10476_v61 = vmov (!%p7964_p13), 0.0|0.0  }
0x5294   :  { %9951 = vmatpush3.bf16.xpose.msk.msra.mxu1 %vm10865_vm4, %v9949_v22  ;;  %v9980_v22 = vpack.c.bf16 (!%p7964_p13), %v7656_v4, %v7655_v21 }
0x5295   :  { %9967 = vmatprep.subr.bf16.mxu1 %v10454_v25 }
0x529b   :  { %9074 = vmatmul.mubr.msk.f32.vlgmr.msra.gmra.mrb[4].mxu1 %vm463_vm2, %v7302_v52  ;;  %v10478_v52 = vmov (!%p7964_p13), 0.0  }
0x529c   :  { %9118 = vmatprep.mubr.msk.f32.mxu1 %vm10457_vm1, %v10452_v0  ;;  %9969 = vmatpush3.bf16.msra.mxu1 %v9968_v36 }
0x529d   :  { %9970 = vmatprep.subr.bf16.mxu1 %v10454_v25 }
0x52a0   :  { %9972 = vmatpush3.bf16.msra.mxu1 %v9971_v24 }
0x52a1   :  { %9973 = vmatprep.subr.bf16.mxu1 %v10454_v25 }
0x536e   :  { %v7378_v59 = vpop.f32.mrb[4].mxu1 }
0x536f   :  { %v9075_v37 = vpop.f32.mrb[5].mxu1  ;;  %v7382_v17 = vsel %vm813_vm5, %v7378_v59, -inf }
0x5370   :  { %7383 = vmax.xlane.f32.xlu1 %v7382_v17 }
0x5381   :  { %7205 = vrot.lane.b32.xlu1 %v7192_v10, %s10456_s27 }
0x53fd   :  { %v7384_v55 = vpop.xlane.xlu1 %7383 }
0x53fe   :  { %v7385_v27 = vsub.f32 %v7378_v59, %v7384_v55  ;;  %v7735_v55 = vand.u32 (!%p7964_p13), 127, %v145_v57 }
0x5400   :  { %v7386_v40 = vmul.f32 1.442695, %v7385_v27 }
0x5401   :  { %v7206_v33 = vpop.permute.xlu1 %7205 }
0x5402   :  { %10303 = vpow2.f32 %v7386_v40 }
0x540c   :  { %v10304_v30 = vpop.eup %10303 }
0x540d   :  { %v7388_v14 = vsel %vm813_vm5, %v10304_v30, 0.0 }
0x540e   :  { %7389 = vadd.xlane.f32.xlu0 %v7388_v14 }
0x5424   :  { %7202 = vrot.lane.b32.xlu0 %v7159_v7, %s10455_s7 }
0x549b   :  { %v7390_v31 = vpop.xlane.xlu0 %7389 }
0x549c   :  { %10305 = vrcp.f32 %v7390_v31 }
0x549f   :  { %v7203_v62 = vpop.permute.xlu0 %7202 }
0x54a0   :  { %v7208_v43 = vsel %vm493_vm3, %v12643_v45, %v7203_v62  ;;  %v7477_v45 = vld [vmem:[%s12888_s16 + $0x18] sm:$0xff] }
0x54a1   :  { %v12742_v58 = vsel %vm639_vm6, %v7208_v43, %v7206_v33  ;;  %v9959_v51 = vpack.c.bf16 %v7477_v45, %v7476_v49 }
0x54a6   :  { %v10306_v20 = vpop.eup %10305 }
0x54a7   :  { %v7392_v42 = vmul.f32 %v10306_v20, %v10304_v30 }
0x54a9   :  { %9081 = vmatmul.mubr.msk.f32.vlgmr.msra.gmra.mrb[6].mxu0 %vm317_vm0, %v7392_v42  ;;  %7643 = vst.msk [vmem:[#allocation12 + $0x6] sm:$0x1] %vm813_vm5, %v7392_v42 }
0x54aa   :  { %9957 = vmatpush3.bf16.msra.mxu0 %v9956_v2  ;;  %9099 = vmatprep.mubr.msk.f32.mxu0 %vm10457_vm1, %v10452_v0  ;;  %v7564_v0 = vld [vmem:[%s12890_s18 + $0x28] sm:$0xff] }
0x54ab   :  { %9958 = vmatprep.subr.bf16.mxu0 %v10454_v25  ;;  %v9974_v56 = vpack.c.bf16 %v7564_v0, %v7563_v16 }
0x54ad   :  { %9975 = vmatpush3.bf16.msra.mxu1 %v9974_v56 }
0x54ae   :  { %9960 = vmatpush3.bf16.msra.mxu0 %v9959_v51  ;;  %9976 = vmatprep.subr.bf16.mxu1 %v10454_v25 }
0x54af   :  { %9961 = vmatprep.subr.bf16.mxu0 %v10454_v25 }
0x54b1   :  { %9978 = vmatpush3.bf16.msra.mxu1 %v9977_v46 }
0x54b2   :  { %9963 = vmatpush3.bf16.msra.mxu0 %v9962_v34 }
0x54b3   :  { %9964 = vmatprep.subr.bf16.mxu0 %v10454_v25  ;;  %v7482_v25 = vld [vmem:[%s12979_s29] sm:$0x1] }
0x54b6   :  { %9966 = vmatpush3.bf16.msra.mxu0 %v9965_v15 }
0x54b7   :  { %9979 = vmatprep.subr.bf16.mxu0 (!%p7964_p13), %v10476_v61 }
0x557c   :  { %v7464_v44 = vpop.f32.mrb[6].mxu0 }
0x557d   :  { %vm7468_vm1 = vcmp.gt.f32.partialorder %v7464_v44, 0.0  ;;  %v7469_v54 = vmul.f32 0.01, %v7464_v44  ;;  %v9082_v7 = vpop.f32.mrb[7].mxu0 }
0x557f   :  { %v7470_v10 = vsel %vm7468_vm1, %v7464_v44, %v7469_v54 }
0x5580   :  { %v7472_v29 = vmul.f32 0.01, %v7470_v10  ;;  %vm7471_vm2 = vcmp.gt.f32.partialorder %v7470_v10, 0.0 }
0x5582   :  { %v7473_v11 = vsel %vm7471_vm2, %v7470_v10, %v7472_v29 }
0x5583   :  { %9100 = vmatmul.mubr.msk.f32.vlgmr.msra.gmra.mrb[8].mxu0 %vm493_vm3, %v7473_v11  ;;  %9119 = vmatmul.mubr.msk.f32.vlgmr.msra.gmra.mrb[6].mxu1 %vm493_vm3, %v7473_v11  ;;  %vm10477_vm3 = vmmov (!%p7964_p13), 0  }
0x5584   :  { %9125 = vmatprep.mubr.msk.f32.mxu0 (!%p7964_p13), %vm10477_vm3, %v10478_v52  ;;  %9981 = vmatpush3.bf16.msra.mxu0 (!%p7964_p13), %v9980_v22 }
0x5656   :  { %v7552_v41 = vpop.f32.mrb[8].mxu0  ;;  %v7634_v5 = vpop.f32.mrb[6].mxu1  ;;  %7654 = sbr.rel (%p7964_p13) target bundleno = 22820 (0x5924), region = 133 }
0x5657   :  { %v7553_v39 = vadd.f32 %v7552_v41, %v7482_v25  ;;  %v7635_v9 = vadd.f32 %v7634_v5, %v7567_v13  ;;  %v9101_v28 = vpop.f32.mrb[9].mxu0  ;;  %v9120_v6 = vpop.f32.mrb[7].mxu1 }
0x5659   :  { %vm7556_vm4 = vcmp.gt.f32.partialorder %v7553_v39, 0.0  ;;  %v7557_v18 = vmul.f32 0.01, %v7553_v39  ;;  %7639 = vst.msk [vmem:[#allocation9 + $0x6] sm:$0x1] %vm813_vm5, %v7635_v9  ;;  %9126 = vmatmul.mubr.msk.f32.vlgmr.msra.gmra.mrb[0].mxu0 (!%p7964_p13), %vm317_vm0, %v7635_v9  ;;  %vm7730_vm5 = vcmask (!%p7964_p13), 90112  }
0x565b   :  { %v7558_v3 = vsel %vm7556_vm4, %v7553_v39, %v7557_v18 }
0x565c   :  { %7641 = vst.msk [vmem:[#allocation10 + $0x6] sm:$0x1] %vm1071_vm10, %v7558_v3 }
0x572c   :  { %v7726_v59 = vpop.f32.mrb[0].mxu0 }
0x572d   :  { %v9127_v37 = vpop.f32.mrb[1].mxu0  ;;  %v7731_v17 = vsel %vm7730_vm5, %v7726_v59, -inf }
0x572e   :  { %7732 = vmax.xlane.f32.xlu0 %v7731_v17 }
0x57bb   :  { %v7733_v27 = vpop.xlane.xlu0 %7732 }
0x57bc   :  { %vm7736_vm6 = vcmp.ge.f32.partialorder %v7726_v59, %v7733_v27 }
0x57bd   :  { %v7737_v40 = vsel %vm7736_vm6, %v7735_v55, 12 }
0x57be   :  { %v7738_v30 = vsel %vm7730_vm5, %v7737_v40, 2147483647 }
0x57bf   :  { %v7740_v14 = vshra.s32 %v7738_v30, 16  ;;  %v7739_v32 = vand.u32 65535, %v7738_v30 }
0x57c1   :  { %v7742_v8 = vcvt.s32.f32 %v7740_v14  ;;  %v7741_v47 = vcvt.s32.f32 %v7739_v32 }
0x57c3   :  { %7743 = vmin.xlane.f32.xlu0 %v7742_v8 }
0x5850   :  { %v7744_v23 = vpop.xlane.xlu0 %7743 }
0x5851   :  { %vm7745_vm10 = vcmp.eq.f32.partialorder %v7742_v8, %v7744_v23  ;;  %v7750_v36 = vcvt.f32.s32 %v7744_v23 }
0x5852   :  { %v7746_v35 = vsel %vm7745_vm10, %v7741_v47, inf }
0x5853   :  { %7747 = vmin.xlane.f32.xlu1 %v7746_v35  ;;  %v7751_v50 = vshll.u32 %v7750_v36, 16 }
0x58e0   :  { %v7748_v48 = vpop.xlane.xlu1 %7747 }
0x58e1   :  { %v7749_v24 = vcvt.f32.s32 %v7748_v48 }
0x58e3   :  { %v7752_v31 = vadd.s32 %v7751_v50, %v7749_v24 }
0x58e5   :  { %v7753_v62 = vrot.slane %v7752_v31, 4 }
0x58e7   :  { %vm7754_vm0 = vcmp.lt.s32.totalorder %v7752_v31, %v7753_v62 }
0x58e8   :  { %v7755_v57 = vsel %vm7754_vm0, %v7752_v31, %v7753_v62 }
0x58e9   :  { %v7756_v33 = vrot.slane %v7755_v57, 2 }
0x58eb   :  { %vm7757_vm12 = vcmp.lt.s32.totalorder %v7755_v57, %v7756_v33 }
0x58ec   :  { %v7758_v43 = vsel %vm7757_vm12, %v7755_v57, %v7756_v33 }
0x58ed   :  { %v7759_v26 = vrot.slane %v7758_v43, 1 }
0x58ef   :  { %vm7760_vm13 = vcmp.lt.s32.totalorder %v7758_v43, %v7759_v26 }
0x58f0   :  { %v7761_v60 = vsel %vm7760_vm13, %v7758_v43, %v7759_v26 }
0x58f1   :  { %9994 = vpush %v7761_v60 }
0x5922   :  { %s9995_s6 = spop %9994 }
0x5923   :  { %7763 = sst [smem:[#allocation2]] %s9995_s6 }
0x5924 PF:  { %7764 = vst [vmem:[#allocation13] sm:$0x1] %v12742_v58  ;;  %s10479_s30 = smov [#allocation10]   ;;  %s10480_s17 = smov [#allocation9]  }
0x5925   :  { %s7782_s12 = sshll.u32 %s10479_s30, 4  ;;  %s7770_s13 = sshll.u32 %s10480_s17, 4  ;;  %s7783_s12 = int_to_ptr.vmem [resolvable:$true] %s7782_s12  ;;  %s12808_s13 = int_to_ptr.vmem [resolvable:$true] %s7770_s13 }
0x5926   :  { %s10349_s14 = scalar_lea.vmem %s7783_s12, 112  ;;  %s10353_s3 = scalar_lea.vmem %s7783_s12, 128 }
0x5927   :  { %p10350_p0 = scmp.ne.s32.totalorder %s7783_s12, %s10349_s14  ;;  %p10354_p1 = scmp.lt.s32.totalorder %s7783_s12, %s7783_s12 }
0x5928   :  { %p10355_p2 = scmp.lt.s32.totalorder %s10353_s3, %s10349_s14 }
0x592a   :  { %p10356_p3 = por %p10355_p2, %p10354_p1 }
0x592c   :  { %p10357_p4 = pnand %p10356_p3, %p10350_p0 }
0x592e   :  { %10360 = shalt.err (!%p10357_p4)
}
0x592f   :  { %s10361_s25 = scalar_lea.hbm %s12893_s21, 112 }
0x5930   :  { %p10362_p5 = scmp.ne.s32.totalorder %s12893_s21, %s10361_s25  ;;  %p10365_p6 = scmp.lt.u32.totalorder %s10361_s25, %s12893_s21 }
0x5932   :  { %p10367_p7 = pnand %p10365_p6, %p10362_p5 }
0x5934   :  { %10370 = shalt.err (!%p10367_p7)
}
0x5935   :  { %s10481_s7 = smov 16   ;;  %s10482_s4 = smov 1  }
0x5936   :  { %7788 = dma.vmem_to_hbm [thread:$0]  %s7783_s12, 112, %s12893_s21, [#allocation11], %s10481_s7, %s10481_s7, %s10482_s4  }
0x5937   :  { %s10371_s2 = scalar_lea.vmem %s12808_s13, 112  ;;  %s10375_s29 = scalar_lea.vmem %s12808_s13, 128 }
0x5938   :  { %p10372_p8 = scmp.ne.s32.totalorder %s12808_s13, %s10371_s2  ;;  %p10376_p9 = scmp.lt.s32.totalorder %s12808_s13, %s12808_s13 }
0x5939   :  { %p10377_p10 = scmp.lt.s32.totalorder %s10375_s29, %s10371_s2 }
0x593b   :  { %p10378_p11 = por %p10377_p10, %p10376_p9 }
0x593d   :  { %p10379_p12 = pnand %p10378_p11, %p10372_p8 }
0x593f   :  { %10382 = shalt.err (!%p10379_p12)
}
0x5940   :  { %s10383_s1 = scalar_lea.hbm %s12892_s20, 112 }
0x5941   :  { %p10384_p13 = scmp.ne.s32.totalorder %s12892_s20, %s10383_s1  ;;  %p10387_p0 = scmp.lt.u32.totalorder %s10383_s1, %s12892_s20 }
0x5943   :  { %p10389_p1 = pnand %p10387_p0, %p10384_p13 }
0x5945   :  { %10392 = shalt.err (!%p10389_p1)
}
0x5946   :  { %7776 = dma.vmem_to_hbm [thread:$0]  %s12808_s13, 112, %s12892_s20, [#allocation8], %s10481_s7, %s10481_s7, %s10482_s4  }
0x5947   :  { %s10483_s30 = smov [#allocation12]   ;;  %s10484_s17 = smov [#allocation13]  }
0x5948   :  { %s7794_s12 = sshll.u32 %s10483_s30, 4  ;;  %s7807_s14 = sshll.u32 %s10484_s17, 4  ;;  %s7795_s12 = int_to_ptr.vmem [resolvable:$true] %s7794_s12  ;;  %s7808_s14 = int_to_ptr.vmem [resolvable:$true] %s7807_s14 }
0x5949   :  { %s10393_s3 = scalar_lea.vmem %s7795_s12, 112  ;;  %s10397_s26 = scalar_lea.vmem %s7795_s12, 128 }
0x594a   :  { %p10394_p2 = scmp.ne.s32.totalorder %s7795_s12, %s10393_s3  ;;  %p10398_p3 = scmp.lt.s32.totalorder %s7795_s12, %s7795_s12 }
0x594b   :  { %p10399_p4 = scmp.lt.s32.totalorder %s10397_s26, %s10393_s3 }
0x594d   :  { %p10400_p5 = por %p10399_p4, %p10398_p3 }
0x594f   :  { %p10401_p6 = pnand %p10400_p5, %p10394_p2 }
0x5951   :  { %10404 = shalt.err (!%p10401_p6)
}
0x5952   :  { %s10405_s10 = scalar_lea.hbm %s12894_s22, 112 }
0x5953   :  { %p10406_p7 = scmp.ne.s32.totalorder %s12894_s22, %s10405_s10  ;;  %p10409_p8 = scmp.lt.u32.totalorder %s10405_s10, %s12894_s22 }
0x5955   :  { %p10411_p9 = pnand %p10409_p8, %p10406_p7 }
0x5957   :  { %10414 = shalt.err (!%p10411_p9)
}
0x5958   :  { %7800 = dma.vmem_to_hbm [thread:$0]  %s7795_s12, 112, %s12894_s22, [#allocation11], %s10481_s7, %s10481_s7, %s10482_s4  }
0x5959   :  { %s10415_s16 = scalar_lea.vmem %s7808_s14, 16  ;;  %s10419_s2 = scalar_lea.vmem %s7808_s14, 32 }
0x595a   :  { %p10416_p10 = scmp.ne.s32.totalorder %s7808_s14, %s10415_s16  ;;  %p10420_p11 = scmp.lt.s32.totalorder %s7808_s14, %s7808_s14 }
0x595b   :  { %p10421_p12 = scmp.lt.s32.totalorder %s10419_s2, %s10415_s16 }
0x595d   :  { %p10422_p13 = por %p10421_p12, %p10420_p11 }
0x595f   :  { %p10423_p0 = pnand %p10422_p13, %p10416_p10 }
0x5961   :  { %10426 = shalt.err (!%p10423_p0)
}
0x5962   :  { %s10427_s11 = scalar_lea.hbm %s12895_s23, 16 }
0x5963   :  { %p10428_p1 = scmp.ne.s32.totalorder %s12895_s23, %s10427_s11  ;;  %p10431_p2 = scmp.lt.u32.totalorder %s10427_s11, %s12895_s23 }
0x5965   :  { %p10433_p3 = pnand %p10431_p2, %p10428_p1 }
0x5967   :  { %10436 = shalt.err (!%p10433_p3)
}
0x5968   :  { %7810 = dma.vmem_to_hbm [thread:$0]  %s7808_s14, 16, %s12895_s23, [#allocation14]  }
0x5969   :  { %10441 = dma.done.wait [#allocation8], 112  }
0x596a   :  { %10442 = vsyncadd [#allocation8], 4294967184 }
0x596b   :  { %10443 = dma.done.wait [#allocation11], 224  }
0x596c   :  { %10444 = vsyncadd [#allocation11], 4294967072 }
0x596d   :  { %10445 = dma.done.wait [#allocation14], 16  }
0x596e   :  { %10446 = vsyncadd [#allocation14], 4294967280 }
0x596f   :  { %7823 = vsyncpa [#allocation7], 1 }
0x5970   :  { %7824 = vsyncpa [#allocation8], 1 }
0x5971   :  { %7825 = vsyncpa [#allocation11], 1 }
0x5972   :  { %7826 = vsyncpa [#allocation14], 1 }

</bundles_post_ra>
